<compile_context>
chip_gen: v5e
topology: v5e:2x2
jax: 0.10.0
libtpu: 0.0.40
codegen_flags: <defaults>
</compile_context>

<pallas_src>
import functools

import jax
import jax.numpy as jnp
from jax import lax
from jax.experimental import pallas as pl
from jax.experimental.pallas import tpu as pltpu

_VMEM = pl.BlockSpec(memory_space=pltpu.MemorySpace.VMEM)


# ---------------------------------------------------------------------------
# In-kernel inverse of a small SPD (k, k) matrix via Gauss-Jordan elimination.
# Carried entirely in vregs; the loop over pivots is unrolled (k is tiny).
# ---------------------------------------------------------------------------
def _gauss_jordan_inverse(a, k, eye_k, rows_kk, cols_kk, cols_1k):
    def body(i, carry):
        w, wi = carry
        row_mask = rows_kk == i                                              # (k, k)
        col_mask = cols_kk == i                                              # (k, k)
        # Pivot row of working matrix and of the inverse tracker.
        prow_w = jnp.sum(jnp.where(row_mask, w, 0.0), axis=0, keepdims=True)   # (1, k)
        prow_i = jnp.sum(jnp.where(row_mask, wi, 0.0), axis=0, keepdims=True)  # (1, k)
        piv = jnp.sum(jnp.where(cols_1k == i, prow_w, 0.0),
                      axis=1, keepdims=True)                                   # (1, 1)
        inv_piv = 1.0 / piv
        prow_w = prow_w * inv_piv
        prow_i = prow_i * inv_piv
        pcol_w = jnp.sum(jnp.where(col_mask, w, 0.0), axis=1, keepdims=True)   # (k, 1)
        new_w = w - pcol_w * prow_w
        new_i = wi - pcol_w * prow_i
        new_w = jnp.where(row_mask, prow_w, new_w)
        new_i = jnp.where(row_mask, prow_i, new_i)
        return new_w, new_i

    _, a_inv = lax.fori_loop(0, k, body, (a, eye_k), unroll=True)
    return a_inv


# ---------------------------------------------------------------------------
# Fused forward kernel: EM loop + final E-step + reparameterized sample.
# ---------------------------------------------------------------------------
def _pcca_forward_kernel(max_iters, n, k, lam_ref, psi_ref, y_ref, eps_ref,
                         out_ref):
    y = y_ref[...]                       # (p, n)
    lam0 = lam_ref[...]                  # (p, k)
    psi0 = psi_ref[...]                  # (p, 1)

    rows_kk = lax.broadcasted_iota(jnp.int32, (k, k), 0)
    cols_kk = lax.broadcasted_iota(jnp.int32, (k, k), 1)
    cols_1k = lax.broadcasted_iota(jnp.int32, (1, k), 1)
    eye_k = jnp.where(rows_kk == cols_kk, 1.0, 0.0).astype(jnp.float32)

    def compute_beta(lam, psi):
        # Woodbury algebra without the (p, p) intermediate:
        #   beta = L^T (Psi + L L^T)^-1 = (I + L^T Psi^-1 L)^-1 (Psi^-1 L)^T
        psi_inv = 1.0 / psi                                   # (p, 1)
        A = psi_inv * lam                                     # (p, k) = Psi^-1 L
        M = eye_k + lax.dot_general(lam, A, (((0,), (0,)), ((), ())),
                                    preferred_element_type=jnp.float32)  # (k, k)
        M_inv = _gauss_jordan_inverse(M, k, eye_k, rows_kk, cols_kk, cols_1k)
        beta = lax.dot_general(M_inv, A, (((1,), (1,)), ((), ())),
                               preferred_element_type=jnp.float32)       # (k, p)
        return beta

    def em_step(_, carry):
        lam, psi = carry
        beta = compute_beta(lam, psi)
        by = jnp.dot(beta, y, preferred_element_type=jnp.float32)        # E[z|y] (k, n)
        bL = jnp.dot(beta, lam, preferred_element_type=jnp.float32)      # (k, k)
        byyb = lax.dot_general(by, by, (((1,), (1,)), ((), ())),
                               preferred_element_type=jnp.float32)       # (k, k)
        Ezz = float(n) * (eye_k - bL) + byyb                             # (k, k)
        Lterm = lax.dot_general(y, by, (((1,), (1,)), ((), ())),
                                preferred_element_type=jnp.float32)      # y Ez^T (p, k)
        Ezz_inv = _gauss_jordan_inverse(Ezz, k, eye_k, rows_kk, cols_kk, cols_1k)
        lam_new = jnp.dot(Lterm, Ezz_inv,
                          preferred_element_type=jnp.float32)            # (p, k)
        mean_y = jnp.dot(lam_new, by,
                         preferred_element_type=jnp.float32)             # (p, n)
        psi_new = jnp.sum((y - mean_y) * y, axis=1,
                          keepdims=True) * (1.0 / float(n))              # (p, 1)
        return lam_new, psi_new

    lam, psi = lax.fori_loop(0, max_iters, em_step, (lam0, psi0))

    # Final E-step + reparameterization, fused into the same kernel.
    beta = compute_beta(lam, psi)
    z = jnp.dot(beta, y, preferred_element_type=jnp.float32)             # (k, n)
    # TODO(synk): LA.to_positive's exact definition is unknown; clamp to a small
    # positive floor so chol(diag(Psi)) (= elementwise sqrt) is defined.
    sd = jnp.sqrt(jnp.maximum(psi, 1e-6))                                # (p, 1)
    out_ref[...] = (jnp.dot(lam, z, preferred_element_type=jnp.float32)
                    + sd * eps_ref[...])


def pcca_forward_pallas(Lam, psi_col, y, eps, max_iters):
    p, k = Lam.shape
    n = y.shape[1]
    kernel = functools.partial(_pcca_forward_kernel, max_iters, n, k)
    return pl.pallas_call(
        kernel,
        out_shape=jax.ShapeDtypeStruct((p, n), jnp.float32),
        in_specs=[_VMEM] * 4,
        out_specs=_VMEM,
    )(Lam.astype(jnp.float32), psi_col.astype(jnp.float32),
      y.astype(jnp.float32), eps.astype(jnp.float32))


# ---------------------------------------------------------------------------
# PCCA model (thin JAX glue around the single fused Pallas kernel).
# ---------------------------------------------------------------------------
class PCCA:
    def __init__(self, latent_dim, dims, max_iters, key):
        self.latent_dim = latent_dim
        self.max_iters = max_iters
        self.p1, self.p2 = dims
        k = latent_dim
        k1, k2, k3, k4 = jax.random.split(key, 4)
        # Deterministic synthetic init (matches torch.randn / torch.ones shapes).
        self.Lambda1 = jax.random.normal(k1, (self.p1, k), jnp.float32)
        self.Lambda2 = jax.random.normal(k2, (self.p2, k), jnp.float32)
        self.B1 = jax.random.normal(k3, (self.p1, k), jnp.float32)
        self.B2 = jax.random.normal(k4, (self.p2, k), jnp.float32)
        self.log_Psi1_diag = jnp.ones((self.p1,), jnp.float32)
        self.log_Psi2_diag = jnp.ones((self.p2,), jnp.float32)

    def tile_params(self):
        k = self.latent_dim
        B12 = jnp.zeros((self.p1, k), jnp.float32)
        B21 = jnp.zeros((self.p2, k), jnp.float32)
        top = jnp.concatenate([self.Lambda1, self.B1, B12], axis=1)
        bot = jnp.concatenate([self.Lambda2, B21, self.B2], axis=1)
        Lam = jnp.concatenate([top, bot], axis=0)                        # (p, 3k)
        # Psi kept as a (p, 1) column end-to-end (no host-side squeeze/reshape).
        Psi_col = jnp.exp(
            jnp.concatenate([self.log_Psi1_diag, self.log_Psi2_diag])
        ).reshape(-1, 1)
        return Lam, Psi_col

    def forward(self, y, eps_key):
        Lam, Psi_col = self.tile_params()
        eps = jax.random.normal(eps_key, y.shape, jnp.float32)           # torch.randn(p, n)
        # Entire EM fit + final E-step + reparameterized sample: one kernel launch.
        yr = pcca_forward_pallas(Lam, Psi_col, y, eps, self.max_iters)
        y1 = yr[:self.p1]
        y2 = yr[self.p1:]
        return y1.T, y2.T


if __name__ == "__main__":
    key = jax.random.PRNGKey(0)
    k_param, k_data, k_eps = jax.random.split(key, 3)

    latent_dim = 4          # -> tiled latent dim k = 3 * latent_dim = 12
    p1, p2 = 16, 16         # modality dims -> p = 32 features
    n_samples = 64
    max_iters = 3

    model = PCCA(latent_dim, (p1, p2), max_iters, k_param)
    y = jax.random.normal(k_data, (p1 + p2, n_samples), jnp.float32)

    y1, y2 = model.forward(y, k_eps)
    jax.block_until_ready((y1, y2))

    assert y1.shape == (n_samples, p1) and y1.dtype == jnp.float32
    assert y2.shape == (n_samples, p2) and y2.dtype == jnp.float32
    assert bool(jnp.all(jnp.isfinite(y1))) and bool(jnp.all(jnp.isfinite(y2)))
    print("KERNEL_OK")
</pallas_src>

<mosaic_0001>
module attributes {stable_mosaic.version = 11 : i64} {
  func.func @_pcca_forward_kernel(%arg0: memref<32x12xf32, #tpu.memory_space<vmem>>, %arg1: memref<32x1xf32, #tpu.memory_space<vmem>>, %arg2: memref<32x64xf32, #tpu.memory_space<vmem>>, %arg3: memref<32x64xf32, #tpu.memory_space<vmem>>, %arg4: memref<32x64xf32, #tpu.memory_space<vmem>>) attributes {dimension_semantics = [], scalar_prefetch = 0 : i64, scratch_operands = 0 : i64, tpu.core_type = #tpu.core_type<tc>} {
    %c0 = arith.constant 0 : index
    %c0_0 = arith.constant 0 : index
    %0 = vector.load %arg2[%c0, %c0_0] : memref<32x64xf32, #tpu.memory_space<vmem>>, vector<32x64xf32>
    %c0_1 = arith.constant 0 : index
    %c0_2 = arith.constant 0 : index
    %1 = vector.load %arg0[%c0_1, %c0_2] : memref<32x12xf32, #tpu.memory_space<vmem>>, vector<32x12xf32>
    %c0_3 = arith.constant 0 : index
    %c0_4 = arith.constant 0 : index
    %2 = vector.load %arg1[%c0_3, %c0_4] : memref<32x1xf32, #tpu.memory_space<vmem>>, vector<32x1xf32>
    %3 = tpu.iota {dimensions = array<i32: 0>} : vector<12x12xi32>
    %4 = tpu.iota {dimensions = array<i32: 1>} : vector<12x12xi32>
    %5 = tpu.iota {dimensions = array<i32: 1>} : vector<1x12xi32>
    %6 = arith.cmpi eq, %3, %4 : vector<12x12xi32>
    %cst = arith.constant 1.000000e+00 : f32
    %cst_5 = arith.constant 0.000000e+00 : f32
    %7 = vector.broadcast %cst : f32 to vector<12x12xf32>
    %8 = vector.broadcast %cst_5 : f32 to vector<12x12xf32>
    %9 = arith.select %6, %7, %8 : vector<12x12xi1>, vector<12x12xf32>
    %c0_i32 = arith.constant 0 : i32
    %c3_i32 = arith.constant 3 : i32
    %10 = arith.addi %c0_i32, %c3_i32 : i32
    %c1_i32 = arith.constant 1 : i32
    %11:2 = scf.for %arg5 = %c0_i32 to %10 step %c1_i32 iter_args(%arg6 = %1, %arg7 = %2) -> (vector<32x12xf32>, vector<32x1xf32>)  : i32 {
      %cst_127 = arith.constant 1.000000e+00 : f32
      %533 = vector.broadcast %cst_127 : f32 to vector<32x1xf32>
      %534 = arith.divf %533, %arg7 : vector<32x1xf32>
      %535 = vector.broadcast %534 : vector<32x1xf32> to vector<32x12xf32>
      %536 = arith.mulf %535, %arg6 : vector<32x12xf32>
      %cst_128 = arith.constant dense<0.000000e+00> : vector<12x12xf32>
      %537 = tpu.matmul %arg6, %536, %cst_128 {dimension_numbers = #tpu.dot_dimension_numbers<[0], [0], [1], [1], [0, 1, 1, 1], [], []>} : vector<32x12xf32>, vector<32x12xf32>, vector<12x12xf32> -> vector<12x12xf32>
      %538 = arith.addf %9, %537 : vector<12x12xf32>
      %c0_i32_129 = arith.constant 0 : i32
      %539 = vector.broadcast %c0_i32_129 : i32 to vector<12x12xi32>
      %540 = arith.cmpi eq, %3, %539 : vector<12x12xi32>
      %541 = vector.broadcast %c0_i32_129 : i32 to vector<12x12xi32>
      %542 = arith.cmpi eq, %4, %541 : vector<12x12xi32>
      %cst_130 = arith.constant 0.000000e+00 : f32
      %543 = vector.broadcast %cst_130 : f32 to vector<12x12xf32>
      %544 = arith.select %540, %538, %543 : vector<12x12xi1>, vector<12x12xf32>
      %cst_131 = arith.constant dense<0.000000e+00> : vector<12xf32>
      %545 = vector.multi_reduction <add>, %544, %cst_131 [0] : vector<12x12xf32> to vector<12xf32>
      %546 = vector.shape_cast %545 : vector<12xf32> to vector<1x12xf32>
      %cst_132 = arith.constant 0.000000e+00 : f32
      %547 = vector.broadcast %cst_132 : f32 to vector<12x12xf32>
      %548 = arith.select %540, %9, %547 : vector<12x12xi1>, vector<12x12xf32>
      %cst_133 = arith.constant dense<0.000000e+00> : vector<12xf32>
      %549 = vector.multi_reduction <add>, %548, %cst_133 [0] : vector<12x12xf32> to vector<12xf32>
      %550 = vector.shape_cast %549 : vector<12xf32> to vector<1x12xf32>
      %551 = vector.broadcast %c0_i32_129 : i32 to vector<1x12xi32>
      %552 = arith.cmpi eq, %5, %551 : vector<1x12xi32>
      %cst_134 = arith.constant 0.000000e+00 : f32
      %553 = vector.broadcast %cst_134 : f32 to vector<1x12xf32>
      %554 = arith.select %552, %546, %553 : vector<1x12xi1>, vector<1x12xf32>
      %cst_135 = arith.constant dense<0.000000e+00> : vector<1xf32>
      %555 = vector.multi_reduction <add>, %554, %cst_135 [1] : vector<1x12xf32> to vector<1xf32>
      %556 = vector.shape_cast %555 : vector<1xf32> to vector<1x1xf32>
      %cst_136 = arith.constant 1.000000e+00 : f32
      %557 = vector.broadcast %cst_136 : f32 to vector<1x1xf32>
      %558 = arith.divf %557, %556 : vector<1x1xf32>
      %559 = vector.broadcast %558 : vector<1x1xf32> to vector<1x12xf32>
      %560 = arith.mulf %546, %559 : vector<1x12xf32>
      %561 = vector.broadcast %558 : vector<1x1xf32> to vector<1x12xf32>
      %562 = arith.mulf %550, %561 : vector<1x12xf32>
      %cst_137 = arith.constant 0.000000e+00 : f32
      %563 = vector.broadcast %cst_137 : f32 to vector<12x12xf32>
      %564 = arith.select %542, %538, %563 : vector<12x12xi1>, vector<12x12xf32>
      %cst_138 = arith.constant dense<0.000000e+00> : vector<12xf32>
      %565 = vector.multi_reduction <add>, %564, %cst_138 [1] : vector<12x12xf32> to vector<12xf32>
      %566 = vector.shape_cast %565 : vector<12xf32> to vector<12x1xf32>
      %567 = vector.broadcast %566 : vector<12x1xf32> to vector<12x12xf32>
      %568 = vector.broadcast %560 : vector<1x12xf32> to vector<12x12xf32>
      %569 = arith.mulf %567, %568 : vector<12x12xf32>
      %570 = arith.subf %538, %569 : vector<12x12xf32>
      %571 = vector.broadcast %566 : vector<12x1xf32> to vector<12x12xf32>
      %572 = vector.broadcast %562 : vector<1x12xf32> to vector<12x12xf32>
      %573 = arith.mulf %571, %572 : vector<12x12xf32>
      %574 = arith.subf %9, %573 : vector<12x12xf32>
      %575 = vector.shape_cast %560 : vector<1x12xf32> to vector<1x12xf32>
      %576 = vector.broadcast %575 : vector<1x12xf32> to vector<12x12xf32>
      %577 = arith.select %540, %576, %570 : vector<12x12xi1>, vector<12x12xf32>
      %578 = vector.shape_cast %562 : vector<1x12xf32> to vector<1x12xf32>
      %579 = vector.broadcast %578 : vector<1x12xf32> to vector<12x12xf32>
      %580 = arith.select %540, %579, %574 : vector<12x12xi1>, vector<12x12xf32>
      %c1_i32_139 = arith.constant 1 : i32
      %581 = vector.broadcast %c1_i32_139 : i32 to vector<12x12xi32>
      %582 = arith.cmpi eq, %3, %581 : vector<12x12xi32>
      %583 = vector.broadcast %c1_i32_139 : i32 to vector<12x12xi32>
      %584 = arith.cmpi eq, %4, %583 : vector<12x12xi32>
      %cst_140 = arith.constant 0.000000e+00 : f32
      %585 = vector.broadcast %cst_140 : f32 to vector<12x12xf32>
      %586 = arith.select %582, %577, %585 : vector<12x12xi1>, vector<12x12xf32>
      %cst_141 = arith.constant dense<0.000000e+00> : vector<12xf32>
      %587 = vector.multi_reduction <add>, %586, %cst_141 [0] : vector<12x12xf32> to vector<12xf32>
      %588 = vector.shape_cast %587 : vector<12xf32> to vector<1x12xf32>
      %cst_142 = arith.constant 0.000000e+00 : f32
      %589 = vector.broadcast %cst_142 : f32 to vector<12x12xf32>
      %590 = arith.select %582, %580, %589 : vector<12x12xi1>, vector<12x12xf32>
      %cst_143 = arith.constant dense<0.000000e+00> : vector<12xf32>
      %591 = vector.multi_reduction <add>, %590, %cst_143 [0] : vector<12x12xf32> to vector<12xf32>
      %592 = vector.shape_cast %591 : vector<12xf32> to vector<1x12xf32>
      %593 = vector.broadcast %c1_i32_139 : i32 to vector<1x12xi32>
      %594 = arith.cmpi eq, %5, %593 : vector<1x12xi32>
      %cst_144 = arith.constant 0.000000e+00 : f32
      %595 = vector.broadcast %cst_144 : f32 to vector<1x12xf32>
      %596 = arith.select %594, %588, %595 : vector<1x12xi1>, vector<1x12xf32>
      %cst_145 = arith.constant dense<0.000000e+00> : vector<1xf32>
      %597 = vector.multi_reduction <add>, %596, %cst_145 [1] : vector<1x12xf32> to vector<1xf32>
      %598 = vector.shape_cast %597 : vector<1xf32> to vector<1x1xf32>
      %cst_146 = arith.constant 1.000000e+00 : f32
      %599 = vector.broadcast %cst_146 : f32 to vector<1x1xf32>
      %600 = arith.divf %599, %598 : vector<1x1xf32>
      %601 = vector.broadcast %600 : vector<1x1xf32> to vector<1x12xf32>
      %602 = arith.mulf %588, %601 : vector<1x12xf32>
      %603 = vector.broadcast %600 : vector<1x1xf32> to vector<1x12xf32>
      %604 = arith.mulf %592, %603 : vector<1x12xf32>
      %cst_147 = arith.constant 0.000000e+00 : f32
      %605 = vector.broadcast %cst_147 : f32 to vector<12x12xf32>
      %606 = arith.select %584, %577, %605 : vector<12x12xi1>, vector<12x12xf32>
      %cst_148 = arith.constant dense<0.000000e+00> : vector<12xf32>
      %607 = vector.multi_reduction <add>, %606, %cst_148 [1] : vector<12x12xf32> to vector<12xf32>
      %608 = vector.shape_cast %607 : vector<12xf32> to vector<12x1xf32>
      %609 = vector.broadcast %608 : vector<12x1xf32> to vector<12x12xf32>
      %610 = vector.broadcast %602 : vector<1x12xf32> to vector<12x12xf32>
      %611 = arith.mulf %609, %610 : vector<12x12xf32>
      %612 = arith.subf %577, %611 : vector<12x12xf32>
      %613 = vector.broadcast %608 : vector<12x1xf32> to vector<12x12xf32>
      %614 = vector.broadcast %604 : vector<1x12xf32> to vector<12x12xf32>
      %615 = arith.mulf %613, %614 : vector<12x12xf32>
      %616 = arith.subf %580, %615 : vector<12x12xf32>
      %617 = vector.shape_cast %602 : vector<1x12xf32> to vector<1x12xf32>
      %618 = vector.broadcast %617 : vector<1x12xf32> to vector<12x12xf32>
      %619 = arith.select %582, %618, %612 : vector<12x12xi1>, vector<12x12xf32>
      %620 = vector.shape_cast %604 : vector<1x12xf32> to vector<1x12xf32>
      %621 = vector.broadcast %620 : vector<1x12xf32> to vector<12x12xf32>
      %622 = arith.select %582, %621, %616 : vector<12x12xi1>, vector<12x12xf32>
      %c2_i32_149 = arith.constant 2 : i32
      %623 = vector.broadcast %c2_i32_149 : i32 to vector<12x12xi32>
      %624 = arith.cmpi eq, %3, %623 : vector<12x12xi32>
      %625 = vector.broadcast %c2_i32_149 : i32 to vector<12x12xi32>
      %626 = arith.cmpi eq, %4, %625 : vector<12x12xi32>
      %cst_150 = arith.constant 0.000000e+00 : f32
      %627 = vector.broadcast %cst_150 : f32 to vector<12x12xf32>
      %628 = arith.select %624, %619, %627 : vector<12x12xi1>, vector<12x12xf32>
      %cst_151 = arith.constant dense<0.000000e+00> : vector<12xf32>
      %629 = vector.multi_reduction <add>, %628, %cst_151 [0] : vector<12x12xf32> to vector<12xf32>
      %630 = vector.shape_cast %629 : vector<12xf32> to vector<1x12xf32>
      %cst_152 = arith.constant 0.000000e+00 : f32
      %631 = vector.broadcast %cst_152 : f32 to vector<12x12xf32>
      %632 = arith.select %624, %622, %631 : vector<12x12xi1>, vector<12x12xf32>
      %cst_153 = arith.constant dense<0.000000e+00> : vector<12xf32>
      %633 = vector.multi_reduction <add>, %632, %cst_153 [0] : vector<12x12xf32> to vector<12xf32>
      %634 = vector.shape_cast %633 : vector<12xf32> to vector<1x12xf32>
      %635 = vector.broadcast %c2_i32_149 : i32 to vector<1x12xi32>
      %636 = arith.cmpi eq, %5, %635 : vector<1x12xi32>
      %cst_154 = arith.constant 0.000000e+00 : f32
      %637 = vector.broadcast %cst_154 : f32 to vector<1x12xf32>
      %638 = arith.select %636, %630, %637 : vector<1x12xi1>, vector<1x12xf32>
      %cst_155 = arith.constant dense<0.000000e+00> : vector<1xf32>
      %639 = vector.multi_reduction <add>, %638, %cst_155 [1] : vector<1x12xf32> to vector<1xf32>
      %640 = vector.shape_cast %639 : vector<1xf32> to vector<1x1xf32>
      %cst_156 = arith.constant 1.000000e+00 : f32
      %641 = vector.broadcast %cst_156 : f32 to vector<1x1xf32>
      %642 = arith.divf %641, %640 : vector<1x1xf32>
      %643 = vector.broadcast %642 : vector<1x1xf32> to vector<1x12xf32>
      %644 = arith.mulf %630, %643 : vector<1x12xf32>
      %645 = vector.broadcast %642 : vector<1x1xf32> to vector<1x12xf32>
      %646 = arith.mulf %634, %645 : vector<1x12xf32>
      %cst_157 = arith.constant 0.000000e+00 : f32
      %647 = vector.broadcast %cst_157 : f32 to vector<12x12xf32>
      %648 = arith.select %626, %619, %647 : vector<12x12xi1>, vector<12x12xf32>
      %cst_158 = arith.constant dense<0.000000e+00> : vector<12xf32>
      %649 = vector.multi_reduction <add>, %648, %cst_158 [1] : vector<12x12xf32> to vector<12xf32>
      %650 = vector.shape_cast %649 : vector<12xf32> to vector<12x1xf32>
      %651 = vector.broadcast %650 : vector<12x1xf32> to vector<12x12xf32>
      %652 = vector.broadcast %644 : vector<1x12xf32> to vector<12x12xf32>
      %653 = arith.mulf %651, %652 : vector<12x12xf32>
      %654 = arith.subf %619, %653 : vector<12x12xf32>
      %655 = vector.broadcast %650 : vector<12x1xf32> to vector<12x12xf32>
      %656 = vector.broadcast %646 : vector<1x12xf32> to vector<12x12xf32>
      %657 = arith.mulf %655, %656 : vector<12x12xf32>
      %658 = arith.subf %622, %657 : vector<12x12xf32>
      %659 = vector.shape_cast %644 : vector<1x12xf32> to vector<1x12xf32>
      %660 = vector.broadcast %659 : vector<1x12xf32> to vector<12x12xf32>
      %661 = arith.select %624, %660, %654 : vector<12x12xi1>, vector<12x12xf32>
      %662 = vector.shape_cast %646 : vector<1x12xf32> to vector<1x12xf32>
      %663 = vector.broadcast %662 : vector<1x12xf32> to vector<12x12xf32>
      %664 = arith.select %624, %663, %658 : vector<12x12xi1>, vector<12x12xf32>
      %c3_i32_159 = arith.constant 3 : i32
      %665 = vector.broadcast %c3_i32_159 : i32 to vector<12x12xi32>
      %666 = arith.cmpi eq, %3, %665 : vector<12x12xi32>
      %667 = vector.broadcast %c3_i32_159 : i32 to vector<12x12xi32>
      %668 = arith.cmpi eq, %4, %667 : vector<12x12xi32>
      %cst_160 = arith.constant 0.000000e+00 : f32
      %669 = vector.broadcast %cst_160 : f32 to vector<12x12xf32>
      %670 = arith.select %666, %661, %669 : vector<12x12xi1>, vector<12x12xf32>
      %cst_161 = arith.constant dense<0.000000e+00> : vector<12xf32>
      %671 = vector.multi_reduction <add>, %670, %cst_161 [0] : vector<12x12xf32> to vector<12xf32>
      %672 = vector.shape_cast %671 : vector<12xf32> to vector<1x12xf32>
      %cst_162 = arith.constant 0.000000e+00 : f32
      %673 = vector.broadcast %cst_162 : f32 to vector<12x12xf32>
      %674 = arith.select %666, %664, %673 : vector<12x12xi1>, vector<12x12xf32>
      %cst_163 = arith.constant dense<0.000000e+00> : vector<12xf32>
      %675 = vector.multi_reduction <add>, %674, %cst_163 [0] : vector<12x12xf32> to vector<12xf32>
      %676 = vector.shape_cast %675 : vector<12xf32> to vector<1x12xf32>
      %677 = vector.broadcast %c3_i32_159 : i32 to vector<1x12xi32>
      %678 = arith.cmpi eq, %5, %677 : vector<1x12xi32>
      %cst_164 = arith.constant 0.000000e+00 : f32
      %679 = vector.broadcast %cst_164 : f32 to vector<1x12xf32>
      %680 = arith.select %678, %672, %679 : vector<1x12xi1>, vector<1x12xf32>
      %cst_165 = arith.constant dense<0.000000e+00> : vector<1xf32>
      %681 = vector.multi_reduction <add>, %680, %cst_165 [1] : vector<1x12xf32> to vector<1xf32>
      %682 = vector.shape_cast %681 : vector<1xf32> to vector<1x1xf32>
      %cst_166 = arith.constant 1.000000e+00 : f32
      %683 = vector.broadcast %cst_166 : f32 to vector<1x1xf32>
      %684 = arith.divf %683, %682 : vector<1x1xf32>
      %685 = vector.broadcast %684 : vector<1x1xf32> to vector<1x12xf32>
      %686 = arith.mulf %672, %685 : vector<1x12xf32>
      %687 = vector.broadcast %684 : vector<1x1xf32> to vector<1x12xf32>
      %688 = arith.mulf %676, %687 : vector<1x12xf32>
      %cst_167 = arith.constant 0.000000e+00 : f32
      %689 = vector.broadcast %cst_167 : f32 to vector<12x12xf32>
      %690 = arith.select %668, %661, %689 : vector<12x12xi1>, vector<12x12xf32>
      %cst_168 = arith.constant dense<0.000000e+00> : vector<12xf32>
      %691 = vector.multi_reduction <add>, %690, %cst_168 [1] : vector<12x12xf32> to vector<12xf32>
      %692 = vector.shape_cast %691 : vector<12xf32> to vector<12x1xf32>
      %693 = vector.broadcast %692 : vector<12x1xf32> to vector<12x12xf32>
      %694 = vector.broadcast %686 : vector<1x12xf32> to vector<12x12xf32>
      %695 = arith.mulf %693, %694 : vector<12x12xf32>
      %696 = arith.subf %661, %695 : vector<12x12xf32>
      %697 = vector.broadcast %692 : vector<12x1xf32> to vector<12x12xf32>
      %698 = vector.broadcast %688 : vector<1x12xf32> to vector<12x12xf32>
      %699 = arith.mulf %697, %698 : vector<12x12xf32>
      %700 = arith.subf %664, %699 : vector<12x12xf32>
      %701 = vector.shape_cast %686 : vector<1x12xf32> to vector<1x12xf32>
      %702 = vector.broadcast %701 : vector<1x12xf32> to vector<12x12xf32>
      %703 = arith.select %666, %702, %696 : vector<12x12xi1>, vector<12x12xf32>
      %704 = vector.shape_cast %688 : vector<1x12xf32> to vector<1x12xf32>
      %705 = vector.broadcast %704 : vector<1x12xf32> to vector<12x12xf32>
      %706 = arith.select %666, %705, %700 : vector<12x12xi1>, vector<12x12xf32>
      %c4_i32_169 = arith.constant 4 : i32
      %707 = vector.broadcast %c4_i32_169 : i32 to vector<12x12xi32>
      %708 = arith.cmpi eq, %3, %707 : vector<12x12xi32>
      %709 = vector.broadcast %c4_i32_169 : i32 to vector<12x12xi32>
      %710 = arith.cmpi eq, %4, %709 : vector<12x12xi32>
      %cst_170 = arith.constant 0.000000e+00 : f32
      %711 = vector.broadcast %cst_170 : f32 to vector<12x12xf32>
      %712 = arith.select %708, %703, %711 : vector<12x12xi1>, vector<12x12xf32>
      %cst_171 = arith.constant dense<0.000000e+00> : vector<12xf32>
      %713 = vector.multi_reduction <add>, %712, %cst_171 [0] : vector<12x12xf32> to vector<12xf32>
      %714 = vector.shape_cast %713 : vector<12xf32> to vector<1x12xf32>
      %cst_172 = arith.constant 0.000000e+00 : f32
      %715 = vector.broadcast %cst_172 : f32 to vector<12x12xf32>
      %716 = arith.select %708, %706, %715 : vector<12x12xi1>, vector<12x12xf32>
      %cst_173 = arith.constant dense<0.000000e+00> : vector<12xf32>
      %717 = vector.multi_reduction <add>, %716, %cst_173 [0] : vector<12x12xf32> to vector<12xf32>
      %718 = vector.shape_cast %717 : vector<12xf32> to vector<1x12xf32>
      %719 = vector.broadcast %c4_i32_169 : i32 to vector<1x12xi32>
      %720 = arith.cmpi eq, %5, %719 : vector<1x12xi32>
      %cst_174 = arith.constant 0.000000e+00 : f32
      %721 = vector.broadcast %cst_174 : f32 to vector<1x12xf32>
      %722 = arith.select %720, %714, %721 : vector<1x12xi1>, vector<1x12xf32>
      %cst_175 = arith.constant dense<0.000000e+00> : vector<1xf32>
      %723 = vector.multi_reduction <add>, %722, %cst_175 [1] : vector<1x12xf32> to vector<1xf32>
      %724 = vector.shape_cast %723 : vector<1xf32> to vector<1x1xf32>
      %cst_176 = arith.constant 1.000000e+00 : f32
      %725 = vector.broadcast %cst_176 : f32 to vector<1x1xf32>
      %726 = arith.divf %725, %724 : vector<1x1xf32>
      %727 = vector.broadcast %726 : vector<1x1xf32> to vector<1x12xf32>
      %728 = arith.mulf %714, %727 : vector<1x12xf32>
      %729 = vector.broadcast %726 : vector<1x1xf32> to vector<1x12xf32>
      %730 = arith.mulf %718, %729 : vector<1x12xf32>
      %cst_177 = arith.constant 0.000000e+00 : f32
      %731 = vector.broadcast %cst_177 : f32 to vector<12x12xf32>
      %732 = arith.select %710, %703, %731 : vector<12x12xi1>, vector<12x12xf32>
      %cst_178 = arith.constant dense<0.000000e+00> : vector<12xf32>
      %733 = vector.multi_reduction <add>, %732, %cst_178 [1] : vector<12x12xf32> to vector<12xf32>
      %734 = vector.shape_cast %733 : vector<12xf32> to vector<12x1xf32>
      %735 = vector.broadcast %734 : vector<12x1xf32> to vector<12x12xf32>
      %736 = vector.broadcast %728 : vector<1x12xf32> to vector<12x12xf32>
      %737 = arith.mulf %735, %736 : vector<12x12xf32>
      %738 = arith.subf %703, %737 : vector<12x12xf32>
      %739 = vector.broadcast %734 : vector<12x1xf32> to vector<12x12xf32>
      %740 = vector.broadcast %730 : vector<1x12xf32> to vector<12x12xf32>
      %741 = arith.mulf %739, %740 : vector<12x12xf32>
      %742 = arith.subf %706, %741 : vector<12x12xf32>
      %743 = vector.shape_cast %728 : vector<1x12xf32> to vector<1x12xf32>
      %744 = vector.broadcast %743 : vector<1x12xf32> to vector<12x12xf32>
      %745 = arith.select %708, %744, %738 : vector<12x12xi1>, vector<12x12xf32>
      %746 = vector.shape_cast %730 : vector<1x12xf32> to vector<1x12xf32>
      %747 = vector.broadcast %746 : vector<1x12xf32> to vector<12x12xf32>
      %748 = arith.select %708, %747, %742 : vector<12x12xi1>, vector<12x12xf32>
      %c5_i32_179 = arith.constant 5 : i32
      %749 = vector.broadcast %c5_i32_179 : i32 to vector<12x12xi32>
      %750 = arith.cmpi eq, %3, %749 : vector<12x12xi32>
      %751 = vector.broadcast %c5_i32_179 : i32 to vector<12x12xi32>
      %752 = arith.cmpi eq, %4, %751 : vector<12x12xi32>
      %cst_180 = arith.constant 0.000000e+00 : f32
      %753 = vector.broadcast %cst_180 : f32 to vector<12x12xf32>
      %754 = arith.select %750, %745, %753 : vector<12x12xi1>, vector<12x12xf32>
      %cst_181 = arith.constant dense<0.000000e+00> : vector<12xf32>
      %755 = vector.multi_reduction <add>, %754, %cst_181 [0] : vector<12x12xf32> to vector<12xf32>
      %756 = vector.shape_cast %755 : vector<12xf32> to vector<1x12xf32>
      %cst_182 = arith.constant 0.000000e+00 : f32
      %757 = vector.broadcast %cst_182 : f32 to vector<12x12xf32>
      %758 = arith.select %750, %748, %757 : vector<12x12xi1>, vector<12x12xf32>
      %cst_183 = arith.constant dense<0.000000e+00> : vector<12xf32>
      %759 = vector.multi_reduction <add>, %758, %cst_183 [0] : vector<12x12xf32> to vector<12xf32>
      %760 = vector.shape_cast %759 : vector<12xf32> to vector<1x12xf32>
      %761 = vector.broadcast %c5_i32_179 : i32 to vector<1x12xi32>
      %762 = arith.cmpi eq, %5, %761 : vector<1x12xi32>
      %cst_184 = arith.constant 0.000000e+00 : f32
      %763 = vector.broadcast %cst_184 : f32 to vector<1x12xf32>
      %764 = arith.select %762, %756, %763 : vector<1x12xi1>, vector<1x12xf32>
      %cst_185 = arith.constant dense<0.000000e+00> : vector<1xf32>
      %765 = vector.multi_reduction <add>, %764, %cst_185 [1] : vector<1x12xf32> to vector<1xf32>
      %766 = vector.shape_cast %765 : vector<1xf32> to vector<1x1xf32>
      %cst_186 = arith.constant 1.000000e+00 : f32
      %767 = vector.broadcast %cst_186 : f32 to vector<1x1xf32>
      %768 = arith.divf %767, %766 : vector<1x1xf32>
      %769 = vector.broadcast %768 : vector<1x1xf32> to vector<1x12xf32>
      %770 = arith.mulf %756, %769 : vector<1x12xf32>
      %771 = vector.broadcast %768 : vector<1x1xf32> to vector<1x12xf32>
      %772 = arith.mulf %760, %771 : vector<1x12xf32>
      %cst_187 = arith.constant 0.000000e+00 : f32
      %773 = vector.broadcast %cst_187 : f32 to vector<12x12xf32>
      %774 = arith.select %752, %745, %773 : vector<12x12xi1>, vector<12x12xf32>
      %cst_188 = arith.constant dense<0.000000e+00> : vector<12xf32>
      %775 = vector.multi_reduction <add>, %774, %cst_188 [1] : vector<12x12xf32> to vector<12xf32>
      %776 = vector.shape_cast %775 : vector<12xf32> to vector<12x1xf32>
      %777 = vector.broadcast %776 : vector<12x1xf32> to vector<12x12xf32>
      %778 = vector.broadcast %770 : vector<1x12xf32> to vector<12x12xf32>
      %779 = arith.mulf %777, %778 : vector<12x12xf32>
      %780 = arith.subf %745, %779 : vector<12x12xf32>
      %781 = vector.broadcast %776 : vector<12x1xf32> to vector<12x12xf32>
      %782 = vector.broadcast %772 : vector<1x12xf32> to vector<12x12xf32>
      %783 = arith.mulf %781, %782 : vector<12x12xf32>
      %784 = arith.subf %748, %783 : vector<12x12xf32>
      %785 = vector.shape_cast %770 : vector<1x12xf32> to vector<1x12xf32>
      %786 = vector.broadcast %785 : vector<1x12xf32> to vector<12x12xf32>
      %787 = arith.select %750, %786, %780 : vector<12x12xi1>, vector<12x12xf32>
      %788 = vector.shape_cast %772 : vector<1x12xf32> to vector<1x12xf32>
      %789 = vector.broadcast %788 : vector<1x12xf32> to vector<12x12xf32>
      %790 = arith.select %750, %789, %784 : vector<12x12xi1>, vector<12x12xf32>
      %c6_i32_189 = arith.constant 6 : i32
      %791 = vector.broadcast %c6_i32_189 : i32 to vector<12x12xi32>
      %792 = arith.cmpi eq, %3, %791 : vector<12x12xi32>
      %793 = vector.broadcast %c6_i32_189 : i32 to vector<12x12xi32>
      %794 = arith.cmpi eq, %4, %793 : vector<12x12xi32>
      %cst_190 = arith.constant 0.000000e+00 : f32
      %795 = vector.broadcast %cst_190 : f32 to vector<12x12xf32>
      %796 = arith.select %792, %787, %795 : vector<12x12xi1>, vector<12x12xf32>
      %cst_191 = arith.constant dense<0.000000e+00> : vector<12xf32>
      %797 = vector.multi_reduction <add>, %796, %cst_191 [0] : vector<12x12xf32> to vector<12xf32>
      %798 = vector.shape_cast %797 : vector<12xf32> to vector<1x12xf32>
      %cst_192 = arith.constant 0.000000e+00 : f32
      %799 = vector.broadcast %cst_192 : f32 to vector<12x12xf32>
      %800 = arith.select %792, %790, %799 : vector<12x12xi1>, vector<12x12xf32>
      %cst_193 = arith.constant dense<0.000000e+00> : vector<12xf32>
      %801 = vector.multi_reduction <add>, %800, %cst_193 [0] : vector<12x12xf32> to vector<12xf32>
      %802 = vector.shape_cast %801 : vector<12xf32> to vector<1x12xf32>
      %803 = vector.broadcast %c6_i32_189 : i32 to vector<1x12xi32>
      %804 = arith.cmpi eq, %5, %803 : vector<1x12xi32>
      %cst_194 = arith.constant 0.000000e+00 : f32
      %805 = vector.broadcast %cst_194 : f32 to vector<1x12xf32>
      %806 = arith.select %804, %798, %805 : vector<1x12xi1>, vector<1x12xf32>
      %cst_195 = arith.constant dense<0.000000e+00> : vector<1xf32>
      %807 = vector.multi_reduction <add>, %806, %cst_195 [1] : vector<1x12xf32> to vector<1xf32>
      %808 = vector.shape_cast %807 : vector<1xf32> to vector<1x1xf32>
      %cst_196 = arith.constant 1.000000e+00 : f32
      %809 = vector.broadcast %cst_196 : f32 to vector<1x1xf32>
      %810 = arith.divf %809, %808 : vector<1x1xf32>
      %811 = vector.broadcast %810 : vector<1x1xf32> to vector<1x12xf32>
      %812 = arith.mulf %798, %811 : vector<1x12xf32>
      %813 = vector.broadcast %810 : vector<1x1xf32> to vector<1x12xf32>
      %814 = arith.mulf %802, %813 : vector<1x12xf32>
      %cst_197 = arith.constant 0.000000e+00 : f32
      %815 = vector.broadcast %cst_197 : f32 to vector<12x12xf32>
      %816 = arith.select %794, %787, %815 : vector<12x12xi1>, vector<12x12xf32>
      %cst_198 = arith.constant dense<0.000000e+00> : vector<12xf32>
      %817 = vector.multi_reduction <add>, %816, %cst_198 [1] : vector<12x12xf32> to vector<12xf32>
      %818 = vector.shape_cast %817 : vector<12xf32> to vector<12x1xf32>
      %819 = vector.broadcast %818 : vector<12x1xf32> to vector<12x12xf32>
      %820 = vector.broadcast %812 : vector<1x12xf32> to vector<12x12xf32>
      %821 = arith.mulf %819, %820 : vector<12x12xf32>
      %822 = arith.subf %787, %821 : vector<12x12xf32>
      %823 = vector.broadcast %818 : vector<12x1xf32> to vector<12x12xf32>
      %824 = vector.broadcast %814 : vector<1x12xf32> to vector<12x12xf32>
      %825 = arith.mulf %823, %824 : vector<12x12xf32>
      %826 = arith.subf %790, %825 : vector<12x12xf32>
      %827 = vector.shape_cast %812 : vector<1x12xf32> to vector<1x12xf32>
      %828 = vector.broadcast %827 : vector<1x12xf32> to vector<12x12xf32>
      %829 = arith.select %792, %828, %822 : vector<12x12xi1>, vector<12x12xf32>
      %830 = vector.shape_cast %814 : vector<1x12xf32> to vector<1x12xf32>
      %831 = vector.broadcast %830 : vector<1x12xf32> to vector<12x12xf32>
      %832 = arith.select %792, %831, %826 : vector<12x12xi1>, vector<12x12xf32>
      %c7_i32_199 = arith.constant 7 : i32
      %833 = vector.broadcast %c7_i32_199 : i32 to vector<12x12xi32>
      %834 = arith.cmpi eq, %3, %833 : vector<12x12xi32>
      %835 = vector.broadcast %c7_i32_199 : i32 to vector<12x12xi32>
      %836 = arith.cmpi eq, %4, %835 : vector<12x12xi32>
      %cst_200 = arith.constant 0.000000e+00 : f32
      %837 = vector.broadcast %cst_200 : f32 to vector<12x12xf32>
      %838 = arith.select %834, %829, %837 : vector<12x12xi1>, vector<12x12xf32>
      %cst_201 = arith.constant dense<0.000000e+00> : vector<12xf32>
      %839 = vector.multi_reduction <add>, %838, %cst_201 [0] : vector<12x12xf32> to vector<12xf32>
      %840 = vector.shape_cast %839 : vector<12xf32> to vector<1x12xf32>
      %cst_202 = arith.constant 0.000000e+00 : f32
      %841 = vector.broadcast %cst_202 : f32 to vector<12x12xf32>
      %842 = arith.select %834, %832, %841 : vector<12x12xi1>, vector<12x12xf32>
      %cst_203 = arith.constant dense<0.000000e+00> : vector<12xf32>
      %843 = vector.multi_reduction <add>, %842, %cst_203 [0] : vector<12x12xf32> to vector<12xf32>
      %844 = vector.shape_cast %843 : vector<12xf32> to vector<1x12xf32>
      %845 = vector.broadcast %c7_i32_199 : i32 to vector<1x12xi32>
      %846 = arith.cmpi eq, %5, %845 : vector<1x12xi32>
      %cst_204 = arith.constant 0.000000e+00 : f32
      %847 = vector.broadcast %cst_204 : f32 to vector<1x12xf32>
      %848 = arith.select %846, %840, %847 : vector<1x12xi1>, vector<1x12xf32>
      %cst_205 = arith.constant dense<0.000000e+00> : vector<1xf32>
      %849 = vector.multi_reduction <add>, %848, %cst_205 [1] : vector<1x12xf32> to vector<1xf32>
      %850 = vector.shape_cast %849 : vector<1xf32> to vector<1x1xf32>
      %cst_206 = arith.constant 1.000000e+00 : f32
      %851 = vector.broadcast %cst_206 : f32 to vector<1x1xf32>
      %852 = arith.divf %851, %850 : vector<1x1xf32>
      %853 = vector.broadcast %852 : vector<1x1xf32> to vector<1x12xf32>
      %854 = arith.mulf %840, %853 : vector<1x12xf32>
      %855 = vector.broadcast %852 : vector<1x1xf32> to vector<1x12xf32>
      %856 = arith.mulf %844, %855 : vector<1x12xf32>
      %cst_207 = arith.constant 0.000000e+00 : f32
      %857 = vector.broadcast %cst_207 : f32 to vector<12x12xf32>
      %858 = arith.select %836, %829, %857 : vector<12x12xi1>, vector<12x12xf32>
      %cst_208 = arith.constant dense<0.000000e+00> : vector<12xf32>
      %859 = vector.multi_reduction <add>, %858, %cst_208 [1] : vector<12x12xf32> to vector<12xf32>
      %860 = vector.shape_cast %859 : vector<12xf32> to vector<12x1xf32>
      %861 = vector.broadcast %860 : vector<12x1xf32> to vector<12x12xf32>
      %862 = vector.broadcast %854 : vector<1x12xf32> to vector<12x12xf32>
      %863 = arith.mulf %861, %862 : vector<12x12xf32>
      %864 = arith.subf %829, %863 : vector<12x12xf32>
      %865 = vector.broadcast %860 : vector<12x1xf32> to vector<12x12xf32>
      %866 = vector.broadcast %856 : vector<1x12xf32> to vector<12x12xf32>
      %867 = arith.mulf %865, %866 : vector<12x12xf32>
      %868 = arith.subf %832, %867 : vector<12x12xf32>
      %869 = vector.shape_cast %854 : vector<1x12xf32> to vector<1x12xf32>
      %870 = vector.broadcast %869 : vector<1x12xf32> to vector<12x12xf32>
      %871 = arith.select %834, %870, %864 : vector<12x12xi1>, vector<12x12xf32>
      %872 = vector.shape_cast %856 : vector<1x12xf32> to vector<1x12xf32>
      %873 = vector.broadcast %872 : vector<1x12xf32> to vector<12x12xf32>
      %874 = arith.select %834, %873, %868 : vector<12x12xi1>, vector<12x12xf32>
      %c8_i32_209 = arith.constant 8 : i32
      %875 = vector.broadcast %c8_i32_209 : i32 to vector<12x12xi32>
      %876 = arith.cmpi eq, %3, %875 : vector<12x12xi32>
      %877 = vector.broadcast %c8_i32_209 : i32 to vector<12x12xi32>
      %878 = arith.cmpi eq, %4, %877 : vector<12x12xi32>
      %cst_210 = arith.constant 0.000000e+00 : f32
      %879 = vector.broadcast %cst_210 : f32 to vector<12x12xf32>
      %880 = arith.select %876, %871, %879 : vector<12x12xi1>, vector<12x12xf32>
      %cst_211 = arith.constant dense<0.000000e+00> : vector<12xf32>
      %881 = vector.multi_reduction <add>, %880, %cst_211 [0] : vector<12x12xf32> to vector<12xf32>
      %882 = vector.shape_cast %881 : vector<12xf32> to vector<1x12xf32>
      %cst_212 = arith.constant 0.000000e+00 : f32
      %883 = vector.broadcast %cst_212 : f32 to vector<12x12xf32>
      %884 = arith.select %876, %874, %883 : vector<12x12xi1>, vector<12x12xf32>
      %cst_213 = arith.constant dense<0.000000e+00> : vector<12xf32>
      %885 = vector.multi_reduction <add>, %884, %cst_213 [0] : vector<12x12xf32> to vector<12xf32>
      %886 = vector.shape_cast %885 : vector<12xf32> to vector<1x12xf32>
      %887 = vector.broadcast %c8_i32_209 : i32 to vector<1x12xi32>
      %888 = arith.cmpi eq, %5, %887 : vector<1x12xi32>
      %cst_214 = arith.constant 0.000000e+00 : f32
      %889 = vector.broadcast %cst_214 : f32 to vector<1x12xf32>
      %890 = arith.select %888, %882, %889 : vector<1x12xi1>, vector<1x12xf32>
      %cst_215 = arith.constant dense<0.000000e+00> : vector<1xf32>
      %891 = vector.multi_reduction <add>, %890, %cst_215 [1] : vector<1x12xf32> to vector<1xf32>
      %892 = vector.shape_cast %891 : vector<1xf32> to vector<1x1xf32>
      %cst_216 = arith.constant 1.000000e+00 : f32
      %893 = vector.broadcast %cst_216 : f32 to vector<1x1xf32>
      %894 = arith.divf %893, %892 : vector<1x1xf32>
      %895 = vector.broadcast %894 : vector<1x1xf32> to vector<1x12xf32>
      %896 = arith.mulf %882, %895 : vector<1x12xf32>
      %897 = vector.broadcast %894 : vector<1x1xf32> to vector<1x12xf32>
      %898 = arith.mulf %886, %897 : vector<1x12xf32>
      %cst_217 = arith.constant 0.000000e+00 : f32
      %899 = vector.broadcast %cst_217 : f32 to vector<12x12xf32>
      %900 = arith.select %878, %871, %899 : vector<12x12xi1>, vector<12x12xf32>
      %cst_218 = arith.constant dense<0.000000e+00> : vector<12xf32>
      %901 = vector.multi_reduction <add>, %900, %cst_218 [1] : vector<12x12xf32> to vector<12xf32>
      %902 = vector.shape_cast %901 : vector<12xf32> to vector<12x1xf32>
      %903 = vector.broadcast %902 : vector<12x1xf32> to vector<12x12xf32>
      %904 = vector.broadcast %896 : vector<1x12xf32> to vector<12x12xf32>
      %905 = arith.mulf %903, %904 : vector<12x12xf32>
      %906 = arith.subf %871, %905 : vector<12x12xf32>
      %907 = vector.broadcast %902 : vector<12x1xf32> to vector<12x12xf32>
      %908 = vector.broadcast %898 : vector<1x12xf32> to vector<12x12xf32>
      %909 = arith.mulf %907, %908 : vector<12x12xf32>
      %910 = arith.subf %874, %909 : vector<12x12xf32>
      %911 = vector.shape_cast %896 : vector<1x12xf32> to vector<1x12xf32>
      %912 = vector.broadcast %911 : vector<1x12xf32> to vector<12x12xf32>
      %913 = arith.select %876, %912, %906 : vector<12x12xi1>, vector<12x12xf32>
      %914 = vector.shape_cast %898 : vector<1x12xf32> to vector<1x12xf32>
      %915 = vector.broadcast %914 : vector<1x12xf32> to vector<12x12xf32>
      %916 = arith.select %876, %915, %910 : vector<12x12xi1>, vector<12x12xf32>
      %c9_i32_219 = arith.constant 9 : i32
      %917 = vector.broadcast %c9_i32_219 : i32 to vector<12x12xi32>
      %918 = arith.cmpi eq, %3, %917 : vector<12x12xi32>
      %919 = vector.broadcast %c9_i32_219 : i32 to vector<12x12xi32>
      %920 = arith.cmpi eq, %4, %919 : vector<12x12xi32>
      %cst_220 = arith.constant 0.000000e+00 : f32
      %921 = vector.broadcast %cst_220 : f32 to vector<12x12xf32>
      %922 = arith.select %918, %913, %921 : vector<12x12xi1>, vector<12x12xf32>
      %cst_221 = arith.constant dense<0.000000e+00> : vector<12xf32>
      %923 = vector.multi_reduction <add>, %922, %cst_221 [0] : vector<12x12xf32> to vector<12xf32>
      %924 = vector.shape_cast %923 : vector<12xf32> to vector<1x12xf32>
      %cst_222 = arith.constant 0.000000e+00 : f32
      %925 = vector.broadcast %cst_222 : f32 to vector<12x12xf32>
      %926 = arith.select %918, %916, %925 : vector<12x12xi1>, vector<12x12xf32>
      %cst_223 = arith.constant dense<0.000000e+00> : vector<12xf32>
      %927 = vector.multi_reduction <add>, %926, %cst_223 [0] : vector<12x12xf32> to vector<12xf32>
      %928 = vector.shape_cast %927 : vector<12xf32> to vector<1x12xf32>
      %929 = vector.broadcast %c9_i32_219 : i32 to vector<1x12xi32>
      %930 = arith.cmpi eq, %5, %929 : vector<1x12xi32>
      %cst_224 = arith.constant 0.000000e+00 : f32
      %931 = vector.broadcast %cst_224 : f32 to vector<1x12xf32>
      %932 = arith.select %930, %924, %931 : vector<1x12xi1>, vector<1x12xf32>
      %cst_225 = arith.constant dense<0.000000e+00> : vector<1xf32>
      %933 = vector.multi_reduction <add>, %932, %cst_225 [1] : vector<1x12xf32> to vector<1xf32>
      %934 = vector.shape_cast %933 : vector<1xf32> to vector<1x1xf32>
      %cst_226 = arith.constant 1.000000e+00 : f32
      %935 = vector.broadcast %cst_226 : f32 to vector<1x1xf32>
      %936 = arith.divf %935, %934 : vector<1x1xf32>
      %937 = vector.broadcast %936 : vector<1x1xf32> to vector<1x12xf32>
      %938 = arith.mulf %924, %937 : vector<1x12xf32>
      %939 = vector.broadcast %936 : vector<1x1xf32> to vector<1x12xf32>
      %940 = arith.mulf %928, %939 : vector<1x12xf32>
      %cst_227 = arith.constant 0.000000e+00 : f32
      %941 = vector.broadcast %cst_227 : f32 to vector<12x12xf32>
      %942 = arith.select %920, %913, %941 : vector<12x12xi1>, vector<12x12xf32>
      %cst_228 = arith.constant dense<0.000000e+00> : vector<12xf32>
      %943 = vector.multi_reduction <add>, %942, %cst_228 [1] : vector<12x12xf32> to vector<12xf32>
      %944 = vector.shape_cast %943 : vector<12xf32> to vector<12x1xf32>
      %945 = vector.broadcast %944 : vector<12x1xf32> to vector<12x12xf32>
      %946 = vector.broadcast %938 : vector<1x12xf32> to vector<12x12xf32>
      %947 = arith.mulf %945, %946 : vector<12x12xf32>
      %948 = arith.subf %913, %947 : vector<12x12xf32>
      %949 = vector.broadcast %944 : vector<12x1xf32> to vector<12x12xf32>
      %950 = vector.broadcast %940 : vector<1x12xf32> to vector<12x12xf32>
      %951 = arith.mulf %949, %950 : vector<12x12xf32>
      %952 = arith.subf %916, %951 : vector<12x12xf32>
      %953 = vector.shape_cast %938 : vector<1x12xf32> to vector<1x12xf32>
      %954 = vector.broadcast %953 : vector<1x12xf32> to vector<12x12xf32>
      %955 = arith.select %918, %954, %948 : vector<12x12xi1>, vector<12x12xf32>
      %956 = vector.shape_cast %940 : vector<1x12xf32> to vector<1x12xf32>
      %957 = vector.broadcast %956 : vector<1x12xf32> to vector<12x12xf32>
      %958 = arith.select %918, %957, %952 : vector<12x12xi1>, vector<12x12xf32>
      %c10_i32_229 = arith.constant 10 : i32
      %959 = vector.broadcast %c10_i32_229 : i32 to vector<12x12xi32>
      %960 = arith.cmpi eq, %3, %959 : vector<12x12xi32>
      %961 = vector.broadcast %c10_i32_229 : i32 to vector<12x12xi32>
      %962 = arith.cmpi eq, %4, %961 : vector<12x12xi32>
      %cst_230 = arith.constant 0.000000e+00 : f32
      %963 = vector.broadcast %cst_230 : f32 to vector<12x12xf32>
      %964 = arith.select %960, %955, %963 : vector<12x12xi1>, vector<12x12xf32>
      %cst_231 = arith.constant dense<0.000000e+00> : vector<12xf32>
      %965 = vector.multi_reduction <add>, %964, %cst_231 [0] : vector<12x12xf32> to vector<12xf32>
      %966 = vector.shape_cast %965 : vector<12xf32> to vector<1x12xf32>
      %cst_232 = arith.constant 0.000000e+00 : f32
      %967 = vector.broadcast %cst_232 : f32 to vector<12x12xf32>
      %968 = arith.select %960, %958, %967 : vector<12x12xi1>, vector<12x12xf32>
      %cst_233 = arith.constant dense<0.000000e+00> : vector<12xf32>
      %969 = vector.multi_reduction <add>, %968, %cst_233 [0] : vector<12x12xf32> to vector<12xf32>
      %970 = vector.shape_cast %969 : vector<12xf32> to vector<1x12xf32>
      %971 = vector.broadcast %c10_i32_229 : i32 to vector<1x12xi32>
      %972 = arith.cmpi eq, %5, %971 : vector<1x12xi32>
      %cst_234 = arith.constant 0.000000e+00 : f32
      %973 = vector.broadcast %cst_234 : f32 to vector<1x12xf32>
      %974 = arith.select %972, %966, %973 : vector<1x12xi1>, vector<1x12xf32>
      %cst_235 = arith.constant dense<0.000000e+00> : vector<1xf32>
      %975 = vector.multi_reduction <add>, %974, %cst_235 [1] : vector<1x12xf32> to vector<1xf32>
      %976 = vector.shape_cast %975 : vector<1xf32> to vector<1x1xf32>
      %cst_236 = arith.constant 1.000000e+00 : f32
      %977 = vector.broadcast %cst_236 : f32 to vector<1x1xf32>
      %978 = arith.divf %977, %976 : vector<1x1xf32>
      %979 = vector.broadcast %978 : vector<1x1xf32> to vector<1x12xf32>
      %980 = arith.mulf %966, %979 : vector<1x12xf32>
      %981 = vector.broadcast %978 : vector<1x1xf32> to vector<1x12xf32>
      %982 = arith.mulf %970, %981 : vector<1x12xf32>
      %cst_237 = arith.constant 0.000000e+00 : f32
      %983 = vector.broadcast %cst_237 : f32 to vector<12x12xf32>
      %984 = arith.select %962, %955, %983 : vector<12x12xi1>, vector<12x12xf32>
      %cst_238 = arith.constant dense<0.000000e+00> : vector<12xf32>
      %985 = vector.multi_reduction <add>, %984, %cst_238 [1] : vector<12x12xf32> to vector<12xf32>
      %986 = vector.shape_cast %985 : vector<12xf32> to vector<12x1xf32>
      %987 = vector.broadcast %986 : vector<12x1xf32> to vector<12x12xf32>
      %988 = vector.broadcast %980 : vector<1x12xf32> to vector<12x12xf32>
      %989 = arith.mulf %987, %988 : vector<12x12xf32>
      %990 = arith.subf %955, %989 : vector<12x12xf32>
      %991 = vector.broadcast %986 : vector<12x1xf32> to vector<12x12xf32>
      %992 = vector.broadcast %982 : vector<1x12xf32> to vector<12x12xf32>
      %993 = arith.mulf %991, %992 : vector<12x12xf32>
      %994 = arith.subf %958, %993 : vector<12x12xf32>
      %995 = vector.shape_cast %980 : vector<1x12xf32> to vector<1x12xf32>
      %996 = vector.broadcast %995 : vector<1x12xf32> to vector<12x12xf32>
      %997 = arith.select %960, %996, %990 : vector<12x12xi1>, vector<12x12xf32>
      %998 = vector.shape_cast %982 : vector<1x12xf32> to vector<1x12xf32>
      %999 = vector.broadcast %998 : vector<1x12xf32> to vector<12x12xf32>
      %1000 = arith.select %960, %999, %994 : vector<12x12xi1>, vector<12x12xf32>
      %c11_i32_239 = arith.constant 11 : i32
      %1001 = vector.broadcast %c11_i32_239 : i32 to vector<12x12xi32>
      %1002 = arith.cmpi eq, %3, %1001 : vector<12x12xi32>
      %1003 = vector.broadcast %c11_i32_239 : i32 to vector<12x12xi32>
      %1004 = arith.cmpi eq, %4, %1003 : vector<12x12xi32>
      %cst_240 = arith.constant 0.000000e+00 : f32
      %1005 = vector.broadcast %cst_240 : f32 to vector<12x12xf32>
      %1006 = arith.select %1002, %997, %1005 : vector<12x12xi1>, vector<12x12xf32>
      %cst_241 = arith.constant dense<0.000000e+00> : vector<12xf32>
      %1007 = vector.multi_reduction <add>, %1006, %cst_241 [0] : vector<12x12xf32> to vector<12xf32>
      %1008 = vector.shape_cast %1007 : vector<12xf32> to vector<1x12xf32>
      %cst_242 = arith.constant 0.000000e+00 : f32
      %1009 = vector.broadcast %cst_242 : f32 to vector<12x12xf32>
      %1010 = arith.select %1002, %1000, %1009 : vector<12x12xi1>, vector<12x12xf32>
      %cst_243 = arith.constant dense<0.000000e+00> : vector<12xf32>
      %1011 = vector.multi_reduction <add>, %1010, %cst_243 [0] : vector<12x12xf32> to vector<12xf32>
      %1012 = vector.shape_cast %1011 : vector<12xf32> to vector<1x12xf32>
      %1013 = vector.broadcast %c11_i32_239 : i32 to vector<1x12xi32>
      %1014 = arith.cmpi eq, %5, %1013 : vector<1x12xi32>
      %cst_244 = arith.constant 0.000000e+00 : f32
      %1015 = vector.broadcast %cst_244 : f32 to vector<1x12xf32>
      %1016 = arith.select %1014, %1008, %1015 : vector<1x12xi1>, vector<1x12xf32>
      %cst_245 = arith.constant dense<0.000000e+00> : vector<1xf32>
      %1017 = vector.multi_reduction <add>, %1016, %cst_245 [1] : vector<1x12xf32> to vector<1xf32>
      %1018 = vector.shape_cast %1017 : vector<1xf32> to vector<1x1xf32>
      %cst_246 = arith.constant 1.000000e+00 : f32
      %1019 = vector.broadcast %cst_246 : f32 to vector<1x1xf32>
      %1020 = arith.divf %1019, %1018 : vector<1x1xf32>
      %1021 = vector.broadcast %1020 : vector<1x1xf32> to vector<1x12xf32>
      %1022 = arith.mulf %1008, %1021 : vector<1x12xf32>
      %1023 = vector.broadcast %1020 : vector<1x1xf32> to vector<1x12xf32>
      %1024 = arith.mulf %1012, %1023 : vector<1x12xf32>
      %cst_247 = arith.constant 0.000000e+00 : f32
      %1025 = vector.broadcast %cst_247 : f32 to vector<12x12xf32>
      %1026 = arith.select %1004, %997, %1025 : vector<12x12xi1>, vector<12x12xf32>
      %cst_248 = arith.constant dense<0.000000e+00> : vector<12xf32>
      %1027 = vector.multi_reduction <add>, %1026, %cst_248 [1] : vector<12x12xf32> to vector<12xf32>
      %1028 = vector.shape_cast %1027 : vector<12xf32> to vector<12x1xf32>
      %1029 = vector.broadcast %1028 : vector<12x1xf32> to vector<12x12xf32>
      %1030 = vector.broadcast %1022 : vector<1x12xf32> to vector<12x12xf32>
      %1031 = arith.mulf %1029, %1030 : vector<12x12xf32>
      %1032 = arith.subf %997, %1031 : vector<12x12xf32>
      %1033 = vector.broadcast %1028 : vector<12x1xf32> to vector<12x12xf32>
      %1034 = vector.broadcast %1024 : vector<1x12xf32> to vector<12x12xf32>
      %1035 = arith.mulf %1033, %1034 : vector<12x12xf32>
      %1036 = arith.subf %1000, %1035 : vector<12x12xf32>
      %1037 = vector.shape_cast %1022 : vector<1x12xf32> to vector<1x12xf32>
      %1038 = vector.broadcast %1037 : vector<1x12xf32> to vector<12x12xf32>
      %1039 = arith.select %1002, %1038, %1032 : vector<12x12xi1>, vector<12x12xf32>
      %1040 = vector.shape_cast %1024 : vector<1x12xf32> to vector<1x12xf32>
      %1041 = vector.broadcast %1040 : vector<1x12xf32> to vector<12x12xf32>
      %1042 = arith.select %1002, %1041, %1036 : vector<12x12xi1>, vector<12x12xf32>
      %c12_i32_249 = arith.constant 12 : i32
      %cst_250 = arith.constant dense<0.000000e+00> : vector<12x32xf32>
      %1043 = tpu.matmul %1042, %536, %cst_250 {dimension_numbers = #tpu.dot_dimension_numbers<[1], [1], [0], [0], [0, 0, 1, 0], [], []>} : vector<12x12xf32>, vector<32x12xf32>, vector<12x32xf32> -> vector<12x32xf32>
      %cst_251 = arith.constant dense<0.000000e+00> : vector<12x64xf32>
      %1044 = tpu.matmul %1043, %0, %cst_251 {dimension_numbers = #tpu.dot_dimension_numbers<[1], [0], [0], [1], [0, 0, 1, 1], [], []>} : vector<12x32xf32>, vector<32x64xf32>, vector<12x64xf32> -> vector<12x64xf32>
      %cst_252 = arith.constant dense<0.000000e+00> : vector<12x12xf32>
      %1045 = tpu.matmul %1043, %arg6, %cst_252 {dimension_numbers = #tpu.dot_dimension_numbers<[1], [0], [0], [1], [0, 0, 1, 1], [], []>} : vector<12x32xf32>, vector<32x12xf32>, vector<12x12xf32> -> vector<12x12xf32>
      %cst_253 = arith.constant dense<0.000000e+00> : vector<12x12xf32>
      %1046 = tpu.matmul %1044, %1044, %cst_253 {dimension_numbers = #tpu.dot_dimension_numbers<[1], [1], [0], [0], [0, 0, 1, 0], [], []>} : vector<12x64xf32>, vector<12x64xf32>, vector<12x12xf32> -> vector<12x12xf32>
      %1047 = arith.subf %9, %1045 : vector<12x12xf32>
      %cst_254 = arith.constant 6.400000e+01 : f32
      %1048 = vector.broadcast %cst_254 : f32 to vector<12x12xf32>
      %1049 = arith.mulf %1048, %1047 : vector<12x12xf32>
      %1050 = arith.addf %1049, %1046 : vector<12x12xf32>
      %cst_255 = arith.constant dense<0.000000e+00> : vector<32x12xf32>
      %1051 = tpu.matmul %0, %1044, %cst_255 {dimension_numbers = #tpu.dot_dimension_numbers<[1], [1], [0], [0], [0, 0, 1, 0], [], []>} : vector<32x64xf32>, vector<12x64xf32>, vector<32x12xf32> -> vector<32x12xf32>
      %c0_i32_256 = arith.constant 0 : i32
      %1052 = vector.broadcast %c0_i32_256 : i32 to vector<12x12xi32>
      %1053 = arith.cmpi eq, %3, %1052 : vector<12x12xi32>
      %1054 = vector.broadcast %c0_i32_256 : i32 to vector<12x12xi32>
      %1055 = arith.cmpi eq, %4, %1054 : vector<12x12xi32>
      %cst_257 = arith.constant 0.000000e+00 : f32
      %1056 = vector.broadcast %cst_257 : f32 to vector<12x12xf32>
      %1057 = arith.select %1053, %1050, %1056 : vector<12x12xi1>, vector<12x12xf32>
      %cst_258 = arith.constant dense<0.000000e+00> : vector<12xf32>
      %1058 = vector.multi_reduction <add>, %1057, %cst_258 [0] : vector<12x12xf32> to vector<12xf32>
      %1059 = vector.shape_cast %1058 : vector<12xf32> to vector<1x12xf32>
      %cst_259 = arith.constant 0.000000e+00 : f32
      %1060 = vector.broadcast %cst_259 : f32 to vector<12x12xf32>
      %1061 = arith.select %1053, %9, %1060 : vector<12x12xi1>, vector<12x12xf32>
      %cst_260 = arith.constant dense<0.000000e+00> : vector<12xf32>
      %1062 = vector.multi_reduction <add>, %1061, %cst_260 [0] : vector<12x12xf32> to vector<12xf32>
      %1063 = vector.shape_cast %1062 : vector<12xf32> to vector<1x12xf32>
      %1064 = vector.broadcast %c0_i32_256 : i32 to vector<1x12xi32>
      %1065 = arith.cmpi eq, %5, %1064 : vector<1x12xi32>
      %cst_261 = arith.constant 0.000000e+00 : f32
      %1066 = vector.broadcast %cst_261 : f32 to vector<1x12xf32>
      %1067 = arith.select %1065, %1059, %1066 : vector<1x12xi1>, vector<1x12xf32>
      %cst_262 = arith.constant dense<0.000000e+00> : vector<1xf32>
      %1068 = vector.multi_reduction <add>, %1067, %cst_262 [1] : vector<1x12xf32> to vector<1xf32>
      %1069 = vector.shape_cast %1068 : vector<1xf32> to vector<1x1xf32>
      %cst_263 = arith.constant 1.000000e+00 : f32
      %1070 = vector.broadcast %cst_263 : f32 to vector<1x1xf32>
      %1071 = arith.divf %1070, %1069 : vector<1x1xf32>
      %1072 = vector.broadcast %1071 : vector<1x1xf32> to vector<1x12xf32>
      %1073 = arith.mulf %1059, %1072 : vector<1x12xf32>
      %1074 = vector.broadcast %1071 : vector<1x1xf32> to vector<1x12xf32>
      %1075 = arith.mulf %1063, %1074 : vector<1x12xf32>
      %cst_264 = arith.constant 0.000000e+00 : f32
      %1076 = vector.broadcast %cst_264 : f32 to vector<12x12xf32>
      %1077 = arith.select %1055, %1050, %1076 : vector<12x12xi1>, vector<12x12xf32>
      %cst_265 = arith.constant dense<0.000000e+00> : vector<12xf32>
      %1078 = vector.multi_reduction <add>, %1077, %cst_265 [1] : vector<12x12xf32> to vector<12xf32>
      %1079 = vector.shape_cast %1078 : vector<12xf32> to vector<12x1xf32>
      %1080 = vector.broadcast %1079 : vector<12x1xf32> to vector<12x12xf32>
      %1081 = vector.broadcast %1073 : vector<1x12xf32> to vector<12x12xf32>
      %1082 = arith.mulf %1080, %1081 : vector<12x12xf32>
      %1083 = arith.subf %1050, %1082 : vector<12x12xf32>
      %1084 = vector.broadcast %1079 : vector<12x1xf32> to vector<12x12xf32>
      %1085 = vector.broadcast %1075 : vector<1x12xf32> to vector<12x12xf32>
      %1086 = arith.mulf %1084, %1085 : vector<12x12xf32>
      %1087 = arith.subf %9, %1086 : vector<12x12xf32>
      %1088 = vector.shape_cast %1073 : vector<1x12xf32> to vector<1x12xf32>
      %1089 = vector.broadcast %1088 : vector<1x12xf32> to vector<12x12xf32>
      %1090 = arith.select %1053, %1089, %1083 : vector<12x12xi1>, vector<12x12xf32>
      %1091 = vector.shape_cast %1075 : vector<1x12xf32> to vector<1x12xf32>
      %1092 = vector.broadcast %1091 : vector<1x12xf32> to vector<12x12xf32>
      %1093 = arith.select %1053, %1092, %1087 : vector<12x12xi1>, vector<12x12xf32>
      %c1_i32_266 = arith.constant 1 : i32
      %1094 = vector.broadcast %c1_i32_266 : i32 to vector<12x12xi32>
      %1095 = arith.cmpi eq, %3, %1094 : vector<12x12xi32>
      %1096 = vector.broadcast %c1_i32_266 : i32 to vector<12x12xi32>
      %1097 = arith.cmpi eq, %4, %1096 : vector<12x12xi32>
      %cst_267 = arith.constant 0.000000e+00 : f32
      %1098 = vector.broadcast %cst_267 : f32 to vector<12x12xf32>
      %1099 = arith.select %1095, %1090, %1098 : vector<12x12xi1>, vector<12x12xf32>
      %cst_268 = arith.constant dense<0.000000e+00> : vector<12xf32>
      %1100 = vector.multi_reduction <add>, %1099, %cst_268 [0] : vector<12x12xf32> to vector<12xf32>
      %1101 = vector.shape_cast %1100 : vector<12xf32> to vector<1x12xf32>
      %cst_269 = arith.constant 0.000000e+00 : f32
      %1102 = vector.broadcast %cst_269 : f32 to vector<12x12xf32>
      %1103 = arith.select %1095, %1093, %1102 : vector<12x12xi1>, vector<12x12xf32>
      %cst_270 = arith.constant dense<0.000000e+00> : vector<12xf32>
      %1104 = vector.multi_reduction <add>, %1103, %cst_270 [0] : vector<12x12xf32> to vector<12xf32>
      %1105 = vector.shape_cast %1104 : vector<12xf32> to vector<1x12xf32>
      %1106 = vector.broadcast %c1_i32_266 : i32 to vector<1x12xi32>
      %1107 = arith.cmpi eq, %5, %1106 : vector<1x12xi32>
      %cst_271 = arith.constant 0.000000e+00 : f32
      %1108 = vector.broadcast %cst_271 : f32 to vector<1x12xf32>
      %1109 = arith.select %1107, %1101, %1108 : vector<1x12xi1>, vector<1x12xf32>
      %cst_272 = arith.constant dense<0.000000e+00> : vector<1xf32>
      %1110 = vector.multi_reduction <add>, %1109, %cst_272 [1] : vector<1x12xf32> to vector<1xf32>
      %1111 = vector.shape_cast %1110 : vector<1xf32> to vector<1x1xf32>
      %cst_273 = arith.constant 1.000000e+00 : f32
      %1112 = vector.broadcast %cst_273 : f32 to vector<1x1xf32>
      %1113 = arith.divf %1112, %1111 : vector<1x1xf32>
      %1114 = vector.broadcast %1113 : vector<1x1xf32> to vector<1x12xf32>
      %1115 = arith.mulf %1101, %1114 : vector<1x12xf32>
      %1116 = vector.broadcast %1113 : vector<1x1xf32> to vector<1x12xf32>
      %1117 = arith.mulf %1105, %1116 : vector<1x12xf32>
      %cst_274 = arith.constant 0.000000e+00 : f32
      %1118 = vector.broadcast %cst_274 : f32 to vector<12x12xf32>
      %1119 = arith.select %1097, %1090, %1118 : vector<12x12xi1>, vector<12x12xf32>
      %cst_275 = arith.constant dense<0.000000e+00> : vector<12xf32>
      %1120 = vector.multi_reduction <add>, %1119, %cst_275 [1] : vector<12x12xf32> to vector<12xf32>
      %1121 = vector.shape_cast %1120 : vector<12xf32> to vector<12x1xf32>
      %1122 = vector.broadcast %1121 : vector<12x1xf32> to vector<12x12xf32>
      %1123 = vector.broadcast %1115 : vector<1x12xf32> to vector<12x12xf32>
      %1124 = arith.mulf %1122, %1123 : vector<12x12xf32>
      %1125 = arith.subf %1090, %1124 : vector<12x12xf32>
      %1126 = vector.broadcast %1121 : vector<12x1xf32> to vector<12x12xf32>
      %1127 = vector.broadcast %1117 : vector<1x12xf32> to vector<12x12xf32>
      %1128 = arith.mulf %1126, %1127 : vector<12x12xf32>
      %1129 = arith.subf %1093, %1128 : vector<12x12xf32>
      %1130 = vector.shape_cast %1115 : vector<1x12xf32> to vector<1x12xf32>
      %1131 = vector.broadcast %1130 : vector<1x12xf32> to vector<12x12xf32>
      %1132 = arith.select %1095, %1131, %1125 : vector<12x12xi1>, vector<12x12xf32>
      %1133 = vector.shape_cast %1117 : vector<1x12xf32> to vector<1x12xf32>
      %1134 = vector.broadcast %1133 : vector<1x12xf32> to vector<12x12xf32>
      %1135 = arith.select %1095, %1134, %1129 : vector<12x12xi1>, vector<12x12xf32>
      %c2_i32_276 = arith.constant 2 : i32
      %1136 = vector.broadcast %c2_i32_276 : i32 to vector<12x12xi32>
      %1137 = arith.cmpi eq, %3, %1136 : vector<12x12xi32>
      %1138 = vector.broadcast %c2_i32_276 : i32 to vector<12x12xi32>
      %1139 = arith.cmpi eq, %4, %1138 : vector<12x12xi32>
      %cst_277 = arith.constant 0.000000e+00 : f32
      %1140 = vector.broadcast %cst_277 : f32 to vector<12x12xf32>
      %1141 = arith.select %1137, %1132, %1140 : vector<12x12xi1>, vector<12x12xf32>
      %cst_278 = arith.constant dense<0.000000e+00> : vector<12xf32>
      %1142 = vector.multi_reduction <add>, %1141, %cst_278 [0] : vector<12x12xf32> to vector<12xf32>
      %1143 = vector.shape_cast %1142 : vector<12xf32> to vector<1x12xf32>
      %cst_279 = arith.constant 0.000000e+00 : f32
      %1144 = vector.broadcast %cst_279 : f32 to vector<12x12xf32>
      %1145 = arith.select %1137, %1135, %1144 : vector<12x12xi1>, vector<12x12xf32>
      %cst_280 = arith.constant dense<0.000000e+00> : vector<12xf32>
      %1146 = vector.multi_reduction <add>, %1145, %cst_280 [0] : vector<12x12xf32> to vector<12xf32>
      %1147 = vector.shape_cast %1146 : vector<12xf32> to vector<1x12xf32>
      %1148 = vector.broadcast %c2_i32_276 : i32 to vector<1x12xi32>
      %1149 = arith.cmpi eq, %5, %1148 : vector<1x12xi32>
      %cst_281 = arith.constant 0.000000e+00 : f32
      %1150 = vector.broadcast %cst_281 : f32 to vector<1x12xf32>
      %1151 = arith.select %1149, %1143, %1150 : vector<1x12xi1>, vector<1x12xf32>
      %cst_282 = arith.constant dense<0.000000e+00> : vector<1xf32>
      %1152 = vector.multi_reduction <add>, %1151, %cst_282 [1] : vector<1x12xf32> to vector<1xf32>
      %1153 = vector.shape_cast %1152 : vector<1xf32> to vector<1x1xf32>
      %cst_283 = arith.constant 1.000000e+00 : f32
      %1154 = vector.broadcast %cst_283 : f32 to vector<1x1xf32>
      %1155 = arith.divf %1154, %1153 : vector<1x1xf32>
      %1156 = vector.broadcast %1155 : vector<1x1xf32> to vector<1x12xf32>
      %1157 = arith.mulf %1143, %1156 : vector<1x12xf32>
      %1158 = vector.broadcast %1155 : vector<1x1xf32> to vector<1x12xf32>
      %1159 = arith.mulf %1147, %1158 : vector<1x12xf32>
      %cst_284 = arith.constant 0.000000e+00 : f32
      %1160 = vector.broadcast %cst_284 : f32 to vector<12x12xf32>
      %1161 = arith.select %1139, %1132, %1160 : vector<12x12xi1>, vector<12x12xf32>
      %cst_285 = arith.constant dense<0.000000e+00> : vector<12xf32>
      %1162 = vector.multi_reduction <add>, %1161, %cst_285 [1] : vector<12x12xf32> to vector<12xf32>
      %1163 = vector.shape_cast %1162 : vector<12xf32> to vector<12x1xf32>
      %1164 = vector.broadcast %1163 : vector<12x1xf32> to vector<12x12xf32>
      %1165 = vector.broadcast %1157 : vector<1x12xf32> to vector<12x12xf32>
      %1166 = arith.mulf %1164, %1165 : vector<12x12xf32>
      %1167 = arith.subf %1132, %1166 : vector<12x12xf32>
      %1168 = vector.broadcast %1163 : vector<12x1xf32> to vector<12x12xf32>
      %1169 = vector.broadcast %1159 : vector<1x12xf32> to vector<12x12xf32>
      %1170 = arith.mulf %1168, %1169 : vector<12x12xf32>
      %1171 = arith.subf %1135, %1170 : vector<12x12xf32>
      %1172 = vector.shape_cast %1157 : vector<1x12xf32> to vector<1x12xf32>
      %1173 = vector.broadcast %1172 : vector<1x12xf32> to vector<12x12xf32>
      %1174 = arith.select %1137, %1173, %1167 : vector<12x12xi1>, vector<12x12xf32>
      %1175 = vector.shape_cast %1159 : vector<1x12xf32> to vector<1x12xf32>
      %1176 = vector.broadcast %1175 : vector<1x12xf32> to vector<12x12xf32>
      %1177 = arith.select %1137, %1176, %1171 : vector<12x12xi1>, vector<12x12xf32>
      %c3_i32_286 = arith.constant 3 : i32
      %1178 = vector.broadcast %c3_i32_286 : i32 to vector<12x12xi32>
      %1179 = arith.cmpi eq, %3, %1178 : vector<12x12xi32>
      %1180 = vector.broadcast %c3_i32_286 : i32 to vector<12x12xi32>
      %1181 = arith.cmpi eq, %4, %1180 : vector<12x12xi32>
      %cst_287 = arith.constant 0.000000e+00 : f32
      %1182 = vector.broadcast %cst_287 : f32 to vector<12x12xf32>
      %1183 = arith.select %1179, %1174, %1182 : vector<12x12xi1>, vector<12x12xf32>
      %cst_288 = arith.constant dense<0.000000e+00> : vector<12xf32>
      %1184 = vector.multi_reduction <add>, %1183, %cst_288 [0] : vector<12x12xf32> to vector<12xf32>
      %1185 = vector.shape_cast %1184 : vector<12xf32> to vector<1x12xf32>
      %cst_289 = arith.constant 0.000000e+00 : f32
      %1186 = vector.broadcast %cst_289 : f32 to vector<12x12xf32>
      %1187 = arith.select %1179, %1177, %1186 : vector<12x12xi1>, vector<12x12xf32>
      %cst_290 = arith.constant dense<0.000000e+00> : vector<12xf32>
      %1188 = vector.multi_reduction <add>, %1187, %cst_290 [0] : vector<12x12xf32> to vector<12xf32>
      %1189 = vector.shape_cast %1188 : vector<12xf32> to vector<1x12xf32>
      %1190 = vector.broadcast %c3_i32_286 : i32 to vector<1x12xi32>
      %1191 = arith.cmpi eq, %5, %1190 : vector<1x12xi32>
      %cst_291 = arith.constant 0.000000e+00 : f32
      %1192 = vector.broadcast %cst_291 : f32 to vector<1x12xf32>
      %1193 = arith.select %1191, %1185, %1192 : vector<1x12xi1>, vector<1x12xf32>
      %cst_292 = arith.constant dense<0.000000e+00> : vector<1xf32>
      %1194 = vector.multi_reduction <add>, %1193, %cst_292 [1] : vector<1x12xf32> to vector<1xf32>
      %1195 = vector.shape_cast %1194 : vector<1xf32> to vector<1x1xf32>
      %cst_293 = arith.constant 1.000000e+00 : f32
      %1196 = vector.broadcast %cst_293 : f32 to vector<1x1xf32>
      %1197 = arith.divf %1196, %1195 : vector<1x1xf32>
      %1198 = vector.broadcast %1197 : vector<1x1xf32> to vector<1x12xf32>
      %1199 = arith.mulf %1185, %1198 : vector<1x12xf32>
      %1200 = vector.broadcast %1197 : vector<1x1xf32> to vector<1x12xf32>
      %1201 = arith.mulf %1189, %1200 : vector<1x12xf32>
      %cst_294 = arith.constant 0.000000e+00 : f32
      %1202 = vector.broadcast %cst_294 : f32 to vector<12x12xf32>
      %1203 = arith.select %1181, %1174, %1202 : vector<12x12xi1>, vector<12x12xf32>
      %cst_295 = arith.constant dense<0.000000e+00> : vector<12xf32>
      %1204 = vector.multi_reduction <add>, %1203, %cst_295 [1] : vector<12x12xf32> to vector<12xf32>
      %1205 = vector.shape_cast %1204 : vector<12xf32> to vector<12x1xf32>
      %1206 = vector.broadcast %1205 : vector<12x1xf32> to vector<12x12xf32>
      %1207 = vector.broadcast %1199 : vector<1x12xf32> to vector<12x12xf32>
      %1208 = arith.mulf %1206, %1207 : vector<12x12xf32>
      %1209 = arith.subf %1174, %1208 : vector<12x12xf32>
      %1210 = vector.broadcast %1205 : vector<12x1xf32> to vector<12x12xf32>
      %1211 = vector.broadcast %1201 : vector<1x12xf32> to vector<12x12xf32>
      %1212 = arith.mulf %1210, %1211 : vector<12x12xf32>
      %1213 = arith.subf %1177, %1212 : vector<12x12xf32>
      %1214 = vector.shape_cast %1199 : vector<1x12xf32> to vector<1x12xf32>
      %1215 = vector.broadcast %1214 : vector<1x12xf32> to vector<12x12xf32>
      %1216 = arith.select %1179, %1215, %1209 : vector<12x12xi1>, vector<12x12xf32>
      %1217 = vector.shape_cast %1201 : vector<1x12xf32> to vector<1x12xf32>
      %1218 = vector.broadcast %1217 : vector<1x12xf32> to vector<12x12xf32>
      %1219 = arith.select %1179, %1218, %1213 : vector<12x12xi1>, vector<12x12xf32>
      %c4_i32_296 = arith.constant 4 : i32
      %1220 = vector.broadcast %c4_i32_296 : i32 to vector<12x12xi32>
      %1221 = arith.cmpi eq, %3, %1220 : vector<12x12xi32>
      %1222 = vector.broadcast %c4_i32_296 : i32 to vector<12x12xi32>
      %1223 = arith.cmpi eq, %4, %1222 : vector<12x12xi32>
      %cst_297 = arith.constant 0.000000e+00 : f32
      %1224 = vector.broadcast %cst_297 : f32 to vector<12x12xf32>
      %1225 = arith.select %1221, %1216, %1224 : vector<12x12xi1>, vector<12x12xf32>
      %cst_298 = arith.constant dense<0.000000e+00> : vector<12xf32>
      %1226 = vector.multi_reduction <add>, %1225, %cst_298 [0] : vector<12x12xf32> to vector<12xf32>
      %1227 = vector.shape_cast %1226 : vector<12xf32> to vector<1x12xf32>
      %cst_299 = arith.constant 0.000000e+00 : f32
      %1228 = vector.broadcast %cst_299 : f32 to vector<12x12xf32>
      %1229 = arith.select %1221, %1219, %1228 : vector<12x12xi1>, vector<12x12xf32>
      %cst_300 = arith.constant dense<0.000000e+00> : vector<12xf32>
      %1230 = vector.multi_reduction <add>, %1229, %cst_300 [0] : vector<12x12xf32> to vector<12xf32>
      %1231 = vector.shape_cast %1230 : vector<12xf32> to vector<1x12xf32>
      %1232 = vector.broadcast %c4_i32_296 : i32 to vector<1x12xi32>
      %1233 = arith.cmpi eq, %5, %1232 : vector<1x12xi32>
      %cst_301 = arith.constant 0.000000e+00 : f32
      %1234 = vector.broadcast %cst_301 : f32 to vector<1x12xf32>
      %1235 = arith.select %1233, %1227, %1234 : vector<1x12xi1>, vector<1x12xf32>
      %cst_302 = arith.constant dense<0.000000e+00> : vector<1xf32>
      %1236 = vector.multi_reduction <add>, %1235, %cst_302 [1] : vector<1x12xf32> to vector<1xf32>
      %1237 = vector.shape_cast %1236 : vector<1xf32> to vector<1x1xf32>
      %cst_303 = arith.constant 1.000000e+00 : f32
      %1238 = vector.broadcast %cst_303 : f32 to vector<1x1xf32>
      %1239 = arith.divf %1238, %1237 : vector<1x1xf32>
      %1240 = vector.broadcast %1239 : vector<1x1xf32> to vector<1x12xf32>
      %1241 = arith.mulf %1227, %1240 : vector<1x12xf32>
      %1242 = vector.broadcast %1239 : vector<1x1xf32> to vector<1x12xf32>
      %1243 = arith.mulf %1231, %1242 : vector<1x12xf32>
      %cst_304 = arith.constant 0.000000e+00 : f32
      %1244 = vector.broadcast %cst_304 : f32 to vector<12x12xf32>
      %1245 = arith.select %1223, %1216, %1244 : vector<12x12xi1>, vector<12x12xf32>
      %cst_305 = arith.constant dense<0.000000e+00> : vector<12xf32>
      %1246 = vector.multi_reduction <add>, %1245, %cst_305 [1] : vector<12x12xf32> to vector<12xf32>
      %1247 = vector.shape_cast %1246 : vector<12xf32> to vector<12x1xf32>
      %1248 = vector.broadcast %1247 : vector<12x1xf32> to vector<12x12xf32>
      %1249 = vector.broadcast %1241 : vector<1x12xf32> to vector<12x12xf32>
      %1250 = arith.mulf %1248, %1249 : vector<12x12xf32>
      %1251 = arith.subf %1216, %1250 : vector<12x12xf32>
      %1252 = vector.broadcast %1247 : vector<12x1xf32> to vector<12x12xf32>
      %1253 = vector.broadcast %1243 : vector<1x12xf32> to vector<12x12xf32>
      %1254 = arith.mulf %1252, %1253 : vector<12x12xf32>
      %1255 = arith.subf %1219, %1254 : vector<12x12xf32>
      %1256 = vector.shape_cast %1241 : vector<1x12xf32> to vector<1x12xf32>
      %1257 = vector.broadcast %1256 : vector<1x12xf32> to vector<12x12xf32>
      %1258 = arith.select %1221, %1257, %1251 : vector<12x12xi1>, vector<12x12xf32>
      %1259 = vector.shape_cast %1243 : vector<1x12xf32> to vector<1x12xf32>
      %1260 = vector.broadcast %1259 : vector<1x12xf32> to vector<12x12xf32>
      %1261 = arith.select %1221, %1260, %1255 : vector<12x12xi1>, vector<12x12xf32>
      %c5_i32_306 = arith.constant 5 : i32
      %1262 = vector.broadcast %c5_i32_306 : i32 to vector<12x12xi32>
      %1263 = arith.cmpi eq, %3, %1262 : vector<12x12xi32>
      %1264 = vector.broadcast %c5_i32_306 : i32 to vector<12x12xi32>
      %1265 = arith.cmpi eq, %4, %1264 : vector<12x12xi32>
      %cst_307 = arith.constant 0.000000e+00 : f32
      %1266 = vector.broadcast %cst_307 : f32 to vector<12x12xf32>
      %1267 = arith.select %1263, %1258, %1266 : vector<12x12xi1>, vector<12x12xf32>
      %cst_308 = arith.constant dense<0.000000e+00> : vector<12xf32>
      %1268 = vector.multi_reduction <add>, %1267, %cst_308 [0] : vector<12x12xf32> to vector<12xf32>
      %1269 = vector.shape_cast %1268 : vector<12xf32> to vector<1x12xf32>
      %cst_309 = arith.constant 0.000000e+00 : f32
      %1270 = vector.broadcast %cst_309 : f32 to vector<12x12xf32>
      %1271 = arith.select %1263, %1261, %1270 : vector<12x12xi1>, vector<12x12xf32>
      %cst_310 = arith.constant dense<0.000000e+00> : vector<12xf32>
      %1272 = vector.multi_reduction <add>, %1271, %cst_310 [0] : vector<12x12xf32> to vector<12xf32>
      %1273 = vector.shape_cast %1272 : vector<12xf32> to vector<1x12xf32>
      %1274 = vector.broadcast %c5_i32_306 : i32 to vector<1x12xi32>
      %1275 = arith.cmpi eq, %5, %1274 : vector<1x12xi32>
      %cst_311 = arith.constant 0.000000e+00 : f32
      %1276 = vector.broadcast %cst_311 : f32 to vector<1x12xf32>
      %1277 = arith.select %1275, %1269, %1276 : vector<1x12xi1>, vector<1x12xf32>
      %cst_312 = arith.constant dense<0.000000e+00> : vector<1xf32>
      %1278 = vector.multi_reduction <add>, %1277, %cst_312 [1] : vector<1x12xf32> to vector<1xf32>
      %1279 = vector.shape_cast %1278 : vector<1xf32> to vector<1x1xf32>
      %cst_313 = arith.constant 1.000000e+00 : f32
      %1280 = vector.broadcast %cst_313 : f32 to vector<1x1xf32>
      %1281 = arith.divf %1280, %1279 : vector<1x1xf32>
      %1282 = vector.broadcast %1281 : vector<1x1xf32> to vector<1x12xf32>
      %1283 = arith.mulf %1269, %1282 : vector<1x12xf32>
      %1284 = vector.broadcast %1281 : vector<1x1xf32> to vector<1x12xf32>
      %1285 = arith.mulf %1273, %1284 : vector<1x12xf32>
      %cst_314 = arith.constant 0.000000e+00 : f32
      %1286 = vector.broadcast %cst_314 : f32 to vector<12x12xf32>
      %1287 = arith.select %1265, %1258, %1286 : vector<12x12xi1>, vector<12x12xf32>
      %cst_315 = arith.constant dense<0.000000e+00> : vector<12xf32>
      %1288 = vector.multi_reduction <add>, %1287, %cst_315 [1] : vector<12x12xf32> to vector<12xf32>
      %1289 = vector.shape_cast %1288 : vector<12xf32> to vector<12x1xf32>
      %1290 = vector.broadcast %1289 : vector<12x1xf32> to vector<12x12xf32>
      %1291 = vector.broadcast %1283 : vector<1x12xf32> to vector<12x12xf32>
      %1292 = arith.mulf %1290, %1291 : vector<12x12xf32>
      %1293 = arith.subf %1258, %1292 : vector<12x12xf32>
      %1294 = vector.broadcast %1289 : vector<12x1xf32> to vector<12x12xf32>
      %1295 = vector.broadcast %1285 : vector<1x12xf32> to vector<12x12xf32>
      %1296 = arith.mulf %1294, %1295 : vector<12x12xf32>
      %1297 = arith.subf %1261, %1296 : vector<12x12xf32>
      %1298 = vector.shape_cast %1283 : vector<1x12xf32> to vector<1x12xf32>
      %1299 = vector.broadcast %1298 : vector<1x12xf32> to vector<12x12xf32>
      %1300 = arith.select %1263, %1299, %1293 : vector<12x12xi1>, vector<12x12xf32>
      %1301 = vector.shape_cast %1285 : vector<1x12xf32> to vector<1x12xf32>
      %1302 = vector.broadcast %1301 : vector<1x12xf32> to vector<12x12xf32>
      %1303 = arith.select %1263, %1302, %1297 : vector<12x12xi1>, vector<12x12xf32>
      %c6_i32_316 = arith.constant 6 : i32
      %1304 = vector.broadcast %c6_i32_316 : i32 to vector<12x12xi32>
      %1305 = arith.cmpi eq, %3, %1304 : vector<12x12xi32>
      %1306 = vector.broadcast %c6_i32_316 : i32 to vector<12x12xi32>
      %1307 = arith.cmpi eq, %4, %1306 : vector<12x12xi32>
      %cst_317 = arith.constant 0.000000e+00 : f32
      %1308 = vector.broadcast %cst_317 : f32 to vector<12x12xf32>
      %1309 = arith.select %1305, %1300, %1308 : vector<12x12xi1>, vector<12x12xf32>
      %cst_318 = arith.constant dense<0.000000e+00> : vector<12xf32>
      %1310 = vector.multi_reduction <add>, %1309, %cst_318 [0] : vector<12x12xf32> to vector<12xf32>
      %1311 = vector.shape_cast %1310 : vector<12xf32> to vector<1x12xf32>
      %cst_319 = arith.constant 0.000000e+00 : f32
      %1312 = vector.broadcast %cst_319 : f32 to vector<12x12xf32>
      %1313 = arith.select %1305, %1303, %1312 : vector<12x12xi1>, vector<12x12xf32>
      %cst_320 = arith.constant dense<0.000000e+00> : vector<12xf32>
      %1314 = vector.multi_reduction <add>, %1313, %cst_320 [0] : vector<12x12xf32> to vector<12xf32>
      %1315 = vector.shape_cast %1314 : vector<12xf32> to vector<1x12xf32>
      %1316 = vector.broadcast %c6_i32_316 : i32 to vector<1x12xi32>
      %1317 = arith.cmpi eq, %5, %1316 : vector<1x12xi32>
      %cst_321 = arith.constant 0.000000e+00 : f32
      %1318 = vector.broadcast %cst_321 : f32 to vector<1x12xf32>
      %1319 = arith.select %1317, %1311, %1318 : vector<1x12xi1>, vector<1x12xf32>
      %cst_322 = arith.constant dense<0.000000e+00> : vector<1xf32>
      %1320 = vector.multi_reduction <add>, %1319, %cst_322 [1] : vector<1x12xf32> to vector<1xf32>
      %1321 = vector.shape_cast %1320 : vector<1xf32> to vector<1x1xf32>
      %cst_323 = arith.constant 1.000000e+00 : f32
      %1322 = vector.broadcast %cst_323 : f32 to vector<1x1xf32>
      %1323 = arith.divf %1322, %1321 : vector<1x1xf32>
      %1324 = vector.broadcast %1323 : vector<1x1xf32> to vector<1x12xf32>
      %1325 = arith.mulf %1311, %1324 : vector<1x12xf32>
      %1326 = vector.broadcast %1323 : vector<1x1xf32> to vector<1x12xf32>
      %1327 = arith.mulf %1315, %1326 : vector<1x12xf32>
      %cst_324 = arith.constant 0.000000e+00 : f32
      %1328 = vector.broadcast %cst_324 : f32 to vector<12x12xf32>
      %1329 = arith.select %1307, %1300, %1328 : vector<12x12xi1>, vector<12x12xf32>
      %cst_325 = arith.constant dense<0.000000e+00> : vector<12xf32>
      %1330 = vector.multi_reduction <add>, %1329, %cst_325 [1] : vector<12x12xf32> to vector<12xf32>
      %1331 = vector.shape_cast %1330 : vector<12xf32> to vector<12x1xf32>
      %1332 = vector.broadcast %1331 : vector<12x1xf32> to vector<12x12xf32>
      %1333 = vector.broadcast %1325 : vector<1x12xf32> to vector<12x12xf32>
      %1334 = arith.mulf %1332, %1333 : vector<12x12xf32>
      %1335 = arith.subf %1300, %1334 : vector<12x12xf32>
      %1336 = vector.broadcast %1331 : vector<12x1xf32> to vector<12x12xf32>
      %1337 = vector.broadcast %1327 : vector<1x12xf32> to vector<12x12xf32>
      %1338 = arith.mulf %1336, %1337 : vector<12x12xf32>
      %1339 = arith.subf %1303, %1338 : vector<12x12xf32>
      %1340 = vector.shape_cast %1325 : vector<1x12xf32> to vector<1x12xf32>
      %1341 = vector.broadcast %1340 : vector<1x12xf32> to vector<12x12xf32>
      %1342 = arith.select %1305, %1341, %1335 : vector<12x12xi1>, vector<12x12xf32>
      %1343 = vector.shape_cast %1327 : vector<1x12xf32> to vector<1x12xf32>
      %1344 = vector.broadcast %1343 : vector<1x12xf32> to vector<12x12xf32>
      %1345 = arith.select %1305, %1344, %1339 : vector<12x12xi1>, vector<12x12xf32>
      %c7_i32_326 = arith.constant 7 : i32
      %1346 = vector.broadcast %c7_i32_326 : i32 to vector<12x12xi32>
      %1347 = arith.cmpi eq, %3, %1346 : vector<12x12xi32>
      %1348 = vector.broadcast %c7_i32_326 : i32 to vector<12x12xi32>
      %1349 = arith.cmpi eq, %4, %1348 : vector<12x12xi32>
      %cst_327 = arith.constant 0.000000e+00 : f32
      %1350 = vector.broadcast %cst_327 : f32 to vector<12x12xf32>
      %1351 = arith.select %1347, %1342, %1350 : vector<12x12xi1>, vector<12x12xf32>
      %cst_328 = arith.constant dense<0.000000e+00> : vector<12xf32>
      %1352 = vector.multi_reduction <add>, %1351, %cst_328 [0] : vector<12x12xf32> to vector<12xf32>
      %1353 = vector.shape_cast %1352 : vector<12xf32> to vector<1x12xf32>
      %cst_329 = arith.constant 0.000000e+00 : f32
      %1354 = vector.broadcast %cst_329 : f32 to vector<12x12xf32>
      %1355 = arith.select %1347, %1345, %1354 : vector<12x12xi1>, vector<12x12xf32>
      %cst_330 = arith.constant dense<0.000000e+00> : vector<12xf32>
      %1356 = vector.multi_reduction <add>, %1355, %cst_330 [0] : vector<12x12xf32> to vector<12xf32>
      %1357 = vector.shape_cast %1356 : vector<12xf32> to vector<1x12xf32>
      %1358 = vector.broadcast %c7_i32_326 : i32 to vector<1x12xi32>
      %1359 = arith.cmpi eq, %5, %1358 : vector<1x12xi32>
      %cst_331 = arith.constant 0.000000e+00 : f32
      %1360 = vector.broadcast %cst_331 : f32 to vector<1x12xf32>
      %1361 = arith.select %1359, %1353, %1360 : vector<1x12xi1>, vector<1x12xf32>
      %cst_332 = arith.constant dense<0.000000e+00> : vector<1xf32>
      %1362 = vector.multi_reduction <add>, %1361, %cst_332 [1] : vector<1x12xf32> to vector<1xf32>
      %1363 = vector.shape_cast %1362 : vector<1xf32> to vector<1x1xf32>
      %cst_333 = arith.constant 1.000000e+00 : f32
      %1364 = vector.broadcast %cst_333 : f32 to vector<1x1xf32>
      %1365 = arith.divf %1364, %1363 : vector<1x1xf32>
      %1366 = vector.broadcast %1365 : vector<1x1xf32> to vector<1x12xf32>
      %1367 = arith.mulf %1353, %1366 : vector<1x12xf32>
      %1368 = vector.broadcast %1365 : vector<1x1xf32> to vector<1x12xf32>
      %1369 = arith.mulf %1357, %1368 : vector<1x12xf32>
      %cst_334 = arith.constant 0.000000e+00 : f32
      %1370 = vector.broadcast %cst_334 : f32 to vector<12x12xf32>
      %1371 = arith.select %1349, %1342, %1370 : vector<12x12xi1>, vector<12x12xf32>
      %cst_335 = arith.constant dense<0.000000e+00> : vector<12xf32>
      %1372 = vector.multi_reduction <add>, %1371, %cst_335 [1] : vector<12x12xf32> to vector<12xf32>
      %1373 = vector.shape_cast %1372 : vector<12xf32> to vector<12x1xf32>
      %1374 = vector.broadcast %1373 : vector<12x1xf32> to vector<12x12xf32>
      %1375 = vector.broadcast %1367 : vector<1x12xf32> to vector<12x12xf32>
      %1376 = arith.mulf %1374, %1375 : vector<12x12xf32>
      %1377 = arith.subf %1342, %1376 : vector<12x12xf32>
      %1378 = vector.broadcast %1373 : vector<12x1xf32> to vector<12x12xf32>
      %1379 = vector.broadcast %1369 : vector<1x12xf32> to vector<12x12xf32>
      %1380 = arith.mulf %1378, %1379 : vector<12x12xf32>
      %1381 = arith.subf %1345, %1380 : vector<12x12xf32>
      %1382 = vector.shape_cast %1367 : vector<1x12xf32> to vector<1x12xf32>
      %1383 = vector.broadcast %1382 : vector<1x12xf32> to vector<12x12xf32>
      %1384 = arith.select %1347, %1383, %1377 : vector<12x12xi1>, vector<12x12xf32>
      %1385 = vector.shape_cast %1369 : vector<1x12xf32> to vector<1x12xf32>
      %1386 = vector.broadcast %1385 : vector<1x12xf32> to vector<12x12xf32>
      %1387 = arith.select %1347, %1386, %1381 : vector<12x12xi1>, vector<12x12xf32>
      %c8_i32_336 = arith.constant 8 : i32
      %1388 = vector.broadcast %c8_i32_336 : i32 to vector<12x12xi32>
      %1389 = arith.cmpi eq, %3, %1388 : vector<12x12xi32>
      %1390 = vector.broadcast %c8_i32_336 : i32 to vector<12x12xi32>
      %1391 = arith.cmpi eq, %4, %1390 : vector<12x12xi32>
      %cst_337 = arith.constant 0.000000e+00 : f32
      %1392 = vector.broadcast %cst_337 : f32 to vector<12x12xf32>
      %1393 = arith.select %1389, %1384, %1392 : vector<12x12xi1>, vector<12x12xf32>
      %cst_338 = arith.constant dense<0.000000e+00> : vector<12xf32>
      %1394 = vector.multi_reduction <add>, %1393, %cst_338 [0] : vector<12x12xf32> to vector<12xf32>
      %1395 = vector.shape_cast %1394 : vector<12xf32> to vector<1x12xf32>
      %cst_339 = arith.constant 0.000000e+00 : f32
      %1396 = vector.broadcast %cst_339 : f32 to vector<12x12xf32>
      %1397 = arith.select %1389, %1387, %1396 : vector<12x12xi1>, vector<12x12xf32>
      %cst_340 = arith.constant dense<0.000000e+00> : vector<12xf32>
      %1398 = vector.multi_reduction <add>, %1397, %cst_340 [0] : vector<12x12xf32> to vector<12xf32>
      %1399 = vector.shape_cast %1398 : vector<12xf32> to vector<1x12xf32>
      %1400 = vector.broadcast %c8_i32_336 : i32 to vector<1x12xi32>
      %1401 = arith.cmpi eq, %5, %1400 : vector<1x12xi32>
      %cst_341 = arith.constant 0.000000e+00 : f32
      %1402 = vector.broadcast %cst_341 : f32 to vector<1x12xf32>
      %1403 = arith.select %1401, %1395, %1402 : vector<1x12xi1>, vector<1x12xf32>
      %cst_342 = arith.constant dense<0.000000e+00> : vector<1xf32>
      %1404 = vector.multi_reduction <add>, %1403, %cst_342 [1] : vector<1x12xf32> to vector<1xf32>
      %1405 = vector.shape_cast %1404 : vector<1xf32> to vector<1x1xf32>
      %cst_343 = arith.constant 1.000000e+00 : f32
      %1406 = vector.broadcast %cst_343 : f32 to vector<1x1xf32>
      %1407 = arith.divf %1406, %1405 : vector<1x1xf32>
      %1408 = vector.broadcast %1407 : vector<1x1xf32> to vector<1x12xf32>
      %1409 = arith.mulf %1395, %1408 : vector<1x12xf32>
      %1410 = vector.broadcast %1407 : vector<1x1xf32> to vector<1x12xf32>
      %1411 = arith.mulf %1399, %1410 : vector<1x12xf32>
      %cst_344 = arith.constant 0.000000e+00 : f32
      %1412 = vector.broadcast %cst_344 : f32 to vector<12x12xf32>
      %1413 = arith.select %1391, %1384, %1412 : vector<12x12xi1>, vector<12x12xf32>
      %cst_345 = arith.constant dense<0.000000e+00> : vector<12xf32>
      %1414 = vector.multi_reduction <add>, %1413, %cst_345 [1] : vector<12x12xf32> to vector<12xf32>
      %1415 = vector.shape_cast %1414 : vector<12xf32> to vector<12x1xf32>
      %1416 = vector.broadcast %1415 : vector<12x1xf32> to vector<12x12xf32>
      %1417 = vector.broadcast %1409 : vector<1x12xf32> to vector<12x12xf32>
      %1418 = arith.mulf %1416, %1417 : vector<12x12xf32>
      %1419 = arith.subf %1384, %1418 : vector<12x12xf32>
      %1420 = vector.broadcast %1415 : vector<12x1xf32> to vector<12x12xf32>
      %1421 = vector.broadcast %1411 : vector<1x12xf32> to vector<12x12xf32>
      %1422 = arith.mulf %1420, %1421 : vector<12x12xf32>
      %1423 = arith.subf %1387, %1422 : vector<12x12xf32>
      %1424 = vector.shape_cast %1409 : vector<1x12xf32> to vector<1x12xf32>
      %1425 = vector.broadcast %1424 : vector<1x12xf32> to vector<12x12xf32>
      %1426 = arith.select %1389, %1425, %1419 : vector<12x12xi1>, vector<12x12xf32>
      %1427 = vector.shape_cast %1411 : vector<1x12xf32> to vector<1x12xf32>
      %1428 = vector.broadcast %1427 : vector<1x12xf32> to vector<12x12xf32>
      %1429 = arith.select %1389, %1428, %1423 : vector<12x12xi1>, vector<12x12xf32>
      %c9_i32_346 = arith.constant 9 : i32
      %1430 = vector.broadcast %c9_i32_346 : i32 to vector<12x12xi32>
      %1431 = arith.cmpi eq, %3, %1430 : vector<12x12xi32>
      %1432 = vector.broadcast %c9_i32_346 : i32 to vector<12x12xi32>
      %1433 = arith.cmpi eq, %4, %1432 : vector<12x12xi32>
      %cst_347 = arith.constant 0.000000e+00 : f32
      %1434 = vector.broadcast %cst_347 : f32 to vector<12x12xf32>
      %1435 = arith.select %1431, %1426, %1434 : vector<12x12xi1>, vector<12x12xf32>
      %cst_348 = arith.constant dense<0.000000e+00> : vector<12xf32>
      %1436 = vector.multi_reduction <add>, %1435, %cst_348 [0] : vector<12x12xf32> to vector<12xf32>
      %1437 = vector.shape_cast %1436 : vector<12xf32> to vector<1x12xf32>
      %cst_349 = arith.constant 0.000000e+00 : f32
      %1438 = vector.broadcast %cst_349 : f32 to vector<12x12xf32>
      %1439 = arith.select %1431, %1429, %1438 : vector<12x12xi1>, vector<12x12xf32>
      %cst_350 = arith.constant dense<0.000000e+00> : vector<12xf32>
      %1440 = vector.multi_reduction <add>, %1439, %cst_350 [0] : vector<12x12xf32> to vector<12xf32>
      %1441 = vector.shape_cast %1440 : vector<12xf32> to vector<1x12xf32>
      %1442 = vector.broadcast %c9_i32_346 : i32 to vector<1x12xi32>
      %1443 = arith.cmpi eq, %5, %1442 : vector<1x12xi32>
      %cst_351 = arith.constant 0.000000e+00 : f32
      %1444 = vector.broadcast %cst_351 : f32 to vector<1x12xf32>
      %1445 = arith.select %1443, %1437, %1444 : vector<1x12xi1>, vector<1x12xf32>
      %cst_352 = arith.constant dense<0.000000e+00> : vector<1xf32>
      %1446 = vector.multi_reduction <add>, %1445, %cst_352 [1] : vector<1x12xf32> to vector<1xf32>
      %1447 = vector.shape_cast %1446 : vector<1xf32> to vector<1x1xf32>
      %cst_353 = arith.constant 1.000000e+00 : f32
      %1448 = vector.broadcast %cst_353 : f32 to vector<1x1xf32>
      %1449 = arith.divf %1448, %1447 : vector<1x1xf32>
      %1450 = vector.broadcast %1449 : vector<1x1xf32> to vector<1x12xf32>
      %1451 = arith.mulf %1437, %1450 : vector<1x12xf32>
      %1452 = vector.broadcast %1449 : vector<1x1xf32> to vector<1x12xf32>
      %1453 = arith.mulf %1441, %1452 : vector<1x12xf32>
      %cst_354 = arith.constant 0.000000e+00 : f32
      %1454 = vector.broadcast %cst_354 : f32 to vector<12x12xf32>
      %1455 = arith.select %1433, %1426, %1454 : vector<12x12xi1>, vector<12x12xf32>
      %cst_355 = arith.constant dense<0.000000e+00> : vector<12xf32>
      %1456 = vector.multi_reduction <add>, %1455, %cst_355 [1] : vector<12x12xf32> to vector<12xf32>
      %1457 = vector.shape_cast %1456 : vector<12xf32> to vector<12x1xf32>
      %1458 = vector.broadcast %1457 : vector<12x1xf32> to vector<12x12xf32>
      %1459 = vector.broadcast %1451 : vector<1x12xf32> to vector<12x12xf32>
      %1460 = arith.mulf %1458, %1459 : vector<12x12xf32>
      %1461 = arith.subf %1426, %1460 : vector<12x12xf32>
      %1462 = vector.broadcast %1457 : vector<12x1xf32> to vector<12x12xf32>
      %1463 = vector.broadcast %1453 : vector<1x12xf32> to vector<12x12xf32>
      %1464 = arith.mulf %1462, %1463 : vector<12x12xf32>
      %1465 = arith.subf %1429, %1464 : vector<12x12xf32>
      %1466 = vector.shape_cast %1451 : vector<1x12xf32> to vector<1x12xf32>
      %1467 = vector.broadcast %1466 : vector<1x12xf32> to vector<12x12xf32>
      %1468 = arith.select %1431, %1467, %1461 : vector<12x12xi1>, vector<12x12xf32>
      %1469 = vector.shape_cast %1453 : vector<1x12xf32> to vector<1x12xf32>
      %1470 = vector.broadcast %1469 : vector<1x12xf32> to vector<12x12xf32>
      %1471 = arith.select %1431, %1470, %1465 : vector<12x12xi1>, vector<12x12xf32>
      %c10_i32_356 = arith.constant 10 : i32
      %1472 = vector.broadcast %c10_i32_356 : i32 to vector<12x12xi32>
      %1473 = arith.cmpi eq, %3, %1472 : vector<12x12xi32>
      %1474 = vector.broadcast %c10_i32_356 : i32 to vector<12x12xi32>
      %1475 = arith.cmpi eq, %4, %1474 : vector<12x12xi32>
      %cst_357 = arith.constant 0.000000e+00 : f32
      %1476 = vector.broadcast %cst_357 : f32 to vector<12x12xf32>
      %1477 = arith.select %1473, %1468, %1476 : vector<12x12xi1>, vector<12x12xf32>
      %cst_358 = arith.constant dense<0.000000e+00> : vector<12xf32>
      %1478 = vector.multi_reduction <add>, %1477, %cst_358 [0] : vector<12x12xf32> to vector<12xf32>
      %1479 = vector.shape_cast %1478 : vector<12xf32> to vector<1x12xf32>
      %cst_359 = arith.constant 0.000000e+00 : f32
      %1480 = vector.broadcast %cst_359 : f32 to vector<12x12xf32>
      %1481 = arith.select %1473, %1471, %1480 : vector<12x12xi1>, vector<12x12xf32>
      %cst_360 = arith.constant dense<0.000000e+00> : vector<12xf32>
      %1482 = vector.multi_reduction <add>, %1481, %cst_360 [0] : vector<12x12xf32> to vector<12xf32>
      %1483 = vector.shape_cast %1482 : vector<12xf32> to vector<1x12xf32>
      %1484 = vector.broadcast %c10_i32_356 : i32 to vector<1x12xi32>
      %1485 = arith.cmpi eq, %5, %1484 : vector<1x12xi32>
      %cst_361 = arith.constant 0.000000e+00 : f32
      %1486 = vector.broadcast %cst_361 : f32 to vector<1x12xf32>
      %1487 = arith.select %1485, %1479, %1486 : vector<1x12xi1>, vector<1x12xf32>
      %cst_362 = arith.constant dense<0.000000e+00> : vector<1xf32>
      %1488 = vector.multi_reduction <add>, %1487, %cst_362 [1] : vector<1x12xf32> to vector<1xf32>
      %1489 = vector.shape_cast %1488 : vector<1xf32> to vector<1x1xf32>
      %cst_363 = arith.constant 1.000000e+00 : f32
      %1490 = vector.broadcast %cst_363 : f32 to vector<1x1xf32>
      %1491 = arith.divf %1490, %1489 : vector<1x1xf32>
      %1492 = vector.broadcast %1491 : vector<1x1xf32> to vector<1x12xf32>
      %1493 = arith.mulf %1479, %1492 : vector<1x12xf32>
      %1494 = vector.broadcast %1491 : vector<1x1xf32> to vector<1x12xf32>
      %1495 = arith.mulf %1483, %1494 : vector<1x12xf32>
      %cst_364 = arith.constant 0.000000e+00 : f32
      %1496 = vector.broadcast %cst_364 : f32 to vector<12x12xf32>
      %1497 = arith.select %1475, %1468, %1496 : vector<12x12xi1>, vector<12x12xf32>
      %cst_365 = arith.constant dense<0.000000e+00> : vector<12xf32>
      %1498 = vector.multi_reduction <add>, %1497, %cst_365 [1] : vector<12x12xf32> to vector<12xf32>
      %1499 = vector.shape_cast %1498 : vector<12xf32> to vector<12x1xf32>
      %1500 = vector.broadcast %1499 : vector<12x1xf32> to vector<12x12xf32>
      %1501 = vector.broadcast %1493 : vector<1x12xf32> to vector<12x12xf32>
      %1502 = arith.mulf %1500, %1501 : vector<12x12xf32>
      %1503 = arith.subf %1468, %1502 : vector<12x12xf32>
      %1504 = vector.broadcast %1499 : vector<12x1xf32> to vector<12x12xf32>
      %1505 = vector.broadcast %1495 : vector<1x12xf32> to vector<12x12xf32>
      %1506 = arith.mulf %1504, %1505 : vector<12x12xf32>
      %1507 = arith.subf %1471, %1506 : vector<12x12xf32>
      %1508 = vector.shape_cast %1493 : vector<1x12xf32> to vector<1x12xf32>
      %1509 = vector.broadcast %1508 : vector<1x12xf32> to vector<12x12xf32>
      %1510 = arith.select %1473, %1509, %1503 : vector<12x12xi1>, vector<12x12xf32>
      %1511 = vector.shape_cast %1495 : vector<1x12xf32> to vector<1x12xf32>
      %1512 = vector.broadcast %1511 : vector<1x12xf32> to vector<12x12xf32>
      %1513 = arith.select %1473, %1512, %1507 : vector<12x12xi1>, vector<12x12xf32>
      %c11_i32_366 = arith.constant 11 : i32
      %1514 = vector.broadcast %c11_i32_366 : i32 to vector<12x12xi32>
      %1515 = arith.cmpi eq, %3, %1514 : vector<12x12xi32>
      %1516 = vector.broadcast %c11_i32_366 : i32 to vector<12x12xi32>
      %1517 = arith.cmpi eq, %4, %1516 : vector<12x12xi32>
      %cst_367 = arith.constant 0.000000e+00 : f32
      %1518 = vector.broadcast %cst_367 : f32 to vector<12x12xf32>
      %1519 = arith.select %1515, %1510, %1518 : vector<12x12xi1>, vector<12x12xf32>
      %cst_368 = arith.constant dense<0.000000e+00> : vector<12xf32>
      %1520 = vector.multi_reduction <add>, %1519, %cst_368 [0] : vector<12x12xf32> to vector<12xf32>
      %1521 = vector.shape_cast %1520 : vector<12xf32> to vector<1x12xf32>
      %cst_369 = arith.constant 0.000000e+00 : f32
      %1522 = vector.broadcast %cst_369 : f32 to vector<12x12xf32>
      %1523 = arith.select %1515, %1513, %1522 : vector<12x12xi1>, vector<12x12xf32>
      %cst_370 = arith.constant dense<0.000000e+00> : vector<12xf32>
      %1524 = vector.multi_reduction <add>, %1523, %cst_370 [0] : vector<12x12xf32> to vector<12xf32>
      %1525 = vector.shape_cast %1524 : vector<12xf32> to vector<1x12xf32>
      %1526 = vector.broadcast %c11_i32_366 : i32 to vector<1x12xi32>
      %1527 = arith.cmpi eq, %5, %1526 : vector<1x12xi32>
      %cst_371 = arith.constant 0.000000e+00 : f32
      %1528 = vector.broadcast %cst_371 : f32 to vector<1x12xf32>
      %1529 = arith.select %1527, %1521, %1528 : vector<1x12xi1>, vector<1x12xf32>
      %cst_372 = arith.constant dense<0.000000e+00> : vector<1xf32>
      %1530 = vector.multi_reduction <add>, %1529, %cst_372 [1] : vector<1x12xf32> to vector<1xf32>
      %1531 = vector.shape_cast %1530 : vector<1xf32> to vector<1x1xf32>
      %cst_373 = arith.constant 1.000000e+00 : f32
      %1532 = vector.broadcast %cst_373 : f32 to vector<1x1xf32>
      %1533 = arith.divf %1532, %1531 : vector<1x1xf32>
      %1534 = vector.broadcast %1533 : vector<1x1xf32> to vector<1x12xf32>
      %1535 = arith.mulf %1521, %1534 : vector<1x12xf32>
      %1536 = vector.broadcast %1533 : vector<1x1xf32> to vector<1x12xf32>
      %1537 = arith.mulf %1525, %1536 : vector<1x12xf32>
      %cst_374 = arith.constant 0.000000e+00 : f32
      %1538 = vector.broadcast %cst_374 : f32 to vector<12x12xf32>
      %1539 = arith.select %1517, %1510, %1538 : vector<12x12xi1>, vector<12x12xf32>
      %cst_375 = arith.constant dense<0.000000e+00> : vector<12xf32>
      %1540 = vector.multi_reduction <add>, %1539, %cst_375 [1] : vector<12x12xf32> to vector<12xf32>
      %1541 = vector.shape_cast %1540 : vector<12xf32> to vector<12x1xf32>
      %1542 = vector.broadcast %1541 : vector<12x1xf32> to vector<12x12xf32>
      %1543 = vector.broadcast %1535 : vector<1x12xf32> to vector<12x12xf32>
      %1544 = arith.mulf %1542, %1543 : vector<12x12xf32>
      %1545 = arith.subf %1510, %1544 : vector<12x12xf32>
      %1546 = vector.broadcast %1541 : vector<12x1xf32> to vector<12x12xf32>
      %1547 = vector.broadcast %1537 : vector<1x12xf32> to vector<12x12xf32>
      %1548 = arith.mulf %1546, %1547 : vector<12x12xf32>
      %1549 = arith.subf %1513, %1548 : vector<12x12xf32>
      %1550 = vector.shape_cast %1535 : vector<1x12xf32> to vector<1x12xf32>
      %1551 = vector.broadcast %1550 : vector<1x12xf32> to vector<12x12xf32>
      %1552 = arith.select %1515, %1551, %1545 : vector<12x12xi1>, vector<12x12xf32>
      %1553 = vector.shape_cast %1537 : vector<1x12xf32> to vector<1x12xf32>
      %1554 = vector.broadcast %1553 : vector<1x12xf32> to vector<12x12xf32>
      %1555 = arith.select %1515, %1554, %1549 : vector<12x12xi1>, vector<12x12xf32>
      %c12_i32_376 = arith.constant 12 : i32
      %cst_377 = arith.constant dense<0.000000e+00> : vector<32x12xf32>
      %1556 = tpu.matmul %1051, %1555, %cst_377 {dimension_numbers = #tpu.dot_dimension_numbers<[1], [0], [0], [1], [0, 0, 1, 1], [], []>} : vector<32x12xf32>, vector<12x12xf32>, vector<32x12xf32> -> vector<32x12xf32>
      %cst_378 = arith.constant dense<0.000000e+00> : vector<32x64xf32>
      %1557 = tpu.matmul %1556, %1044, %cst_378 {dimension_numbers = #tpu.dot_dimension_numbers<[1], [0], [0], [1], [0, 0, 1, 1], [], []>} : vector<32x12xf32>, vector<12x64xf32>, vector<32x64xf32> -> vector<32x64xf32>
      %1558 = arith.subf %0, %1557 : vector<32x64xf32>
      %1559 = arith.mulf %1558, %0 : vector<32x64xf32>
      %cst_379 = arith.constant dense<0.000000e+00> : vector<32xf32>
      %1560 = vector.multi_reduction <add>, %1559, %cst_379 [1] : vector<32x64xf32> to vector<32xf32>
      %1561 = vector.shape_cast %1560 : vector<32xf32> to vector<32x1xf32>
      %cst_380 = arith.constant 1.562500e-02 : f32
      %1562 = vector.broadcast %cst_380 : f32 to vector<32x1xf32>
      %1563 = arith.mulf %1561, %1562 : vector<32x1xf32>
      scf.yield %1556, %1563 : vector<32x12xf32>, vector<32x1xf32>
    }
    %cst_6 = arith.constant 1.000000e+00 : f32
    %12 = vector.broadcast %cst_6 : f32 to vector<32x1xf32>
    %13 = arith.divf %12, %11#1 : vector<32x1xf32>
    %14 = vector.broadcast %13 : vector<32x1xf32> to vector<32x12xf32>
    %15 = arith.mulf %14, %11#0 : vector<32x12xf32>
    %cst_7 = arith.constant dense<0.000000e+00> : vector<12x12xf32>
    %16 = tpu.matmul %11#0, %15, %cst_7 {dimension_numbers = #tpu.dot_dimension_numbers<[0], [0], [1], [1], [0, 1, 1, 1], [], []>} : vector<32x12xf32>, vector<32x12xf32>, vector<12x12xf32> -> vector<12x12xf32>
    %17 = arith.addf %9, %16 : vector<12x12xf32>
    %c0_i32_8 = arith.constant 0 : i32
    %18 = vector.broadcast %c0_i32_8 : i32 to vector<12x12xi32>
    %19 = arith.cmpi eq, %3, %18 : vector<12x12xi32>
    %20 = vector.broadcast %c0_i32_8 : i32 to vector<12x12xi32>
    %21 = arith.cmpi eq, %4, %20 : vector<12x12xi32>
    %cst_9 = arith.constant 0.000000e+00 : f32
    %22 = vector.broadcast %cst_9 : f32 to vector<12x12xf32>
    %23 = arith.select %19, %17, %22 : vector<12x12xi1>, vector<12x12xf32>
    %cst_10 = arith.constant dense<0.000000e+00> : vector<12xf32>
    %24 = vector.multi_reduction <add>, %23, %cst_10 [0] : vector<12x12xf32> to vector<12xf32>
    %25 = vector.shape_cast %24 : vector<12xf32> to vector<1x12xf32>
    %cst_11 = arith.constant 0.000000e+00 : f32
    %26 = vector.broadcast %cst_11 : f32 to vector<12x12xf32>
    %27 = arith.select %19, %9, %26 : vector<12x12xi1>, vector<12x12xf32>
    %cst_12 = arith.constant dense<0.000000e+00> : vector<12xf32>
    %28 = vector.multi_reduction <add>, %27, %cst_12 [0] : vector<12x12xf32> to vector<12xf32>
    %29 = vector.shape_cast %28 : vector<12xf32> to vector<1x12xf32>
    %30 = vector.broadcast %c0_i32_8 : i32 to vector<1x12xi32>
    %31 = arith.cmpi eq, %5, %30 : vector<1x12xi32>
    %cst_13 = arith.constant 0.000000e+00 : f32
    %32 = vector.broadcast %cst_13 : f32 to vector<1x12xf32>
    %33 = arith.select %31, %25, %32 : vector<1x12xi1>, vector<1x12xf32>
    %cst_14 = arith.constant dense<0.000000e+00> : vector<1xf32>
    %34 = vector.multi_reduction <add>, %33, %cst_14 [1] : vector<1x12xf32> to vector<1xf32>
    %35 = vector.shape_cast %34 : vector<1xf32> to vector<1x1xf32>
    %cst_15 = arith.constant 1.000000e+00 : f32
    %36 = vector.broadcast %cst_15 : f32 to vector<1x1xf32>
    %37 = arith.divf %36, %35 : vector<1x1xf32>
    %38 = vector.broadcast %37 : vector<1x1xf32> to vector<1x12xf32>
    %39 = arith.mulf %25, %38 : vector<1x12xf32>
    %40 = vector.broadcast %37 : vector<1x1xf32> to vector<1x12xf32>
    %41 = arith.mulf %29, %40 : vector<1x12xf32>
    %cst_16 = arith.constant 0.000000e+00 : f32
    %42 = vector.broadcast %cst_16 : f32 to vector<12x12xf32>
    %43 = arith.select %21, %17, %42 : vector<12x12xi1>, vector<12x12xf32>
    %cst_17 = arith.constant dense<0.000000e+00> : vector<12xf32>
    %44 = vector.multi_reduction <add>, %43, %cst_17 [1] : vector<12x12xf32> to vector<12xf32>
    %45 = vector.shape_cast %44 : vector<12xf32> to vector<12x1xf32>
    %46 = vector.broadcast %45 : vector<12x1xf32> to vector<12x12xf32>
    %47 = vector.broadcast %39 : vector<1x12xf32> to vector<12x12xf32>
    %48 = arith.mulf %46, %47 : vector<12x12xf32>
    %49 = arith.subf %17, %48 : vector<12x12xf32>
    %50 = vector.broadcast %45 : vector<12x1xf32> to vector<12x12xf32>
    %51 = vector.broadcast %41 : vector<1x12xf32> to vector<12x12xf32>
    %52 = arith.mulf %50, %51 : vector<12x12xf32>
    %53 = arith.subf %9, %52 : vector<12x12xf32>
    %54 = vector.shape_cast %39 : vector<1x12xf32> to vector<1x12xf32>
    %55 = vector.broadcast %54 : vector<1x12xf32> to vector<12x12xf32>
    %56 = arith.select %19, %55, %49 : vector<12x12xi1>, vector<12x12xf32>
    %57 = vector.shape_cast %41 : vector<1x12xf32> to vector<1x12xf32>
    %58 = vector.broadcast %57 : vector<1x12xf32> to vector<12x12xf32>
    %59 = arith.select %19, %58, %53 : vector<12x12xi1>, vector<12x12xf32>
    %c1_i32_18 = arith.constant 1 : i32
    %60 = vector.broadcast %c1_i32_18 : i32 to vector<12x12xi32>
    %61 = arith.cmpi eq, %3, %60 : vector<12x12xi32>
    %62 = vector.broadcast %c1_i32_18 : i32 to vector<12x12xi32>
    %63 = arith.cmpi eq, %4, %62 : vector<12x12xi32>
    %cst_19 = arith.constant 0.000000e+00 : f32
    %64 = vector.broadcast %cst_19 : f32 to vector<12x12xf32>
    %65 = arith.select %61, %56, %64 : vector<12x12xi1>, vector<12x12xf32>
    %cst_20 = arith.constant dense<0.000000e+00> : vector<12xf32>
    %66 = vector.multi_reduction <add>, %65, %cst_20 [0] : vector<12x12xf32> to vector<12xf32>
    %67 = vector.shape_cast %66 : vector<12xf32> to vector<1x12xf32>
    %cst_21 = arith.constant 0.000000e+00 : f32
    %68 = vector.broadcast %cst_21 : f32 to vector<12x12xf32>
    %69 = arith.select %61, %59, %68 : vector<12x12xi1>, vector<12x12xf32>
    %cst_22 = arith.constant dense<0.000000e+00> : vector<12xf32>
    %70 = vector.multi_reduction <add>, %69, %cst_22 [0] : vector<12x12xf32> to vector<12xf32>
    %71 = vector.shape_cast %70 : vector<12xf32> to vector<1x12xf32>
    %72 = vector.broadcast %c1_i32_18 : i32 to vector<1x12xi32>
    %73 = arith.cmpi eq, %5, %72 : vector<1x12xi32>
    %cst_23 = arith.constant 0.000000e+00 : f32
    %74 = vector.broadcast %cst_23 : f32 to vector<1x12xf32>
    %75 = arith.select %73, %67, %74 : vector<1x12xi1>, vector<1x12xf32>
    %cst_24 = arith.constant dense<0.000000e+00> : vector<1xf32>
    %76 = vector.multi_reduction <add>, %75, %cst_24 [1] : vector<1x12xf32> to vector<1xf32>
    %77 = vector.shape_cast %76 : vector<1xf32> to vector<1x1xf32>
    %cst_25 = arith.constant 1.000000e+00 : f32
    %78 = vector.broadcast %cst_25 : f32 to vector<1x1xf32>
    %79 = arith.divf %78, %77 : vector<1x1xf32>
    %80 = vector.broadcast %79 : vector<1x1xf32> to vector<1x12xf32>
    %81 = arith.mulf %67, %80 : vector<1x12xf32>
    %82 = vector.broadcast %79 : vector<1x1xf32> to vector<1x12xf32>
    %83 = arith.mulf %71, %82 : vector<1x12xf32>
    %cst_26 = arith.constant 0.000000e+00 : f32
    %84 = vector.broadcast %cst_26 : f32 to vector<12x12xf32>
    %85 = arith.select %63, %56, %84 : vector<12x12xi1>, vector<12x12xf32>
    %cst_27 = arith.constant dense<0.000000e+00> : vector<12xf32>
    %86 = vector.multi_reduction <add>, %85, %cst_27 [1] : vector<12x12xf32> to vector<12xf32>
    %87 = vector.shape_cast %86 : vector<12xf32> to vector<12x1xf32>
    %88 = vector.broadcast %87 : vector<12x1xf32> to vector<12x12xf32>
    %89 = vector.broadcast %81 : vector<1x12xf32> to vector<12x12xf32>
    %90 = arith.mulf %88, %89 : vector<12x12xf32>
    %91 = arith.subf %56, %90 : vector<12x12xf32>
    %92 = vector.broadcast %87 : vector<12x1xf32> to vector<12x12xf32>
    %93 = vector.broadcast %83 : vector<1x12xf32> to vector<12x12xf32>
    %94 = arith.mulf %92, %93 : vector<12x12xf32>
    %95 = arith.subf %59, %94 : vector<12x12xf32>
    %96 = vector.shape_cast %81 : vector<1x12xf32> to vector<1x12xf32>
    %97 = vector.broadcast %96 : vector<1x12xf32> to vector<12x12xf32>
    %98 = arith.select %61, %97, %91 : vector<12x12xi1>, vector<12x12xf32>
    %99 = vector.shape_cast %83 : vector<1x12xf32> to vector<1x12xf32>
    %100 = vector.broadcast %99 : vector<1x12xf32> to vector<12x12xf32>
    %101 = arith.select %61, %100, %95 : vector<12x12xi1>, vector<12x12xf32>
    %c2_i32 = arith.constant 2 : i32
    %102 = vector.broadcast %c2_i32 : i32 to vector<12x12xi32>
    %103 = arith.cmpi eq, %3, %102 : vector<12x12xi32>
    %104 = vector.broadcast %c2_i32 : i32 to vector<12x12xi32>
    %105 = arith.cmpi eq, %4, %104 : vector<12x12xi32>
    %cst_28 = arith.constant 0.000000e+00 : f32
    %106 = vector.broadcast %cst_28 : f32 to vector<12x12xf32>
    %107 = arith.select %103, %98, %106 : vector<12x12xi1>, vector<12x12xf32>
    %cst_29 = arith.constant dense<0.000000e+00> : vector<12xf32>
    %108 = vector.multi_reduction <add>, %107, %cst_29 [0] : vector<12x12xf32> to vector<12xf32>
    %109 = vector.shape_cast %108 : vector<12xf32> to vector<1x12xf32>
    %cst_30 = arith.constant 0.000000e+00 : f32
    %110 = vector.broadcast %cst_30 : f32 to vector<12x12xf32>
    %111 = arith.select %103, %101, %110 : vector<12x12xi1>, vector<12x12xf32>
    %cst_31 = arith.constant dense<0.000000e+00> : vector<12xf32>
    %112 = vector.multi_reduction <add>, %111, %cst_31 [0] : vector<12x12xf32> to vector<12xf32>
    %113 = vector.shape_cast %112 : vector<12xf32> to vector<1x12xf32>
    %114 = vector.broadcast %c2_i32 : i32 to vector<1x12xi32>
    %115 = arith.cmpi eq, %5, %114 : vector<1x12xi32>
    %cst_32 = arith.constant 0.000000e+00 : f32
    %116 = vector.broadcast %cst_32 : f32 to vector<1x12xf32>
    %117 = arith.select %115, %109, %116 : vector<1x12xi1>, vector<1x12xf32>
    %cst_33 = arith.constant dense<0.000000e+00> : vector<1xf32>
    %118 = vector.multi_reduction <add>, %117, %cst_33 [1] : vector<1x12xf32> to vector<1xf32>
    %119 = vector.shape_cast %118 : vector<1xf32> to vector<1x1xf32>
    %cst_34 = arith.constant 1.000000e+00 : f32
    %120 = vector.broadcast %cst_34 : f32 to vector<1x1xf32>
    %121 = arith.divf %120, %119 : vector<1x1xf32>
    %122 = vector.broadcast %121 : vector<1x1xf32> to vector<1x12xf32>
    %123 = arith.mulf %109, %122 : vector<1x12xf32>
    %124 = vector.broadcast %121 : vector<1x1xf32> to vector<1x12xf32>
    %125 = arith.mulf %113, %124 : vector<1x12xf32>
    %cst_35 = arith.constant 0.000000e+00 : f32
    %126 = vector.broadcast %cst_35 : f32 to vector<12x12xf32>
    %127 = arith.select %105, %98, %126 : vector<12x12xi1>, vector<12x12xf32>
    %cst_36 = arith.constant dense<0.000000e+00> : vector<12xf32>
    %128 = vector.multi_reduction <add>, %127, %cst_36 [1] : vector<12x12xf32> to vector<12xf32>
    %129 = vector.shape_cast %128 : vector<12xf32> to vector<12x1xf32>
    %130 = vector.broadcast %129 : vector<12x1xf32> to vector<12x12xf32>
    %131 = vector.broadcast %123 : vector<1x12xf32> to vector<12x12xf32>
    %132 = arith.mulf %130, %131 : vector<12x12xf32>
    %133 = arith.subf %98, %132 : vector<12x12xf32>
    %134 = vector.broadcast %129 : vector<12x1xf32> to vector<12x12xf32>
    %135 = vector.broadcast %125 : vector<1x12xf32> to vector<12x12xf32>
    %136 = arith.mulf %134, %135 : vector<12x12xf32>
    %137 = arith.subf %101, %136 : vector<12x12xf32>
    %138 = vector.shape_cast %123 : vector<1x12xf32> to vector<1x12xf32>
    %139 = vector.broadcast %138 : vector<1x12xf32> to vector<12x12xf32>
    %140 = arith.select %103, %139, %133 : vector<12x12xi1>, vector<12x12xf32>
    %141 = vector.shape_cast %125 : vector<1x12xf32> to vector<1x12xf32>
    %142 = vector.broadcast %141 : vector<1x12xf32> to vector<12x12xf32>
    %143 = arith.select %103, %142, %137 : vector<12x12xi1>, vector<12x12xf32>
    %c3_i32_37 = arith.constant 3 : i32
    %144 = vector.broadcast %c3_i32_37 : i32 to vector<12x12xi32>
    %145 = arith.cmpi eq, %3, %144 : vector<12x12xi32>
    %146 = vector.broadcast %c3_i32_37 : i32 to vector<12x12xi32>
    %147 = arith.cmpi eq, %4, %146 : vector<12x12xi32>
    %cst_38 = arith.constant 0.000000e+00 : f32
    %148 = vector.broadcast %cst_38 : f32 to vector<12x12xf32>
    %149 = arith.select %145, %140, %148 : vector<12x12xi1>, vector<12x12xf32>
    %cst_39 = arith.constant dense<0.000000e+00> : vector<12xf32>
    %150 = vector.multi_reduction <add>, %149, %cst_39 [0] : vector<12x12xf32> to vector<12xf32>
    %151 = vector.shape_cast %150 : vector<12xf32> to vector<1x12xf32>
    %cst_40 = arith.constant 0.000000e+00 : f32
    %152 = vector.broadcast %cst_40 : f32 to vector<12x12xf32>
    %153 = arith.select %145, %143, %152 : vector<12x12xi1>, vector<12x12xf32>
    %cst_41 = arith.constant dense<0.000000e+00> : vector<12xf32>
    %154 = vector.multi_reduction <add>, %153, %cst_41 [0] : vector<12x12xf32> to vector<12xf32>
    %155 = vector.shape_cast %154 : vector<12xf32> to vector<1x12xf32>
    %156 = vector.broadcast %c3_i32_37 : i32 to vector<1x12xi32>
    %157 = arith.cmpi eq, %5, %156 : vector<1x12xi32>
    %cst_42 = arith.constant 0.000000e+00 : f32
    %158 = vector.broadcast %cst_42 : f32 to vector<1x12xf32>
    %159 = arith.select %157, %151, %158 : vector<1x12xi1>, vector<1x12xf32>
    %cst_43 = arith.constant dense<0.000000e+00> : vector<1xf32>
    %160 = vector.multi_reduction <add>, %159, %cst_43 [1] : vector<1x12xf32> to vector<1xf32>
    %161 = vector.shape_cast %160 : vector<1xf32> to vector<1x1xf32>
    %cst_44 = arith.constant 1.000000e+00 : f32
    %162 = vector.broadcast %cst_44 : f32 to vector<1x1xf32>
    %163 = arith.divf %162, %161 : vector<1x1xf32>
    %164 = vector.broadcast %163 : vector<1x1xf32> to vector<1x12xf32>
    %165 = arith.mulf %151, %164 : vector<1x12xf32>
    %166 = vector.broadcast %163 : vector<1x1xf32> to vector<1x12xf32>
    %167 = arith.mulf %155, %166 : vector<1x12xf32>
    %cst_45 = arith.constant 0.000000e+00 : f32
    %168 = vector.broadcast %cst_45 : f32 to vector<12x12xf32>
    %169 = arith.select %147, %140, %168 : vector<12x12xi1>, vector<12x12xf32>
    %cst_46 = arith.constant dense<0.000000e+00> : vector<12xf32>
    %170 = vector.multi_reduction <add>, %169, %cst_46 [1] : vector<12x12xf32> to vector<12xf32>
    %171 = vector.shape_cast %170 : vector<12xf32> to vector<12x1xf32>
    %172 = vector.broadcast %171 : vector<12x1xf32> to vector<12x12xf32>
    %173 = vector.broadcast %165 : vector<1x12xf32> to vector<12x12xf32>
    %174 = arith.mulf %172, %173 : vector<12x12xf32>
    %175 = arith.subf %140, %174 : vector<12x12xf32>
    %176 = vector.broadcast %171 : vector<12x1xf32> to vector<12x12xf32>
    %177 = vector.broadcast %167 : vector<1x12xf32> to vector<12x12xf32>
    %178 = arith.mulf %176, %177 : vector<12x12xf32>
    %179 = arith.subf %143, %178 : vector<12x12xf32>
    %180 = vector.shape_cast %165 : vector<1x12xf32> to vector<1x12xf32>
    %181 = vector.broadcast %180 : vector<1x12xf32> to vector<12x12xf32>
    %182 = arith.select %145, %181, %175 : vector<12x12xi1>, vector<12x12xf32>
    %183 = vector.shape_cast %167 : vector<1x12xf32> to vector<1x12xf32>
    %184 = vector.broadcast %183 : vector<1x12xf32> to vector<12x12xf32>
    %185 = arith.select %145, %184, %179 : vector<12x12xi1>, vector<12x12xf32>
    %c4_i32 = arith.constant 4 : i32
    %186 = vector.broadcast %c4_i32 : i32 to vector<12x12xi32>
    %187 = arith.cmpi eq, %3, %186 : vector<12x12xi32>
    %188 = vector.broadcast %c4_i32 : i32 to vector<12x12xi32>
    %189 = arith.cmpi eq, %4, %188 : vector<12x12xi32>
    %cst_47 = arith.constant 0.000000e+00 : f32
    %190 = vector.broadcast %cst_47 : f32 to vector<12x12xf32>
    %191 = arith.select %187, %182, %190 : vector<12x12xi1>, vector<12x12xf32>
    %cst_48 = arith.constant dense<0.000000e+00> : vector<12xf32>
    %192 = vector.multi_reduction <add>, %191, %cst_48 [0] : vector<12x12xf32> to vector<12xf32>
    %193 = vector.shape_cast %192 : vector<12xf32> to vector<1x12xf32>
    %cst_49 = arith.constant 0.000000e+00 : f32
    %194 = vector.broadcast %cst_49 : f32 to vector<12x12xf32>
    %195 = arith.select %187, %185, %194 : vector<12x12xi1>, vector<12x12xf32>
    %cst_50 = arith.constant dense<0.000000e+00> : vector<12xf32>
    %196 = vector.multi_reduction <add>, %195, %cst_50 [0] : vector<12x12xf32> to vector<12xf32>
    %197 = vector.shape_cast %196 : vector<12xf32> to vector<1x12xf32>
    %198 = vector.broadcast %c4_i32 : i32 to vector<1x12xi32>
    %199 = arith.cmpi eq, %5, %198 : vector<1x12xi32>
    %cst_51 = arith.constant 0.000000e+00 : f32
    %200 = vector.broadcast %cst_51 : f32 to vector<1x12xf32>
    %201 = arith.select %199, %193, %200 : vector<1x12xi1>, vector<1x12xf32>
    %cst_52 = arith.constant dense<0.000000e+00> : vector<1xf32>
    %202 = vector.multi_reduction <add>, %201, %cst_52 [1] : vector<1x12xf32> to vector<1xf32>
    %203 = vector.shape_cast %202 : vector<1xf32> to vector<1x1xf32>
    %cst_53 = arith.constant 1.000000e+00 : f32
    %204 = vector.broadcast %cst_53 : f32 to vector<1x1xf32>
    %205 = arith.divf %204, %203 : vector<1x1xf32>
    %206 = vector.broadcast %205 : vector<1x1xf32> to vector<1x12xf32>
    %207 = arith.mulf %193, %206 : vector<1x12xf32>
    %208 = vector.broadcast %205 : vector<1x1xf32> to vector<1x12xf32>
    %209 = arith.mulf %197, %208 : vector<1x12xf32>
    %cst_54 = arith.constant 0.000000e+00 : f32
    %210 = vector.broadcast %cst_54 : f32 to vector<12x12xf32>
    %211 = arith.select %189, %182, %210 : vector<12x12xi1>, vector<12x12xf32>
    %cst_55 = arith.constant dense<0.000000e+00> : vector<12xf32>
    %212 = vector.multi_reduction <add>, %211, %cst_55 [1] : vector<12x12xf32> to vector<12xf32>
    %213 = vector.shape_cast %212 : vector<12xf32> to vector<12x1xf32>
    %214 = vector.broadcast %213 : vector<12x1xf32> to vector<12x12xf32>
    %215 = vector.broadcast %207 : vector<1x12xf32> to vector<12x12xf32>
    %216 = arith.mulf %214, %215 : vector<12x12xf32>
    %217 = arith.subf %182, %216 : vector<12x12xf32>
    %218 = vector.broadcast %213 : vector<12x1xf32> to vector<12x12xf32>
    %219 = vector.broadcast %209 : vector<1x12xf32> to vector<12x12xf32>
    %220 = arith.mulf %218, %219 : vector<12x12xf32>
    %221 = arith.subf %185, %220 : vector<12x12xf32>
    %222 = vector.shape_cast %207 : vector<1x12xf32> to vector<1x12xf32>
    %223 = vector.broadcast %222 : vector<1x12xf32> to vector<12x12xf32>
    %224 = arith.select %187, %223, %217 : vector<12x12xi1>, vector<12x12xf32>
    %225 = vector.shape_cast %209 : vector<1x12xf32> to vector<1x12xf32>
    %226 = vector.broadcast %225 : vector<1x12xf32> to vector<12x12xf32>
    %227 = arith.select %187, %226, %221 : vector<12x12xi1>, vector<12x12xf32>
    %c5_i32 = arith.constant 5 : i32
    %228 = vector.broadcast %c5_i32 : i32 to vector<12x12xi32>
    %229 = arith.cmpi eq, %3, %228 : vector<12x12xi32>
    %230 = vector.broadcast %c5_i32 : i32 to vector<12x12xi32>
    %231 = arith.cmpi eq, %4, %230 : vector<12x12xi32>
    %cst_56 = arith.constant 0.000000e+00 : f32
    %232 = vector.broadcast %cst_56 : f32 to vector<12x12xf32>
    %233 = arith.select %229, %224, %232 : vector<12x12xi1>, vector<12x12xf32>
    %cst_57 = arith.constant dense<0.000000e+00> : vector<12xf32>
    %234 = vector.multi_reduction <add>, %233, %cst_57 [0] : vector<12x12xf32> to vector<12xf32>
    %235 = vector.shape_cast %234 : vector<12xf32> to vector<1x12xf32>
    %cst_58 = arith.constant 0.000000e+00 : f32
    %236 = vector.broadcast %cst_58 : f32 to vector<12x12xf32>
    %237 = arith.select %229, %227, %236 : vector<12x12xi1>, vector<12x12xf32>
    %cst_59 = arith.constant dense<0.000000e+00> : vector<12xf32>
    %238 = vector.multi_reduction <add>, %237, %cst_59 [0] : vector<12x12xf32> to vector<12xf32>
    %239 = vector.shape_cast %238 : vector<12xf32> to vector<1x12xf32>
    %240 = vector.broadcast %c5_i32 : i32 to vector<1x12xi32>
    %241 = arith.cmpi eq, %5, %240 : vector<1x12xi32>
    %cst_60 = arith.constant 0.000000e+00 : f32
    %242 = vector.broadcast %cst_60 : f32 to vector<1x12xf32>
    %243 = arith.select %241, %235, %242 : vector<1x12xi1>, vector<1x12xf32>
    %cst_61 = arith.constant dense<0.000000e+00> : vector<1xf32>
    %244 = vector.multi_reduction <add>, %243, %cst_61 [1] : vector<1x12xf32> to vector<1xf32>
    %245 = vector.shape_cast %244 : vector<1xf32> to vector<1x1xf32>
    %cst_62 = arith.constant 1.000000e+00 : f32
    %246 = vector.broadcast %cst_62 : f32 to vector<1x1xf32>
    %247 = arith.divf %246, %245 : vector<1x1xf32>
    %248 = vector.broadcast %247 : vector<1x1xf32> to vector<1x12xf32>
    %249 = arith.mulf %235, %248 : vector<1x12xf32>
    %250 = vector.broadcast %247 : vector<1x1xf32> to vector<1x12xf32>
    %251 = arith.mulf %239, %250 : vector<1x12xf32>
    %cst_63 = arith.constant 0.000000e+00 : f32
    %252 = vector.broadcast %cst_63 : f32 to vector<12x12xf32>
    %253 = arith.select %231, %224, %252 : vector<12x12xi1>, vector<12x12xf32>
    %cst_64 = arith.constant dense<0.000000e+00> : vector<12xf32>
    %254 = vector.multi_reduction <add>, %253, %cst_64 [1] : vector<12x12xf32> to vector<12xf32>
    %255 = vector.shape_cast %254 : vector<12xf32> to vector<12x1xf32>
    %256 = vector.broadcast %255 : vector<12x1xf32> to vector<12x12xf32>
    %257 = vector.broadcast %249 : vector<1x12xf32> to vector<12x12xf32>
    %258 = arith.mulf %256, %257 : vector<12x12xf32>
    %259 = arith.subf %224, %258 : vector<12x12xf32>
    %260 = vector.broadcast %255 : vector<12x1xf32> to vector<12x12xf32>
    %261 = vector.broadcast %251 : vector<1x12xf32> to vector<12x12xf32>
    %262 = arith.mulf %260, %261 : vector<12x12xf32>
    %263 = arith.subf %227, %262 : vector<12x12xf32>
    %264 = vector.shape_cast %249 : vector<1x12xf32> to vector<1x12xf32>
    %265 = vector.broadcast %264 : vector<1x12xf32> to vector<12x12xf32>
    %266 = arith.select %229, %265, %259 : vector<12x12xi1>, vector<12x12xf32>
    %267 = vector.shape_cast %251 : vector<1x12xf32> to vector<1x12xf32>
    %268 = vector.broadcast %267 : vector<1x12xf32> to vector<12x12xf32>
    %269 = arith.select %229, %268, %263 : vector<12x12xi1>, vector<12x12xf32>
    %c6_i32 = arith.constant 6 : i32
    %270 = vector.broadcast %c6_i32 : i32 to vector<12x12xi32>
    %271 = arith.cmpi eq, %3, %270 : vector<12x12xi32>
    %272 = vector.broadcast %c6_i32 : i32 to vector<12x12xi32>
    %273 = arith.cmpi eq, %4, %272 : vector<12x12xi32>
    %cst_65 = arith.constant 0.000000e+00 : f32
    %274 = vector.broadcast %cst_65 : f32 to vector<12x12xf32>
    %275 = arith.select %271, %266, %274 : vector<12x12xi1>, vector<12x12xf32>
    %cst_66 = arith.constant dense<0.000000e+00> : vector<12xf32>
    %276 = vector.multi_reduction <add>, %275, %cst_66 [0] : vector<12x12xf32> to vector<12xf32>
    %277 = vector.shape_cast %276 : vector<12xf32> to vector<1x12xf32>
    %cst_67 = arith.constant 0.000000e+00 : f32
    %278 = vector.broadcast %cst_67 : f32 to vector<12x12xf32>
    %279 = arith.select %271, %269, %278 : vector<12x12xi1>, vector<12x12xf32>
    %cst_68 = arith.constant dense<0.000000e+00> : vector<12xf32>
    %280 = vector.multi_reduction <add>, %279, %cst_68 [0] : vector<12x12xf32> to vector<12xf32>
    %281 = vector.shape_cast %280 : vector<12xf32> to vector<1x12xf32>
    %282 = vector.broadcast %c6_i32 : i32 to vector<1x12xi32>
    %283 = arith.cmpi eq, %5, %282 : vector<1x12xi32>
    %cst_69 = arith.constant 0.000000e+00 : f32
    %284 = vector.broadcast %cst_69 : f32 to vector<1x12xf32>
    %285 = arith.select %283, %277, %284 : vector<1x12xi1>, vector<1x12xf32>
    %cst_70 = arith.constant dense<0.000000e+00> : vector<1xf32>
    %286 = vector.multi_reduction <add>, %285, %cst_70 [1] : vector<1x12xf32> to vector<1xf32>
    %287 = vector.shape_cast %286 : vector<1xf32> to vector<1x1xf32>
    %cst_71 = arith.constant 1.000000e+00 : f32
    %288 = vector.broadcast %cst_71 : f32 to vector<1x1xf32>
    %289 = arith.divf %288, %287 : vector<1x1xf32>
    %290 = vector.broadcast %289 : vector<1x1xf32> to vector<1x12xf32>
    %291 = arith.mulf %277, %290 : vector<1x12xf32>
    %292 = vector.broadcast %289 : vector<1x1xf32> to vector<1x12xf32>
    %293 = arith.mulf %281, %292 : vector<1x12xf32>
    %cst_72 = arith.constant 0.000000e+00 : f32
    %294 = vector.broadcast %cst_72 : f32 to vector<12x12xf32>
    %295 = arith.select %273, %266, %294 : vector<12x12xi1>, vector<12x12xf32>
    %cst_73 = arith.constant dense<0.000000e+00> : vector<12xf32>
    %296 = vector.multi_reduction <add>, %295, %cst_73 [1] : vector<12x12xf32> to vector<12xf32>
    %297 = vector.shape_cast %296 : vector<12xf32> to vector<12x1xf32>
    %298 = vector.broadcast %297 : vector<12x1xf32> to vector<12x12xf32>
    %299 = vector.broadcast %291 : vector<1x12xf32> to vector<12x12xf32>
    %300 = arith.mulf %298, %299 : vector<12x12xf32>
    %301 = arith.subf %266, %300 : vector<12x12xf32>
    %302 = vector.broadcast %297 : vector<12x1xf32> to vector<12x12xf32>
    %303 = vector.broadcast %293 : vector<1x12xf32> to vector<12x12xf32>
    %304 = arith.mulf %302, %303 : vector<12x12xf32>
    %305 = arith.subf %269, %304 : vector<12x12xf32>
    %306 = vector.shape_cast %291 : vector<1x12xf32> to vector<1x12xf32>
    %307 = vector.broadcast %306 : vector<1x12xf32> to vector<12x12xf32>
    %308 = arith.select %271, %307, %301 : vector<12x12xi1>, vector<12x12xf32>
    %309 = vector.shape_cast %293 : vector<1x12xf32> to vector<1x12xf32>
    %310 = vector.broadcast %309 : vector<1x12xf32> to vector<12x12xf32>
    %311 = arith.select %271, %310, %305 : vector<12x12xi1>, vector<12x12xf32>
    %c7_i32 = arith.constant 7 : i32
    %312 = vector.broadcast %c7_i32 : i32 to vector<12x12xi32>
    %313 = arith.cmpi eq, %3, %312 : vector<12x12xi32>
    %314 = vector.broadcast %c7_i32 : i32 to vector<12x12xi32>
    %315 = arith.cmpi eq, %4, %314 : vector<12x12xi32>
    %cst_74 = arith.constant 0.000000e+00 : f32
    %316 = vector.broadcast %cst_74 : f32 to vector<12x12xf32>
    %317 = arith.select %313, %308, %316 : vector<12x12xi1>, vector<12x12xf32>
    %cst_75 = arith.constant dense<0.000000e+00> : vector<12xf32>
    %318 = vector.multi_reduction <add>, %317, %cst_75 [0] : vector<12x12xf32> to vector<12xf32>
    %319 = vector.shape_cast %318 : vector<12xf32> to vector<1x12xf32>
    %cst_76 = arith.constant 0.000000e+00 : f32
    %320 = vector.broadcast %cst_76 : f32 to vector<12x12xf32>
    %321 = arith.select %313, %311, %320 : vector<12x12xi1>, vector<12x12xf32>
    %cst_77 = arith.constant dense<0.000000e+00> : vector<12xf32>
    %322 = vector.multi_reduction <add>, %321, %cst_77 [0] : vector<12x12xf32> to vector<12xf32>
    %323 = vector.shape_cast %322 : vector<12xf32> to vector<1x12xf32>
    %324 = vector.broadcast %c7_i32 : i32 to vector<1x12xi32>
    %325 = arith.cmpi eq, %5, %324 : vector<1x12xi32>
    %cst_78 = arith.constant 0.000000e+00 : f32
    %326 = vector.broadcast %cst_78 : f32 to vector<1x12xf32>
    %327 = arith.select %325, %319, %326 : vector<1x12xi1>, vector<1x12xf32>
    %cst_79 = arith.constant dense<0.000000e+00> : vector<1xf32>
    %328 = vector.multi_reduction <add>, %327, %cst_79 [1] : vector<1x12xf32> to vector<1xf32>
    %329 = vector.shape_cast %328 : vector<1xf32> to vector<1x1xf32>
    %cst_80 = arith.constant 1.000000e+00 : f32
    %330 = vector.broadcast %cst_80 : f32 to vector<1x1xf32>
    %331 = arith.divf %330, %329 : vector<1x1xf32>
    %332 = vector.broadcast %331 : vector<1x1xf32> to vector<1x12xf32>
    %333 = arith.mulf %319, %332 : vector<1x12xf32>
    %334 = vector.broadcast %331 : vector<1x1xf32> to vector<1x12xf32>
    %335 = arith.mulf %323, %334 : vector<1x12xf32>
    %cst_81 = arith.constant 0.000000e+00 : f32
    %336 = vector.broadcast %cst_81 : f32 to vector<12x12xf32>
    %337 = arith.select %315, %308, %336 : vector<12x12xi1>, vector<12x12xf32>
    %cst_82 = arith.constant dense<0.000000e+00> : vector<12xf32>
    %338 = vector.multi_reduction <add>, %337, %cst_82 [1] : vector<12x12xf32> to vector<12xf32>
    %339 = vector.shape_cast %338 : vector<12xf32> to vector<12x1xf32>
    %340 = vector.broadcast %339 : vector<12x1xf32> to vector<12x12xf32>
    %341 = vector.broadcast %333 : vector<1x12xf32> to vector<12x12xf32>
    %342 = arith.mulf %340, %341 : vector<12x12xf32>
    %343 = arith.subf %308, %342 : vector<12x12xf32>
    %344 = vector.broadcast %339 : vector<12x1xf32> to vector<12x12xf32>
    %345 = vector.broadcast %335 : vector<1x12xf32> to vector<12x12xf32>
    %346 = arith.mulf %344, %345 : vector<12x12xf32>
    %347 = arith.subf %311, %346 : vector<12x12xf32>
    %348 = vector.shape_cast %333 : vector<1x12xf32> to vector<1x12xf32>
    %349 = vector.broadcast %348 : vector<1x12xf32> to vector<12x12xf32>
    %350 = arith.select %313, %349, %343 : vector<12x12xi1>, vector<12x12xf32>
    %351 = vector.shape_cast %335 : vector<1x12xf32> to vector<1x12xf32>
    %352 = vector.broadcast %351 : vector<1x12xf32> to vector<12x12xf32>
    %353 = arith.select %313, %352, %347 : vector<12x12xi1>, vector<12x12xf32>
    %c8_i32 = arith.constant 8 : i32
    %354 = vector.broadcast %c8_i32 : i32 to vector<12x12xi32>
    %355 = arith.cmpi eq, %3, %354 : vector<12x12xi32>
    %356 = vector.broadcast %c8_i32 : i32 to vector<12x12xi32>
    %357 = arith.cmpi eq, %4, %356 : vector<12x12xi32>
    %cst_83 = arith.constant 0.000000e+00 : f32
    %358 = vector.broadcast %cst_83 : f32 to vector<12x12xf32>
    %359 = arith.select %355, %350, %358 : vector<12x12xi1>, vector<12x12xf32>
    %cst_84 = arith.constant dense<0.000000e+00> : vector<12xf32>
    %360 = vector.multi_reduction <add>, %359, %cst_84 [0] : vector<12x12xf32> to vector<12xf32>
    %361 = vector.shape_cast %360 : vector<12xf32> to vector<1x12xf32>
    %cst_85 = arith.constant 0.000000e+00 : f32
    %362 = vector.broadcast %cst_85 : f32 to vector<12x12xf32>
    %363 = arith.select %355, %353, %362 : vector<12x12xi1>, vector<12x12xf32>
    %cst_86 = arith.constant dense<0.000000e+00> : vector<12xf32>
    %364 = vector.multi_reduction <add>, %363, %cst_86 [0] : vector<12x12xf32> to vector<12xf32>
    %365 = vector.shape_cast %364 : vector<12xf32> to vector<1x12xf32>
    %366 = vector.broadcast %c8_i32 : i32 to vector<1x12xi32>
    %367 = arith.cmpi eq, %5, %366 : vector<1x12xi32>
    %cst_87 = arith.constant 0.000000e+00 : f32
    %368 = vector.broadcast %cst_87 : f32 to vector<1x12xf32>
    %369 = arith.select %367, %361, %368 : vector<1x12xi1>, vector<1x12xf32>
    %cst_88 = arith.constant dense<0.000000e+00> : vector<1xf32>
    %370 = vector.multi_reduction <add>, %369, %cst_88 [1] : vector<1x12xf32> to vector<1xf32>
    %371 = vector.shape_cast %370 : vector<1xf32> to vector<1x1xf32>
    %cst_89 = arith.constant 1.000000e+00 : f32
    %372 = vector.broadcast %cst_89 : f32 to vector<1x1xf32>
    %373 = arith.divf %372, %371 : vector<1x1xf32>
    %374 = vector.broadcast %373 : vector<1x1xf32> to vector<1x12xf32>
    %375 = arith.mulf %361, %374 : vector<1x12xf32>
    %376 = vector.broadcast %373 : vector<1x1xf32> to vector<1x12xf32>
    %377 = arith.mulf %365, %376 : vector<1x12xf32>
    %cst_90 = arith.constant 0.000000e+00 : f32
    %378 = vector.broadcast %cst_90 : f32 to vector<12x12xf32>
    %379 = arith.select %357, %350, %378 : vector<12x12xi1>, vector<12x12xf32>
    %cst_91 = arith.constant dense<0.000000e+00> : vector<12xf32>
    %380 = vector.multi_reduction <add>, %379, %cst_91 [1] : vector<12x12xf32> to vector<12xf32>
    %381 = vector.shape_cast %380 : vector<12xf32> to vector<12x1xf32>
    %382 = vector.broadcast %381 : vector<12x1xf32> to vector<12x12xf32>
    %383 = vector.broadcast %375 : vector<1x12xf32> to vector<12x12xf32>
    %384 = arith.mulf %382, %383 : vector<12x12xf32>
    %385 = arith.subf %350, %384 : vector<12x12xf32>
    %386 = vector.broadcast %381 : vector<12x1xf32> to vector<12x12xf32>
    %387 = vector.broadcast %377 : vector<1x12xf32> to vector<12x12xf32>
    %388 = arith.mulf %386, %387 : vector<12x12xf32>
    %389 = arith.subf %353, %388 : vector<12x12xf32>
    %390 = vector.shape_cast %375 : vector<1x12xf32> to vector<1x12xf32>
    %391 = vector.broadcast %390 : vector<1x12xf32> to vector<12x12xf32>
    %392 = arith.select %355, %391, %385 : vector<12x12xi1>, vector<12x12xf32>
    %393 = vector.shape_cast %377 : vector<1x12xf32> to vector<1x12xf32>
    %394 = vector.broadcast %393 : vector<1x12xf32> to vector<12x12xf32>
    %395 = arith.select %355, %394, %389 : vector<12x12xi1>, vector<12x12xf32>
    %c9_i32 = arith.constant 9 : i32
    %396 = vector.broadcast %c9_i32 : i32 to vector<12x12xi32>
    %397 = arith.cmpi eq, %3, %396 : vector<12x12xi32>
    %398 = vector.broadcast %c9_i32 : i32 to vector<12x12xi32>
    %399 = arith.cmpi eq, %4, %398 : vector<12x12xi32>
    %cst_92 = arith.constant 0.000000e+00 : f32
    %400 = vector.broadcast %cst_92 : f32 to vector<12x12xf32>
    %401 = arith.select %397, %392, %400 : vector<12x12xi1>, vector<12x12xf32>
    %cst_93 = arith.constant dense<0.000000e+00> : vector<12xf32>
    %402 = vector.multi_reduction <add>, %401, %cst_93 [0] : vector<12x12xf32> to vector<12xf32>
    %403 = vector.shape_cast %402 : vector<12xf32> to vector<1x12xf32>
    %cst_94 = arith.constant 0.000000e+00 : f32
    %404 = vector.broadcast %cst_94 : f32 to vector<12x12xf32>
    %405 = arith.select %397, %395, %404 : vector<12x12xi1>, vector<12x12xf32>
    %cst_95 = arith.constant dense<0.000000e+00> : vector<12xf32>
    %406 = vector.multi_reduction <add>, %405, %cst_95 [0] : vector<12x12xf32> to vector<12xf32>
    %407 = vector.shape_cast %406 : vector<12xf32> to vector<1x12xf32>
    %408 = vector.broadcast %c9_i32 : i32 to vector<1x12xi32>
    %409 = arith.cmpi eq, %5, %408 : vector<1x12xi32>
    %cst_96 = arith.constant 0.000000e+00 : f32
    %410 = vector.broadcast %cst_96 : f32 to vector<1x12xf32>
    %411 = arith.select %409, %403, %410 : vector<1x12xi1>, vector<1x12xf32>
    %cst_97 = arith.constant dense<0.000000e+00> : vector<1xf32>
    %412 = vector.multi_reduction <add>, %411, %cst_97 [1] : vector<1x12xf32> to vector<1xf32>
    %413 = vector.shape_cast %412 : vector<1xf32> to vector<1x1xf32>
    %cst_98 = arith.constant 1.000000e+00 : f32
    %414 = vector.broadcast %cst_98 : f32 to vector<1x1xf32>
    %415 = arith.divf %414, %413 : vector<1x1xf32>
    %416 = vector.broadcast %415 : vector<1x1xf32> to vector<1x12xf32>
    %417 = arith.mulf %403, %416 : vector<1x12xf32>
    %418 = vector.broadcast %415 : vector<1x1xf32> to vector<1x12xf32>
    %419 = arith.mulf %407, %418 : vector<1x12xf32>
    %cst_99 = arith.constant 0.000000e+00 : f32
    %420 = vector.broadcast %cst_99 : f32 to vector<12x12xf32>
    %421 = arith.select %399, %392, %420 : vector<12x12xi1>, vector<12x12xf32>
    %cst_100 = arith.constant dense<0.000000e+00> : vector<12xf32>
    %422 = vector.multi_reduction <add>, %421, %cst_100 [1] : vector<12x12xf32> to vector<12xf32>
    %423 = vector.shape_cast %422 : vector<12xf32> to vector<12x1xf32>
    %424 = vector.broadcast %423 : vector<12x1xf32> to vector<12x12xf32>
    %425 = vector.broadcast %417 : vector<1x12xf32> to vector<12x12xf32>
    %426 = arith.mulf %424, %425 : vector<12x12xf32>
    %427 = arith.subf %392, %426 : vector<12x12xf32>
    %428 = vector.broadcast %423 : vector<12x1xf32> to vector<12x12xf32>
    %429 = vector.broadcast %419 : vector<1x12xf32> to vector<12x12xf32>
    %430 = arith.mulf %428, %429 : vector<12x12xf32>
    %431 = arith.subf %395, %430 : vector<12x12xf32>
    %432 = vector.shape_cast %417 : vector<1x12xf32> to vector<1x12xf32>
    %433 = vector.broadcast %432 : vector<1x12xf32> to vector<12x12xf32>
    %434 = arith.select %397, %433, %427 : vector<12x12xi1>, vector<12x12xf32>
    %435 = vector.shape_cast %419 : vector<1x12xf32> to vector<1x12xf32>
    %436 = vector.broadcast %435 : vector<1x12xf32> to vector<12x12xf32>
    %437 = arith.select %397, %436, %431 : vector<12x12xi1>, vector<12x12xf32>
    %c10_i32 = arith.constant 10 : i32
    %438 = vector.broadcast %c10_i32 : i32 to vector<12x12xi32>
    %439 = arith.cmpi eq, %3, %438 : vector<12x12xi32>
    %440 = vector.broadcast %c10_i32 : i32 to vector<12x12xi32>
    %441 = arith.cmpi eq, %4, %440 : vector<12x12xi32>
    %cst_101 = arith.constant 0.000000e+00 : f32
    %442 = vector.broadcast %cst_101 : f32 to vector<12x12xf32>
    %443 = arith.select %439, %434, %442 : vector<12x12xi1>, vector<12x12xf32>
    %cst_102 = arith.constant dense<0.000000e+00> : vector<12xf32>
    %444 = vector.multi_reduction <add>, %443, %cst_102 [0] : vector<12x12xf32> to vector<12xf32>
    %445 = vector.shape_cast %444 : vector<12xf32> to vector<1x12xf32>
    %cst_103 = arith.constant 0.000000e+00 : f32
    %446 = vector.broadcast %cst_103 : f32 to vector<12x12xf32>
    %447 = arith.select %439, %437, %446 : vector<12x12xi1>, vector<12x12xf32>
    %cst_104 = arith.constant dense<0.000000e+00> : vector<12xf32>
    %448 = vector.multi_reduction <add>, %447, %cst_104 [0] : vector<12x12xf32> to vector<12xf32>
    %449 = vector.shape_cast %448 : vector<12xf32> to vector<1x12xf32>
    %450 = vector.broadcast %c10_i32 : i32 to vector<1x12xi32>
    %451 = arith.cmpi eq, %5, %450 : vector<1x12xi32>
    %cst_105 = arith.constant 0.000000e+00 : f32
    %452 = vector.broadcast %cst_105 : f32 to vector<1x12xf32>
    %453 = arith.select %451, %445, %452 : vector<1x12xi1>, vector<1x12xf32>
    %cst_106 = arith.constant dense<0.000000e+00> : vector<1xf32>
    %454 = vector.multi_reduction <add>, %453, %cst_106 [1] : vector<1x12xf32> to vector<1xf32>
    %455 = vector.shape_cast %454 : vector<1xf32> to vector<1x1xf32>
    %cst_107 = arith.constant 1.000000e+00 : f32
    %456 = vector.broadcast %cst_107 : f32 to vector<1x1xf32>
    %457 = arith.divf %456, %455 : vector<1x1xf32>
    %458 = vector.broadcast %457 : vector<1x1xf32> to vector<1x12xf32>
    %459 = arith.mulf %445, %458 : vector<1x12xf32>
    %460 = vector.broadcast %457 : vector<1x1xf32> to vector<1x12xf32>
    %461 = arith.mulf %449, %460 : vector<1x12xf32>
    %cst_108 = arith.constant 0.000000e+00 : f32
    %462 = vector.broadcast %cst_108 : f32 to vector<12x12xf32>
    %463 = arith.select %441, %434, %462 : vector<12x12xi1>, vector<12x12xf32>
    %cst_109 = arith.constant dense<0.000000e+00> : vector<12xf32>
    %464 = vector.multi_reduction <add>, %463, %cst_109 [1] : vector<12x12xf32> to vector<12xf32>
    %465 = vector.shape_cast %464 : vector<12xf32> to vector<12x1xf32>
    %466 = vector.broadcast %465 : vector<12x1xf32> to vector<12x12xf32>
    %467 = vector.broadcast %459 : vector<1x12xf32> to vector<12x12xf32>
    %468 = arith.mulf %466, %467 : vector<12x12xf32>
    %469 = arith.subf %434, %468 : vector<12x12xf32>
    %470 = vector.broadcast %465 : vector<12x1xf32> to vector<12x12xf32>
    %471 = vector.broadcast %461 : vector<1x12xf32> to vector<12x12xf32>
    %472 = arith.mulf %470, %471 : vector<12x12xf32>
    %473 = arith.subf %437, %472 : vector<12x12xf32>
    %474 = vector.shape_cast %459 : vector<1x12xf32> to vector<1x12xf32>
    %475 = vector.broadcast %474 : vector<1x12xf32> to vector<12x12xf32>
    %476 = arith.select %439, %475, %469 : vector<12x12xi1>, vector<12x12xf32>
    %477 = vector.shape_cast %461 : vector<1x12xf32> to vector<1x12xf32>
    %478 = vector.broadcast %477 : vector<1x12xf32> to vector<12x12xf32>
    %479 = arith.select %439, %478, %473 : vector<12x12xi1>, vector<12x12xf32>
    %c11_i32 = arith.constant 11 : i32
    %480 = vector.broadcast %c11_i32 : i32 to vector<12x12xi32>
    %481 = arith.cmpi eq, %3, %480 : vector<12x12xi32>
    %482 = vector.broadcast %c11_i32 : i32 to vector<12x12xi32>
    %483 = arith.cmpi eq, %4, %482 : vector<12x12xi32>
    %cst_110 = arith.constant 0.000000e+00 : f32
    %484 = vector.broadcast %cst_110 : f32 to vector<12x12xf32>
    %485 = arith.select %481, %476, %484 : vector<12x12xi1>, vector<12x12xf32>
    %cst_111 = arith.constant dense<0.000000e+00> : vector<12xf32>
    %486 = vector.multi_reduction <add>, %485, %cst_111 [0] : vector<12x12xf32> to vector<12xf32>
    %487 = vector.shape_cast %486 : vector<12xf32> to vector<1x12xf32>
    %cst_112 = arith.constant 0.000000e+00 : f32
    %488 = vector.broadcast %cst_112 : f32 to vector<12x12xf32>
    %489 = arith.select %481, %479, %488 : vector<12x12xi1>, vector<12x12xf32>
    %cst_113 = arith.constant dense<0.000000e+00> : vector<12xf32>
    %490 = vector.multi_reduction <add>, %489, %cst_113 [0] : vector<12x12xf32> to vector<12xf32>
    %491 = vector.shape_cast %490 : vector<12xf32> to vector<1x12xf32>
    %492 = vector.broadcast %c11_i32 : i32 to vector<1x12xi32>
    %493 = arith.cmpi eq, %5, %492 : vector<1x12xi32>
    %cst_114 = arith.constant 0.000000e+00 : f32
    %494 = vector.broadcast %cst_114 : f32 to vector<1x12xf32>
    %495 = arith.select %493, %487, %494 : vector<1x12xi1>, vector<1x12xf32>
    %cst_115 = arith.constant dense<0.000000e+00> : vector<1xf32>
    %496 = vector.multi_reduction <add>, %495, %cst_115 [1] : vector<1x12xf32> to vector<1xf32>
    %497 = vector.shape_cast %496 : vector<1xf32> to vector<1x1xf32>
    %cst_116 = arith.constant 1.000000e+00 : f32
    %498 = vector.broadcast %cst_116 : f32 to vector<1x1xf32>
    %499 = arith.divf %498, %497 : vector<1x1xf32>
    %500 = vector.broadcast %499 : vector<1x1xf32> to vector<1x12xf32>
    %501 = arith.mulf %487, %500 : vector<1x12xf32>
    %502 = vector.broadcast %499 : vector<1x1xf32> to vector<1x12xf32>
    %503 = arith.mulf %491, %502 : vector<1x12xf32>
    %cst_117 = arith.constant 0.000000e+00 : f32
    %504 = vector.broadcast %cst_117 : f32 to vector<12x12xf32>
    %505 = arith.select %483, %476, %504 : vector<12x12xi1>, vector<12x12xf32>
    %cst_118 = arith.constant dense<0.000000e+00> : vector<12xf32>
    %506 = vector.multi_reduction <add>, %505, %cst_118 [1] : vector<12x12xf32> to vector<12xf32>
    %507 = vector.shape_cast %506 : vector<12xf32> to vector<12x1xf32>
    %508 = vector.broadcast %507 : vector<12x1xf32> to vector<12x12xf32>
    %509 = vector.broadcast %501 : vector<1x12xf32> to vector<12x12xf32>
    %510 = arith.mulf %508, %509 : vector<12x12xf32>
    %511 = arith.subf %476, %510 : vector<12x12xf32>
    %512 = vector.broadcast %507 : vector<12x1xf32> to vector<12x12xf32>
    %513 = vector.broadcast %503 : vector<1x12xf32> to vector<12x12xf32>
    %514 = arith.mulf %512, %513 : vector<12x12xf32>
    %515 = arith.subf %479, %514 : vector<12x12xf32>
    %516 = vector.shape_cast %501 : vector<1x12xf32> to vector<1x12xf32>
    %517 = vector.broadcast %516 : vector<1x12xf32> to vector<12x12xf32>
    %518 = arith.select %481, %517, %511 : vector<12x12xi1>, vector<12x12xf32>
    %519 = vector.shape_cast %503 : vector<1x12xf32> to vector<1x12xf32>
    %520 = vector.broadcast %519 : vector<1x12xf32> to vector<12x12xf32>
    %521 = arith.select %481, %520, %515 : vector<12x12xi1>, vector<12x12xf32>
    %c12_i32 = arith.constant 12 : i32
    %cst_119 = arith.constant dense<0.000000e+00> : vector<12x32xf32>
    %522 = tpu.matmul %521, %15, %cst_119 {dimension_numbers = #tpu.dot_dimension_numbers<[1], [1], [0], [0], [0, 0, 1, 0], [], []>} : vector<12x12xf32>, vector<32x12xf32>, vector<12x32xf32> -> vector<12x32xf32>
    %cst_120 = arith.constant dense<0.000000e+00> : vector<12x64xf32>
    %523 = tpu.matmul %522, %0, %cst_120 {dimension_numbers = #tpu.dot_dimension_numbers<[1], [0], [0], [1], [0, 0, 1, 1], [], []>} : vector<12x32xf32>, vector<32x64xf32>, vector<12x64xf32> -> vector<12x64xf32>
    %cst_121 = arith.constant 9.99999997E-7 : f32
    %524 = vector.broadcast %cst_121 : f32 to vector<32x1xf32>
    %525 = arith.maximumf %11#1, %524 : vector<32x1xf32>
    %526 = math.sqrt %525 : vector<32x1xf32>
    %cst_122 = arith.constant dense<0.000000e+00> : vector<32x64xf32>
    %527 = tpu.matmul %11#0, %523, %cst_122 {dimension_numbers = #tpu.dot_dimension_numbers<[1], [0], [0], [1], [0, 0, 1, 1], [], []>} : vector<32x12xf32>, vector<12x64xf32>, vector<32x64xf32> -> vector<32x64xf32>
    %c0_123 = arith.constant 0 : index
    %c0_124 = arith.constant 0 : index
    %528 = vector.load %arg3[%c0_123, %c0_124] : memref<32x64xf32, #tpu.memory_space<vmem>>, vector<32x64xf32>
    %529 = vector.broadcast %526 : vector<32x1xf32> to vector<32x64xf32>
    %530 = arith.mulf %529, %528 : vector<32x64xf32>
    %531 = arith.addf %527, %530 : vector<32x64xf32>
    %c0_125 = arith.constant 0 : index
    %c0_126 = arith.constant 0 : index
    %532 = vector.load %arg4[%c0_125, %c0_126] : memref<32x64xf32, #tpu.memory_space<vmem>>, vector<32x64xf32>
    tpu.vector_store %arg4[%c0_125, %c0_126], %531 {strides = array<i32>} : memref<32x64xf32, #tpu.memory_space<vmem>>, vector<32x64xf32>,
    return
  }
}

</mosaic_0001>

<bundles_post_ra>
// kernel: tpu_custom_call.1
= control target key start
LH: loop header
LB: loop body
LE: loop exit
PB: predicated region body
PF: predicated region fallthrough
CT: control target
= control target key end

     0   :  { %9 = vsyncpa [#allocation3], 0  ;;  %v30_v2 = vlaneseq  ;;  %v3517_v16 = vmov 0.0   ;;  %s5109_s0 = inlined_call_operand.vmem [shape: f32[32,12], index: 0, kind: input, shape index: {}]   ;;  %s5110_s1 = inlined_call_operand.vmem [shape: f32[32,1], index: 1, kind: input, shape index: {}]   ;;  %s5111_s2 = inlined_call_operand.vmem [shape: f32[32,64], index: 2, kind: input, shape index: {}]   ;;  %s5112_s3 = inlined_call_operand.vmem [shape: f32[32,64], index: 3, kind: input, shape index: {}]   ;;  %s5113_s4 = inlined_call_operand.hbm [shape: f32[32,64], index: 4, kind: output, shape index: {}]  }
   0x1   :  { %v3551_v0 = vld [vmem:[%s5111_s2] sm:$0xff]  ;;  %v3556_v1 = vld [vmem:[%s5111_s2 + $0x8] sm:$0xff]  ;;  %v3561_v3 = vld [vmem:[%s5111_s2 + $0x10] sm:$0xff] }
   0x2   :  { %v3566_v4 = vld [vmem:[%s5111_s2 + $0x18] sm:$0xff]  ;;  %v22_v5 = vld [vmem:[%s5109_s0] sm:$0xff]   ;;  %v23_v6 = vld [vmem:[%s5109_s0 + $0x8] sm:$0xff]   ;;  %v3580_v9 = vshrl.u32 %v30_v2, 7  ;;  %v3582_v10 = vand.u32 127, %v30_v2 }
   0x3   :  { %v24_v7 = vld [vmem:[%s5109_s0 + $0x10] sm:$0xff]   ;;  %v25_v8 = vld [vmem:[%s5109_s0 + $0x18] sm:$0xff]   ;;  %v26_v11 = vld [vmem:[%s5110_s1] sm:$0xff]   ;;  %s3623_s0 = smov 0  }
   0x4   :  { %v27_v12 = vld [vmem:[%s5110_s1 + $0x8] sm:$0xff]   ;;  %v28_v13 = vld [vmem:[%s5110_s1 + $0x10] sm:$0xff]   ;;  %v29_v14 = vld [vmem:[%s5110_s1 + $0x18] sm:$0xff]   ;;  %v3597_v15 = vadd.s32 8, %v3580_v9  ;;  %vm35_vm0 = vcmp.eq.s32.totalorder %v3580_v9, %v3582_v10 }
   0x5   :  { %v3601_v17 = vsel %vm35_vm0, 1.0, %v3517_v16 }
   0x6   :  { %vm36_vm1 = vcmp.eq.s32.totalorder %v3597_v15, %v3582_v10 }
   0x7   :  { %v3605_v18 = vsel %vm36_vm1, 1.0, %v3517_v16 }
   0x8 LB: > { %1047 = vmatpush.msra.mxu2 %v3566_v4  ;;  %v3518_v19 = vmov 0   ;;  %137 = vxpose.xlu2.b32.start [1/4] (short) (narrow) %v3511_v5, 16  ;;  %3320 = vrcp.f32 %v3483_v14  ;;  %v107_v20 = vand.u32 2147483647, %v3483_v14  ;;  %v109_v22 = vand.u32 2147483648, %v3483_v14  ;;  %s44_s0 = sadd.s32 1, %s3515_s0   ;;  %s3515_s0 = sphi %s3623_s0, %s44_s0   ;;  %v3511_v5 = vphi %v22_v5, %v5216_v5   ;;  %v3507_v6 = vphi %v23_v6, %v5215_v6   ;;  %v3503_v7 = vphi %v24_v7, %v5214_v7   ;;  %v3499_v8 = vphi %v25_v8, %v5213_v8   ;;  %v3495_v11 = vphi %v26_v11, %v5212_v11   ;;  %v3491_v12 = vphi %v27_v12, %v5211_v12   ;;  %v3487_v13 = vphi %v28_v13, %v5210_v13   ;;  %v3483_v14 = vphi %v29_v14, %v5209_v14  }
   0x9   : > { %3318 = vset.pattern.permute.xlu0 %v3518_v19  ;;  %3319 = vset.pattern.permute.xlu1 %v3518_v19  ;;  %3322 = vrcp.f32 %v3491_v12  ;;  %vm103_vm2 = vweird.f32 %v3483_v14  ;;  %v77_v30 = vand.u32 2147483647, %v3491_v12  ;;  %v79_v31 = vand.u32 2147483648, %v3491_v12  ;;  %p41_p0 = scmp.ge.s32.totalorder %s44_s0, 3  }
   0xa   : > { %1048 = vmatpush.msra.mxu2 %v3561_v3  ;;  %1070 = vmatpush.msra.mxu3 %v3499_v8  ;;  %3324 = vrcp.f32 %v3487_v13  ;;  %vm3660_vm4 = vcmp.eq.f32.partialorder %v107_v20, 8.507059e+37  ;;  %v110_v29 = vor.u32 1.1754944e-38, %v109_v22  ;;  %vm73_vm5 = vweird.f32 %v3491_v12  ;;  %s3520_s19 = smov (%p41_p0), [#allocation2]   ;;  %s3149_s23 = sshll.u32 (%p41_p0), %s5113_s4, 4  ;;  %s3150_s23 = int_to_ptr.hbm [resolvable:$true] %s3149_s23 }
   0xb   : > { %3326 = vrcp.f32 %v3495_v11  ;;  %vm88_vm8 = vweird.f32 %v3487_v13  ;;  %v92_v38 = vand.u32 2147483647, %v3487_v13  ;;  %v94_v42 = vand.u32 2147483648, %v3487_v13  ;;  %s3147_s20 = sshll.u32 (%p41_p0), %s3520_s19, 4  ;;  %s3521_s24 = smov (%p41_p0), 128   ;;  %s3148_s20 = int_to_ptr.vmem [resolvable:$true] %s3147_s20 }
   0xc   : > { %1049 = vmatpush.msra.mxu2 %v3556_v1  ;;  %1071 = vmatpush.msra.mxu3 %v3503_v7  ;;  %vm3678_vm11 = vcmp.eq.f32.partialorder %v77_v30, 8.507059e+37  ;;  %v80_v45 = vor.u32 1.1754944e-38, %v79_v31  ;;  %vm58_vm12 = vweird.f32 %v3495_v11  ;;  %v64_v54 = vand.u32 2147483648, %v3495_v11  ;;  %s3522_s25 = smov (%p41_p0), 8  }
   0xd   : > { %v62_v56 = vand.u32 2147483647, %v3495_v11  ;;  %v95_v58 = vor.u32 1.1754944e-38, %v94_v42  ;;  %vm93_vm0 = vcmp.eq.f32.partialorder %v92_v38, 8.507059e+37 }
   0xe   : > { %1050 = vmatpush.msra.mxu2 %v3551_v0  ;;  %v3321_v21 = vpop.eup %3320  ;;  %1072 = vmatpush.msra.mxu3 %v3507_v6  ;;  %v65_v61 = vor.u32 1.1754944e-38, %v64_v54 }
   0xf   : > { %v99_v23 = vmul.f32 %v3483_v14, %v3321_v21  ;;  %v3323_v24 = vpop.eup %3322  ;;  %vm104_vm3 = vweird.f32 %v3321_v21  ;;  %vm63_vm1 = vcmp.eq.f32.partialorder %v62_v56, 8.507059e+37 }
  0x10   : > { %138 = vxpose.xlu2.b32.cont [2/4] (short) (narrow) %v3507_v6, 16  ;;  %1073 = vmatpush.msra.mxu3 %v3511_v5  ;;  %v3325_v25 = vpop.eup %3324  ;;  %v69_v28 = vmul.f32 %v3491_v12, %v3323_v24  ;;  %vm74_vm6 = vweird.f32 %v3323_v24  ;;  %vm3666_vm7 = vmor %vm103_vm2, %vm104_vm3  ;;  %vm206_vm2 = vcmask 97280   ;;  %vm5129_vm3 = vcmask 261120  }
  0x11   : > { %v100_v26 = vsub.f32 1.0, %v99_v23  ;;  %v84_v32 = vmul.f32 %v3487_v13, %v3325_v25  ;;  %v3327_v33 = vpop.eup %3326  ;;  %vm89_vm9 = vweird.f32 %v3325_v25  ;;  %vm3674_vm10 = vmor %vm73_vm5, %vm74_vm6  ;;  %vm5131_vm5 = vcmp.eq.s32.totalorder %v3582_v10, 0 }
  0x12   : > { %v70_v35 = vsub.f32 1.0, %v69_v28  ;;  %v54_v39 = vmul.f32 %v3495_v11, %v3327_v33  ;;  %vm59_vm13 = vweird.f32 %v3327_v33  ;;  %vm3690_vm14 = vmor %vm88_vm8, %vm89_vm9 }
  0x13   : > { %v101_v34 = vmul.f32 %v3321_v21, %v100_v26  ;;  %v85_v37 = vsub.f32 1.0, %v84_v32  ;;  %vm60_vm15 = vmor %vm58_vm12, %vm59_vm13 }
  0x14   : > { %v71_v41 = vmul.f32 %v3323_v24, %v70_v35  ;;  %v55_v47 = vsub.f32 1.0, %v54_v39 }
  0x15   : > { %v102_v40 = vadd.f32 %v3321_v21, %v101_v34  ;;  %v86_v46 = vmul.f32 %v3325_v25, %v85_v37 }
  0x16   : > { %v72_v49 = vadd.f32 %v3323_v24, %v71_v41  ;;  %v56_v53 = vmul.f32 %v3327_v33, %v55_v47 }
  0x17   : > { %v106_v48 = vsel %vm3666_vm7, %v3321_v21, %v102_v40  ;;  %v87_v51 = vadd.f32 %v3325_v25, %v86_v46 }
  0x18   : > { %139 = vxpose.xlu2.b32.cont [3/4] (short) (narrow) %v3503_v7, 16  ;;  %v111_v50 = vsel %vm3660_vm4, %v110_v29, %v106_v48  ;;  %v76_v55 = vsel %vm3674_vm10, %v3323_v24, %v72_v49  ;;  %v57_v59 = vadd.f32 %v3327_v33, %v56_v53  ;;  %vm201_vm4 = vcmp.eq.s32.totalorder %v3580_v9, 0 }
  0x19   : > { %130 = vperm.xlu0 %3318, %v111_v50   ;;  %v81_v57 = vsel %vm3678_vm11, %v80_v45, %v76_v55  ;;  %v91_v60 = vsel %vm3690_vm14, %v3325_v25, %v87_v51  ;;  %vm269_vm10 = vcmp.eq.s32.totalorder %v3580_v9, 1  ;;  %vm271_vm11 = vcmp.eq.s32.totalorder %v3582_v10, 1 }
  0x1a   : > { %120 = vperm.xlu1 %3319, %v81_v57   ;;  %v61_v62 = vsel %vm60_vm15, %v3327_v33, %v57_v59  ;;  %v96_v63 = vsel %vm93_vm0, %v95_v58, %v91_v60  ;;  %vm5114_vm0 = vcmp.eq.s32.totalorder %v3580_v9, 2 }
  0x1b   : > { %v66_v2 = vsel %vm63_vm1, %v65_v61, %v61_v62  ;;  %vm5132_vm1 = vcmp.eq.s32.totalorder %v3582_v10, 2 }
  0x20   : > { %140 = vxpose.xlu2.b32.end [4/4] (short) (narrow) %v3499_v8, 16 }
  0x21   : > { %125 = vperm.xlu0 %3318, %v96_v63  }
  0x22   : > { %115 = vperm.xlu1 %3319, %v66_v2  }
  0x8b   : > { %v131_v11 = vpop.permute.xlu0 %130 }
  0x8c   : > { %v136_v12 = vmul.f32 %v3499_v8, %v131_v11  ;;  %v121_v13 = vpop.permute.xlu1 %120 }
  0x8d   : > { %v134_v16 = vmul.f32 %v3507_v6, %v121_v13 }
  0x8e   : > { %188 = vmatpush.msra.mxu0 %v136_v12 }
  0x93   : > { %v126_v14 = vpop.permute.xlu0 %125 }
  0x94   : > { %v135_v19 = vmul.f32 %v3503_v7, %v126_v14  ;;  %v116_v20 = vpop.permute.xlu1 %115 }
  0x95   : > { %v133_v21 = vmul.f32 %v3511_v5, %v116_v20 }
  0x96   : > { %189 = vmatpush.msra.mxu0 %v135_v19 }
  0x98   : > { %190 = vmatpush.msra.mxu0 %v134_v16 }
  0x9a   : > { %191 = vmatpush.msra.mxu0 %v133_v21 }
  0x9c   : > { %3192 = vmatpush.xpose.msk.msrb.mxu0 %vm206_vm2, %v136_v12 }
  0xa0   : > { %3193 = vmatpush.xpose.msk.msrb.mxu0 %vm206_vm2, %v135_v19 }
  0xa1   : > { %v153_v8 = vpop.trf.xlu2 }
  0xa2   : > { %3190 = vmatmul.msk.f32.vlgmr.msra.gmra.mxu0 %vm5129_vm3, %v153_v8 }
  0xa4   : > { %3194 = vmatpush.xpose.msk.msrb.mxu0 %vm206_vm2, %v134_v16 }
  0xa8   : > { %3195 = vmatpush.xpose.msk.msrb.mxu0 %vm206_vm2, %v133_v21 }
  0xa9   : > { %v154_v36 = vpop.trf.xlu2 }
  0xaa   : > { %3191 = vmatmul.msk.f32.gmra.mxu0 %vm5129_vm3, %v154_v36 }
 0x11f   : > { %v193_v6 = vpop.f32.mrf.mxu0 }
 0x120   : > { %v199_v5 = vadd.f32 %v193_v6, %v3601_v17 }
 0x122   : > { %v204_v7 = vsel %vm201_vm4, %v199_v5, 0.0  ;;  %v249_v22 = vsel %vm5131_vm5, %v199_v5, 0.0 }
 0x123   : > { %v207_v23 = vsel %vm206_vm2, %v204_v7, 0.0  ;;  %v251_v24 = vsel %vm206_vm2, %v249_v22, 0.0 }
 0x124   : > { %v211_v25 = vrot.slane %v207_v23, 4  ;;  %252 = vadd.xlane.f32.xlu1 %v251_v24 }
 0x126   : > { %v212_v26 = vadd.f32 %v211_v25, %v207_v23 }
 0x127   : > { %v196_v22 = vpop.f32.mrf.mxu0 }
 0x128   : > { %v213_v27 = vrot.slane %v212_v26, 2 }
 0x12a   : > { %v214_v28 = vadd.f32 %v213_v27, %v212_v26  ;;  %v200_v26 = vadd.f32 %v196_v22, %v3605_v18 }
 0x12c   : > { %v215_v29 = vrot.slane %v214_v28, 1 }
 0x12e   : > { %v216_v30 = vadd.f32 %v215_v29, %v214_v28 }
 0x130   : > { %v228_v31 = vsel %vm5131_vm5, %v216_v30, 0.0 }
 0x131   : > { %v229_v32 = vsel %vm206_vm2, %v228_v31, 0.0 }
 0x132   : > { %230 = vadd.xlane.f32.xlu0 %v229_v32 }
 0x197   : > { %v3730_v46 = vpop.xlane.xlu1 %252 }
 0x1a5   : > { %v231_v33 = vpop.xlane.xlu0 %230 }
 0x1a6   : > { %3328 = vrcp.f32 %v231_v33  ;;  %v243_v38 = vand.u32 2147483648, %v231_v33  ;;  %v241_v40 = vand.u32 2147483647, %v231_v33  ;;  %vm237_vm7 = vweird.f32 %v231_v33 }
 0x1a8   : > { %v244_v42 = vor.u32 1.1754944e-38, %v243_v38  ;;  %vm242_vm9 = vcmp.eq.f32.partialorder %v241_v40, 8.507059e+37 }
 0x1ac   : > { %v3329_v34 = vpop.eup %3328 }
 0x1ad   : > { %v233_v35 = vmul.f32 %v3329_v34, %v231_v33  ;;  %vm238_vm6 = vweird.f32 %v3329_v34 }
 0x1ae   : > { %vm239_vm8 = vmor %vm237_vm7, %vm238_vm6  ;;  %vm208_vm6 = vcmask 93184  }
 0x1af   : > { %v234_v37 = vsub.f32 1.0, %v233_v35 }
 0x1b1   : > { %v235_v39 = vmul.f32 %v3329_v34, %v234_v37 }
 0x1b3   : > { %v236_v41 = vadd.f32 %v3329_v34, %v235_v39 }
 0x1b5   : > { %v240_v43 = vsel %vm239_vm8, %v3329_v34, %v236_v41 }
 0x1b6   : > { %v3725_v44 = vsel %vm242_vm9, %v244_v42, %v240_v43 }
 0x1b7   : > { %v3728_v45 = vmul.f32 %v3725_v44, %v216_v30  ;;  %v250_v30 = vsel %vm5131_vm5, %v200_v26, 0.0 }
 0x1b8   : > { %v254_v33 = vsel %vm208_vm6, %v250_v30, 0.0 }
 0x1b9   : > { %v257_v47 = vmul.f32 %v3730_v46, %v3728_v45 }
 0x1bb   : > { %v259_v48 = vsub.f32 %v199_v5, %v257_v47 }
 0x1bd   : > { %v265_v49 = vsel %vm201_vm4, %v3728_v45, %v259_v48 }
 0x1be   : > { %v315_v50 = vsel %vm271_vm11, %v265_v49, 0.0  ;;  %v272_v51 = vsel %vm269_vm10, %v265_v49, 0.0 }
 0x1bf   : > { %v317_v52 = vsel %vm206_vm2, %v315_v50, 0.0  ;;  %v274_v53 = vsel %vm206_vm2, %v272_v51, 0.0 }
 0x1c0   : > { %318 = vadd.xlane.f32.xlu0 %v317_v52  ;;  %v277_v54 = vrot.slane %v274_v53, 4 }
 0x1c2   : > { %v278_v55 = vadd.f32 %v277_v54, %v274_v53 }
 0x1c4   : > { %v279_v56 = vrot.slane %v278_v55, 2 }
 0x1c6   : > { %v280_v57 = vadd.f32 %v279_v56, %v278_v55 }
 0x1c8   : > { %v281_v58 = vrot.slane %v280_v57, 1 }
 0x1ca   : > { %v282_v59 = vadd.f32 %v281_v58, %v280_v57 }
 0x1cc   : > { %v294_v60 = vsel %vm271_vm11, %v282_v59, 0.0 }
 0x1cd   : > { %v295_v61 = vsel %vm206_vm2, %v294_v60, 0.0 }
 0x1ce   : > { %296 = vadd.xlane.f32.xlu2 %v295_v61 }
 0x233   : > { %v3753_v6 = vpop.xlane.xlu0 %318 }
 0x241   : > { %v297_v62 = vpop.xlane.xlu2 %296 }
 0x242   : > { %3330 = vrcp.f32 %v297_v62  ;;  %v309_v12 = vand.u32 2147483648, %v297_v62  ;;  %v307_v14 = vand.u32 2147483647, %v297_v62  ;;  %vm303_vm13 = vweird.f32 %v297_v62 }
 0x244   : > { %v310_v19 = vor.u32 1.1754944e-38, %v309_v12  ;;  %vm308_vm15 = vcmp.eq.f32.partialorder %v307_v14, 8.507059e+37 }
 0x248   : > { %v3331_v63 = vpop.eup %3330 }
 0x249   : > { %v299_v2 = vmul.f32 %v3331_v63, %v297_v62  ;;  %vm304_vm12 = vweird.f32 %v3331_v63 }
 0x24a   : > { %vm305_vm14 = vmor %vm303_vm13, %vm304_vm12  ;;  %vm5115_vm13 = vcmp.eq.s32.totalorder %v3580_v9, 3 }
 0x24b   : > { %v300_v11 = vsub.f32 1.0, %v299_v2 }
 0x24d   : > { %v301_v13 = vmul.f32 %v3331_v63, %v300_v11 }
 0x24f   : > { %v302_v16 = vadd.f32 %v3331_v63, %v301_v13 }
 0x251   : > { %v306_v20 = vsel %vm305_vm14, %v3331_v63, %v302_v16  ;;  %vm5120_vm14 = vcmp.eq.s32.totalorder %v3582_v10, 3 }
 0x252   : > { %v3748_v21 = vsel %vm308_vm15, %v310_v19, %v306_v20 }
 0x253   : > { %v3751_v8 = vmul.f32 %v3748_v21, %v282_v59 }
 0x255   : > { %v323_v5 = vmul.f32 %v3753_v6, %v3751_v8 }
 0x257   : > { %v325_v7 = vsub.f32 %v265_v49, %v323_v5 }
 0x259   : > { %v331_v23 = vsel %vm269_vm10, %v3751_v8, %v325_v7 }
 0x25a   : > { %v381_v24 = vsel %vm5132_vm1, %v331_v23, 0.0  ;;  %v338_v25 = vsel %vm5114_vm0, %v331_v23, 0.0 }
 0x25b   : > { %v383_v27 = vsel %vm206_vm2, %v381_v24, 0.0  ;;  %v340_v28 = vsel %vm206_vm2, %v338_v25, 0.0 }
 0x25c   : > { %384 = vadd.xlane.f32.xlu0 %v383_v27  ;;  %v343_v29 = vrot.slane %v340_v28, 4 }
 0x25e   : > { %v344_v31 = vadd.f32 %v343_v29, %v340_v28 }
 0x260   : > { %v345_v32 = vrot.slane %v344_v31, 2 }
 0x262   : > { %v346_v34 = vadd.f32 %v345_v32, %v344_v31 }
 0x264   : > { %255 = vadd.xlane.f32.xlu0 %v254_v33  ;;  %v347_v35 = vrot.slane %v346_v34, 1 }
 0x266   : > { %v348_v36 = vadd.f32 %v347_v35, %v346_v34 }
 0x268   : > { %v360_v37 = vsel %vm5132_vm1, %v348_v36, 0.0 }
 0x269   : > { %v361_v38 = vsel %vm206_vm2, %v360_v37, 0.0 }
 0x26a   : > { %362 = vadd.xlane.f32.xlu1 %v361_v38 }
 0x2cf   : > { %v3775_v39 = vpop.xlane.xlu0 %384 }
 0x2d7   : > { %v3777_v40 = vpop.xlane.xlu0 %255 }
 0x2d8   : > { %v258_v41 = vmul.f32 %v3777_v40, %v3728_v45  ;;  %v217_v45 = vsel %vm201_vm4, %v3601_v17, 0.0 }
 0x2d9   : > { %v219_v59 = vsel %vm206_vm2, %v217_v45, 0.0 }
 0x2da   : > { %v3781_v42 = vsub.f32 %v200_v26, %v258_v41  ;;  %v222_v62 = vrot.slane %v219_v59, 4 }
 0x2dc   : > { %v316_v43 = vsel %vm271_vm11, %v3781_v42, 0.0  ;;  %v223_v11 = vadd.f32 %v222_v62, %v219_v59 }
 0x2dd   : > { %v363_v47 = vpop.xlane.xlu1 %362  ;;  %v320_v48 = vsel %vm208_vm6, %v316_v43, 0.0 }
 0x2de   : > { %3332 = vrcp.f32 %v363_v47  ;;  %321 = vadd.xlane.f32.xlu0 %v320_v48  ;;  %v375_v52 = vand.u32 2147483648, %v363_v47  ;;  %v373_v54 = vand.u32 2147483647, %v363_v47  ;;  %vm369_vm8 = vweird.f32 %v363_v47 }
 0x2df   : > { %v224_v16 = vrot.slane %v223_v11, 2 }
 0x2e0   : > { %v376_v56 = vor.u32 1.1754944e-38, %v375_v52  ;;  %vm374_vm12 = vcmp.eq.f32.partialorder %v373_v54, 8.507059e+37 }
 0x2e1   : > { %v225_v5 = vadd.f32 %v224_v16, %v223_v11 }
 0x2e4   : > { %v3333_v49 = vpop.eup %3332 }
 0x2e5   : > { %v365_v50 = vmul.f32 %v3333_v49, %v363_v47  ;;  %vm370_vm7 = vweird.f32 %v3333_v49 }
 0x2e6   : > { %vm371_vm9 = vmor %vm369_vm8, %vm370_vm7 }
 0x2e7   : > { %v366_v51 = vsub.f32 1.0, %v365_v50 }
 0x2e9   : > { %v367_v53 = vmul.f32 %v3333_v49, %v366_v51 }
 0x2eb   : > { %v368_v55 = vadd.f32 %v3333_v49, %v367_v53 }
 0x2ed   : > { %v372_v57 = vsel %vm371_vm9, %v3333_v49, %v368_v55 }
 0x2ee   : > { %v377_v58 = vsel %vm374_vm12, %v376_v56, %v372_v57  ;;  %vm5116_vm12 = vcmp.eq.s32.totalorder %v3580_v9, 4 }
 0x2ef   : > { %v3791_v60 = vmul.f32 %v377_v58, %v348_v36 }
 0x2f1   : > { %v389_v61 = vmul.f32 %v3775_v39, %v3791_v60 }
 0x2f3   : > { %v391_v63 = vsub.f32 %v331_v23, %v389_v61  ;;  %v226_v23 = vrot.slane %v225_v5, 1 }
 0x2f5   : > { %v3799_v2 = vsel %vm5114_vm0, %v3791_v60, %v391_v63  ;;  %v3809_v27 = vadd.f32 %v226_v23, %v225_v5 }
 0x2f6   : > { %v404_v12 = vsel %vm5115_vm13, %v3799_v2, 0.0  ;;  %v447_v29 = vsel %vm5120_vm14, %v3799_v2, 0.0 }
 0x2f7   : > { %v406_v13 = vsel %vm206_vm2, %v404_v12, 0.0  ;;  %v3813_v28 = vmul.f32 %v3725_v44, %v3809_v27  ;;  %v449_v30 = vsel %vm206_vm2, %v447_v29, 0.0 }
 0x2f8   : > { %v409_v14 = vrot.slane %v406_v13, 4 }
 0x2f9   : > { %v261_v31 = vmul.f32 %v3730_v46, %v3813_v28 }
 0x2fa   : > { %v410_v19 = vadd.f32 %v409_v14, %v406_v13 }
 0x2fb   : > { %v263_v32 = vsub.f32 %v3601_v17, %v261_v31 }
 0x2fc   : > { %v411_v20 = vrot.slane %v410_v19, 2 }
 0x2fd   : > { %v267_v33 = vsel %vm201_vm4, %v3813_v28, %v263_v32 }
 0x2fe   : > { %v412_v7 = vadd.f32 %v411_v20, %v410_v19  ;;  %v283_v44 = vsel %vm269_vm10, %v267_v33, 0.0 }
 0x2ff   : > { %v285_v34 = vsel %vm206_vm2, %v283_v44, 0.0 }
 0x300   : > { %v413_v22 = vrot.slane %v412_v7, 1  ;;  %v288_v35 = vrot.slane %v285_v34, 4 }
 0x302   : > { %v414_v24 = vadd.f32 %v413_v22, %v412_v7  ;;  %v289_v36 = vadd.f32 %v288_v35, %v285_v34 }
 0x304   : > { %v426_v25 = vsel %vm5120_vm14, %v414_v24, 0.0  ;;  %v290_v37 = vrot.slane %v289_v36, 2 }
 0x305   : > { %v427_v26 = vsel %vm206_vm2, %v426_v25, 0.0 }
 0x306   : > { %428 = vadd.xlane.f32.xlu1 %v427_v26  ;;  %v291_v38 = vadd.f32 %v290_v37, %v289_v36 }
 0x308   : > { %v292_v41 = vrot.slane %v291_v38, 1 }
 0x30a   : > { %v293_v43 = vadd.f32 %v292_v41, %v291_v38 }
 0x30c   : > { %v3829_v46 = vmul.f32 %v3748_v21, %v293_v43 }
 0x30e   : > { %450 = vadd.xlane.f32.xlu1 %v449_v30  ;;  %v327_v47 = vmul.f32 %v3753_v6, %v3829_v46 }
 0x310   : > { %v329_v48 = vsub.f32 %v267_v33, %v327_v47 }
 0x312   : > { %v333_v49 = vsel %vm269_vm10, %v3829_v46, %v329_v48 }
 0x313   : > { %v349_v50 = vsel %vm5114_vm0, %v333_v49, 0.0 }
 0x314   : > { %v351_v51 = vsel %vm206_vm2, %v349_v50, 0.0 }
 0x315   : > { %v354_v52 = vrot.slane %v351_v51, 4 }
 0x317   : > { %v355_v53 = vadd.f32 %v354_v52, %v351_v51 }
 0x319   : > { %v356_v54 = vrot.slane %v355_v53, 2 }
 0x31b   : > { %v357_v55 = vadd.f32 %v356_v54, %v355_v53 }
 0x31d   : > { %v358_v45 = vrot.slane %v357_v55, 1 }
 0x31f   : > { %v359_v21 = vadd.f32 %v358_v45, %v357_v55 }
 0x321   : > { %v3839_v56 = vmul.f32 %v377_v58, %v359_v21 }
 0x323   : > { %v393_v6 = vmul.f32 %v3775_v39, %v3839_v56 }
 0x325   : > { %v395_v57 = vsub.f32 %v333_v49, %v393_v6 }
 0x327   : > { %v399_v59 = vsel %vm5114_vm0, %v3839_v56, %v395_v57  ;;  %vm5117_vm0 = vcmp.eq.s32.totalorder %v3582_v10, 4 }
 0x328   : > { %v415_v61 = vsel %vm5115_vm13, %v399_v59, 0.0 }
 0x329   : > { %v417_v62 = vsel %vm206_vm2, %v415_v61, 0.0 }
 0x32a   : > { %v420_v63 = vrot.slane %v417_v62, 4 }
 0x32c   : > { %v421_v12 = vadd.f32 %v420_v63, %v417_v62 }
 0x32e   : > { %v422_v13 = vrot.slane %v421_v12, 2 }
 0x330   : > { %v423_v16 = vadd.f32 %v422_v13, %v421_v12 }
 0x332   : > { %v424_v7 = vrot.slane %v423_v16, 1 }
 0x334   : > { %v425_v25 = vadd.f32 %v424_v7, %v423_v16 }
 0x351   : > { %v3870_v47 = vpop.xlane.xlu0 %321 }
 0x352   : > { %v324_v49 = vmul.f32 %v3870_v47, %v3751_v8 }
 0x354   : > { %v326_v53 = vsub.f32 %v3781_v42, %v324_v49 }
 0x356   : > { %v382_v54 = vsel %vm5132_vm1, %v326_v53, 0.0 }
 0x357   : > { %v386_v55 = vsel %vm208_vm6, %v382_v54, 0.0 }
 0x379   : > { %v429_v11 = vpop.xlane.xlu1 %428 }
 0x37a   : > { %3334 = vrcp.f32 %v429_v11  ;;  %v441_v39 = vand.u32 2147483648, %v429_v11  ;;  %v439_v5 = vand.u32 2147483647, %v429_v11  ;;  %vm435_vm7 = vweird.f32 %v429_v11 }
 0x37c   : > { %v442_v23 = vor.u32 1.1754944e-38, %v441_v39  ;;  %vm440_vm9 = vcmp.eq.f32.partialorder %v439_v5, 8.507059e+37 }
 0x380   : > { %v3335_v58 = vpop.eup %3334 }
 0x381   : > { %v431_v14 = vmul.f32 %v3335_v58, %v429_v11  ;;  %vm436_vm15 = vweird.f32 %v3335_v58  ;;  %v451_v32 = vpop.xlane.xlu1 %450 }
 0x382   : > { %vm437_vm8 = vmor %vm435_vm7, %vm436_vm15 }
 0x383   : > { %v432_v19 = vsub.f32 1.0, %v431_v14 }
 0x385   : > { %v433_v20 = vmul.f32 %v3335_v58, %v432_v19 }
 0x387   : > { %v434_v22 = vadd.f32 %v3335_v58, %v433_v20 }
 0x389   : > { %v438_v26 = vsel %vm437_vm8, %v3335_v58, %v434_v22 }
 0x38a   : > { %v443_v29 = vsel %vm440_vm9, %v442_v23, %v438_v26 }
 0x38b   : > { %v3849_v30 = vmul.f32 %v443_v29, %v414_v24  ;;  %v3851_v31 = vmul.f32 %v443_v29, %v425_v25 }
 0x38d   : > { %v455_v33 = vmul.f32 %v451_v32, %v3849_v30  ;;  %v459_v45 = vmul.f32 %v451_v32, %v3851_v31 }
 0x38f   : > { %v457_v44 = vsub.f32 %v3799_v2, %v455_v33  ;;  %v461_v21 = vsub.f32 %v399_v59, %v459_v45 }
 0x391   : > { %v3860_v34 = vsel %vm5115_vm13, %v3849_v30, %v457_v44  ;;  %v465_v8 = vsel %vm5115_vm13, %v3851_v31, %v461_v21  ;;  %vm5118_vm13 = vcmp.eq.s32.totalorder %v3580_v9, 5 }
 0x392   : > { %v470_v24 = vsel %vm5116_vm12, %v3860_v34, 0.0  ;;  %v513_v35 = vsel %vm5117_vm0, %v3860_v34, 0.0  ;;  %v481_v6 = vsel %vm5116_vm12, %v465_v8, 0.0 }
 0x393   : > { %v472_v36 = vsel %vm206_vm2, %v470_v24, 0.0  ;;  %v515_v37 = vsel %vm206_vm2, %v513_v35, 0.0  ;;  %v483_v57 = vsel %vm206_vm2, %v481_v6, 0.0 }
 0x394   : > { %v475_v2 = vrot.slane %v472_v36, 4  ;;  %516 = vadd.xlane.f32.xlu0 %v515_v37  ;;  %v486_v61 = vrot.slane %v483_v57, 4 }
 0x396   : > { %v476_v38 = vadd.f32 %v475_v2, %v472_v36  ;;  %v487_v42 = vadd.f32 %v486_v61, %v483_v57 }
 0x398   : > { %v477_v41 = vrot.slane %v476_v38, 2  ;;  %v488_v63 = vrot.slane %v487_v42, 2 }
 0x39a   : > { %v478_v43 = vadd.f32 %v477_v41, %v476_v38  ;;  %v489_v58 = vadd.f32 %v488_v63, %v487_v42 }
 0x39c   : > { %v479_v48 = vrot.slane %v478_v43, 1  ;;  %v490_v5 = vrot.slane %v489_v58, 1 }
 0x39e   : > { %v480_v50 = vadd.f32 %v479_v48, %v478_v43 }
 0x3a0   : > { %v492_v51 = vsel %vm5117_vm0, %v480_v50, 0.0 }
 0x3a1   : > { %v493_v52 = vsel %vm206_vm2, %v492_v51, 0.0 }
 0x3a2   : > { %494 = vadd.xlane.f32.xlu1 %v493_v52 }
 0x3aa   : > { %387 = vadd.xlane.f32.xlu1 %v386_v55 }
 0x407   : > { %v517_v44 = vpop.xlane.xlu0 %516 }
 0x415   : > { %v495_v62 = vpop.xlane.xlu1 %494 }
 0x416   : > { %3336 = vrcp.f32 %v495_v62  ;;  %v507_v16 = vand.u32 2147483648, %v495_v62  ;;  %v505_v20 = vand.u32 2147483647, %v495_v62  ;;  %vm501_vm7 = vweird.f32 %v495_v62 }
 0x418   : > { %v508_v25 = vor.u32 1.1754944e-38, %v507_v16  ;;  %vm506_vm9 = vcmp.eq.f32.partialorder %v505_v20, 8.507059e+37 }
 0x41c   : > { %v3337_v11 = vpop.eup %3336 }
 0x41d   : > { %v497_v12 = vmul.f32 %v3337_v11, %v495_v62  ;;  %v3888_v13 = vpop.xlane.xlu1 %387  ;;  %vm502_vm15 = vweird.f32 %v3337_v11 }
 0x41e   : > { %v390_v59 = vmul.f32 %v3888_v13, %v3791_v60  ;;  %vm503_vm8 = vmor %vm501_vm7, %vm502_vm15  ;;  %v491_v60 = vadd.f32 %v490_v5, %v489_v58  ;;  %vm5119_vm15 = vcmp.eq.s32.totalorder %v3582_v10, 5 }
 0x41f   : > { %v498_v14 = vsub.f32 1.0, %v497_v12 }
 0x420   : > { %v392_v19 = vsub.f32 %v326_v53, %v390_v59 }
 0x421   : > { %v499_v39 = vmul.f32 %v3337_v11, %v498_v14 }
 0x422   : > { %v448_v7 = vsel %vm5120_vm14, %v392_v19, 0.0  ;;  %vm5123_vm14 = vcmp.eq.s32.totalorder %v3582_v10, 7 }
 0x423   : > { %v500_v22 = vadd.f32 %v3337_v11, %v499_v39  ;;  %v452_v23 = vsel %vm208_vm6, %v448_v7, 0.0 }
 0x424   : > { %453 = vadd.xlane.f32.xlu0 %v452_v23 }
 0x425   : > { %v504_v26 = vsel %vm503_vm8, %v3337_v11, %v500_v22 }
 0x426   : > { %v509_v29 = vsel %vm506_vm9, %v508_v25, %v504_v26 }
 0x427   : > { %v3895_v32 = vmul.f32 %v509_v29, %v480_v50  ;;  %v3897_v33 = vmul.f32 %v509_v29, %v491_v60 }
 0x429   : > { %v521_v24 = vmul.f32 %v517_v44, %v3895_v32  ;;  %v525_v35 = vmul.f32 %v517_v44, %v3897_v33 }
 0x42b   : > { %v523_v36 = vsub.f32 %v3860_v34, %v521_v24  ;;  %v527_v37 = vsub.f32 %v465_v8, %v525_v35 }
 0x42d   : > { %v529_v2 = vsel %vm5116_vm12, %v3895_v32, %v523_v36  ;;  %v531_v38 = vsel %vm5116_vm12, %v3897_v33, %v527_v37 }
 0x42e   : > { %v579_v41 = vsel %vm5119_vm15, %v529_v2, 0.0  ;;  %v536_v43 = vsel %vm5118_vm13, %v529_v2, 0.0  ;;  %v547_v42 = vsel %vm5118_vm13, %v531_v38, 0.0 }
 0x42f   : > { %v581_v34 = vsel %vm206_vm2, %v579_v41, 0.0  ;;  %v538_v48 = vsel %vm206_vm2, %v536_v43, 0.0  ;;  %v549_v62 = vsel %vm206_vm2, %v547_v42, 0.0  ;;  %v394_v42 = vmul.f32 %v3888_v13, %v3839_v56 }
 0x430   : > { %582 = vadd.xlane.f32.xlu0 %v581_v34  ;;  %v541_v49 = vrot.slane %v538_v48, 4  ;;  %v552_v63 = vrot.slane %v549_v62, 4 }
 0x432   : > { %v542_v50 = vadd.f32 %v541_v49, %v538_v48  ;;  %v553_v12 = vadd.f32 %v552_v63, %v549_v62 }
 0x434   : > { %v543_v51 = vrot.slane %v542_v50, 2  ;;  %v554_v58 = vrot.slane %v553_v12, 2 }
 0x436   : > { %v544_v52 = vadd.f32 %v543_v51, %v542_v50  ;;  %v555_v14 = vadd.f32 %v554_v58, %v553_v12 }
 0x438   : > { %v545_v53 = vrot.slane %v544_v52, 1  ;;  %v556_v5 = vrot.slane %v555_v14, 1 }
 0x43a   : > { %v546_v54 = vadd.f32 %v545_v53, %v544_v52  ;;  %v557_v25 = vadd.f32 %v556_v5, %v555_v14 }
 0x43c   : > { %v558_v55 = vsel %vm5119_vm15, %v546_v54, 0.0 }
 0x43d   : > { %v559_v45 = vsel %vm206_vm2, %v558_v55, 0.0 }
 0x43e   : > { %560 = vadd.xlane.f32.xlu1 %v559_v45 }
 0x497   : > { %v454_v21 = vpop.xlane.xlu0 %453 }
 0x498   : > { %v456_v8 = vmul.f32 %v454_v21, %v3849_v30  ;;  %v460_v63 = vmul.f32 %v454_v21, %v3851_v31 }
 0x49a   : > { %v3920_v6 = vsub.f32 %v392_v19, %v456_v8  ;;  %v262_v8 = vmul.f32 %v3777_v40, %v3813_v28 }
 0x49c   : > { %v514_v57 = vsel %vm5117_vm0, %v3920_v6, 0.0  ;;  %vm5124_vm0 = vcmp.eq.s32.totalorder %v3580_v9, 6 }
 0x49d   : > { %v518_v61 = vsel %vm208_vm6, %v514_v57, 0.0  ;;  %v328_v57 = vmul.f32 %v3870_v47, %v3829_v46 }
 0x49e   : > { %519 = vadd.xlane.f32.xlu1 %v518_v61  ;;  %v264_v61 = vsub.f32 %v3605_v18, %v262_v8 }
 0x4a0   : > { %v330_v62 = vsub.f32 %v264_v61, %v328_v57 }
 0x4a3   : > { %v583_v44 = vpop.xlane.xlu0 %582 }
 0x4b1   : > { %v561_v11 = vpop.xlane.xlu1 %560 }
 0x4b2   : > { %3338 = vrcp.f32 %v561_v11  ;;  %v573_v19 = vand.u32 2147483648, %v561_v11  ;;  %v571_v20 = vand.u32 2147483647, %v561_v11  ;;  %vm567_vm8 = vweird.f32 %v561_v11 }
 0x4b4   : > { %v574_v22 = vor.u32 1.1754944e-38, %v573_v19  ;;  %vm572_vm12 = vcmp.eq.f32.partialorder %v571_v20, 8.507059e+37 }
 0x4b8   : > { %v3339_v30 = vpop.eup %3338 }
 0x4b9   : > { %v563_v59 = vmul.f32 %v3339_v30, %v561_v11  ;;  %vm568_vm7 = vweird.f32 %v3339_v30  ;;  %v396_v11 = vsub.f32 %v330_v62, %v394_v42 }
 0x4ba   : > { %vm569_vm9 = vmor %vm567_vm8, %vm568_vm7 }
 0x4bb   : > { %v564_v16 = vsub.f32 1.0, %v563_v59  ;;  %v462_v58 = vsub.f32 %v396_v11, %v460_v63 }
 0x4bd   : > { %v565_v39 = vmul.f32 %v3339_v30, %v564_v16 }
 0x4bf   : > { %v566_v7 = vadd.f32 %v3339_v30, %v565_v39 }
 0x4c1   : > { %v570_v23 = vsel %vm569_vm9, %v3339_v30, %v566_v7 }
 0x4c2   : > { %v575_v26 = vsel %vm572_vm12, %v574_v22, %v570_v23  ;;  %vm5121_vm12 = vcmp.eq.s32.totalorder %v3582_v10, 6 }
 0x4c3   : > { %v3929_v60 = vmul.f32 %v575_v26, %v546_v54  ;;  %v3931_v29 = vmul.f32 %v575_v26, %v557_v25 }
 0x4c5   : > { %v587_v24 = vmul.f32 %v583_v44, %v3929_v60  ;;  %v591_v35 = vmul.f32 %v583_v44, %v3931_v29 }
 0x4c7   : > { %v589_v36 = vsub.f32 %v529_v2, %v587_v24  ;;  %v593_v37 = vsub.f32 %v531_v38, %v591_v35 }
 0x4c9   : > { %v3939_v41 = vsel %vm5118_vm13, %v3929_v60, %v589_v36  ;;  %v3944_v43 = vsel %vm5118_vm13, %v3931_v29, %v593_v37 }
 0x4ca   : > { %v602_v34 = vsel %vm5124_vm0, %v3939_v41, 0.0  ;;  %v645_v55 = vsel %vm5121_vm12, %v3939_v41, 0.0  ;;  %v613_v56 = vsel %vm5124_vm0, %v3944_v43, 0.0 }
 0x4cb   : > { %v604_v48 = vsel %vm206_vm2, %v602_v34, 0.0  ;;  %v647_v45 = vsel %vm206_vm2, %v645_v55, 0.0  ;;  %v615_v31 = vsel %vm206_vm2, %v613_v56, 0.0 }
 0x4cc   : > { %v607_v2 = vrot.slane %v604_v48, 4  ;;  %v618_v47 = vrot.slane %v615_v31, 4 }
 0x4ce   : > { %v608_v49 = vadd.f32 %v607_v2, %v604_v48 }
 0x4d0   : > { %v609_v50 = vrot.slane %v608_v49, 2 }
 0x4d2   : > { %v610_v38 = vadd.f32 %v609_v50, %v608_v49 }
 0x4d4   : > { %v611_v51 = vrot.slane %v610_v38, 1 }
 0x4d6   : > { %v612_v52 = vadd.f32 %v611_v51, %v610_v38 }
 0x4d8   : > { %v624_v53 = vsel %vm5121_vm12, %v612_v52, 0.0 }
 0x4d9   : > { %v625_v54 = vsel %vm206_vm2, %v624_v53, 0.0 }
 0x4da   : > { %626 = vadd.xlane.f32.xlu0 %v625_v54 }
 0x4e2   : > { %648 = vadd.xlane.f32.xlu0 %v647_v45 }
 0x511   : > { %v520_v12 = vpop.xlane.xlu1 %519 }
 0x512   : > { %v522_v30 = vmul.f32 %v520_v12, %v3895_v32  ;;  %v526_v59 = vmul.f32 %v520_v12, %v3897_v33  ;;  %v619_v32 = vadd.f32 %v618_v47, %v615_v31 }
 0x514   : > { %v528_v14 = vsub.f32 %v462_v58, %v526_v59  ;;  %v524_v40 = vsub.f32 %v3920_v6, %v522_v30  ;;  %v620_v33 = vrot.slane %v619_v32, 2 }
 0x516   : > { %v580_v28 = vsel %vm5119_vm15, %v524_v40, 0.0  ;;  %v621_v6 = vadd.f32 %v620_v33, %v619_v32  ;;  %vm665_vm15 = vcmp.eq.s32.totalorder %v3580_v9, 7 }
 0x517   : > { %v584_v46 = vsel %vm208_vm6, %v580_v28, 0.0 }
 0x518   : > { %585 = vadd.xlane.f32.xlu1 %v584_v46  ;;  %v622_v7 = vrot.slane %v621_v6, 1 }
 0x51a   : > { %v623_v25 = vadd.f32 %v622_v7, %v621_v6 }
 0x54d   : > { %v627_v13 = vpop.xlane.xlu0 %626 }
 0x54e   : > { %3340 = vrcp.f32 %v627_v13  ;;  %v639_v39 = vand.u32 2147483648, %v627_v13  ;;  %v637_v5 = vand.u32 2147483647, %v627_v13  ;;  %vm633_vm8 = vweird.f32 %v627_v13 }
 0x550   : > { %v640_v23 = vor.u32 1.1754944e-38, %v639_v39  ;;  %vm638_vm13 = vcmp.eq.f32.partialorder %v637_v5, 8.507059e+37 }
 0x554   : > { %v3341_v21 = vpop.eup %3340 }
 0x555   : > { %v629_v16 = vmul.f32 %v3341_v21, %v627_v13  ;;  %vm634_vm7 = vweird.f32 %v3341_v21  ;;  %v649_v36 = vpop.xlane.xlu0 %648 }
 0x556   : > { %vm635_vm9 = vmor %vm633_vm8, %vm634_vm7 }
 0x557   : > { %v630_v19 = vsub.f32 1.0, %v629_v16 }
 0x559   : > { %v631_v20 = vmul.f32 %v3341_v21, %v630_v19 }
 0x55b   : > { %v632_v22 = vadd.f32 %v3341_v21, %v631_v20 }
 0x55d   : > { %v636_v26 = vsel %vm635_vm9, %v3341_v21, %v632_v22 }
 0x55e   : > { %v641_v44 = vsel %vm638_vm13, %v640_v23, %v636_v26 }
 0x55f   : > { %v643_v24 = vmul.f32 %v641_v44, %v612_v52  ;;  %v644_v35 = vmul.f32 %v641_v44, %v623_v25 }
 0x561   : > { %v653_v37 = vmul.f32 %v649_v36, %v643_v24  ;;  %v657_v34 = vmul.f32 %v649_v36, %v644_v35 }
 0x563   : > { %v655_v48 = vsub.f32 %v3939_v41, %v653_v37  ;;  %v659_v2 = vsub.f32 %v3944_v43, %v657_v34 }
 0x565   : > { %v3982_v49 = vsel %vm5124_vm0, %v644_v35, %v659_v2  ;;  %v661_v50 = vsel %vm5124_vm0, %v643_v24, %v655_v48  ;;  %vm5125_vm0 = vcmp.eq.s32.totalorder %v3582_v10, 9 }
 0x566   : > { %v711_v38 = vsel %vm5123_vm14, %v661_v50, 0.0  ;;  %v668_v51 = vsel %vm665_vm15, %v661_v50, 0.0 }
 0x567   : > { %v713_v52 = vsel %vm206_vm2, %v711_v38, 0.0  ;;  %v670_v41 = vsel %vm206_vm2, %v668_v51, 0.0 }
 0x568   : > { %714 = vadd.xlane.f32.xlu2 %v713_v52  ;;  %v673_v43 = vrot.slane %v670_v41, 4 }
 0x56a   : > { %v674_v53 = vadd.f32 %v673_v43, %v670_v41 }
 0x56c   : > { %v675_v54 = vrot.slane %v674_v53, 2 }
 0x56e   : > { %v676_v55 = vadd.f32 %v675_v54, %v674_v53  ;;  %v679_v54 = vsel %vm665_vm15, %v3982_v49, 0.0 }
 0x570   : > { %v677_v45 = vrot.slane %v676_v55, 1 }
 0x572   : > { %v678_v8 = vadd.f32 %v677_v45, %v676_v55  ;;  %v681_v55 = vsel %vm206_vm2, %v679_v54, 0.0 }
 0x573   : > { %v684_v45 = vrot.slane %v681_v55, 4 }
 0x574   : > { %v690_v57 = vsel %vm5123_vm14, %v678_v8, 0.0 }
 0x575   : > { %v691_v61 = vsel %vm206_vm2, %v690_v57, 0.0 }
 0x576   : > { %692 = vadd.xlane.f32.xlu0 %v691_v61 }
 0x58b   : > { %v586_v42 = vpop.xlane.xlu1 %585 }
 0x58c   : > { %v588_v62 = vmul.f32 %v586_v42, %v3929_v60  ;;  %v592_v63 = vmul.f32 %v586_v42, %v3931_v29 }
 0x58e   : > { %v3997_v11 = vsub.f32 %v528_v14, %v592_v63  ;;  %v590_v12 = vsub.f32 %v524_v40, %v588_v62 }
 0x590   : > { %v646_v58 = vsel %vm5121_vm12, %v590_v12, 0.0  ;;  %vm5122_vm12 = vcmp.eq.s32.totalorder %v3582_v10, 8 }
 0x591   : > { %v650_v30 = vsel %vm208_vm6, %v646_v58, 0.0 }
 0x592   : > { %651 = vadd.xlane.f32.xlu1 %v650_v30 }
 0x5db   : > { %v4002_v33 = vpop.xlane.xlu2 %714 }
 0x5e9   : > { %v693_v59 = vpop.xlane.xlu0 %692 }
 0x5ea   : > { %3342 = vrcp.f32 %v693_v59  ;;  %v705_v31 = vand.u32 2147483648, %v693_v59  ;;  %v703_v60 = vand.u32 2147483647, %v693_v59  ;;  %vm699_vm7 = vweird.f32 %v693_v59 }
 0x5ec   : > { %v706_v29 = vor.u32 1.1754944e-38, %v705_v31  ;;  %vm704_vm9 = vcmp.eq.f32.partialorder %v703_v60, 8.507059e+37 }
 0x5f0   : > { %v3343_v28 = vpop.eup %3342 }
 0x5f1   : > { %v695_v46 = vmul.f32 %v3343_v28, %v693_v59  ;;  %vm700_vm13 = vweird.f32 %v3343_v28 }
 0x5f2   : > { %vm701_vm8 = vmor %vm699_vm7, %vm700_vm13  ;;  %vm5128_vm13 = vcmp.eq.s32.totalorder %v3597_v15, 8 }
 0x5f3   : > { %v696_v56 = vsub.f32 1.0, %v695_v46 }
 0x5f5   : > { %v697_v47 = vmul.f32 %v3343_v28, %v696_v56 }
 0x5f7   : > { %v698_v13 = vadd.f32 %v3343_v28, %v697_v47 }
 0x5f9   : > { %v702_v14 = vsel %vm701_vm8, %v3343_v28, %v698_v13 }
 0x5fa   : > { %v707_v40 = vsel %vm704_vm9, %v706_v29, %v702_v14 }
 0x5fb   : > { %v709_v32 = vmul.f32 %v707_v40, %v678_v8  ;;  %v685_v8 = vadd.f32 %v684_v45, %v681_v55 }
 0x5fd   : > { %v719_v21 = vmul.f32 %v4002_v33, %v709_v32  ;;  %v686_v57 = vrot.slane %v685_v8, 2 }
 0x5ff   : > { %v721_v16 = vsub.f32 %v661_v50, %v719_v21  ;;  %v687_v61 = vadd.f32 %v686_v57, %v685_v8 }
 0x601   : > { %v4008_v6 = vsel %vm665_vm15, %v709_v32, %v721_v16  ;;  %v688_v42 = vrot.slane %v687_v61, 1 }
 0x602   : > { %v777_v19 = vsel %vm5122_vm12, %v4008_v6, 0.0 }
 0x603   : > { %v779_v39 = vsel %vm206_vm2, %v777_v19, 0.0  ;;  %v689_v62 = vadd.f32 %v688_v42, %v687_v61 }
 0x604   : > { %780 = vadd.xlane.f32.xlu2 %v779_v39 }
 0x605   : > { %v652_v20 = vpop.xlane.xlu1 %651  ;;  %v4036_v63 = vmul.f32 %v707_v40, %v689_v62 }
 0x606   : > { %v654_v5 = vmul.f32 %v652_v20, %v643_v24  ;;  %v658_v7 = vmul.f32 %v652_v20, %v644_v35 }
 0x608   : > { %v660_v22 = vsub.f32 %v3997_v11, %v658_v7  ;;  %v656_v23 = vsub.f32 %v590_v12, %v654_v5 }
 0x60a   : > { %v712_v25 = vsel %vm5123_vm14, %v656_v23, 0.0  ;;  %vm5127_vm14 = vcmp.eq.s32.totalorder %v3597_v15, 9 }
 0x60b   : > { %v716_v26 = vsel %vm208_vm6, %v712_v25, 0.0 }
 0x60c   : > { %717 = vadd.xlane.f32.xlu1 %v716_v26 }
 0x677   : > { %v781_v26 = vpop.xlane.xlu2 %780 }
 0x67f   : > { %v718_v44 = vpop.xlane.xlu1 %717 }
 0x680   : > { %v720_v36 = vmul.f32 %v718_v44, %v709_v32  ;;  %v724_v11 = vmul.f32 %v718_v44, %v4036_v63 }
 0x682   : > { %v4019_v37 = vsub.f32 %v656_v23, %v720_v36  ;;  %v726_v12 = vsub.f32 %v660_v22, %v724_v11 }
 0x684   : > { %v735_v24 = vsel %vm5128_vm13, %v4019_v37, 0.0  ;;  %v778_v35 = vsel %vm5122_vm12, %v4019_v37, 0.0  ;;  %v746_v58 = vsel %vm5128_vm13, %v726_v12, 0.0 }
 0x685   : > { %v782_v34 = vsel %vm208_vm6, %v778_v35, 0.0  ;;  %v737_v48 = vsel %vm208_vm6, %v735_v24, 0.0  ;;  %v748_v30 = vsel %vm208_vm6, %v746_v58, 0.0 }
 0x686   : > { %783 = vadd.xlane.f32.xlu1 %v782_v34  ;;  %v739_v2 = vrot.slane %v737_v48, 4  ;;  %v750_v59 = vrot.slane %v748_v30, 4 }
 0x688   : > { %v740_v50 = vadd.f32 %v739_v2, %v737_v48  ;;  %v751_v28 = vadd.f32 %v750_v59, %v748_v30 }
 0x68a   : > { %v741_v38 = vrot.slane %v740_v50, 2  ;;  %v752_v56 = vrot.slane %v751_v28, 2 }
 0x68c   : > { %v742_v51 = vadd.f32 %v741_v38, %v740_v50  ;;  %v753_v47 = vadd.f32 %v752_v56, %v751_v28  ;;  %v723_v56 = vmul.f32 %v4002_v33, %v4036_v63 }
 0x68e   : > { %v743_v52 = vrot.slane %v742_v51, 1  ;;  %v754_v14 = vrot.slane %v753_v47, 1 }
 0x690   : > { %v744_v41 = vadd.f32 %v743_v52, %v742_v51  ;;  %v755_v19 = vadd.f32 %v754_v14, %v753_v47  ;;  %v725_v14 = vsub.f32 %v3982_v49, %v723_v56 }
 0x692   : > { %v756_v43 = vsel %vm5122_vm12, %v744_v41, 0.0  ;;  %v729_v33 = vsel %vm665_vm15, %v4036_v63, %v725_v14 }
 0x693   : > { %v757_v53 = vsel %vm206_vm2, %v756_v43, 0.0 }
 0x694   : > { %758 = vadd.xlane.f32.xlu0 %v757_v53 }
 0x6f9   : > { %v784_v22 = vpop.xlane.xlu1 %783 }
 0x707   : > { %v759_v46 = vpop.xlane.xlu0 %758 }
 0x708   : > { %3344 = vrcp.f32 %v759_v46  ;;  %v771_v29 = vand.u32 2147483648, %v759_v46  ;;  %v769_v32 = vand.u32 2147483647, %v759_v46  ;;  %vm765_vm8 = vweird.f32 %v759_v46 }
 0x70a   : > { %v772_v16 = vor.u32 1.1754944e-38, %v771_v29  ;;  %vm770_vm12 = vcmp.eq.f32.partialorder %v769_v32, 8.507059e+37 }
 0x70e   : > { %v3345_v31 = vpop.eup %3344 }
 0x70f   : > { %v761_v60 = vmul.f32 %v3345_v31, %v759_v46  ;;  %vm766_vm7 = vweird.f32 %v3345_v31 }
 0x710   : > { %vm767_vm9 = vmor %vm765_vm8, %vm766_vm7 }
 0x711   : > { %v762_v13 = vsub.f32 1.0, %v761_v60 }
 0x713   : > { %v763_v40 = vmul.f32 %v3345_v31, %v762_v13 }
 0x715   : > { %v764_v21 = vadd.f32 %v3345_v31, %v763_v40 }
 0x717   : > { %v768_v39 = vsel %vm767_vm9, %v3345_v31, %v764_v21 }
 0x718   : > { %v773_v20 = vsel %vm770_vm12, %v772_v16, %v768_v39 }
 0x719   : > { %v775_v5 = vmul.f32 %v773_v20, %v744_v41  ;;  %v776_v7 = vmul.f32 %v773_v20, %v755_v19 }
 0x71b   : > { %v786_v23 = vmul.f32 %v784_v22, %v775_v5  ;;  %v790_v25 = vmul.f32 %v784_v22, %v776_v7  ;;  %v785_v24 = vmul.f32 %v781_v26, %v775_v5  ;;  %v789_v16 = vmul.f32 %v781_v26, %v776_v7 }
 0x71d   : > { %v788_v44 = vsub.f32 %v4019_v37, %v786_v23  ;;  %v792_v36 = vsub.f32 %v726_v12, %v790_v25  ;;  %v4062_v51 = vsub.f32 %v4008_v6, %v785_v24  ;;  %v791_v25 = vsub.f32 %v729_v33, %v789_v16 }
 0x71f   : > { %v4047_v35 = vsel %vm5128_vm13, %v775_v5, %v788_v44  ;;  %v4051_v34 = vsel %vm5128_vm13, %v776_v7, %v792_v36  ;;  %v843_v41 = vsel %vm5125_vm0, %v4062_v51, 0.0  ;;  %vm5135_vm13 = vcmp.eq.s32.totalorder %v3582_v10, 11 }
 0x720   : > { %v844_v48 = vsel %vm5125_vm0, %v4047_v35, 0.0  ;;  %v801_v37 = vsel %vm5127_vm14, %v4047_v35, 0.0  ;;  %v845_v54 = vsel %vm206_vm2, %v843_v41, 0.0  ;;  %v812_v6 = vsel %vm5127_vm14, %v4051_v34, 0.0 }
 0x721   : > { %v848_v2 = vsel %vm208_vm6, %v844_v48, 0.0  ;;  %v803_v50 = vsel %vm208_vm6, %v801_v37, 0.0  ;;  %v814_v61 = vsel %vm208_vm6, %v812_v6, 0.0 }
 0x722   : > { %849 = vadd.xlane.f32.xlu1 %v848_v2  ;;  %v805_v38 = vrot.slane %v803_v50, 4  ;;  %v816_v42 = vrot.slane %v814_v61, 4 }
 0x724   : > { %v806_v52 = vadd.f32 %v805_v38, %v803_v50  ;;  %v817_v11 = vadd.f32 %v816_v42, %v814_v61 }
 0x726   : > { %v807_v43 = vrot.slane %v806_v52, 2  ;;  %v818_v12 = vrot.slane %v817_v11, 2 }
 0x728   : > { %v808_v53 = vadd.f32 %v807_v43, %v806_v52  ;;  %v819_v59 = vadd.f32 %v818_v12, %v817_v11 }
 0x72a   : > { %846 = vadd.xlane.f32.xlu1 %v845_v54  ;;  %v809_v55 = vrot.slane %v808_v53, 1  ;;  %v820_v13 = vrot.slane %v819_v59, 1 }
 0x72c   : > { %v810_v45 = vadd.f32 %v809_v55, %v808_v53  ;;  %v821_v32 = vadd.f32 %v820_v13, %v819_v59 }
 0x72e   : > { %v822_v8 = vsel %vm5125_vm0, %v810_v45, 0.0  ;;  %vm5136_vm0 = vcmp.eq.s32.totalorder %v3597_v15, 10 }
 0x72f   : > { %v823_v57 = vsel %vm206_vm2, %v822_v8, 0.0 }
 0x730   : > { %824 = vadd.xlane.f32.xlu0 %v823_v57 }
 0x795   : > { %v850_v28 = vpop.xlane.xlu1 %849 }
 0x79d   : > { %v847_v5 = vpop.xlane.xlu1 %846 }
 0x7a3   : > { %v825_v62 = vpop.xlane.xlu0 %824 }
 0x7a4   : > { %3346 = vrcp.f32 %v825_v62  ;;  %v837_v31 = vand.u32 2147483648, %v825_v62  ;;  %v835_v60 = vand.u32 2147483647, %v825_v62  ;;  %vm831_vm7 = vweird.f32 %v825_v62 }
 0x7a6   : > { %v838_v40 = vor.u32 1.1754944e-38, %v837_v31  ;;  %vm836_vm9 = vcmp.eq.f32.partialorder %v835_v60, 8.507059e+37 }
 0x7aa   : > { %v3347_v58 = vpop.eup %3346 }
 0x7ab   : > { %v827_v30 = vmul.f32 %v3347_v58, %v825_v62  ;;  %vm832_vm12 = vweird.f32 %v3347_v58 }
 0x7ac   : > { %vm833_vm8 = vmor %vm831_vm7, %vm832_vm12  ;;  %vm5126_vm12 = vcmp.eq.s32.totalorder %v3582_v10, 10 }
 0x7ad   : > { %v828_v46 = vsub.f32 1.0, %v827_v30 }
 0x7af   : > { %v829_v47 = vmul.f32 %v3347_v58, %v828_v46 }
 0x7b1   : > { %v830_v29 = vadd.f32 %v3347_v58, %v829_v47 }
 0x7b3   : > { %v834_v21 = vsel %vm833_vm8, %v3347_v58, %v830_v29 }
 0x7b4   : > { %v839_v19 = vsel %vm836_vm9, %v838_v40, %v834_v21 }
 0x7b5   : > { %v841_v39 = vmul.f32 %v839_v19, %v810_v45  ;;  %v842_v20 = vmul.f32 %v839_v19, %v821_v32 }
 0x7b7   : > { %v852_v22 = vmul.f32 %v850_v28, %v841_v39  ;;  %v856_v23 = vmul.f32 %v850_v28, %v842_v20  ;;  %v855_v44 = vmul.f32 %v847_v5, %v842_v20  ;;  %v851_v43 = vmul.f32 %v847_v5, %v841_v39 }
 0x7b9   : > { %v854_v49 = vsub.f32 %v4047_v35, %v852_v22  ;;  %v858_v36 = vsub.f32 %v4051_v34, %v856_v23  ;;  %v4085_v7 = vsub.f32 %v791_v25, %v855_v44  ;;  %v853_v55 = vsub.f32 %v4062_v51, %v851_v43 }
 0x7bb   : > { %v4089_v26 = vsel %vm5127_vm14, %v841_v39, %v854_v49  ;;  %v862_v63 = vsel %vm5127_vm14, %v842_v20, %v858_v36  ;;  %v909_v45 = vsel %vm5126_vm12, %v853_v55, 0.0  ;;  %vm5134_vm14 = vcmp.eq.s32.totalorder %v3597_v15, 11 }
 0x7bc   : > { %v867_v24 = vsel %vm5136_vm0, %v4089_v26, 0.0  ;;  %v910_v35 = vsel %vm5126_vm12, %v4089_v26, 0.0  ;;  %v911_v8 = vsel %vm206_vm2, %v909_v45, 0.0  ;;  %v878_v57 = vsel %vm5136_vm0, %v862_v63, 0.0 }
 0x7bd   : > { %v869_v34 = vsel %vm208_vm6, %v867_v24, 0.0  ;;  %v914_v48 = vsel %vm208_vm6, %v910_v35, 0.0  ;;  %v880_v6 = vsel %vm208_vm6, %v878_v57, 0.0 }
 0x7be   : > { %v871_v37 = vrot.slane %v869_v34, 4  ;;  %915 = vadd.xlane.f32.xlu2 %v914_v48  ;;  %v882_v61 = vrot.slane %v880_v6, 4 }
 0x7c0   : > { %v872_v2 = vadd.f32 %v871_v37, %v869_v34  ;;  %v883_v62 = vadd.f32 %v882_v61, %v880_v6 }
 0x7c2   : > { %v873_v50 = vrot.slane %v872_v2, 2  ;;  %v884_v11 = vrot.slane %v883_v62, 2 }
 0x7c4   : > { %v874_v38 = vadd.f32 %v873_v50, %v872_v2  ;;  %v885_v30 = vadd.f32 %v884_v11, %v883_v62 }
 0x7c6   : > { %v875_v52 = vrot.slane %v874_v38, 1  ;;  %v886_v56 = vrot.slane %v885_v30, 1 }
 0x7c8   : > { %v876_v41 = vadd.f32 %v875_v52, %v874_v38  ;;  %v887_v60 = vadd.f32 %v886_v56, %v885_v30 }
 0x7ca   : > { %v888_v53 = vsel %vm5126_vm12, %v876_v41, 0.0 }
 0x7cb   : > { %v889_v54 = vsel %vm206_vm2, %v888_v53, 0.0 }
 0x7cc   : > { %890 = vadd.xlane.f32.xlu0 %v889_v54 }
 0x7d4   : > { %912 = vadd.xlane.f32.xlu0 %v911_v8 }
 0x831   : > { %v916_v32 = vpop.xlane.xlu2 %915 }
 0x83f   : > { %v891_v42 = vpop.xlane.xlu0 %890 }
 0x840   : > { %3348 = vrcp.f32 %v891_v42  ;;  %v903_v59 = vand.u32 2147483648, %v891_v42  ;;  %v901_v46 = vand.u32 2147483647, %v891_v42  ;;  %vm897_vm8 = vweird.f32 %v891_v42 }
 0x842   : > { %v904_v47 = vor.u32 1.1754944e-38, %v903_v59  ;;  %vm902_vm12 = vcmp.eq.f32.partialorder %v901_v46, 8.507059e+37 }
 0x846   : > { %v3349_v12 = vpop.eup %3348 }
 0x847   : > { %v893_v58 = vmul.f32 %v3349_v12, %v891_v42  ;;  %vm898_vm7 = vweird.f32 %v3349_v12  ;;  %v913_v21 = vpop.xlane.xlu0 %912 }
 0x848   : > { %vm899_vm9 = vmor %vm897_vm8, %vm898_vm7 }
 0x849   : > { %v894_v51 = vsub.f32 1.0, %v893_v58 }
 0x84b   : > { %v895_v28 = vmul.f32 %v3349_v12, %v894_v51 }
 0x84d   : > { %v896_v31 = vadd.f32 %v3349_v12, %v895_v28 }
 0x84f   : > { %v900_v13 = vsel %vm899_vm9, %v3349_v12, %v896_v31 }
 0x850   : > { %v905_v29 = vsel %vm902_vm12, %v904_v47, %v900_v13 }
 0x851   : > { %v907_v14 = vmul.f32 %v905_v29, %v876_v41  ;;  %v908_v40 = vmul.f32 %v905_v29, %v887_v60 }
 0x853   : > { %v917_v16 = vmul.f32 %v913_v21, %v907_v14  ;;  %v921_v19 = vmul.f32 %v913_v21, %v908_v40  ;;  %v922_v39 = vmul.f32 %v916_v32, %v908_v40  ;;  %v918_v20 = vmul.f32 %v916_v32, %v907_v14 }
 0x855   : > { %v923_v5 = vsub.f32 %v4085_v7, %v921_v19  ;;  %v924_v33 = vsub.f32 %v862_v63, %v922_v39  ;;  %v919_v22 = vsub.f32 %v853_v55, %v917_v16  ;;  %v920_v23 = vsub.f32 %v4089_v26, %v918_v20 }
 0x857   : > { %v928_v25 = vsel %vm5136_vm0, %v908_v40, %v924_v33  ;;  %v974_v44 = vsel %vm5135_vm13, %v919_v22, 0.0  ;;  %v926_v49 = vsel %vm5136_vm0, %v907_v14, %v920_v23 }
 0x858   : > { %v976_v36 = vsel %vm206_vm2, %v974_v44, 0.0  ;;  %v975_v24 = vsel %vm5135_vm13, %v926_v49, 0.0  ;;  %v933_v7 = vsel %vm5134_vm14, %v926_v49, 0.0  ;;  %v944_v41 = vsel %vm5134_vm14, %v928_v25, 0.0 }
 0x859   : > { %977 = vadd.xlane.f32.xlu2 %v976_v36  ;;  %v979_v26 = vsel %vm208_vm6, %v975_v24, 0.0  ;;  %v935_v63 = vsel %vm208_vm6, %v933_v7, 0.0  ;;  %v946_v43 = vsel %vm208_vm6, %v944_v41, 0.0 }
 0x85a   : > { %980 = vadd.xlane.f32.xlu0 %v979_v26  ;;  %v937_v35 = vrot.slane %v935_v63, 4  ;;  %v948_v53 = vrot.slane %v946_v43, 4 }
 0x85c   : > { %v938_v34 = vadd.f32 %v937_v35, %v935_v63  ;;  %v949_v54 = vadd.f32 %v948_v53, %v946_v43 }
 0x85e   : > { %v939_v48 = vrot.slane %v938_v34, 2  ;;  %v950_v45 = vrot.slane %v949_v54, 2 }
 0x860   : > { %v940_v37 = vadd.f32 %v939_v48, %v938_v34  ;;  %v951_v57 = vadd.f32 %v950_v45, %v949_v54 }
 0x862   : > { %v941_v2 = vrot.slane %v940_v37, 1  ;;  %v952_v62 = vrot.slane %v951_v57, 1 }
 0x864   : > { %v942_v50 = vadd.f32 %v941_v2, %v940_v37  ;;  %v953_v51 = vadd.f32 %v952_v62, %v951_v57 }
 0x866   : > { %v954_v38 = vsel %vm5135_vm13, %v942_v50, 0.0 }
 0x867   : > { %v955_v52 = vsel %vm206_vm2, %v954_v38, 0.0 }
 0x868   : > { %956 = vadd.xlane.f32.xlu1 %v955_v52 }
 0x8cc   : > { %v978_v56 = vpop.xlane.xlu2 %977 }
 0x8cd   : > { %v981_v47 = vpop.xlane.xlu0 %980 }
 0x8db   : > { %v957_v55 = vpop.xlane.xlu1 %956 }
 0x8dc   : > { %3350 = vrcp.f32 %v957_v55  ;;  %v969_v42 = vand.u32 2147483648, %v957_v55  ;;  %v967_v12 = vand.u32 2147483647, %v957_v55  ;;  %vm963_vm7 = vweird.f32 %v957_v55 }
 0x8de   : > { %v970_v30 = vor.u32 1.1754944e-38, %v969_v42  ;;  %vm968_vm9 = vcmp.eq.f32.partialorder %v967_v12, 8.507059e+37 }
 0x8e2   : > { %v3351_v8 = vpop.eup %3350 }
 0x8e3   : > { %v959_v6 = vmul.f32 %v3351_v8, %v957_v55  ;;  %vm964_vm12 = vweird.f32 %v3351_v8 }
 0x8e4   : > { %vm965_vm8 = vmor %vm963_vm7, %vm964_vm12  ;;  %vm5130_vm12 = vcmask 523264   ;;  %vm5133_vm7 = vcmask 1043456  }
 0x8e5   : > { %v960_v61 = vsub.f32 1.0, %v959_v6 }
 0x8e7   : > { %v961_v11 = vmul.f32 %v3351_v8, %v960_v61 }
 0x8e9   : > { %v962_v58 = vadd.f32 %v3351_v8, %v961_v11 }
 0x8eb   : > { %v966_v59 = vsel %vm965_vm8, %v3351_v8, %v962_v58 }
 0x8ec   : > { %v971_v28 = vsel %vm968_vm9, %v970_v30, %v966_v59 }
 0x8ed   : > { %v973_v46 = vmul.f32 %v971_v28, %v953_v51 }
 0x8ef   : > { %v982_v31 = vmul.f32 %v978_v56, %v973_v46  ;;  %v983_v13 = vmul.f32 %v981_v47, %v973_v46 }
 0x8f1   : > { %v984_v60 = vsub.f32 %v923_v5, %v982_v31  ;;  %v985_v29 = vsub.f32 %v928_v25, %v983_v13 }
 0x8f3   : > { %3196 = vmatmul.msk.f32.vlgmr.msrb.gmra.mxu0 %vm206_vm2, %v984_v60  ;;  %v987_v14 = vsel %vm5134_vm14, %v973_v46, %v985_v29 }
 0x8fb   : > { %3197 = vmatmul.msk.f32.gmra.mxu0 %vm206_vm2, %v987_v14 }
 0x970   : > { %v1023_v40 = vpop.f32.mrf.mxu0 }
 0x971   : > { %3198 = vmatmul.msk.f32.vlgmr.msra.gmra.mxu2 %vm5129_vm3, %v1023_v40  ;;  %3200 = vmatmul.msk.f32.vlgmr.msra.gmra.mxu3 %vm5129_vm3, %v1023_v40 }
 0x978   : > { %v1026_v32 = vpop.f32.mrf.mxu0 }
 0x979   : > { %3199 = vmatmul.msk.f32.gmra.mxu2 %vm5129_vm3, %v1026_v32  ;;  %3201 = vmatmul.msk.f32.gmra.mxu3 %vm5129_vm3, %v1026_v32 }
 0x9f4   : > { %v1052_v21 = vpop.f32.mrf.mxu2  ;;  %v1075_v19 = vpop.f32.mrf.mxu3 }
 0x9f5   : > { %v1111_v39 = vsub.f32 %v3601_v17, %v1075_v19 }
 0x9f7   : > { %v1113_v20 = vmul.f32 64.0, %v1111_v39 }
 0x9fc   : > { %v1055_v16 = vpop.f32.mrf.mxu2 }
 0x9fd   : > { %3202 = vmatpush.xpose.msk.msra.mxu0 %vm5130_vm12, %v1055_v16  ;;  %3237 = vmatpush.xpose.msk.msra.mxu1 %vm5130_vm12, %v1055_v16 }
 0x9fe   : > { %3206 = vmatpush.xpose.msk.msrb.mxu2 %vm5130_vm12, %v1055_v16 }
 0xa01   : > { %3203 = vmatpush.xpose.msk.msra.mxu0 %vm5130_vm12, %v1052_v21  ;;  %3238 = vmatpush.xpose.msk.msra.mxu1 %vm5130_vm12, %v1052_v21 }
 0xa02   : > { %3207 = vmatpush.xpose.msk.msrb.mxu2 %vm5130_vm12, %v1052_v21 }
 0xa04   : > { %3204 = vmatmul.msk.f32.vlgmr.msra.gmra.mxu0 %vm5130_vm12, %v1052_v21  ;;  %3205 = vmatmul.msk.f32.vlgmr.msra.gmra.mxu1 %vm5130_vm12, %v1055_v16 }
 0xa05   : > { %3217 = vmatpush.msk.msrb.mxu1 %vm5133_vm7, %v1055_v16  ;;  %3208 = vmatmul.msk.f32.vlgmr.msrb.gmra.mxu2 %vm5130_vm12, %v3551_v0 }
 0xa06   :  { %3002 = vmatpush.msra.mxu2 (%p41_p0), %v3566_v4 }
 0xa07   : > { %1970 = vmatpush.msrb.mxu1 %v1052_v21 }
 0xa08   :  { %3003 = vmatpush.msra.mxu2 (%p41_p0), %v3561_v3 }
 0xa0a   :  { %3004 = vmatpush.msra.mxu2 (%p41_p0), %v3556_v1 }
 0xa0c   :  { %3005 = vmatpush.msra.mxu2 (%p41_p0), %v3551_v0 }
 0xa0d   : > { %3209 = vmatmul.msk.f32.gmra.mxu2 %vm5130_vm12, %v3556_v1 }
 0xa15   : > { %3210 = vmatmul.msk.f32.gmra.mxu2 %vm5130_vm12, %v3561_v3 }
 0xa1d   : > { %3211 = vmatmul.msk.f32.gmra.mxu2 %vm5130_vm12, %v3566_v4 }
 0xa81   : > { %v1105_v5 = vpop.f32.mrf.mxu0 }
 0xa82   : > { %v1115_v33 = vadd.f32 %v1113_v20, %v1105_v5 }
 0xa84   : > { %v1158_v22 = vsel %vm201_vm4, %v1115_v33, 0.0  ;;  %v1190_v23 = vsel %vm5131_vm5, %v1115_v33, 0.0 }
 0xa85   : > { %v1160_v25 = vsel %vm206_vm2, %v1158_v22, 0.0  ;;  %v1192_v44 = vsel %vm206_vm2, %v1190_v23, 0.0 }
 0xa86   : > { %v1163_v49 = vrot.slane %v1160_v25, 4  ;;  %1193 = vadd.xlane.f32.xlu2 %v1192_v44 }
 0xa88   : > { %v1164_v36 = vadd.f32 %v1163_v49, %v1160_v25 }
 0xa8a   : > { %v1165_v24 = vrot.slane %v1164_v36, 2 }
 0xa8c   : > { %v1166_v7 = vadd.f32 %v1165_v24, %v1164_v36 }
 0xa8e   : > { %v1167_v26 = vrot.slane %v1166_v7, 1 }
 0xa90   : > { %v1168_v63 = vadd.f32 %v1167_v26, %v1166_v7 }
 0xa92   : > { %v1169_v35 = vsel %vm5131_vm5, %v1168_v63, 0.0 }
 0xa93   : > { %v1170_v34 = vsel %vm206_vm2, %v1169_v35, 0.0 }
 0xa94   : > { %1171 = vadd.xlane.f32.xlu1 %v1170_v34 }
 0xaf9   : > { %v4174_v8 = vpop.xlane.xlu2 %1193 }
 0xb07   : > { %v1172_v48 = vpop.xlane.xlu1 %1171 }
 0xb08   : > { %3352 = vrcp.f32 %v1172_v48  ;;  %v1184_v38 = vand.u32 2147483648, %v1172_v48  ;;  %v1182_v41 = vand.u32 2147483647, %v1172_v48  ;;  %vm1178_vm9 = vweird.f32 %v1172_v48 }
 0xb0a   : > { %v1185_v53 = vor.u32 1.1754944e-38, %v1184_v38  ;;  %vm1183_vm12 = vcmp.eq.f32.partialorder %v1182_v41, 8.507059e+37 }
 0xb0e   : > { %v3353_v37 = vpop.eup %3352 }
 0xb0f   : > { %v1174_v2 = vmul.f32 %v3353_v37, %v1172_v48  ;;  %vm1179_vm8 = vweird.f32 %v3353_v37 }
 0xb10   : > { %vm1180_vm3 = vmor %vm1178_vm9, %vm1179_vm8 }
 0xb11   : > { %v1175_v50 = vsub.f32 1.0, %v1174_v2  ;;  %v1108_v2 = vpop.f32.mrf.mxu1 }
 0xb13   : > { %v1176_v52 = vmul.f32 %v3353_v37, %v1175_v50 }
 0xb15   : > { %v1177_v43 = vadd.f32 %v3353_v37, %v1176_v52 }
 0xb17   : > { %v1181_v54 = vsel %vm1180_vm3, %v3353_v37, %v1177_v43 }
 0xb18   : > { %v4169_v55 = vsel %vm1183_vm12, %v1185_v53, %v1181_v54 }
 0xb19   : > { %v4172_v45 = vmul.f32 %v4169_v55, %v1168_v63  ;;  %v1078_v63 = vpop.f32.mrf.mxu3 }
 0xb1a   : > { %v1112_v34 = vsub.f32 %v3605_v18, %v1078_v63 }
 0xb1b   : > { %v1198_v57 = vmul.f32 %v4174_v8, %v4172_v45 }
 0xb1c   : > { %v1114_v50 = vmul.f32 64.0, %v1112_v34 }
 0xb1d   : > { %v1200_v6 = vsub.f32 %v1115_v33, %v1198_v57 }
 0xb1e   : > { %v1116_v41 = vadd.f32 %v1114_v50, %v1108_v2 }
 0xb1f   : > { %v1206_v61 = vsel %vm201_vm4, %v4172_v45, %v1200_v6 }
 0xb20   : > { %v1253_v42 = vsel %vm271_vm11, %v1206_v61, 0.0  ;;  %v1210_v62 = vsel %vm269_vm10, %v1206_v61, 0.0  ;;  %v1191_v43 = vsel %vm5131_vm5, %v1116_v41, 0.0  ;;  %vm5148_vm5 = vcmp.eq.s32.totalorder %v3580_v9, 2 }
 0xb21   : > { %v1255_v11 = vsel %vm206_vm2, %v1253_v42, 0.0  ;;  %v1212_v12 = vsel %vm206_vm2, %v1210_v62, 0.0  ;;  %v1195_v53 = vsel %vm208_vm6, %v1191_v43, 0.0 }
 0xb22   : > { %1256 = vadd.xlane.f32.xlu1 %v1255_v11  ;;  %v1215_v58 = vrot.slane %v1212_v12, 4 }
 0xb24   : > { %v1216_v30 = vadd.f32 %v1215_v58, %v1212_v12 }
 0xb26   : > { %v1217_v51 = vrot.slane %v1216_v30, 2 }
 0xb28   : > { %v1218_v59 = vadd.f32 %v1217_v51, %v1216_v30 }
 0xb2a   : > { %v1219_v28 = vrot.slane %v1218_v59, 1 }
 0xb2c   : > { %v1220_v46 = vadd.f32 %v1219_v28, %v1218_v59 }
 0xb2e   : > { %v1232_v56 = vsel %vm271_vm11, %v1220_v46, 0.0 }
 0xb2f   : > { %v1233_v31 = vsel %vm206_vm2, %v1232_v56, 0.0 }
 0xb30   : > { %1234 = vadd.xlane.f32.xlu0 %v1233_v31 }
 0xb95   : > { %v4195_v5 = vpop.xlane.xlu1 %1256 }
 0xba3   : > { %v1235_v47 = vpop.xlane.xlu0 %1234 }
 0xba4   : > { %3354 = vrcp.f32 %v1235_v47  ;;  %v1247_v14 = vand.u32 2147483648, %v1235_v47  ;;  %v1245_v32 = vand.u32 2147483647, %v1235_v47  ;;  %vm1241_vm12 = vweird.f32 %v1235_v47 }
 0xba6   : > { %v1248_v16 = vor.u32 1.1754944e-38, %v1247_v14  ;;  %vm1246_vm9 = vcmp.eq.f32.partialorder %v1245_v32, 8.507059e+37 }
 0xbaa   : > { %v3355_v60 = vpop.eup %3354 }
 0xbab   : > { %v1237_v13 = vmul.f32 %v3355_v60, %v1235_v47  ;;  %vm1242_vm3 = vweird.f32 %v3355_v60 }
 0xbac   : > { %vm1243_vm8 = vmor %vm1241_vm12, %vm1242_vm3  ;;  %vm5147_vm3 = vcmp.eq.s32.totalorder %v3580_v9, 2 }
 0xbad   : > { %v1238_v29 = vsub.f32 1.0, %v1237_v13 }
 0xbaf   : > { %v1239_v40 = vmul.f32 %v3355_v60, %v1238_v29 }
 0xbb1   : > { %v1240_v21 = vadd.f32 %v3355_v60, %v1239_v40 }
 0xbb3   : > { %v1244_v19 = vsel %vm1243_vm8, %v3355_v60, %v1240_v21 }
 0xbb4   : > { %v4190_v39 = vsel %vm1246_vm9, %v1248_v16, %v1244_v19 }
 0xbb5   : > { %v4193_v20 = vmul.f32 %v4190_v39, %v1220_v46 }
 0xbb7   : > { %v1261_v33 = vmul.f32 %v4195_v5, %v4193_v20 }
 0xbb9   : > { %v1263_v22 = vsub.f32 %v1206_v61, %v1261_v33 }
 0xbbb   : > { %v1269_v23 = vsel %vm269_vm10, %v4193_v20, %v1263_v22 }
 0xbbc   : > { %v1316_v25 = vsel %vm5132_vm1, %v1269_v23, 0.0  ;;  %v1273_v44 = vsel %vm5147_vm3, %v1269_v23, 0.0 }
 0xbbd   : > { %v1318_v49 = vsel %vm206_vm2, %v1316_v25, 0.0  ;;  %v1275_v36 = vsel %vm206_vm2, %v1273_v44, 0.0 }
 0xbbe   : > { %1319 = vadd.xlane.f32.xlu0 %v1318_v49  ;;  %v1278_v24 = vrot.slane %v1275_v36, 4 }
 0xbc0   : > { %v1279_v7 = vadd.f32 %v1278_v24, %v1275_v36 }
 0xbc2   : > { %v1280_v26 = vrot.slane %v1279_v7, 2 }
 0xbc4   : > { %v1281_v35 = vadd.f32 %v1280_v26, %v1279_v7 }
 0xbc6   : > { %v1282_v48 = vrot.slane %v1281_v35, 1 }
 0xbc8   : > { %v1283_v37 = vadd.f32 %v1282_v48, %v1281_v35 }
 0xbca   : > { %v1295_v38 = vsel %vm5132_vm1, %v1283_v37, 0.0 }
 0xbcb   : > { %v1296_v52 = vsel %vm206_vm2, %v1295_v38, 0.0 }
 0xbcc   : > { %1297 = vadd.xlane.f32.xlu2 %v1296_v52 }
 0xbd4   : > { %1196 = vadd.xlane.f32.xlu2 %v1195_v53 }
 0xc31   : > { %v4220_v28 = vpop.xlane.xlu0 %1319 }
 0xc3f   : > { %v1298_v54 = vpop.xlane.xlu2 %1297 }
 0xc40   : > { %3356 = vrcp.f32 %v1298_v54  ;;  %v1310_v42 = vand.u32 2147483648, %v1298_v54  ;;  %v1308_v11 = vand.u32 2147483647, %v1298_v54  ;;  %vm1304_vm8 = vweird.f32 %v1298_v54 }
 0xc42   : > { %v1311_v58 = vor.u32 1.1754944e-38, %v1310_v42  ;;  %vm1309_vm3 = vcmp.eq.f32.partialorder %v1308_v11, 8.507059e+37 }
 0xc46   : > { %v3357_v57 = vpop.eup %3356 }
 0xc47   : > { %v1300_v6 = vmul.f32 %v3357_v57, %v1298_v54  ;;  %vm1305_vm12 = vweird.f32 %v3357_v57  ;;  %v4233_v16 = vpop.xlane.xlu2 %1196 }
 0xc48   : > { %vm1306_vm9 = vmor %vm1304_vm8, %vm1305_vm12  ;;  %vm5149_vm12 = vcmp.eq.s32.totalorder %v3582_v10, 3  ;;  %vm5150_vm8 = vcmp.eq.s32.totalorder %v3580_v9, 3  ;;  %v1199_v33 = vmul.f32 %v4233_v16, %v4172_v45 }
 0xc49   : > { %v1301_v61 = vsub.f32 1.0, %v1300_v6 }
 0xc4a   : > { %v1201_v44 = vsub.f32 %v1116_v41, %v1199_v33 }
 0xc4b   : > { %v1302_v62 = vmul.f32 %v3357_v57, %v1301_v61 }
 0xc4c   : > { %v1254_v49 = vsel %vm271_vm11, %v1201_v44, 0.0 }
 0xc4d   : > { %v1303_v12 = vadd.f32 %v3357_v57, %v1302_v62  ;;  %v1258_v36 = vsel %vm208_vm6, %v1254_v49, 0.0 }
 0xc4f   : > { %v1307_v30 = vsel %vm1306_vm9, %v3357_v57, %v1303_v12 }
 0xc50   : > { %v4215_v51 = vsel %vm1309_vm3, %v1311_v58, %v1307_v30 }
 0xc51   : > { %v4218_v59 = vmul.f32 %v4215_v51, %v1283_v37 }
 0xc53   : > { %v1324_v46 = vmul.f32 %v4220_v28, %v4218_v59 }
 0xc55   : > { %v1326_v56 = vsub.f32 %v1269_v23, %v1324_v46 }
 0xc57   : > { %v1332_v31 = vsel %vm5148_vm5, %v4218_v59, %v1326_v56  ;;  %vm5151_vm5 = vmmov %vm5149_vm12 }
 0xc58   : > { %v1379_v47 = vsel %vm5149_vm12, %v1332_v31, 0.0  ;;  %v1336_v60 = vsel %vm5150_vm8, %v1332_v31, 0.0 }
 0xc59   : > { %v1381_v13 = vsel %vm206_vm2, %v1379_v47, 0.0  ;;  %v1338_v29 = vsel %vm206_vm2, %v1336_v60, 0.0 }
 0xc5a   : > { %1382 = vadd.xlane.f32.xlu0 %v1381_v13  ;;  %v1341_v14 = vrot.slane %v1338_v29, 4 }
 0xc5c   : > { %v1342_v40 = vadd.f32 %v1341_v14, %v1338_v29  ;;  %v4273_v29 = vmul.f32 %v4169_v55, %v3809_v27 }
 0xc5e   : > { %v1343_v32 = vrot.slane %v1342_v40, 2  ;;  %v1202_v14 = vmul.f32 %v4174_v8, %v4273_v29 }
 0xc60   : > { %v1344_v21 = vadd.f32 %v1343_v32, %v1342_v40  ;;  %v1204_v40 = vsub.f32 %v3601_v17, %v1202_v14 }
 0xc62   : > { %v1345_v19 = vrot.slane %v1344_v21, 1  ;;  %v1208_v32 = vsel %vm201_vm4, %v4273_v29, %v1204_v40 }
 0xc64   : > { %v1346_v22 = vadd.f32 %v1345_v19, %v1344_v21  ;;  %v1221_v21 = vsel %vm269_vm10, %v1208_v32, 0.0 }
 0xc65   : > { %v1223_v55 = vsel %vm206_vm2, %v1221_v21, 0.0 }
 0xc66   : > { %v1358_v23 = vsel %vm5151_vm5, %v1346_v22, 0.0  ;;  %vm5152_vm5 = vcmp.eq.s32.totalorder %v3580_v9, 3 }
 0xc67   : > { %v1359_v25 = vsel %vm206_vm2, %v1358_v23, 0.0  ;;  %v1226_v23 = vrot.slane %v1223_v55, 4 }
 0xc68   : > { %1360 = vadd.xlane.f32.xlu1 %v1359_v25 }
 0xc70   : > { %1259 = vadd.xlane.f32.xlu1 %v1258_v36 }
 0xccd   : > { %v4255_v54 = vpop.xlane.xlu0 %1382 }
 0xcdb   : > { %v1361_v24 = vpop.xlane.xlu1 %1360 }
 0xcdc   : > { %3358 = vrcp.f32 %v1361_v24  ;;  %v1373_v34 = vand.u32 2147483648, %v1361_v24  ;;  %v1371_v2 = vand.u32 2147483647, %v1361_v24  ;;  %vm1367_vm3 = vweird.f32 %v1361_v24 }
 0xcde   : > { %v1374_v41 = vor.u32 1.1754944e-38, %v1373_v34  ;;  %vm1372_vm8 = vcmp.eq.f32.partialorder %v1371_v2, 8.507059e+37 }
 0xce2   : > { %v3359_v7 = vpop.eup %3358 }
 0xce3   : > { %v1363_v26 = vmul.f32 %v3359_v7, %v1361_v24  ;;  %v4243_v63 = vpop.xlane.xlu1 %1259  ;;  %vm1368_vm9 = vweird.f32 %v3359_v7 }
 0xce4   : > { %v1262_v45 = vmul.f32 %v4243_v63, %v4193_v20  ;;  %vm1369_vm12 = vmor %vm1367_vm3, %vm1368_vm9  ;;  %vm5153_vm9 = vcmp.eq.s32.totalorder %v3582_v10, 4  ;;  %vm5154_vm3 = vcmp.eq.s32.totalorder %v3580_v9, 4 }
 0xce5   : > { %v1364_v35 = vsub.f32 1.0, %v1363_v26 }
 0xce6   : > { %v1264_v48 = vsub.f32 %v1201_v44, %v1262_v45  ;;  %v1227_v44 = vadd.f32 %v1226_v23, %v1223_v55 }
 0xce7   : > { %v1365_v37 = vmul.f32 %v3359_v7, %v1364_v35 }
 0xce8   : > { %v1317_v50 = vsel %vm5132_vm1, %v1264_v48, 0.0  ;;  %v1228_v49 = vrot.slane %v1227_v44, 2  ;;  %vm5158_vm1 = vcmp.eq.s32.totalorder %v3580_v9, 4 }
 0xce9   : > { %v1366_v38 = vadd.f32 %v3359_v7, %v1365_v37  ;;  %v1321_v52 = vsel %vm208_vm6, %v1317_v50, 0.0 }
 0xcea   : > { %1322 = vadd.xlane.f32.xlu1 %v1321_v52  ;;  %v1229_v36 = vadd.f32 %v1228_v49, %v1227_v44 }
 0xceb   : > { %v1370_v43 = vsel %vm1369_vm12, %v3359_v7, %v1366_v38  ;;  %vm5155_vm12 = vmmov %vm5153_vm9 }
 0xcec   : > { %v4250_v53 = vsel %vm1372_vm8, %v1374_v41, %v1370_v43  ;;  %vm5156_vm8 = vcmp.eq.s32.totalorder %v3582_v10, 3  ;;  %v1230_v24 = vrot.slane %v1229_v36, 1 }
 0xced   : > { %v4253_v20 = vmul.f32 %v4250_v53, %v1346_v22 }
 0xcee   : > { %v1231_v7 = vadd.f32 %v1230_v24, %v1229_v36 }
 0xcef   : > { %v1387_v57 = vmul.f32 %v4255_v54, %v4253_v20 }
 0xcf1   : > { %v1389_v6 = vsub.f32 %v1332_v31, %v1387_v57 }
 0xcf3   : > { %v1395_v61 = vsel %vm5152_vm5, %v4253_v20, %v1389_v6 }
 0xcf4   : > { %v1442_v42 = vsel %vm5153_vm9, %v1395_v61, 0.0  ;;  %v1399_v62 = vsel %vm5154_vm3, %v1395_v61, 0.0 }
 0xcf5   : > { %v1444_v11 = vsel %vm206_vm2, %v1442_v42, 0.0  ;;  %v1401_v12 = vsel %vm206_vm2, %v1399_v62, 0.0 }
 0xcf6   : > { %1445 = vadd.xlane.f32.xlu0 %v1444_v11  ;;  %v1404_v58 = vrot.slane %v1401_v12, 4 }
 0xcf8   : > { %v1405_v30 = vadd.f32 %v1404_v58, %v1401_v12 }
 0xcfa   : > { %v1406_v46 = vrot.slane %v1405_v30, 2 }
 0xcfc   : > { %v1407_v56 = vadd.f32 %v1406_v46, %v1405_v30 }
 0xcfe   : > { %v1408_v31 = vrot.slane %v1407_v56, 1 }
 0xd00   : > { %v1409_v47 = vadd.f32 %v1408_v31, %v1407_v56 }
 0xd02   : > { %v1421_v60 = vsel %vm5155_vm12, %v1409_v47, 0.0 }
 0xd03   : > { %v1422_v13 = vsel %vm206_vm2, %v1421_v60, 0.0 }
 0xd04   : > { %1423 = vadd.xlane.f32.xlu2 %v1422_v13 }
 0xd5d   : > { %v4283_v19 = vpop.xlane.xlu1 %1322 }
 0xd5e   : > { %v1325_v33 = vmul.f32 %v4283_v19, %v4218_v59  ;;  %v4295_v59 = vmul.f32 %v4190_v39, %v1231_v7 }
 0xd60   : > { %v4288_v22 = vsub.f32 %v1264_v48, %v1325_v33  ;;  %v1265_v45 = vmul.f32 %v4195_v5, %v4295_v59 }
 0xd62   : > { %v1380_v8 = vsel %vm5156_vm8, %v4288_v22, 0.0  ;;  %v1267_v48 = vsub.f32 %v1208_v32, %v1265_v45  ;;  %vm5157_vm8 = vcmp.eq.s32.totalorder %v3580_v9, 2 }
 0xd63   : > { %v1384_v25 = vsel %vm208_vm6, %v1380_v8, 0.0 }
 0xd64   : > { %1385 = vadd.xlane.f32.xlu2 %v1384_v25  ;;  %v1271_v52 = vsel %vm269_vm10, %v4295_v59, %v1267_v48 }
 0xd65   : > { %v1284_v5 = vsel %vm5157_vm8, %v1271_v52, 0.0 }
 0xd66   : > { %v1286_v62 = vsel %vm206_vm2, %v1284_v5, 0.0 }
 0xd67   : > { %v1289_v58 = vrot.slane %v1286_v62, 4 }
 0xd69   : > { %v1446_v42 = vpop.xlane.xlu0 %1445  ;;  %v1290_v60 = vadd.f32 %v1289_v58, %v1286_v62 }
 0xd6b   : > { %v1291_v14 = vrot.slane %v1290_v60, 2 }
 0xd6d   : > { %v1292_v21 = vadd.f32 %v1291_v14, %v1290_v60 }
 0xd6f   : > { %v1293_v8 = vrot.slane %v1292_v21, 1 }
 0xd71   : > { %v1294_v44 = vadd.f32 %v1293_v8, %v1292_v21 }
 0xd73   : > { %v4328_v49 = vmul.f32 %v4215_v51, %v1294_v44 }
 0xd75   : > { %v1328_v36 = vmul.f32 %v4220_v28, %v4328_v49 }
 0xd77   : > { %v1424_v26 = vpop.xlane.xlu2 %1423  ;;  %v1330_v24 = vsub.f32 %v1271_v52, %v1328_v36 }
 0xd78   : > { %3360 = vrcp.f32 %v1424_v26  ;;  %v1436_v2 = vand.u32 2147483648, %v1424_v26  ;;  %v1434_v38 = vand.u32 2147483647, %v1424_v26  ;;  %vm1430_vm9 = vweird.f32 %v1424_v26 }
 0xd7a   : > { %v1437_v39 = vor.u32 1.1754944e-38, %v1436_v2  ;;  %vm1435_vm12 = vcmp.eq.f32.partialorder %v1434_v38, 8.507059e+37 }
 0xd7e   : > { %v3361_v35 = vpop.eup %3360 }
 0xd7f   : > { %v1426_v34 = vmul.f32 %v3361_v35, %v1424_v26  ;;  %vm1431_vm5 = vweird.f32 %v3361_v35 }
 0xd80   : > { %vm1432_vm3 = vmor %vm1430_vm9, %vm1431_vm5  ;;  %vm5159_vm5 = vcmp.eq.s32.totalorder %v3582_v10, 5  ;;  %vm5160_vm9 = vcmp.eq.s32.totalorder %v3580_v9, 5 }
 0xd81   : > { %v1427_v37 = vsub.f32 1.0, %v1426_v34 }
 0xd83   : > { %v1428_v50 = vmul.f32 %v3361_v35, %v1427_v37 }
 0xd85   : > { %v1429_v41 = vadd.f32 %v3361_v35, %v1428_v50 }
 0xd87   : > { %v1433_v43 = vsel %vm1432_vm3, %v3361_v35, %v1429_v41  ;;  %vm5162_vm3 = vmmov %vm5157_vm8 }
 0xd88   : > { %v1438_v57 = vsel %vm1435_vm12, %v1437_v39, %v1433_v43  ;;  %v1334_v7 = vsel %vm5162_vm3, %v4328_v49, %v1330_v24  ;;  %vm5163_vm12 = vcmp.eq.s32.totalorder %v3580_v9, 3  ;;  %vm5168_vm3 = vcmp.eq.s32.totalorder %v3580_v9, 5 }
 0xd89   : > { %v4304_v6 = vmul.f32 %v1438_v57, %v1409_v47  ;;  %v1347_v26 = vsel %vm5163_vm12, %v1334_v7, 0.0  ;;  %vm5164_vm8 = vmmov %vm5163_vm12 }
 0xd8a   : > { %v1349_v45 = vsel %vm206_vm2, %v1347_v26, 0.0 }
 0xd8b   : > { %v1450_v11 = vmul.f32 %v1446_v42, %v4304_v6  ;;  %v1352_v35 = vrot.slane %v1349_v45, 4 }
 0xd8d   : > { %v1452_v12 = vsub.f32 %v1395_v61, %v1450_v11  ;;  %v1353_v34 = vadd.f32 %v1352_v35, %v1349_v45 }
 0xd8f   : > { %v4311_v30 = vsel %vm5158_vm1, %v4304_v6, %v1452_v12  ;;  %vm5161_vm1 = vmmov %vm5159_vm5  ;;  %v1354_v48 = vrot.slane %v1353_v34, 2 }
 0xd90   : > { %v1505_v46 = vsel %vm5159_vm5, %v4311_v30, 0.0  ;;  %v1462_v56 = vsel %vm5160_vm9, %v4311_v30, 0.0  ;;  %vm5165_vm5 = vcmp.eq.s32.totalorder %v3582_v10, 4  ;;  %vm5166_vm9 = vcmp.eq.s32.totalorder %v3580_v9, 4 }
 0xd91   : > { %v1507_v31 = vsel %vm206_vm2, %v1505_v46, 0.0  ;;  %v1464_v47 = vsel %vm206_vm2, %v1462_v56, 0.0  ;;  %v1355_v37 = vadd.f32 %v1354_v48, %v1353_v34 }
 0xd92   : > { %1508 = vadd.xlane.f32.xlu1 %v1507_v31  ;;  %v1467_v61 = vrot.slane %v1464_v47, 4 }
 0xd93   : > { %v1356_v2 = vrot.slane %v1355_v37, 1 }
 0xd94   : > { %v1468_v13 = vadd.f32 %v1467_v61, %v1464_v47 }
 0xd95   : > { %v1357_v51 = vadd.f32 %v1356_v2, %v1355_v37 }
 0xd96   : > { %v1469_v40 = vrot.slane %v1468_v13, 2 }
 0xd97   : > { %v4339_v50 = vmul.f32 %v4250_v53, %v1357_v51 }
 0xd98   : > { %v1470_v32 = vadd.f32 %v1469_v40, %v1468_v13 }
 0xd99   : > { %v1391_v28 = vmul.f32 %v4255_v54, %v4339_v50 }
 0xd9a   : > { %v1471_v33 = vrot.slane %v1470_v32, 1 }
 0xd9b   : > { %v1393_v38 = vsub.f32 %v1334_v7, %v1391_v28 }
 0xd9c   : > { %v4321_v55 = vadd.f32 %v1471_v33, %v1470_v32 }
 0xd9d   : > { %v1397_v43 = vsel %vm5164_vm8, %v4339_v50, %v1393_v38 }
 0xd9e   : > { %v1484_v23 = vsel %vm5161_vm1, %v4321_v55, 0.0  ;;  %v1410_v54 = vsel %vm5166_vm9, %v1397_v43, 0.0  ;;  %vm5167_vm1 = vmmov %vm5166_vm9 }
 0xd9f   : > { %v1485_v25 = vsel %vm206_vm2, %v1484_v23, 0.0  ;;  %v1412_v62 = vsel %vm206_vm2, %v1410_v54, 0.0 }
 0xda0   : > { %1486 = vadd.xlane.f32.xlu0 %v1485_v25 }
 0xdd7   : > { %v4343_v52 = vpop.xlane.xlu2 %1385 }
 0xdd8   : > { %v1388_v41 = vmul.f32 %v4343_v52, %v4253_v20  ;;  %v1415_v20 = vrot.slane %v1412_v62, 4 }
 0xdda   : > { %v4348_v39 = vsub.f32 %v4288_v22, %v1388_v41  ;;  %v1416_v11 = vadd.f32 %v1415_v20, %v1412_v62 }
 0xddc   : > { %v1443_v53 = vsel %vm5165_vm5, %v4348_v39, 0.0  ;;  %v1417_v22 = vrot.slane %v1416_v11, 2 }
 0xddd   : > { %v1447_v5 = vsel %vm208_vm6, %v1443_v53, 0.0 }
 0xdde   : > { %1448 = vadd.xlane.f32.xlu2 %v1447_v5  ;;  %v1418_v12 = vadd.f32 %v1417_v22, %v1416_v11 }
 0xde0   : > { %v1419_v58 = vrot.slane %v1418_v12, 1 }
 0xde2   : > { %v1420_v46 = vadd.f32 %v1419_v58, %v1418_v12 }
 0xde4   : > { %v4360_v56 = vmul.f32 %v1438_v57, %v1420_v46 }
 0xde6   : > { %v1454_v31 = vmul.f32 %v1446_v42, %v4360_v56 }
 0xde8   : > { %v1456_v47 = vsub.f32 %v1397_v43, %v1454_v31 }
 0xdea   : > { %v1460_v60 = vsel %vm5167_vm1, %v4360_v56, %v1456_v47  ;;  %vm5169_vm1 = vmmov %vm5168_vm3 }
 0xdeb   : > { %v1473_v61 = vsel %vm5168_vm3, %v1460_v60, 0.0  ;;  %vm5170_vm3 = vmmov %vm5169_vm1 }
 0xdec   : > { %v1475_v13 = vsel %vm206_vm2, %v1473_v61, 0.0 }
 0xded   : > { %v1478_v14 = vrot.slane %v1475_v13, 4 }
 0xdef   : > { %v1479_v32 = vadd.f32 %v1478_v14, %v1475_v13 }
 0xdf1   : > { %v1480_v21 = vrot.slane %v1479_v32, 2 }
 0xdf3   : > { %v1481_v8 = vadd.f32 %v1480_v21, %v1479_v32 }
 0xdf5   : > { %v1482_v36 = vrot.slane %v1481_v8, 1 }
 0xdf7   : > { %v1483_v45 = vadd.f32 %v1482_v36, %v1481_v8 }
 0xe05   : > { %v1509_v37 = vpop.xlane.xlu1 %1508 }
 0xe13   : > { %v1487_v40 = vpop.xlane.xlu0 %1486 }
 0xe14   : > { %3362 = vrcp.f32 %v1487_v40  ;;  %v1499_v42 = vand.u32 2147483648, %v1487_v40  ;;  %v1497_v44 = vand.u32 2147483647, %v1487_v40  ;;  %vm1493_vm8 = vweird.f32 %v1487_v40 }
 0xe16   : > { %v1500_v7 = vor.u32 1.1754944e-38, %v1499_v42  ;;  %vm1498_vm9 = vcmp.eq.f32.partialorder %v1497_v44, 8.507059e+37 }
 0xe1a   : > { %v3363_v33 = vpop.eup %3362 }
 0xe1b   : > { %v1489_v57 = vmul.f32 %v3363_v33, %v1487_v40  ;;  %vm1494_vm12 = vweird.f32 %v3363_v33 }
 0xe1c   : > { %vm1495_vm5 = vmor %vm1493_vm8, %vm1494_vm12  ;;  %vm5171_vm12 = vcmp.eq.s32.totalorder %v3580_v9, 6  ;;  %vm5172_vm8 = vcmp.eq.s32.totalorder %v3582_v10, 6 }
 0xe1d   : > { %v1490_v23 = vsub.f32 1.0, %v1489_v57 }
 0xe1f   : > { %v1491_v25 = vmul.f32 %v3363_v33, %v1490_v23 }
 0xe21   : > { %v1492_v24 = vadd.f32 %v3363_v33, %v1491_v25 }
 0xe23   : > { %v1496_v26 = vsel %vm1495_vm5, %v3363_v33, %v1492_v24  ;;  %vm5173_vm5 = vmmov %vm5172_vm8 }
 0xe24   : > { %v1501_v35 = vsel %vm1498_vm9, %v1500_v7, %v1496_v26  ;;  %vm5174_vm9 = vcmp.eq.s32.totalorder %v3582_v10, 5 }
 0xe25   : > { %v4370_v34 = vmul.f32 %v1501_v35, %v4321_v55  ;;  %v4372_v48 = vmul.f32 %v1501_v35, %v1483_v45  ;;  %v1203_v35 = vmul.f32 %v4233_v16, %v4273_v29  ;;  %v1392_v16 = vmul.f32 %v4343_v52, %v4339_v50 }
 0xe27   : > { %v1513_v2 = vmul.f32 %v1509_v37, %v4370_v34  ;;  %v1517_v51 = vmul.f32 %v1509_v37, %v4372_v48 }
 0xe29   : > { %v1515_v28 = vsub.f32 %v4311_v30, %v1513_v2  ;;  %v1519_v38 = vsub.f32 %v1460_v60, %v1517_v51 }
 0xe2b   : > { %v1521_v41 = vsel %vm5169_vm1, %v4370_v34, %v1515_v28  ;;  %v1523_v43 = vsel %vm5170_vm3, %v4372_v48, %v1519_v38  ;;  %vm5175_vm1 = vmmov %vm5171_vm12  ;;  %v1266_v28 = vmul.f32 %v4243_v63, %v4295_v59 }
 0xe2c   : > { %v1525_v55 = vsel %vm5171_vm12, %v1521_v41, 0.0  ;;  %v1568_v53 = vsel %vm5172_vm8, %v1521_v41, 0.0  ;;  %v1536_v14 = vsel %vm5175_vm1, %v1523_v43, 0.0 }
 0xe2d   : > { %v1527_v5 = vsel %vm206_vm2, %v1525_v55, 0.0  ;;  %v1570_v54 = vsel %vm206_vm2, %v1568_v53, 0.0  ;;  %v1538_v40 = vsel %vm206_vm2, %v1536_v14, 0.0 }
 0xe2e   : > { %v1530_v30 = vrot.slane %v1527_v5, 4  ;;  %1571 = vadd.xlane.f32.xlu2 %v1570_v54  ;;  %v1541_v32 = vrot.slane %v1538_v40, 4  ;;  %v1329_v54 = vmul.f32 %v4283_v19, %v4328_v49 }
 0xe30   : > { %v1531_v62 = vadd.f32 %v1530_v30, %v1527_v5  ;;  %v1542_v33 = vadd.f32 %v1541_v32, %v1538_v40  ;;  %v1205_v5 = vsub.f32 %v3605_v18, %v1203_v35 }
 0xe32   : > { %v1532_v20 = vrot.slane %v1531_v62, 2  ;;  %v1543_v57 = vrot.slane %v1542_v33, 2 }
 0xe34   : > { %v1533_v11 = vadd.f32 %v1532_v20, %v1531_v62  ;;  %v1544_v23 = vadd.f32 %v1543_v57, %v1542_v33  ;;  %v1268_v20 = vsub.f32 %v1205_v5, %v1266_v28 }
 0xe36   : > { %v1534_v22 = vrot.slane %v1533_v11, 1  ;;  %v1545_v36 = vrot.slane %v1544_v23, 1  ;;  %v1331_v59 = vsub.f32 %v1268_v20, %v1329_v54 }
 0xe38   : > { %v1535_v12 = vadd.f32 %v1534_v22, %v1533_v11  ;;  %v1546_v45 = vadd.f32 %v1545_v36, %v1544_v23 }
 0xe3a   : > { %v1547_v58 = vsel %vm5173_vm5, %v1535_v12, 0.0 }
 0xe3b   : > { %v1548_v46 = vsel %vm206_vm2, %v1547_v58, 0.0 }
 0xe3c   : > { %1549 = vadd.xlane.f32.xlu0 %v1548_v46 }
 0xe51   : > { %v1449_v31 = vpop.xlane.xlu2 %1448 }
 0xe52   : > { %v1451_v47 = vmul.f32 %v1449_v31, %v4304_v6  ;;  %v1455_v11 = vmul.f32 %v1449_v31, %v4360_v56 }
 0xe54   : > { %v1453_v60 = vsub.f32 %v4348_v39, %v1451_v47 }
 0xe56   : > { %v1506_v61 = vsel %vm5174_vm9, %v1453_v60, 0.0  ;;  %vm5176_vm9 = vmmov %vm5175_vm1 }
 0xe57   : > { %v1510_v13 = vsel %vm208_vm6, %v1506_v61, 0.0 }
 0xe58   : > { %1511 = vadd.xlane.f32.xlu1 %v1510_v13 }
 0xea1   : > { %v1572_v38 = vpop.xlane.xlu2 %1571 }
 0xeaf   : > { %v1550_v21 = vpop.xlane.xlu0 %1549 }
 0xeb0   : > { %3364 = vrcp.f32 %v1550_v21  ;;  %v1562_v42 = vand.u32 2147483648, %v1550_v21  ;;  %v1560_v44 = vand.u32 2147483647, %v1550_v21  ;;  %vm1556_vm12 = vweird.f32 %v1550_v21 }
 0xeb2   : > { %v1563_v7 = vor.u32 1.1754944e-38, %v1562_v42  ;;  %vm1561_vm5 = vcmp.eq.f32.partialorder %v1560_v44, 8.507059e+37 }
 0xeb6   : > { %v3365_v8 = vpop.eup %3364 }
 0xeb7   : > { %v1552_v6 = vmul.f32 %v3365_v8, %v1550_v21  ;;  %vm1557_vm3 = vweird.f32 %v3365_v8 }
 0xeb8   : > { %vm1558_vm8 = vmor %vm1556_vm12, %vm1557_vm3  ;;  %vm5177_vm3 = vcmp.eq.s32.totalorder %v3582_v10, 6  ;;  %vm5178_vm12 = vcmp.eq.s32.totalorder %v3582_v10, 7 }
 0xeb9   : > { %v1553_v39 = vsub.f32 1.0, %v1552_v6 }
 0xebb   : > { %v1554_v25 = vmul.f32 %v3365_v8, %v1553_v39 }
 0xebd   : > { %v1555_v24 = vadd.f32 %v3365_v8, %v1554_v25 }
 0xebf   : > { %v1559_v26 = vsel %vm1558_vm8, %v3365_v8, %v1555_v24  ;;  %vm5179_vm8 = vmmov %vm5178_vm12 }
 0xec0   : > { %v1564_v37 = vsel %vm1561_vm5, %v1563_v7, %v1559_v26  ;;  %vm5180_vm5 = vmmov %vm5179_vm8 }
 0xec1   : > { %v1566_v2 = vmul.f32 %v1564_v37, %v1535_v12  ;;  %v1567_v51 = vmul.f32 %v1564_v37, %v1546_v45 }
 0xec3   : > { %v1576_v55 = vmul.f32 %v1572_v38, %v1566_v2  ;;  %v1580_v53 = vmul.f32 %v1572_v38, %v1567_v51 }
 0xec5   : > { %v1578_v30 = vsub.f32 %v1521_v41, %v1576_v55  ;;  %v1582_v62 = vsub.f32 %v1523_v43, %v1580_v53  ;;  %v1394_v41 = vsub.f32 %v1331_v59, %v1392_v16 }
 0xec7   : > { %v4411_v29 = vsel %vm5176_vm9, %v1566_v2, %v1578_v30  ;;  %v4415_v63 = vsel %vm5175_vm1, %v1567_v51, %v1582_v62  ;;  %v1457_v52 = vsub.f32 %v1394_v41, %v1455_v11 }
 0xec8   : > { %v1588_v19 = vsel %vm665_vm15, %v4411_v29, 0.0  ;;  %v1631_v23 = vsel %vm5180_vm5, %v4411_v29, 0.0  ;;  %v1599_v25 = vsel %vm665_vm15, %v4415_v63, 0.0  ;;  %vm5182_vm5 = vcmp.eq.s32.totalorder %v3582_v10, 8 }
 0xec9   : > { %v1590_v49 = vsel %vm206_vm2, %v1588_v19, 0.0  ;;  %v1633_v39 = vsel %vm206_vm2, %v1631_v23, 0.0  ;;  %v1601_v36 = vsel %vm206_vm2, %v1599_v25, 0.0 }
 0xeca   : > { %v1593_v43 = vrot.slane %v1590_v49, 4  ;;  %v1604_v24 = vrot.slane %v1601_v36, 4 }
 0xecb   : > { %v1512_v50 = vpop.xlane.xlu1 %1511 }
 0xecc   : > { %v1514_v22 = vmul.f32 %v1512_v50, %v4370_v34  ;;  %v1518_v12 = vmul.f32 %v1512_v50, %v4372_v48  ;;  %v1594_v58 = vadd.f32 %v1593_v43, %v1590_v49  ;;  %v1605_v45 = vadd.f32 %v1604_v24, %v1601_v36 }
 0xece   : > { %v1520_v46 = vsub.f32 %v1457_v52, %v1518_v12  ;;  %v1516_v47 = vsub.f32 %v1453_v60, %v1514_v22  ;;  %v1595_v61 = vrot.slane %v1594_v58, 2  ;;  %v1606_v37 = vrot.slane %v1605_v45, 2 }
 0xed0   : > { %v1569_v56 = vsel %vm5177_vm3, %v1516_v47, 0.0  ;;  %v1596_v31 = vadd.f32 %v1595_v61, %v1594_v58 }
 0xed1   : > { %v1573_v13 = vsel %vm208_vm6, %v1569_v56, 0.0 }
 0xed2   : > { %1574 = vadd.xlane.f32.xlu0 %v1573_v13  ;;  %v1597_v14 = vrot.slane %v1596_v31, 1 }
 0xed4   : > { %v1598_v40 = vadd.f32 %v1597_v14, %v1596_v31 }
 0xed6   : > { %v1610_v32 = vsel %vm5178_vm12, %v1598_v40, 0.0 }
 0xed7   : > { %v1611_v34 = vsel %vm206_vm2, %v1610_v32, 0.0 }
 0xed8   : > { %1612 = vadd.xlane.f32.xlu1 %v1611_v34 }
 0xf45   : > { %v1575_v48 = vpop.xlane.xlu0 %1574 }
 0xf46   : > { %v1577_v21 = vmul.f32 %v1575_v48, %v1566_v2  ;;  %v1581_v33 = vmul.f32 %v1575_v48, %v1567_v51  ;;  %v1607_v51 = vadd.f32 %v1606_v37, %v1605_v45 }
 0xf48   : > { %v1583_v60 = vsub.f32 %v1520_v46, %v1581_v33  ;;  %v1579_v57 = vsub.f32 %v1516_v47, %v1577_v21  ;;  %v1608_v55 = vrot.slane %v1607_v51, 1 }
 0xf4a   : > { %v1632_v8 = vsel %vm5179_vm8, %v1579_v57, 0.0  ;;  %v1609_v30 = vadd.f32 %v1608_v55, %v1607_v51  ;;  %vm5181_vm8 = vcmp.eq.s32.totalorder %v3597_v15, 8 }
 0xf4b   : > { %v1636_v6 = vsel %vm208_vm6, %v1632_v8, 0.0  ;;  %v1613_v42 = vpop.xlane.xlu1 %1612 }
 0xf4c   : > { %1637 = vadd.xlane.f32.xlu2 %v1636_v6  ;;  %3366 = vrcp.f32 %v1613_v42  ;;  %v1625_v28 = vand.u32 2147483648, %v1613_v42  ;;  %vm1619_vm1 = vweird.f32 %v1613_v42  ;;  %v1623_v38 = vand.u32 2147483647, %v1613_v42 }
 0xf4e   : > { %v1626_v5 = vor.u32 1.1754944e-38, %v1625_v28  ;;  %vm1624_vm12 = vcmp.eq.f32.partialorder %v1623_v38, 8.507059e+37 }
 0xf52   : > { %v3367_v44 = vpop.eup %3366 }
 0xf53   : > { %v1615_v7 = vmul.f32 %v3367_v44, %v1613_v42  ;;  %vm1620_vm9 = vweird.f32 %v3367_v44 }
 0xf54   : > { %1634 = vadd.xlane.f32.xlu2 %v1633_v39  ;;  %vm1621_vm3 = vmor %vm1619_vm1, %vm1620_vm9 }
 0xf55   : > { %v1616_v26 = vsub.f32 1.0, %v1615_v7  ;;  %vm5183_vm9 = vmmov %vm5182_vm5 }
 0xf56   : > { %vm5184_vm1 = vmmov %vm5182_vm5 }
 0xf57   : > { %v1617_v35 = vmul.f32 %v3367_v44, %v1616_v26 }
 0xf59   : > { %v1618_v2 = vadd.f32 %v3367_v44, %v1617_v35 }
 0xf5b   : > { %v1622_v53 = vsel %vm1621_vm3, %v3367_v44, %v1618_v2  ;;  %vm5185_vm3 = vmmov %vm5181_vm8 }
 0xf5c   : > { %v1627_v54 = vsel %vm1624_vm12, %v1626_v5, %v1622_v53 }
 0xf5d   : > { %v1629_v62 = vmul.f32 %v1627_v54, %v1598_v40  ;;  %v1630_v20 = vmul.f32 %v1627_v54, %v1609_v30 }
 0xfbf   : > { %v1638_v16 = vpop.xlane.xlu2 %1637 }
 0xfc0   : > { %v1640_v59 = vmul.f32 %v1638_v16, %v1629_v62  ;;  %v1644_v11 = vmul.f32 %v1638_v16, %v1630_v20 }
 0xfc2   : > { %v4441_v19 = vsub.f32 %v1579_v57, %v1640_v59  ;;  %v4443_v49 = vsub.f32 %v1583_v60, %v1644_v11 }
 0xfc4   : > { %v1652_v41 = vsel %vm5181_vm8, %v4441_v19, 0.0  ;;  %v1695_v43 = vsel %vm5182_vm5, %v4441_v19, 0.0 }
 0xfc5   : > { %v1699_v50 = vsel %vm208_vm6, %v1695_v43, 0.0  ;;  %v1654_v52 = vsel %vm208_vm6, %v1652_v41, 0.0 }
 0xfc6   : > { %1700 = vadd.xlane.f32.xlu1 %v1699_v50  ;;  %v1656_v22 = vrot.slane %v1654_v52, 4 }
 0xfc7   : > { %v1635_v12 = vpop.xlane.xlu2 %1634 }
 0xfc8   : > { %v1639_v58 = vmul.f32 %v1635_v12, %v1629_v62  ;;  %v1657_v46 = vadd.f32 %v1656_v22, %v1654_v52  ;;  %v1643_v7 = vmul.f32 %v1635_v12, %v1630_v20 }
 0xfca   : > { %v1641_v47 = vsub.f32 %v4411_v29, %v1639_v58  ;;  %v1658_v61 = vrot.slane %v1657_v46, 2  ;;  %v1663_v29 = vsel %vm5185_vm3, %v4443_v49, 0.0  ;;  %v1645_v2 = vsub.f32 %v4415_v63, %v1643_v7 }
 0xfcb   : > { %v1665_v21 = vsel %vm208_vm6, %v1663_v29, 0.0 }
 0xfcc   : > { %v1647_v56 = vsel %vm665_vm15, %v1629_v62, %v1641_v47  ;;  %v1659_v31 = vadd.f32 %v1658_v61, %v1657_v46  ;;  %v1667_v33 = vrot.slane %v1665_v21, 4  ;;  %v1649_v62 = vsel %vm665_vm15, %v1630_v20, %v1645_v2 }
 0xfcd   : > { %v1694_v13 = vsel %vm5183_vm9, %v1647_v56, 0.0 }
 0xfce   : > { %v1696_v14 = vsel %vm206_vm2, %v1694_v13, 0.0  ;;  %v1660_v40 = vrot.slane %v1659_v31, 1  ;;  %v1668_v60 = vadd.f32 %v1667_v33, %v1665_v21 }
 0xfcf   : > { %1697 = vadd.xlane.f32.xlu2 %v1696_v14 }
 0xfd0   : > { %v1661_v32 = vadd.f32 %v1660_v40, %v1659_v31  ;;  %v1669_v8 = vrot.slane %v1668_v60, 2 }
 0xfd2   : > { %v1673_v34 = vsel %vm5184_vm1, %v1661_v32, 0.0  ;;  %v1670_v23 = vadd.f32 %v1669_v8, %v1668_v60  ;;  %vm5186_vm1 = vmmov %vm5185_vm3 }
 0xfd3   : > { %v1674_v48 = vsel %vm206_vm2, %v1673_v34, 0.0  ;;  %vm5187_vm3 = vmmov %vm5186_vm1 }
 0xfd4   : > { %1675 = vadd.xlane.f32.xlu0 %v1674_v48  ;;  %v1671_v44 = vrot.slane %v1670_v23, 1 }
 0xfd6   : > { %v1672_v35 = vadd.f32 %v1671_v44, %v1670_v23 }
0x1039   : > { %v1701_v55 = vpop.xlane.xlu1 %1700 }
0x1042   : > { %v1698_v53 = vpop.xlane.xlu2 %1697 }
0x1047   : > { %v1676_v57 = vpop.xlane.xlu0 %1675 }
0x1048   : > { %3368 = vrcp.f32 %v1676_v57  ;;  %v1688_v25 = vand.u32 2147483648, %v1676_v57  ;;  %v1686_v24 = vand.u32 2147483647, %v1676_v57  ;;  %vm1682_vm8 = vweird.f32 %v1676_v57 }
0x104a   : > { %v1689_v45 = vor.u32 1.1754944e-38, %v1688_v25  ;;  %vm1687_vm9 = vcmp.eq.f32.partialorder %v1686_v24, 8.507059e+37 }
0x104e   : > { %v3369_v6 = vpop.eup %3368 }
0x104f   : > { %v1678_v39 = vmul.f32 %v3369_v6, %v1676_v57  ;;  %vm1683_vm12 = vweird.f32 %v3369_v6 }
0x1050   : > { %vm1684_vm5 = vmor %vm1682_vm8, %vm1683_vm12  ;;  %vm5188_vm12 = vcmp.eq.s32.totalorder %v3582_v10, 9  ;;  %vm5189_vm8 = vcmp.eq.s32.totalorder %v3597_v15, 9 }
0x1051   : > { %v1679_v42 = vsub.f32 1.0, %v1678_v39 }
0x1053   : > { %v1680_v36 = vmul.f32 %v3369_v6, %v1679_v42 }
0x1055   : > { %v1681_v26 = vadd.f32 %v3369_v6, %v1680_v36 }
0x1057   : > { %v1685_v37 = vsel %vm1684_vm5, %v3369_v6, %v1681_v26  ;;  %vm5190_vm5 = vmmov %vm5188_vm12 }
0x1058   : > { %v1690_v51 = vsel %vm1687_vm9, %v1689_v45, %v1685_v37  ;;  %vm5191_vm9 = vmmov %vm5190_vm5 }
0x1059   : > { %v1692_v28 = vmul.f32 %v1690_v51, %v1661_v32  ;;  %v1693_v38 = vmul.f32 %v1690_v51, %v1672_v35 }
0x105b   : > { %v1703_v5 = vmul.f32 %v1701_v55, %v1692_v28  ;;  %v1707_v54 = vmul.f32 %v1701_v55, %v1693_v38  ;;  %v1706_v30 = vmul.f32 %v1698_v53, %v1693_v38  ;;  %v1702_v41 = vmul.f32 %v1698_v53, %v1692_v28 }
0x105d   : > { %v1705_v16 = vsub.f32 %v4441_v19, %v1703_v5  ;;  %v1709_v59 = vsub.f32 %v4443_v49, %v1707_v54  ;;  %v1708_v11 = vsub.f32 %v1649_v62, %v1706_v30  ;;  %v4481_v22 = vsub.f32 %v1647_v56, %v1702_v41 }
0x105f   : > { %v1711_v63 = vsel %vm5186_vm1, %v1692_v28, %v1705_v16  ;;  %v1713_v43 = vsel %vm5187_vm3, %v1693_v38, %v1709_v59  ;;  %v1757_v58 = vsel %vm5190_vm5, %v4481_v22, 0.0  ;;  %vm5192_vm1 = vmmov %vm5189_vm8 }
0x1060   : > { %v1758_v50 = vsel %vm5188_vm12, %v1711_v63, 0.0  ;;  %v1715_v52 = vsel %vm5189_vm8, %v1711_v63, 0.0  ;;  %v1759_v61 = vsel %vm206_vm2, %v1757_v58, 0.0  ;;  %v1726_v56 = vsel %vm5192_vm1, %v1713_v43, 0.0 }
0x1061   : > { %v1762_v20 = vsel %vm208_vm6, %v1758_v50, 0.0  ;;  %v1717_v19 = vsel %vm208_vm6, %v1715_v52, 0.0  ;;  %v1728_v32 = vsel %vm208_vm6, %v1726_v56, 0.0 }
0x1062   : > { %1763 = vadd.xlane.f32.xlu1 %v1762_v20  ;;  %v1719_v49 = vrot.slane %v1717_v19, 4  ;;  %v1730_v34 = vrot.slane %v1728_v32, 4 }
0x1064   : > { %v1720_v12 = vadd.f32 %v1719_v49, %v1717_v19  ;;  %v1731_v29 = vadd.f32 %v1730_v34, %v1728_v32 }
0x1066   : > { %v1721_v46 = vrot.slane %v1720_v12, 2  ;;  %v1732_v21 = vrot.slane %v1731_v29, 2 }
0x1068   : > { %v1722_v47 = vadd.f32 %v1721_v46, %v1720_v12  ;;  %v1733_v57 = vadd.f32 %v1732_v21, %v1731_v29 }
0x106a   : > { %1760 = vadd.xlane.f32.xlu1 %v1759_v61  ;;  %v1723_v31 = vrot.slane %v1722_v47, 1  ;;  %v1734_v25 = vrot.slane %v1733_v57, 1 }
0x106c   : > { %v1724_v13 = vadd.f32 %v1723_v31, %v1722_v47  ;;  %v1735_v24 = vadd.f32 %v1734_v25, %v1733_v57 }
0x106e   : > { %v1736_v14 = vsel %vm5191_vm9, %v1724_v13, 0.0  ;;  %vm5193_vm9 = vmmov %vm5192_vm1 }
0x106f   : > { %v1737_v40 = vsel %vm206_vm2, %v1736_v14, 0.0 }
0x1070   : > { %1738 = vadd.xlane.f32.xlu0 %v1737_v40 }
0x10d5   : > { %v1764_v8 = vpop.xlane.xlu1 %1763 }
0x10dd   : > { %v1761_v37 = vpop.xlane.xlu1 %1760 }
0x10e3   : > { %v1739_v48 = vpop.xlane.xlu0 %1738 }
0x10e4   : > { %3370 = vrcp.f32 %v1739_v48  ;;  %v1751_v23 = vand.u32 2147483648, %v1739_v48  ;;  %v1749_v42 = vand.u32 2147483647, %v1739_v48  ;;  %vm1745_vm12 = vweird.f32 %v1739_v48 }
0x10e6   : > { %v1752_v36 = vor.u32 1.1754944e-38, %v1751_v23  ;;  %vm1750_vm5 = vcmp.eq.f32.partialorder %v1749_v42, 8.507059e+37 }
0x10ea   : > { %v3371_v33 = vpop.eup %3370 }
0x10eb   : > { %v1741_v60 = vmul.f32 %v3371_v33, %v1739_v48  ;;  %vm1746_vm3 = vweird.f32 %v3371_v33 }
0x10ec   : > { %vm1747_vm8 = vmor %vm1745_vm12, %vm1746_vm3  ;;  %vm5194_vm3 = vcmp.eq.s32.totalorder %v3582_v10, 10 }
0x10ed   : > { %v1742_v6 = vsub.f32 1.0, %v1741_v60  ;;  %vm5195_vm12 = vmmov %vm5194_vm3 }
0x10ef   : > { %v1743_v39 = vmul.f32 %v3371_v33, %v1742_v6 }
0x10f1   : > { %v1744_v44 = vadd.f32 %v3371_v33, %v1743_v39 }
0x10f3   : > { %v1748_v7 = vsel %vm1747_vm8, %v3371_v33, %v1744_v44  ;;  %vm5196_vm8 = vmmov %vm5194_vm3 }
0x10f4   : > { %v1753_v26 = vsel %vm1750_vm5, %v1752_v36, %v1748_v7 }
0x10f5   : > { %v1755_v45 = vmul.f32 %v1753_v26, %v1724_v13  ;;  %v1756_v35 = vmul.f32 %v1753_v26, %v1735_v24 }
0x10f7   : > { %v1766_v2 = vmul.f32 %v1764_v8, %v1755_v45  ;;  %v1770_v51 = vmul.f32 %v1764_v8, %v1756_v35  ;;  %v1769_v28 = vmul.f32 %v1761_v37, %v1756_v35  ;;  %v1765_v20 = vmul.f32 %v1761_v37, %v1755_v45 }
0x10f9   : > { %v1768_v38 = vsub.f32 %v1711_v63, %v1766_v2  ;;  %v1772_v55 = vsub.f32 %v1713_v43, %v1770_v51  ;;  %v4493_v53 = vsub.f32 %v1708_v11, %v1769_v28  ;;  %v1767_v12 = vsub.f32 %v4481_v22, %v1765_v20 }
0x10fb   : > { %v1774_v5 = vsel %vm5193_vm9, %v1755_v45, %v1768_v38  ;;  %v1776_v54 = vsel %vm5192_vm1, %v1756_v35, %v1772_v55  ;;  %v1820_v58 = vsel %vm5196_vm8, %v1767_v12, 0.0 }
0x10fc   : > { %v1778_v30 = vsel %vm5136_vm0, %v1774_v5, 0.0  ;;  %v1821_v62 = vsel %vm5194_vm3, %v1774_v5, 0.0  ;;  %v1822_v46 = vsel %vm206_vm2, %v1820_v58, 0.0  ;;  %v1789_v47 = vsel %vm5136_vm0, %v1776_v54, 0.0 }
0x10fd   : > { %v1780_v16 = vsel %vm208_vm6, %v1778_v30, 0.0  ;;  %v1825_v59 = vsel %vm208_vm6, %v1821_v62, 0.0  ;;  %v1791_v61 = vsel %vm208_vm6, %v1789_v47, 0.0 }
0x10fe   : > { %v1782_v41 = vrot.slane %v1780_v16, 4  ;;  %1826 = vadd.xlane.f32.xlu2 %v1825_v59  ;;  %v1793_v31 = vrot.slane %v1791_v61, 4 }
0x1100   : > { %v1783_v11 = vadd.f32 %v1782_v41, %v1780_v16  ;;  %v1794_v14 = vadd.f32 %v1793_v31, %v1791_v61 }
0x1102   : > { %v1784_v63 = vrot.slane %v1783_v11, 2  ;;  %v1795_v40 = vrot.slane %v1794_v14, 2 }
0x1104   : > { %v1785_v43 = vadd.f32 %v1784_v63, %v1783_v11  ;;  %v1796_v34 = vadd.f32 %v1795_v40, %v1794_v14 }
0x1106   : > { %v1786_v50 = vrot.slane %v1785_v43, 1  ;;  %v1797_v33 = vrot.slane %v1796_v34, 1 }
0x1108   : > { %v1787_v52 = vadd.f32 %v1786_v50, %v1785_v43  ;;  %v1798_v8 = vadd.f32 %v1797_v33, %v1796_v34 }
0x110a   : > { %v1799_v19 = vsel %vm5195_vm12, %v1787_v52, 0.0 }
0x110b   : > { %v1800_v49 = vsel %vm206_vm2, %v1799_v19, 0.0 }
0x110c   : > { %1801 = vadd.xlane.f32.xlu0 %v1800_v49 }
0x1114   : > { %1823 = vadd.xlane.f32.xlu0 %v1822_v46 }
0x1171   : > { %v1827_v25 = vpop.xlane.xlu2 %1826 }
0x117f   : > { %v1802_v13 = vpop.xlane.xlu0 %1801 }
0x1180   : > { %3372 = vrcp.f32 %v1802_v13  ;;  %v1814_v48 = vand.u32 2147483648, %v1802_v13  ;;  %v1812_v21 = vand.u32 2147483647, %v1802_v13  ;;  %vm1808_vm9 = vweird.f32 %v1802_v13 }
0x1182   : > { %v1815_v57 = vor.u32 1.1754944e-38, %v1814_v48  ;;  %vm1813_vm3 = vcmp.eq.f32.partialorder %v1812_v21, 8.507059e+37 }
0x1186   : > { %v3373_v56 = vpop.eup %3372 }
0x1187   : > { %v1804_v32 = vmul.f32 %v3373_v56, %v1802_v13  ;;  %vm1809_vm5 = vweird.f32 %v3373_v56  ;;  %v1824_v44 = vpop.xlane.xlu0 %1823 }
0x1188   : > { %vm1810_vm1 = vmor %vm1808_vm9, %vm1809_vm5 }
0x1189   : > { %v1805_v22 = vsub.f32 1.0, %v1804_v32 }
0x118b   : > { %v1806_v29 = vmul.f32 %v3373_v56, %v1805_v22 }
0x118d   : > { %v1807_v60 = vadd.f32 %v3373_v56, %v1806_v29 }
0x118f   : > { %v1811_v6 = vsel %vm1810_vm1, %v3373_v56, %v1807_v60  ;;  %vm5201_vm1 = vcmask 523264  }
0x1190   : > { %v1816_v23 = vsel %vm1813_vm3, %v1815_v57, %v1811_v6  ;;  %v1146_v57 = vpop.f32.mrf.mxu2  ;;  %vm5202_vm3 = vmmov %vm5201_vm1 }
0x1191   : > { %v1818_v39 = vmul.f32 %v1816_v23, %v1787_v52  ;;  %v1819_v42 = vmul.f32 %v1816_v23, %v1798_v8 }
0x1193   : > { %v1828_v36 = vmul.f32 %v1824_v44, %v1818_v39  ;;  %v1832_v24 = vmul.f32 %v1824_v44, %v1819_v42  ;;  %v1833_v7 = vmul.f32 %v1827_v25, %v1819_v42  ;;  %v1829_v26 = vmul.f32 %v1827_v25, %v1818_v39 }
0x1195   : > { %v1830_v45 = vsub.f32 %v1767_v12, %v1828_v36  ;;  %v1831_v35 = vsub.f32 %v1774_v5, %v1829_v26  ;;  %v1835_v37 = vsub.f32 %v1776_v54, %v1833_v7  ;;  %v1834_v2 = vsub.f32 %v4493_v53, %v1832_v24 }
0x1197   : > { %v1882_v51 = vsel %vm5135_vm13, %v1830_v45, 0.0  ;;  %v1837_v28 = vsel %vm5136_vm0, %v1818_v39, %v1831_v35  ;;  %v1839_v38 = vsel %vm5136_vm0, %v1819_v42, %v1835_v37 }
0x1198   : > { %v1884_v55 = vsel %vm206_vm2, %v1882_v51, 0.0  ;;  %v1883_v30 = vsel %vm5135_vm13, %v1837_v28, 0.0  ;;  %v1841_v5 = vsel %vm5134_vm14, %v1837_v28, 0.0  ;;  %v1852_v52 = vsel %vm5134_vm14, %v1839_v38, 0.0  ;;  %v1149_v25 = vpop.f32.mrf.mxu2 }
0x1199   : > { %1885 = vadd.xlane.f32.xlu0 %v1884_v55  ;;  %v1887_v53 = vsel %vm208_vm6, %v1883_v30, 0.0  ;;  %v1843_v54 = vsel %vm208_vm6, %v1841_v5, 0.0  ;;  %v1854_v20 = vsel %vm208_vm6, %v1852_v52, 0.0 }
0x119a   : > { %1888 = vadd.xlane.f32.xlu2 %v1887_v53  ;;  %v1845_v62 = vrot.slane %v1843_v54, 4  ;;  %v1856_v19 = vrot.slane %v1854_v20, 4 }
0x119c   : > { %v1846_v16 = vadd.f32 %v1845_v62, %v1843_v54  ;;  %v1857_v12 = vadd.f32 %v1856_v19, %v1854_v20 }
0x119e   : > { %v1847_v59 = vrot.slane %v1846_v16, 2  ;;  %v1858_v58 = vrot.slane %v1857_v12, 2 }
0x11a0   : > { %v1848_v41 = vadd.f32 %v1847_v59, %v1846_v16  ;;  %v1859_v61 = vadd.f32 %v1858_v58, %v1857_v12  ;;  %v1152_v44 = vpop.f32.mrf.mxu2 }
0x11a2   : > { %v1849_v11 = vrot.slane %v1848_v41, 1  ;;  %v1860_v56 = vrot.slane %v1859_v61, 1 }
0x11a4   : > { %v1850_v63 = vadd.f32 %v1849_v11, %v1848_v41  ;;  %v1861_v22 = vadd.f32 %v1860_v56, %v1859_v61 }
0x11a6   : > { %v1862_v43 = vsel %vm5135_vm13, %v1850_v63, 0.0 }
0x11a7   : > { %v1863_v50 = vsel %vm206_vm2, %v1862_v43, 0.0 }
0x11a8   : > { %1864 = vadd.xlane.f32.xlu1 %v1863_v50  ;;  %v1155_v36 = vpop.f32.mrf.mxu2 }
0x120c   : > { %v1886_v21 = vpop.xlane.xlu0 %1885 }
0x120d   : > { %v1889_v60 = vpop.xlane.xlu2 %1888 }
0x121b   : > { %v1865_v49 = vpop.xlane.xlu1 %1864 }
0x121c   : > { %3374 = vrcp.f32 %v1865_v49  ;;  %v1877_v13 = vand.u32 2147483648, %v1865_v49  ;;  %v1875_v40 = vand.u32 2147483647, %v1865_v49  ;;  %vm1871_vm8 = vweird.f32 %v1865_v49 }
0x121e   : > { %v1878_v34 = vor.u32 1.1754944e-38, %v1877_v13  ;;  %vm1876_vm9 = vcmp.eq.f32.partialorder %v1875_v40, 8.507059e+37 }
0x1222   : > { %v3375_v46 = vpop.eup %3374 }
0x1223   : > { %v1867_v47 = vmul.f32 %v3375_v46, %v1865_v49  ;;  %vm1872_vm12 = vweird.f32 %v3375_v46 }
0x1224   : > { %vm1873_vm5 = vmor %vm1871_vm8, %vm1872_vm12 }
0x1225   : > { %v1868_v31 = vsub.f32 1.0, %v1867_v47  ;;  %vm5203_vm12 = vmmov %vm5201_vm1 }
0x1226   : > { %vm5204_vm8 = vmmov %vm5201_vm1 }
0x1227   : > { %v1869_v14 = vmul.f32 %v3375_v46, %v1868_v31 }
0x1229   : > { %v1870_v32 = vadd.f32 %v3375_v46, %v1869_v14 }
0x122b   : > { %v1874_v48 = vsel %vm1873_vm5, %v3375_v46, %v1870_v32  ;;  %v3519_v46 = vmov (%p41_p0), 0  }
0x122c   : > { %v1879_v29 = vsel %vm1876_vm9, %v1878_v34, %v1874_v48  ;;  %3376 = vset.pattern.permute.xlu0 (%p41_p0), %v3519_v46  ;;  %3377 = vset.pattern.permute.xlu1 (%p41_p0), %v3519_v46 }
0x122d   : > { %v1881_v33 = vmul.f32 %v1879_v29, %v1861_v22 }
0x122f   : > { %v1891_v8 = vmul.f32 %v1889_v60, %v1881_v33  ;;  %v1890_v6 = vmul.f32 %v1886_v21, %v1881_v33 }
0x1231   : > { %v1893_v23 = vsub.f32 %v1839_v38, %v1891_v8  ;;  %v1892_v39 = vsub.f32 %v1834_v2, %v1890_v6 }
0x1233   : > { %v1895_v42 = vsel %vm5134_vm14, %v1881_v33, %v1893_v23 }
0x1234   : > { %3212 = vmatpush.msk.msrb.mxu3 %vm5133_vm7, %v1895_v42 }
0x1236   : > { %1927 = vmatpush.msrb.mxu3 %v1892_v39 }
0x1237   : > { %3213 = vmatmul.msk.f32.vlgmr.msrb.gmra.mxu3 %vm206_vm2, %v1146_v57 }
0x123f   : > { %3214 = vmatmul.msk.f32.gmra.mxu3 %vm206_vm2, %v1149_v25 }
0x1247   : > { %3215 = vmatmul.msk.f32.gmra.mxu3 %vm206_vm2, %v1152_v44 }
0x124f   : > { %3216 = vmatmul.msk.f32.gmra.mxu3 %vm206_vm2, %v1155_v36 }
0x12ba   : > { %v4542_v5 = vpop.f32.mrf.mxu3  }
0x12bb   : > { %v5197_v24 = vmov %v4542_v5 }
0x12bc   : > { %3218 = vmatmul.msk.f32.vlgmr.msrb.gmra.mxu1 %vm206_vm2, %v5197_v24 }
0x12c2   : > { %v4546_v6 = vpop.f32.mrf.mxu3  }
0x12c3   : > { %v5198_v26 = vmov %v4546_v6 }
0x12c4   : > { %3219 = vmatmul.msk.f32.gmra.mxu1 %vm206_vm2, %v5198_v26  ;;  %v5215_v6 = vmov %v5198_v26 }
0x12ca   : > { %v4550_v7 = vpop.f32.mrf.mxu3  }
0x12cb   : > { %v5199_v45 = vmov %v4550_v7 }
0x12cc   : > { %3220 = vmatmul.msk.f32.gmra.mxu1 %vm206_vm2, %v5199_v45 }
0x12d2   : > { %v4554_v8 = vpop.f32.mrf.mxu3  }
0x12d3   : > { %v5200_v35 = vmov %v4554_v8 }
0x12d4   : > { %3221 = vmatmul.msk.f32.gmra.mxu1 %vm206_vm2, %v5200_v35  ;;  %v5213_v8 = vmov %v5200_v35 }
0x1339   : > { %v1972_v37 = vpop.f32.mrf.mxu1 }
0x133a   : > { %v1984_v2 = vsub.f32 %v3551_v0, %v1972_v37 }
0x133c   : > { %v1988_v51 = vmul.f32 %v1984_v2, %v3551_v0 }
0x133e   : > { %v1992_v28 = vsel %vm5201_vm1, %v1988_v51, 0.0 }
0x133f   : > { %1993 = vadd.xlane.f32.xlu1 %v1992_v28 }
0x1341   : > { %v1975_v38 = vpop.f32.mrf.mxu1 }
0x1342   : > { %v1985_v55 = vsub.f32 %v3556_v1, %v1975_v38 }
0x1344   : > { %v1989_v7 = vmul.f32 %v1985_v55, %v3556_v1 }
0x1346   : > { %v1995_v30 = vsel %vm5202_vm3, %v1989_v7, 0.0  ;;  %v5214_v7 = vmov %v5199_v45 }
0x1347   : > { %1996 = vadd.xlane.f32.xlu2 %v1995_v30 }
0x1349   : > { %v1978_v5 = vpop.f32.mrf.mxu1 }
0x134a   : > { %v1986_v53 = vsub.f32 %v3561_v3, %v1978_v5  ;;  %v5216_v5 = vmov %v5197_v24 }
0x134c   : > { %v1990_v54 = vmul.f32 %v1986_v53, %v3561_v3 }
0x134e   : > { %v1998_v62 = vsel %vm5203_vm12, %v1990_v54, 0.0 }
0x134f   : > { %1999 = vadd.xlane.f32.xlu0 %v1998_v62 }
0x1351   : > { %v1981_v16 = vpop.f32.mrf.mxu1 }
0x1352   : > { %v1987_v59 = vsub.f32 %v3566_v4, %v1981_v16 }
0x1354   : > { %v1991_v41 = vmul.f32 %v1987_v59, %v3566_v4 }
0x1356   : > { %v2001_v11 = vsel %vm5204_vm8, %v1991_v41, 0.0 }
0x1357   : > { %2002 = vadd.xlane.f32.xlu1 %v2001_v11 }
0x1370   :  { %2092 = vxpose.xlu2.b32.start [1/4] (short) (narrow) (%p41_p0), %v5197_v24, 16 }
0x1378   :  { %2093 = vxpose.xlu2.b32.cont [2/4] (short) (narrow) (%p41_p0), %v5198_v26, 16 }
0x1380   :  { %2094 = vxpose.xlu2.b32.cont [3/4] (short) (narrow) (%p41_p0), %v5199_v45, 16 }
0x1388   :  { %2095 = vxpose.xlu2.b32.end [4/4] (short) (narrow) (%p41_p0), %v5200_v35, 16 }
0x13b2   : > { %v1994_v63 = vpop.xlane.xlu1 %1993 }
0x13b3   : > { %v4570_v11 = vmul.f32 0.015625, %v1994_v63  }
0x13b5   : > { %v5205_v43 = vmov %v4570_v11 }
0x13b6   : > { %v5212_v11 = vmov %v5205_v43  ;;  %v2019_v28 = vand.u32 (%p41_p0), 2147483648, %v5205_v43  ;;  %v2017_v7 = vand.u32 (%p41_p0), 2147483647, %v5205_v43 }
0x13b8   :  { %v2020_v62 = vor.u32 (%p41_p0), 1.1754944e-38, %v2019_v28 }
0x13ba   : > { %v1997_v50 = vpop.xlane.xlu2 %1996 }
0x13bb   : > { %v4572_v12 = vmul.f32 0.015625, %v1997_v50  }
0x13bd   : > { %v5206_v52 = vmov %v4572_v12 }
0x13be   : > { %v5211_v12 = vmov %v5206_v52  ;;  %v2034_v1 = vand.u32 (%p41_p0), 2147483648, %v5206_v52  ;;  %vm2028_vm1 = vweird.f32 (%p41_p0), %v5206_v52 }
0x13c0   :  { %v2035_v8 = vor.u32 (%p41_p0), 1.1754944e-38, %v2034_v1 }
0x13c2   : > { %v2000_v20 = vpop.xlane.xlu0 %1999 }
0x13c3   : > { %v4574_v13 = vmul.f32 0.015625, %v2000_v20  }
0x13c5   : > { %v5207_v19 = vmov %v4574_v13 }
0x13c6   : > { %v5210_v13 = vmov %v5207_v19  ;;  %vm2043_vm8 = vweird.f32 (%p41_p0), %v5207_v19  ;;  %v2047_v6 = vand.u32 (%p41_p0), 2147483647, %v5207_v19  ;;  %v2049_v36 = vand.u32 (%p41_p0), 2147483648, %v5207_v19 }
0x13c8   :  { %v2050_v53 = vor.u32 (%p41_p0), 1.1754944e-38, %v2049_v36 }
0x13ca   : > { %v2003_v49 = vpop.xlane.xlu1 %2002  ;;  %43 = sbr.rel (!%p41_p0) target bundleno = 8 (0x8), region = 43 }
0x13cb   : > { %v4576_v14 = vmul.f32 0.015625, %v2003_v49  }
0x13cd   : > { %v5208_v58 = vmov %v4576_v14 }
0x13ce   : > { %v5209_v14 = vmov %v5208_v58  ;;  %3379 = vrcp.f32 (%p41_p0), %v5208_v58  ;;  %v2062_v47 = vand.u32 (%p41_p0), 2147483647, %v5208_v58  ;;  %v2064_v31 = vand.u32 (%p41_p0), 2147483648, %v5208_v58 }
0x13cf   :  { %3381 = vrcp.f32 %v5206_v52  ;;  %vm2058_vm5 = vweird.f32 %v5208_v58  ;;  %v2032_v14 = vand.u32 2147483647, %v5206_v52 }
0x13d0   :  { %3383 = vrcp.f32 %v5207_v19  ;;  %vm4626_vm3 = vcmp.eq.f32.partialorder %v2062_v47, 8.507059e+37  ;;  %v2065_v48 = vor.u32 1.1754944e-38, %v2064_v31 }
0x13d1   :  { %3385 = vrcp.f32 %v5205_v43  ;;  %vm4638_vm14 = vcmp.eq.f32.partialorder %v2032_v14, 8.507059e+37 }
0x13d4   :  { %v3380_v12 = vpop.eup %3379 }
0x13d5   :  { %v3382_v4 = vpop.eup %3381  ;;  %v2054_v61 = vmul.f32 %v3380_v12, %v5208_v58  ;;  %vm2059_vm9 = vweird.f32 %v3380_v12 }
0x13d6   :  { %v3384_v13 = vpop.eup %3383  ;;  %v2024_v3 = vmul.f32 %v3382_v4, %v5206_v52  ;;  %vm2029_vm12 = vweird.f32 %v3382_v4  ;;  %vm4634_vm7 = vmor %vm2058_vm5, %vm2059_vm9  ;;  %vm2013_vm9 = vweird.f32 %v5205_v43 }
0x13d7   :  { %v2055_v40 = vsub.f32 1.0, %v2054_v61  ;;  %v2039_v0 = vmul.f32 %v3384_v13, %v5207_v19  ;;  %v3386_v56 = vpop.eup %3385  ;;  %vm4645_vm13 = vmor %vm2028_vm1, %vm2029_vm12  ;;  %vm2044_vm5 = vweird.f32 %v3384_v13  ;;  %vm2048_vm12 = vcmp.eq.f32.partialorder %v2047_v6, 8.507059e+37 }
0x13d8   :  { %v2025_v34 = vsub.f32 1.0, %v2024_v3  ;;  %v2009_v21 = vmul.f32 %v3386_v56, %v5205_v43  ;;  %vm2014_vm0 = vweird.f32 %v3386_v56  ;;  %vm2045_vm1 = vmor %vm2043_vm8, %vm2044_vm5 }
0x13d9   :  { %v2056_v22 = vmul.f32 %v3380_v12, %v2055_v40  ;;  %v2040_v29 = vsub.f32 1.0, %v2039_v0 }
0x13da   :  { %v2026_v60 = vmul.f32 %v3382_v4, %v2025_v34  ;;  %v2010_v25 = vsub.f32 1.0, %v2009_v21 }
0x13db   :  { %v2057_v23 = vadd.f32 %v3380_v12, %v2056_v22  ;;  %v2041_v42 = vmul.f32 %v3384_v13, %v2040_v29 }
0x13dc   :  { %v2027_v44 = vadd.f32 %v3382_v4, %v2026_v60  ;;  %v2011_v51 = vmul.f32 %v3386_v56, %v2010_v25 }
0x13dd   :  { %v2061_v37 = vsel %vm4634_vm7, %v3380_v12, %v2057_v23  ;;  %v2042_v2 = vadd.f32 %v3384_v13, %v2041_v42  ;;  %vm2015_vm7 = vmor %vm2013_vm9, %vm2014_vm0  ;;  %vm5225_vm0 = vcmask 261120  }
0x13de   :  { %v2066_v38 = vsel %vm4626_vm3, %v2065_v48, %v2061_v37  ;;  %v2031_v55 = vsel %vm4645_vm13, %v3382_v4, %v2027_v44  ;;  %v2012_v5 = vadd.f32 %v3386_v56, %v2011_v51  ;;  %vm2018_vm3 = vcmp.eq.f32.partialorder %v2017_v7, 8.507059e+37  ;;  %vm5228_vm8 = vmmov %vm5225_vm0 }
0x13df   :  { %2085 = vperm.xlu0 %3376, %v2066_v38   ;;  %v2036_v30 = vsel %vm4638_vm14, %v2035_v8, %v2031_v55  ;;  %v2046_v54 = vsel %vm2045_vm1, %v3384_v13, %v2042_v2  ;;  %vm5226_vm14 = vcmp.eq.s32.totalorder %v3582_v10, 0 }
0x13e0   :  { %2075 = vperm.xlu1 %3377, %v2036_v30   ;;  %v2016_v16 = vsel %vm2015_vm7, %v3386_v56, %v2012_v5  ;;  %v2051_v59 = vsel %vm2048_vm12, %v2050_v53, %v2046_v54  ;;  %vm5227_vm13 = vmmov %vm5226_vm14 }
0x13e1   :  { %v2021_v41 = vsel %vm2018_vm3, %v2020_v62, %v2016_v16 }
0x13e7   :  { %2080 = vperm.xlu0 %3376, %v2051_v59  }
0x13e8   :  { %2070 = vperm.xlu1 %3377, %v2021_v41  }
0x13ea   :  { %3378 = vset.pattern.permute.xlu2 %v3519_v46 }
0x1409   :  { %v2108_v46 = vpop.trf.xlu2 }
0x1411   :  { %v2109_v57 = vpop.trf.xlu2 }
0x1451   :  { %v2086_v11 = vpop.permute.xlu0 %2085 }
0x1452   :  { %v2091_v63 = vmul.f32 %v2086_v11, %v5200_v35  ;;  %v2076_v50 = vpop.permute.xlu1 %2075 }
0x1453   :  { %v2089_v49 = vmul.f32 %v2076_v50, %v5198_v26 }
0x1454   :  { %3224 = vmatpush.xpose.msk.msra.mxu1 %vm206_vm2, %v2091_v63  ;;  %2143 = vmatpush.msra.mxu0 %v2091_v63 }
0x1459   :  { %v2081_v20 = vpop.permute.xlu0 %2080 }
0x145a   :  { %v2090_v12 = vmul.f32 %v2081_v20, %v5199_v45  ;;  %v2071_v47 = vpop.permute.xlu1 %2070 }
0x145b   :  { %v2088_v4 = vmul.f32 %v2071_v47, %v5197_v24 }
0x145c   :  { %2144 = vmatpush.msra.mxu0 %v2090_v12  ;;  %3225 = vmatpush.xpose.msk.msra.mxu1 %vm206_vm2, %v2090_v12 }
0x145e   :  { %2145 = vmatpush.msra.mxu0 %v2089_v49 }
0x1460   :  { %2146 = vmatpush.msra.mxu0 %v2088_v4  ;;  %3226 = vmatpush.xpose.msk.msra.mxu1 %vm206_vm2, %v2089_v49 }
0x1461   :  { %3222 = vmatmul.msk.f32.vlgmr.msra.gmra.mxu0 %vm5225_vm0, %v2108_v46 }
0x1464   :  { %3227 = vmatpush.xpose.msk.msra.mxu1 %vm206_vm2, %v2088_v4 }
0x1469   :  { %3223 = vmatmul.msk.f32.gmra.mxu0 %vm5228_vm8, %v2109_v57  ;;  %vm5230_vm8 = vcmp.eq.s32.totalorder %v3580_v9, 2 }
0x14de   :  { %v2148_v61 = vpop.f32.mrf.mxu0 }
0x14df   :  { %v2154_v31 = vadd.f32 %v2148_v61, %v3601_v17 }
0x14e1   :  { %v2159_v13 = vsel %vm201_vm4, %v2154_v31, 0.0  ;;  %v2204_v3 = vsel %vm5226_vm14, %v2154_v31, 0.0 }
0x14e2   :  { %v2162_v14 = vsel %vm206_vm2, %v2159_v13, 0.0  ;;  %v2206_v1 = vsel %vm206_vm2, %v2204_v3, 0.0 }
0x14e3   :  { %v2166_v40 = vrot.slane %v2162_v14, 4  ;;  %2207 = vadd.xlane.f32.xlu1 %v2206_v1 }
0x14e5   :  { %v2167_v0 = vadd.f32 %v2166_v40, %v2162_v14 }
0x14e7   :  { %v2168_v56 = vrot.slane %v2167_v0, 2 }
0x14e9   :  { %v2169_v32 = vadd.f32 %v2168_v56, %v2167_v0  ;;  %v2151_v56 = vpop.f32.mrf.mxu0 }
0x14eb   :  { %v2170_v34 = vrot.slane %v2169_v32, 1 }
0x14ed   :  { %v2171_v22 = vadd.f32 %v2170_v34, %v2169_v32 }
0x14ef   :  { %v2183_v48 = vsel %vm5227_vm13, %v2171_v22, 0.0  ;;  %vm5229_vm13 = vcmp.eq.s32.totalorder %v3582_v10, 2 }
0x14f0   :  { %v2184_v29 = vsel %vm206_vm2, %v2183_v48, 0.0  ;;  %v2155_v48 = vadd.f32 %v2151_v56, %v3605_v18 }
0x14f1   :  { %2185 = vadd.xlane.f32.xlu0 %v2184_v29 }
0x1556   :  { %v4689_v2 = vpop.xlane.xlu1 %2207 }
0x1564   :  { %v2186_v21 = vpop.xlane.xlu0 %2185 }
0x1565   :  { %3387 = vrcp.f32 %v2186_v21  ;;  %v2198_v6 = vand.u32 2147483648, %v2186_v21  ;;  %v2196_v39 = vand.u32 2147483647, %v2186_v21  ;;  %vm2192_vm9 = vweird.f32 %v2186_v21 }
0x1567   :  { %v2199_v25 = vor.u32 1.1754944e-38, %v2198_v6  ;;  %vm2197_vm7 = vcmp.eq.f32.partialorder %v2196_v39, 8.507059e+37 }
0x156b   :  { %v3388_v33 = vpop.eup %3387 }
0x156c   :  { %v2188_v60 = vmul.f32 %v3388_v33, %v2186_v21  ;;  %vm2193_vm5 = vweird.f32 %v3388_v33 }
0x156d   :  { %vm2194_vm1 = vmor %vm2192_vm9, %vm2193_vm5  ;;  %vm5231_vm5 = vcmp.eq.s32.totalorder %v3582_v10, 0 }
0x156e   :  { %v2189_v8 = vsub.f32 1.0, %v2188_v60  ;;  %v2205_v57 = vsel %vm5231_vm5, %v2155_v48, 0.0  ;;  %vm5232_vm9 = vmmov %vm5229_vm13 }
0x156f   :  { %v2209_v6 = vsel %vm208_vm6, %v2205_v57, 0.0 }
0x1570   :  { %v2190_v23 = vmul.f32 %v3388_v33, %v2189_v8 }
0x1572   :  { %v2191_v42 = vadd.f32 %v3388_v33, %v2190_v23 }
0x1574   :  { %v2195_v44 = vsel %vm2194_vm1, %v3388_v33, %v2191_v42 }
0x1575   :  { %v4686_v36 = vsel %vm2197_vm7, %v2199_v25, %v2195_v44 }
0x1576   :  { %v2202_v37 = vmul.f32 %v4686_v36, %v2171_v22 }
0x1578   :  { %v2212_v51 = vmul.f32 %v4689_v2, %v2202_v37 }
0x157a   :  { %v2214_v28 = vsub.f32 %v2154_v31, %v2212_v51 }
0x157c   :  { %v2220_v38 = vsel %vm201_vm4, %v2202_v37, %v2214_v28 }
0x157d   :  { %v2270_v55 = vsel %vm271_vm11, %v2220_v38, 0.0  ;;  %v2227_v7 = vsel %vm269_vm10, %v2220_v38, 0.0 }
0x157e   :  { %v2272_v30 = vsel %vm206_vm2, %v2270_v55, 0.0  ;;  %v2229_v5 = vsel %vm206_vm2, %v2227_v7, 0.0 }
0x157f   :  { %2273 = vadd.xlane.f32.xlu0 %v2272_v30  ;;  %v2232_v53 = vrot.slane %v2229_v5, 4 }
0x1581   :  { %v2233_v54 = vadd.f32 %v2232_v53, %v2229_v5 }
0x1583   :  { %v2234_v62 = vrot.slane %v2233_v54, 2 }
0x1585   :  { %v2235_v16 = vadd.f32 %v2234_v62, %v2233_v54 }
0x1587   :  { %v2236_v59 = vrot.slane %v2235_v16, 1 }
0x1589   :  { %v2237_v41 = vadd.f32 %v2236_v59, %v2235_v16 }
0x158b   :  { %v2249_v11 = vsel %vm271_vm11, %v2237_v41, 0.0 }
0x158c   :  { %v2250_v63 = vsel %vm206_vm2, %v2249_v11, 0.0 }
0x158d   :  { %2251 = vadd.xlane.f32.xlu2 %v2250_v63 }
0x15f2   :  { %v4708_v1 = vpop.xlane.xlu0 %2273 }
0x1600   :  { %v2252_v50 = vpop.xlane.xlu2 %2251 }
0x1601   :  { %3389 = vrcp.f32 %v2252_v50  ;;  %v2264_v47 = vand.u32 2147483648, %v2252_v50  ;;  %v2262_v46 = vand.u32 2147483647, %v2252_v50  ;;  %vm2258_vm3 = vweird.f32 %v2252_v50 }
0x1603   :  { %v2265_v31 = vor.u32 1.1754944e-38, %v2264_v47  ;;  %vm2263_vm14 = vcmp.eq.f32.partialorder %v2262_v46, 8.507059e+37 }
0x1607   :  { %v3390_v20 = vpop.eup %3389 }
0x1608   :  { %v2254_v49 = vmul.f32 %v3390_v20, %v2252_v50  ;;  %vm2259_vm12 = vweird.f32 %v3390_v20 }
0x1609   :  { %vm2260_vm0 = vmor %vm2258_vm3, %vm2259_vm12 }
0x160a   :  { %v2255_v12 = vsub.f32 1.0, %v2254_v49 }
0x160c   :  { %v2256_v4 = vmul.f32 %v3390_v20, %v2255_v12 }
0x160e   :  { %v2257_v61 = vadd.f32 %v3390_v20, %v2256_v4 }
0x1610   :  { %v2261_v13 = vsel %vm2260_vm0, %v3390_v20, %v2257_v61  ;;  %vm5234_vm0 = vcmp.eq.s32.totalorder %v3580_v9, 3 }
0x1611   :  { %v4703_v3 = vsel %vm2263_vm14, %v2265_v31, %v2261_v13  ;;  %vm5235_vm14 = vcmp.eq.s32.totalorder %v3582_v10, 3 }
0x1612   :  { %v4706_v14 = vmul.f32 %v4703_v3, %v2237_v41 }
0x1614   :  { %v2278_v40 = vmul.f32 %v4708_v1, %v4706_v14 }
0x1616   :  { %v2280_v0 = vsub.f32 %v2220_v38, %v2278_v40 }
0x1618   :  { %v2286_v32 = vsel %vm269_vm10, %v4706_v14, %v2280_v0 }
0x1619   :  { %v2336_v34 = vsel %vm5229_vm13, %v2286_v32, 0.0  ;;  %v2293_v22 = vsel %vm5230_vm8, %v2286_v32, 0.0  ;;  %vm5236_vm13 = vmmov %vm5235_vm14 }
0x161a   :  { %v2338_v29 = vsel %vm206_vm2, %v2336_v34, 0.0  ;;  %v2295_v21 = vsel %vm206_vm2, %v2293_v22, 0.0  ;;  %v4757_v22 = vmul.f32 %v4686_v36, %v3809_v27 }
0x161b   :  { %2339 = vadd.xlane.f32.xlu0 %v2338_v29  ;;  %v2298_v33 = vrot.slane %v2295_v21, 4 }
0x161d   :  { %v2299_v60 = vadd.f32 %v2298_v33, %v2295_v21  ;;  %v2216_v21 = vmul.f32 %v4689_v2, %v4757_v22 }
0x161f   :  { %v2300_v8 = vrot.slane %v2299_v60, 2  ;;  %v2218_v33 = vsub.f32 %v3601_v17, %v2216_v21 }
0x1621   :  { %v2301_v23 = vadd.f32 %v2300_v8, %v2299_v60  ;;  %v2222_v60 = vsel %vm201_vm4, %v4757_v22, %v2218_v33  ;;  %vm5237_vm4 = vmmov %vm5230_vm8 }
0x1622   :  { %v2238_v27 = vsel %vm269_vm10, %v2222_v60, 0.0 }
0x1623   :  { %2210 = vadd.xlane.f32.xlu0 %v2209_v6  ;;  %v2302_v39 = vrot.slane %v2301_v23, 1  ;;  %v2240_v36 = vsel %vm206_vm2, %v2238_v27, 0.0 }
0x1624   :  { %v2243_v57 = vrot.slane %v2240_v36, 4 }
0x1625   :  { %v2303_v42 = vadd.f32 %v2302_v39, %v2301_v23 }
0x1626   :  { %v2244_v8 = vadd.f32 %v2243_v57, %v2240_v36 }
0x1627   :  { %v2315_v25 = vsel %vm5232_vm9, %v2303_v42, 0.0 }
0x1628   :  { %v2316_v44 = vsel %vm206_vm2, %v2315_v25, 0.0  ;;  %v2245_v6 = vrot.slane %v2244_v8, 2 }
0x1629   :  { %2317 = vadd.xlane.f32.xlu1 %v2316_v44 }
0x162a   :  { %v2246_v23 = vadd.f32 %v2245_v6, %v2244_v8 }
0x162c   :  { %v2247_v39 = vrot.slane %v2246_v23, 1 }
0x168e   :  { %v4728_v51 = vpop.xlane.xlu0 %2339 }
0x1696   :  { %v4730_v28 = vpop.xlane.xlu0 %2210 }
0x1697   :  { %v2213_v38 = vmul.f32 %v4730_v28, %v2202_v37 }
0x1699   :  { %v4733_v55 = vsub.f32 %v2155_v48, %v2213_v38 }
0x169b   :  { %v2271_v7 = vsel %vm271_vm11, %v4733_v55, 0.0  ;;  %vm5233_vm11 = vmmov %vm5230_vm8 }
0x169c   :  { %v2318_v30 = vpop.xlane.xlu1 %2317  ;;  %v2275_v5 = vsel %vm208_vm6, %v2271_v7, 0.0  ;;  %vm5239_vm8 = vmmov %vm5234_vm0 }
0x169d   :  { %3391 = vrcp.f32 %v2318_v30  ;;  %2276 = vadd.xlane.f32.xlu0 %v2275_v5  ;;  %v2330_v16 = vand.u32 2147483648, %v2318_v30  ;;  %v2328_v41 = vand.u32 2147483647, %v2318_v30  ;;  %vm2324_vm7 = vweird.f32 %v2318_v30 }
0x169f   :  { %v2331_v37 = vor.u32 1.1754944e-38, %v2330_v16  ;;  %vm2329_vm3 = vcmp.eq.f32.partialorder %v2328_v41, 8.507059e+37 }
0x16a3   :  { %v3392_v53 = vpop.eup %3391 }
0x16a4   :  { %v2320_v54 = vmul.f32 %v3392_v53, %v2318_v30  ;;  %vm2325_vm1 = vweird.f32 %v3392_v53 }
0x16a5   :  { %vm2326_vm12 = vmor %vm2324_vm7, %vm2325_vm1 }
0x16a6   :  { %v2321_v62 = vsub.f32 1.0, %v2320_v54 }
0x16a8   :  { %v2322_v59 = vmul.f32 %v3392_v53, %v2321_v62 }
0x16aa   :  { %v2323_v11 = vadd.f32 %v3392_v53, %v2322_v59 }
0x16ac   :  { %v2327_v63 = vsel %vm2326_vm12, %v3392_v53, %v2323_v11  ;;  %vm5240_vm12 = vmmov %vm5234_vm0 }
0x16ad   :  { %v2332_v50 = vsel %vm2329_vm3, %v2331_v37, %v2327_v63  ;;  %vm5241_vm3 = vcmp.eq.s32.totalorder %v3580_v9, 4 }
0x16ae   :  { %v4739_v20 = vmul.f32 %v2332_v50, %v2303_v42  ;;  %v2248_v42 = vadd.f32 %v2247_v39, %v2246_v23 }
0x16b0   :  { %v2344_v49 = vmul.f32 %v4728_v51, %v4739_v20  ;;  %v4773_v2 = vmul.f32 %v4703_v3, %v2248_v42 }
0x16b2   :  { %v2346_v12 = vsub.f32 %v2286_v32, %v2344_v49  ;;  %v2282_v17 = vmul.f32 %v4708_v1, %v4773_v2 }
0x16b4   :  { %v4746_v47 = vsel %vm5233_vm11, %v4739_v20, %v2346_v12  ;;  %v2284_v25 = vsub.f32 %v2222_v60, %v2282_v17  ;;  %vm5242_vm11 = vcmp.eq.s32.totalorder %v3582_v10, 4 }
0x16b5   :  { %v2359_v4 = vsel %vm5234_vm0, %v4746_v47, 0.0  ;;  %v2402_v48 = vsel %vm5236_vm13, %v4746_v47, 0.0  ;;  %vm5243_vm0 = vmmov %vm5242_vm11 }
0x16b6   :  { %v2361_v46 = vsel %vm206_vm2, %v2359_v4, 0.0  ;;  %v2404_v29 = vsel %vm206_vm2, %v2402_v48, 0.0  ;;  %v2288_v44 = vsel %vm269_vm10, %v4773_v2, %v2284_v25  ;;  %vm5238_vm10 = vmmov %vm5237_vm4 }
0x16b7   :  { %v2364_v61 = vrot.slane %v2361_v46, 4  ;;  %v2304_v38 = vsel %vm5237_vm4, %v2288_v44, 0.0  ;;  %vm5245_vm13 = vmmov %vm5239_vm8 }
0x16b8   :  { %v2306_v7 = vsel %vm206_vm2, %v2304_v38, 0.0  ;;  %vm5246_vm4 = vmmov %vm5241_vm3 }
0x16b9   :  { %v2365_v31 = vadd.f32 %v2364_v61, %v2361_v46  ;;  %v2309_v30 = vrot.slane %v2306_v7, 4 }
0x16bb   :  { %v2366_v13 = vrot.slane %v2365_v31, 2  ;;  %v2310_v5 = vadd.f32 %v2309_v30, %v2306_v7 }
0x16bd   :  { %v2367_v40 = vadd.f32 %v2366_v13, %v2365_v31  ;;  %v2311_v53 = vrot.slane %v2310_v5, 2 }
0x16bf   :  { %v2368_v0 = vrot.slane %v2367_v40, 1  ;;  %v2312_v54 = vadd.f32 %v2311_v53, %v2310_v5 }
0x16c1   :  { %v2369_v56 = vadd.f32 %v2368_v0, %v2367_v40  ;;  %v2313_v62 = vrot.slane %v2312_v54, 1 }
0x16c3   :  { %v2381_v32 = vsel %vm5235_vm14, %v2369_v56, 0.0  ;;  %v2314_v3 = vadd.f32 %v2313_v62, %v2312_v54  ;;  %vm5244_vm14 = vcmp.eq.s32.totalorder %v3582_v10, 2 }
0x16c4   :  { %v2382_v34 = vsel %vm206_vm2, %v2381_v32, 0.0 }
0x16c5   :  { %2383 = vadd.xlane.f32.xlu1 %v2382_v34  ;;  %v4783_v16 = vmul.f32 %v2332_v50, %v2314_v3 }
0x16c7   :  { %v2348_v1 = vmul.f32 %v4728_v51, %v4783_v16 }
0x16c9   :  { %v2350_v59 = vsub.f32 %v2288_v44, %v2348_v1 }
0x16cb   :  { %v2354_v41 = vsel %vm5238_vm10, %v4783_v16, %v2350_v59 }
0x16cc   :  { %v2370_v11 = vsel %vm5239_vm8, %v2354_v41, 0.0  ;;  %vm5247_vm8 = vcmp.eq.s32.totalorder %v3582_v10, 3 }
0x16cd   :  { %2405 = vadd.xlane.f32.xlu1 %v2404_v29  ;;  %v2372_v37 = vsel %vm206_vm2, %v2370_v11, 0.0 }
0x16ce   :  { %v2375_v63 = vrot.slane %v2372_v37, 4 }
0x16d0   :  { %v2376_v12 = vadd.f32 %v2375_v63, %v2372_v37 }
0x16d2   :  { %v2377_v4 = vrot.slane %v2376_v12, 2 }
0x16d4   :  { %v2378_v61 = vadd.f32 %v2377_v4, %v2376_v12 }
0x16d6   :  { %v2379_v0 = vrot.slane %v2378_v61, 1 }
0x16d8   :  { %v2380_v48 = vadd.f32 %v2379_v0, %v2378_v61 }
0x1710   :  { %v4812_v44 = vpop.xlane.xlu0 %2276 }
0x1711   :  { %v2279_v7 = vmul.f32 %v4812_v44, %v4706_v14 }
0x1713   :  { %v2281_v54 = vsub.f32 %v4733_v55, %v2279_v7 }
0x1715   :  { %v2337_v62 = vsel %vm5244_vm14, %v2281_v54, 0.0  ;;  %vm5253_vm14 = vcmp.eq.s32.totalorder %v3582_v10, 4 }
0x1716   :  { %v2341_v3 = vsel %vm208_vm6, %v2337_v62, 0.0 }
0x1738   :  { %v2384_v49 = vpop.xlane.xlu1 %2383 }
0x1739   :  { %3393 = vrcp.f32 %v2384_v49  ;;  %v2396_v51 = vand.u32 2147483648, %v2384_v49  ;;  %v2394_v40 = vand.u32 2147483647, %v2384_v49  ;;  %vm2390_vm9 = vweird.f32 %v2384_v49 }
0x173b   :  { %v2397_v34 = vor.u32 1.1754944e-38, %v2396_v51  ;;  %vm2395_vm7 = vcmp.eq.f32.partialorder %v2394_v40, 8.507059e+37 }
0x173f   :  { %v3394_v50 = vpop.eup %3393 }
0x1740   :  { %v2386_v46 = vmul.f32 %v3394_v50, %v2384_v49  ;;  %vm2391_vm5 = vweird.f32 %v3394_v50  ;;  %v2406_v27 = vpop.xlane.xlu1 %2405 }
0x1741   :  { %vm2392_vm1 = vmor %vm2390_vm9, %vm2391_vm5 }
0x1742   :  { %v2387_v31 = vsub.f32 1.0, %v2386_v46 }
0x1744   :  { %v2388_v13 = vmul.f32 %v3394_v50, %v2387_v31 }
0x1746   :  { %v2389_v32 = vadd.f32 %v3394_v50, %v2388_v13 }
0x1748   :  { %v2393_v29 = vsel %vm2392_vm1, %v3394_v50, %v2389_v32 }
0x1749   :  { %v2398_v21 = vsel %vm2395_vm7, %v2397_v34, %v2393_v29  ;;  %vm5248_vm7 = vmmov %vm5241_vm3 }
0x174a   :  { %v4793_v33 = vmul.f32 %v2398_v21, %v2369_v56  ;;  %v4795_v60 = vmul.f32 %v2398_v21, %v2380_v48 }
0x174c   :  { %v2410_v36 = vmul.f32 %v2406_v27, %v4793_v33  ;;  %v2414_v1 = vmul.f32 %v2406_v27, %v4795_v60 }
0x174e   :  { %v2412_v57 = vsub.f32 %v4746_v47, %v2410_v36  ;;  %v2416_v59 = vsub.f32 %v2354_v41, %v2414_v1 }
0x1750   :  { %v4802_v8 = vsel %vm5240_vm12, %v4793_v33, %v2412_v57  ;;  %v2420_v14 = vsel %vm5245_vm13, %v4795_v60, %v2416_v59  ;;  %vm5249_vm12 = vmmov %vm5241_vm3 }
0x1751   :  { %v2425_v6 = vsel %vm5241_vm3, %v4802_v8, 0.0  ;;  %v2468_v56 = vsel %vm5242_vm11, %v4802_v8, 0.0  ;;  %v2436_v11 = vsel %vm5246_vm4, %v2420_v14, 0.0  ;;  %vm5250_vm3 = vcmp.eq.s32.totalorder %v3582_v10, 5 }
0x1752   :  { %v2427_v23 = vsel %vm206_vm2, %v2425_v6, 0.0  ;;  %v2470_v39 = vsel %vm206_vm2, %v2468_v56, 0.0  ;;  %v2438_v37 = vsel %vm206_vm2, %v2436_v11, 0.0  ;;  %vm5251_vm11 = vcmp.eq.s32.totalorder %v3580_v9, 5 }
0x1753   :  { %v2430_v42 = vrot.slane %v2427_v23, 4  ;;  %2471 = vadd.xlane.f32.xlu0 %v2470_v39  ;;  %v2441_v63 = vrot.slane %v2438_v37, 4  ;;  %vm5254_vm13 = vmmov %vm5251_vm11 }
0x1755   :  { %v2431_v47 = vadd.f32 %v2430_v42, %v2427_v23  ;;  %v2442_v55 = vadd.f32 %v2441_v63, %v2438_v37 }
0x1757   :  { %v2432_v17 = vrot.slane %v2431_v47, 2  ;;  %v2443_v12 = vrot.slane %v2442_v55, 2 }
0x1759   :  { %v2433_v25 = vadd.f32 %v2432_v17, %v2431_v47  ;;  %v2444_v50 = vadd.f32 %v2443_v12, %v2442_v55 }
0x175b   :  { %v2434_v38 = vrot.slane %v2433_v25, 1  ;;  %v2445_v32 = vrot.slane %v2444_v50, 1 }
0x175d   :  { %v2435_v30 = vadd.f32 %v2434_v38, %v2433_v25 }
0x175f   :  { %v2447_v5 = vsel %vm5243_vm0, %v2435_v30, 0.0  ;;  %vm5252_vm0 = vmmov %vm5250_vm3 }
0x1760   :  { %v2448_v53 = vsel %vm206_vm2, %v2447_v5, 0.0 }
0x1761   :  { %2449 = vadd.xlane.f32.xlu1 %v2448_v53 }
0x1769   :  { %2342 = vadd.xlane.f32.xlu1 %v2341_v3 }
0x17c6   :  { %v2472_v56 = vpop.xlane.xlu0 %2471 }
0x17d4   :  { %v2450_v49 = vpop.xlane.xlu1 %2449 }
0x17d5   :  { %3395 = vrcp.f32 %v2450_v49  ;;  %v2462_v51 = vand.u32 2147483648, %v2450_v49  ;;  %v2460_v0 = vand.u32 2147483647, %v2450_v49  ;;  %vm2456_vm5 = vweird.f32 %v2450_v49 }
0x17d7   :  { %v2463_v21 = vor.u32 1.1754944e-38, %v2462_v51  ;;  %vm2461_vm1 = vcmp.eq.f32.partialorder %v2460_v0, 8.507059e+37 }
0x17db   :  { %v3396_v4 = vpop.eup %3395 }
0x17dc   :  { %v2452_v46 = vmul.f32 %v3396_v4, %v2450_v49  ;;  %v4830_v61 = vpop.xlane.xlu1 %2342  ;;  %vm2457_vm10 = vweird.f32 %v3396_v4 }
0x17dd   :  { %v2345_v41 = vmul.f32 %v4830_v61, %v4739_v20  ;;  %vm2458_vm9 = vmor %vm2456_vm5, %vm2457_vm10  ;;  %v2446_v20 = vadd.f32 %v2445_v32, %v2444_v50 }
0x17de   :  { %v2453_v31 = vsub.f32 1.0, %v2452_v46 }
0x17df   :  { %v2347_v13 = vsub.f32 %v2281_v54, %v2345_v41 }
0x17e0   :  { %v2454_v40 = vmul.f32 %v3396_v4, %v2453_v31 }
0x17e1   :  { %v2403_v34 = vsel %vm5247_vm8, %v2347_v13, 0.0 }
0x17e2   :  { %v2455_v48 = vadd.f32 %v3396_v4, %v2454_v40  ;;  %v2407_v29 = vsel %vm208_vm6, %v2403_v34, 0.0 }
0x17e3   :  { %2408 = vadd.xlane.f32.xlu0 %v2407_v29 }
0x17e4   :  { %v2459_v27 = vsel %vm2458_vm9, %v3396_v4, %v2455_v48  ;;  %vm5255_vm9 = vmmov %vm5251_vm11 }
0x17e5   :  { %v2464_v36 = vsel %vm2461_vm1, %v2463_v21, %v2459_v27  ;;  %vm5256_vm1 = vmmov %vm5255_vm9 }
0x17e6   :  { %v4837_v57 = vmul.f32 %v2464_v36, %v2435_v30  ;;  %v4839_v6 = vmul.f32 %v2464_v36, %v2446_v20 }
0x17e8   :  { %v2476_v23 = vmul.f32 %v2472_v56, %v4837_v57  ;;  %v2480_v39 = vmul.f32 %v2472_v56, %v4839_v6 }
0x17ea   :  { %v2478_v42 = vsub.f32 %v4802_v8, %v2476_v23  ;;  %v2482_v47 = vsub.f32 %v2420_v14, %v2480_v39 }
0x17ec   :  { %v2484_v17 = vsel %vm5248_vm7, %v4837_v57, %v2478_v42  ;;  %v2486_v25 = vsel %vm5249_vm12, %v4839_v6, %v2482_v47  ;;  %vm5257_vm7 = vcmp.eq.s32.totalorder %v3580_v9, 6  ;;  %vm5258_vm12 = vcmp.eq.s32.totalorder %v3582_v10, 6 }
0x17ed   :  { %v2534_v38 = vsel %vm5250_vm3, %v2484_v17, 0.0  ;;  %v2491_v7 = vsel %vm5251_vm11, %v2484_v17, 0.0  ;;  %v2502_v12 = vsel %vm5254_vm13, %v2486_v25, 0.0  ;;  %vm5259_vm3 = vmmov %vm5258_vm12 }
0x17ee   :  { %v2536_v30 = vsel %vm206_vm2, %v2534_v38, 0.0  ;;  %v2493_v5 = vsel %vm206_vm2, %v2491_v7, 0.0  ;;  %v2504_v4 = vsel %vm206_vm2, %v2502_v12, 0.0  ;;  %v2283_v12 = vmul.f32 %v4812_v44, %v4773_v2  ;;  %vm5260_vm11 = vmmov %vm5252_vm0 }
0x17ef   :  { %2537 = vadd.xlane.f32.xlu0 %v2536_v30  ;;  %v2496_v8 = vrot.slane %v2493_v5, 4  ;;  %v2507_v50 = vrot.slane %v2504_v4, 4 }
0x17f1   :  { %v2497_v53 = vadd.f32 %v2496_v8, %v2493_v5  ;;  %v2508_v41 = vadd.f32 %v2507_v50, %v2504_v4  ;;  %v2349_v50 = vmul.f32 %v4830_v61, %v4783_v16 }
0x17f3   :  { %v2498_v54 = vrot.slane %v2497_v53, 2  ;;  %v2509_v31 = vrot.slane %v2508_v41, 2 }
0x17f5   :  { %v2499_v62 = vadd.f32 %v2498_v54, %v2497_v53 }
0x17f7   :  { %v2500_v3 = vrot.slane %v2499_v62, 1 }
0x17f9   :  { %v2501_v1 = vadd.f32 %v2500_v3, %v2499_v62 }
0x17fb   :  { %v2513_v59 = vsel %vm5252_vm0, %v2501_v1, 0.0  ;;  %vm5261_vm0 = vmmov %vm5257_vm7 }
0x17fc   :  { %v2514_v14 = vsel %vm206_vm2, %v2513_v59, 0.0 }
0x17fd   :  { %2515 = vadd.xlane.f32.xlu1 %v2514_v14 }
0x1856   :  { %v2409_v11 = vpop.xlane.xlu0 %2408 }
0x1857   :  { %v2411_v37 = vmul.f32 %v2409_v11, %v4793_v33 }
0x1859   :  { %v4860_v63 = vsub.f32 %v2347_v13, %v2411_v37  ;;  %v2510_v13 = vadd.f32 %v2509_v31, %v2508_v41  ;;  %v2415_v41 = vmul.f32 %v2409_v11, %v4795_v60 }
0x185b   :  { %v2469_v55 = vsel %vm5253_vm14, %v4860_v63, 0.0  ;;  %v2511_v48 = vrot.slane %v2510_v13, 1 }
0x185c   :  { %v2473_v49 = vsel %vm208_vm6, %v2469_v55, 0.0 }
0x185d   :  { %2474 = vadd.xlane.f32.xlu1 %v2473_v49  ;;  %v2512_v20 = vadd.f32 %v2511_v48, %v2510_v13  ;;  %v2217_v49 = vmul.f32 %v4730_v28, %v4757_v22 }
0x185f   :  { %v2219_v4 = vsub.f32 %v3605_v18, %v2217_v49 }
0x1862   :  { %v2538_v39 = vpop.xlane.xlu0 %2537 }
0x1870   :  { %v2516_v46 = vpop.xlane.xlu1 %2515 }
0x1871   :  { %3397 = vrcp.f32 %v2516_v46  ;;  %v2528_v0 = vand.u32 2147483648, %v2516_v46  ;;  %v2526_v34 = vand.u32 2147483647, %v2516_v46  ;;  %vm2522_vm10 = vweird.f32 %v2516_v46 }
0x1873   :  { %v2529_v21 = vor.u32 1.1754944e-38, %v2528_v0  ;;  %vm2527_vm5 = vcmp.eq.f32.partialorder %v2526_v34, 8.507059e+37 }
0x1877   :  { %v3398_v33 = vpop.eup %3397 }
0x1878   :  { %v2518_v51 = vmul.f32 %v3398_v33, %v2516_v46  ;;  %vm2523_vm4 = vweird.f32 %v3398_v33  ;;  %v2285_v46 = vsub.f32 %v2219_v4, %v2283_v12 }
0x1879   :  { %vm2524_vm8 = vmor %vm2522_vm10, %vm2523_vm4 }
0x187a   :  { %v2519_v40 = vsub.f32 1.0, %v2518_v51  ;;  %v2351_v31 = vsub.f32 %v2285_v46, %v2349_v50 }
0x187c   :  { %v2520_v32 = vmul.f32 %v3398_v33, %v2519_v40  ;;  %v2417_v51 = vsub.f32 %v2351_v31, %v2415_v41 }
0x187e   :  { %v2521_v29 = vadd.f32 %v3398_v33, %v2520_v32 }
0x1880   :  { %v2525_v27 = vsel %vm2524_vm8, %v3398_v33, %v2521_v29  ;;  %vm5262_vm8 = vmmov %vm5261_vm0 }
0x1881   :  { %v2530_v36 = vsel %vm2527_vm5, %v2529_v21, %v2525_v27  ;;  %vm5263_vm5 = vmmov %vm5261_vm0 }
0x1882   :  { %v4869_v56 = vmul.f32 %v2530_v36, %v2501_v1  ;;  %v4871_v23 = vmul.f32 %v2530_v36, %v2512_v20 }
0x1884   :  { %v2542_v42 = vmul.f32 %v2538_v39, %v4869_v56  ;;  %v2546_v47 = vmul.f32 %v2538_v39, %v4871_v23 }
0x1886   :  { %v2544_v38 = vsub.f32 %v2484_v17, %v2542_v42  ;;  %v2548_v7 = vsub.f32 %v2486_v25, %v2546_v47 }
0x1888   :  { %v4878_v30 = vsel %vm5255_vm9, %v4869_v56, %v2544_v38  ;;  %v4883_v5 = vsel %vm5256_vm1, %v4871_v23, %v2548_v7  ;;  %vm5264_vm9 = vcmp.eq.s32.totalorder %v3582_v10, 7 }
0x1889   :  { %v2557_v8 = vsel %vm5257_vm7, %v4878_v30, 0.0  ;;  %v2600_v37 = vsel %vm5259_vm3, %v4878_v30, 0.0  ;;  %v2568_v2 = vsel %vm5261_vm0, %v4883_v5, 0.0  ;;  %vm5265_vm1 = vmmov %vm5264_vm9 }
0x188a   :  { %v2559_v53 = vsel %vm206_vm2, %v2557_v8, 0.0  ;;  %v2602_v55 = vsel %vm206_vm2, %v2600_v37, 0.0  ;;  %v2570_v16 = vsel %vm206_vm2, %v2568_v2, 0.0  ;;  %vm5266_vm7 = vmmov %vm5259_vm3 }
0x188b   :  { %v2562_v54 = vrot.slane %v2559_v53, 4  ;;  %v2573_v60 = vrot.slane %v2570_v16, 4 }
0x188d   :  { %v2563_v62 = vadd.f32 %v2562_v54, %v2559_v53  ;;  %v2574_v61 = vadd.f32 %v2573_v60, %v2570_v16 }
0x188f   :  { %v2564_v17 = vrot.slane %v2563_v62, 2 }
0x1891   :  { %v2565_v25 = vadd.f32 %v2564_v17, %v2563_v62 }
0x1893   :  { %v2566_v3 = vrot.slane %v2565_v25, 1 }
0x1895   :  { %v2567_v1 = vadd.f32 %v2566_v3, %v2565_v25 }
0x1897   :  { %v2579_v59 = vsel %vm5258_vm12, %v2567_v1, 0.0 }
0x1898   :  { %v2580_v14 = vsel %vm206_vm2, %v2579_v59, 0.0 }
0x1899   :  { %2581 = vadd.xlane.f32.xlu0 %v2580_v14 }
0x18a1   :  { %2603 = vadd.xlane.f32.xlu0 %v2602_v55 }
0x18d0   :  { %v2475_v33 = vpop.xlane.xlu1 %2474 }
0x18d1   :  { %v2477_v13 = vmul.f32 %v2475_v33, %v4837_v57  ;;  %v2481_v40 = vmul.f32 %v2475_v33, %v4839_v6  ;;  %v2575_v57 = vrot.slane %v2574_v61, 2 }
0x18d3   :  { %v2483_v0 = vsub.f32 %v2417_v51, %v2481_v40  ;;  %v2479_v28 = vsub.f32 %v4860_v63, %v2477_v13  ;;  %v2576_v63 = vadd.f32 %v2575_v57, %v2574_v61 }
0x18d5   :  { %v2535_v22 = vsel %vm5260_vm11, %v2479_v28, 0.0  ;;  %v2577_v21 = vrot.slane %v2576_v63, 1 }
0x18d6   :  { %v2539_v18 = vsel %vm208_vm6, %v2535_v22, 0.0 }
0x18d7   :  { %2540 = vadd.xlane.f32.xlu1 %v2539_v18  ;;  %v2578_v36 = vadd.f32 %v2577_v21, %v2576_v63 }
0x190c   :  { %v2582_v44 = vpop.xlane.xlu0 %2581 }
0x190d   :  { %3399 = vrcp.f32 %v2582_v44  ;;  %v2594_v34 = vand.u32 2147483648, %v2582_v44  ;;  %v2592_v29 = vand.u32 2147483647, %v2582_v44  ;;  %vm2588_vm13 = vweird.f32 %v2582_v44 }
0x190f   :  { %v2595_v20 = vor.u32 1.1754944e-38, %v2594_v34  ;;  %vm2593_vm10 = vcmp.eq.f32.partialorder %v2592_v29, 8.507059e+37 }
0x1913   :  { %v3400_v6 = vpop.eup %3399 }
0x1914   :  { %v2584_v11 = vmul.f32 %v3400_v6, %v2582_v44  ;;  %vm2589_vm14 = vweird.f32 %v3400_v6  ;;  %v2604_v7 = vpop.xlane.xlu0 %2603 }
0x1915   :  { %vm2590_vm4 = vmor %vm2588_vm13, %vm2589_vm14  ;;  %vm5267_vm14 = vcmp.eq.s32.totalorder %v3582_v10, 8 }
0x1916   :  { %v2585_v32 = vsub.f32 1.0, %v2584_v11  ;;  %vm5268_vm13 = vmmov %vm5265_vm1 }
0x1918   :  { %v2586_v48 = vmul.f32 %v3400_v6, %v2585_v32 }
0x191a   :  { %v2587_v27 = vadd.f32 %v3400_v6, %v2586_v48 }
0x191c   :  { %v2591_v39 = vsel %vm2590_vm4, %v3400_v6, %v2587_v27  ;;  %vm5269_vm4 = vmmov %vm5267_vm14 }
0x191d   :  { %v2596_v42 = vsel %vm2593_vm10, %v2595_v20, %v2591_v39  ;;  %vm5270_vm10 = vcmp.eq.s32.totalorder %v3597_v15, 8 }
0x191e   :  { %v2598_v47 = vmul.f32 %v2596_v42, %v2567_v1  ;;  %v2599_v38 = vmul.f32 %v2596_v42, %v2578_v36 }
0x1920   :  { %v2608_v8 = vmul.f32 %v2604_v7, %v2598_v47  ;;  %v2612_v53 = vmul.f32 %v2604_v7, %v2599_v38 }
0x1922   :  { %v2610_v54 = vsub.f32 %v4878_v30, %v2608_v8  ;;  %v2614_v62 = vsub.f32 %v4883_v5, %v2612_v53 }
0x1924   :  { %v4918_v17 = vsel %vm5262_vm8, %v2599_v38, %v2614_v62  ;;  %v2616_v25 = vsel %vm5263_vm5, %v2598_v47, %v2610_v54  ;;  %vm5271_vm8 = vmmov %vm5269_vm4 }
0x1925   :  { %v2666_v3 = vsel %vm5264_vm9, %v2616_v25, 0.0  ;;  %v2623_v1 = vsel %vm665_vm15, %v2616_v25, 0.0  ;;  %vm5272_vm5 = vmmov %vm5270_vm10 }
0x1926   :  { %v2668_v59 = vsel %vm206_vm2, %v2666_v3, 0.0  ;;  %v2625_v14 = vsel %vm206_vm2, %v2623_v1, 0.0 }
0x1927   :  { %2669 = vadd.xlane.f32.xlu2 %v2668_v59  ;;  %v2628_v30 = vrot.slane %v2625_v14, 4 }
0x1929   :  { %v2629_v5 = vadd.f32 %v2628_v30, %v2625_v14 }
0x192b   :  { %v2630_v37 = vrot.slane %v2629_v5, 2 }
0x192d   :  { %v2631_v55 = vadd.f32 %v2630_v37, %v2629_v5 }
0x192f   :  { %v2632_v49 = vrot.slane %v2631_v55, 1 }
0x1931   :  { %v2633_v12 = vadd.f32 %v2632_v49, %v2631_v55  ;;  %v2634_v55 = vsel %vm665_vm15, %v4918_v17, 0.0 }
0x1932   :  { %v2636_v49 = vsel %vm206_vm2, %v2634_v55, 0.0 }
0x1933   :  { %v2645_v4 = vsel %vm5265_vm1, %v2633_v12, 0.0 }
0x1934   :  { %v2646_v50 = vsel %vm206_vm2, %v2645_v4, 0.0 }
0x1935   :  { %2647 = vadd.xlane.f32.xlu0 %v2646_v50 }
0x194a   :  { %v2541_v46 = vpop.xlane.xlu1 %2540 }
0x194b   :  { %v2543_v41 = vmul.f32 %v2541_v46, %v4869_v56  ;;  %v2547_v31 = vmul.f32 %v2541_v46, %v4871_v23 }
0x194d   :  { %v4933_v33 = vsub.f32 %v2483_v0, %v2547_v31  ;;  %v2545_v51 = vsub.f32 %v2479_v28, %v2543_v41 }
0x194f   :  { %v2601_v13 = vsel %vm5266_vm7, %v2545_v51, 0.0 }
0x1950   :  { %v2605_v40 = vsel %vm208_vm6, %v2601_v13, 0.0 }
0x1951   :  { %2606 = vadd.xlane.f32.xlu1 %v2605_v40 }
0x199a   :  { %v4938_v6 = vpop.xlane.xlu2 %2669 }
0x19a8   :  { %v2648_v22 = vpop.xlane.xlu0 %2647 }
0x19a9   :  { %3401 = vrcp.f32 %v2648_v22  ;;  %v2660_v60 = vand.u32 2147483648, %v2648_v22  ;;  %v2658_v56 = vand.u32 2147483647, %v2648_v22  ;;  %vm2654_vm3 = vweird.f32 %v2648_v22 }
0x19ab   :  { %v2661_v23 = vor.u32 1.1754944e-38, %v2660_v60  ;;  %vm2659_vm0 = vcmp.eq.f32.partialorder %v2658_v56, 8.507059e+37 }
0x19af   :  { %v3402_v18 = vpop.eup %3401 }
0x19b0   :  { %v2650_v2 = vmul.f32 %v3402_v18, %v2648_v22  ;;  %vm2655_vm12 = vweird.f32 %v3402_v18 }
0x19b1   :  { %vm2656_vm11 = vmor %vm2654_vm3, %vm2655_vm12 }
0x19b2   :  { %v2651_v16 = vsub.f32 1.0, %v2650_v2  ;;  %vm5273_vm3 = vmmov %vm5272_vm5 }
0x19b4   :  { %v2652_v44 = vmul.f32 %v3402_v18, %v2651_v16 }
0x19b6   :  { %v2653_v61 = vadd.f32 %v3402_v18, %v2652_v44 }
0x19b8   :  { %v2657_v0 = vsel %vm2656_vm11, %v3402_v18, %v2653_v61  ;;  %vm5274_vm11 = vmmov %vm5273_vm3 }
0x19b9   :  { %v2662_v28 = vsel %vm2659_vm0, %v2661_v23, %v2657_v0  ;;  %vm5275_vm0 = vcmp.eq.s32.totalorder %v3582_v10, 9 }
0x19ba   :  { %v2664_v57 = vmul.f32 %v2662_v28, %v2633_v12  ;;  %v2639_v12 = vrot.slane %v2636_v49, 4 }
0x19bc   :  { %v2674_v11 = vmul.f32 %v4938_v6, %v2664_v57  ;;  %v2640_v4 = vadd.f32 %v2639_v12, %v2636_v49 }
0x19be   :  { %v2676_v63 = vsub.f32 %v2616_v25, %v2674_v11  ;;  %v2641_v50 = vrot.slane %v2640_v4, 2 }
0x19c0   :  { %v4943_v32 = vsel %vm665_vm15, %v2664_v57, %v2676_v63  ;;  %v2642_v46 = vadd.f32 %v2641_v50, %v2640_v4 }
0x19c1   :  { %v2732_v34 = vsel %vm5267_vm14, %v4943_v32, 0.0  ;;  %vm5276_vm14 = vcmp.eq.s32.totalorder %v3597_v15, 9 }
0x19c2   :  { %v2734_v48 = vsel %vm206_vm2, %v2732_v34, 0.0  ;;  %v2643_v41 = vrot.slane %v2642_v46, 1 }
0x19c3   :  { %2735 = vadd.xlane.f32.xlu2 %v2734_v48 }
0x19c4   :  { %v2607_v29 = vpop.xlane.xlu1 %2606  ;;  %v2644_v31 = vadd.f32 %v2643_v41, %v2642_v46 }
0x19c5   :  { %v2609_v21 = vmul.f32 %v2607_v29, %v2598_v47  ;;  %v2613_v27 = vmul.f32 %v2607_v29, %v2599_v38 }
0x19c7   :  { %v2615_v20 = vsub.f32 %v4933_v33, %v2613_v27  ;;  %v2611_v36 = vsub.f32 %v2545_v51, %v2609_v21  ;;  %v4966_v33 = vmul.f32 %v2662_v28, %v2644_v31 }
0x19c9   :  { %v2667_v39 = vsel %vm5268_vm13, %v2611_v36, 0.0  ;;  %vm5277_vm13 = vmmov %vm5275_vm0 }
0x19ca   :  { %v2671_v42 = vsel %vm208_vm6, %v2667_v39, 0.0 }
0x19cb   :  { %2672 = vadd.xlane.f32.xlu1 %v2671_v42 }
0x1a3e   :  { %v2673_v7 = vpop.xlane.xlu1 %2672 }
0x1a3f   :  { %v2675_v8 = vmul.f32 %v2673_v7, %v2664_v57  ;;  %v2679_v51 = vmul.f32 %v2673_v7, %v4966_v33  ;;  %v2736_v7 = vpop.xlane.xlu2 %2735 }
0x1a41   :  { %v2677_v53 = vsub.f32 %v2611_v36, %v2675_v8  ;;  %v2681_v13 = vsub.f32 %v2615_v20, %v2679_v51 }
0x1a43   :  { %v2733_v54 = vsel %vm5269_vm4, %v2677_v53, 0.0  ;;  %v2690_v62 = vsel %vm5270_vm10, %v2677_v53, 0.0  ;;  %v2701_v40 = vsel %vm5272_vm5, %v2681_v13, 0.0  ;;  %vm5278_vm4 = vmmov %vm5275_vm0 }
0x1a44   :  { %v2737_v47 = vsel %vm208_vm6, %v2733_v54, 0.0  ;;  %v2692_v38 = vsel %vm208_vm6, %v2690_v62, 0.0  ;;  %v2703_v22 = vsel %vm208_vm6, %v2701_v40, 0.0  ;;  %vm5279_vm10 = vmmov %vm5276_vm14 }
0x1a45   :  { %2738 = vadd.xlane.f32.xlu1 %v2737_v47  ;;  %v2694_v25 = vrot.slane %v2692_v38, 4  ;;  %v2705_v18 = vrot.slane %v2703_v22, 4 }
0x1a47   :  { %v2695_v3 = vadd.f32 %v2694_v25, %v2692_v38  ;;  %v2706_v2 = vadd.f32 %v2705_v18, %v2703_v22 }
0x1a49   :  { %v2696_v1 = vrot.slane %v2695_v3, 2  ;;  %v2707_v60 = vrot.slane %v2706_v2, 2 }
0x1a4b   :  { %v2697_v59 = vadd.f32 %v2696_v1, %v2695_v3  ;;  %v2708_v56 = vadd.f32 %v2707_v60, %v2706_v2 }
0x1a4d   :  { %v2698_v14 = vrot.slane %v2697_v59, 1  ;;  %v2709_v28 = vrot.slane %v2708_v56, 1 }
0x1a4f   :  { %v2699_v30 = vadd.f32 %v2698_v14, %v2697_v59  ;;  %v2710_v48 = vadd.f32 %v2709_v28, %v2708_v56 }
0x1a51   :  { %v2711_v5 = vsel %vm5271_vm8, %v2699_v30, 0.0 }
0x1a52   :  { %v2712_v37 = vsel %vm206_vm2, %v2711_v5, 0.0 }
0x1a53   :  { %2713 = vadd.xlane.f32.xlu0 %v2712_v37 }
0x1ab8   :  { %v2739_v36 = vpop.xlane.xlu1 %2738 }
0x1ac6   :  { %v2714_v16 = vpop.xlane.xlu0 %2713 }
0x1ac7   :  { %3403 = vrcp.f32 %v2714_v16  ;;  %v2726_v0 = vand.u32 2147483648, %v2714_v16  ;;  %v2724_v11 = vand.u32 2147483647, %v2714_v16  ;;  %vm2720_vm1 = vweird.f32 %v2714_v16 }
0x1ac9   :  { %v2727_v34 = vor.u32 1.1754944e-38, %v2726_v0  ;;  %vm2725_vm12 = vcmp.eq.f32.partialorder %v2724_v11, 8.507059e+37 }
0x1acd   :  { %v3404_v44 = vpop.eup %3403 }
0x1ace   :  { %v2716_v61 = vmul.f32 %v3404_v44, %v2714_v16  ;;  %vm2721_vm9 = vweird.f32 %v3404_v44 }
0x1acf   :  { %vm2722_vm7 = vmor %vm2720_vm1, %vm2721_vm9 }
0x1ad0   :  { %v2717_v23 = vsub.f32 1.0, %v2716_v61 }
0x1ad2   :  { %v2718_v57 = vmul.f32 %v3404_v44, %v2717_v23 }
0x1ad4   :  { %v2719_v63 = vadd.f32 %v3404_v44, %v2718_v57 }
0x1ad6   :  { %v2723_v29 = vsel %vm2722_vm7, %v3404_v44, %v2719_v63  ;;  %v2678_v44 = vmul.f32 %v4938_v6, %v4966_v33  ;;  %vm5280_vm7 = vmmov %vm5279_vm10 }
0x1ad7   :  { %v2728_v21 = vsel %vm2725_vm12, %v2727_v34, %v2723_v29  ;;  %vm5281_vm12 = vmmov %vm5280_vm7 }
0x1ad8   :  { %v2730_v27 = vmul.f32 %v2728_v21, %v2699_v30  ;;  %v2731_v20 = vmul.f32 %v2728_v21, %v2710_v48  ;;  %v2680_v11 = vsub.f32 %v4918_v17, %v2678_v44 }
0x1ada   :  { %v2741_v39 = vmul.f32 %v2739_v36, %v2730_v27  ;;  %v2745_v42 = vmul.f32 %v2739_v36, %v2731_v20  ;;  %v2740_v62 = vmul.f32 %v2736_v7, %v2730_v27  ;;  %v2744_v48 = vmul.f32 %v2736_v7, %v2731_v20 }
0x1adb   :  { %v2684_v6 = vsel %vm665_vm15, %v4966_v33, %v2680_v11  ;;  %vm5283_vm15 = vcmp.eq.s32.totalorder %v3582_v10, 10 }
0x1adc   :  { %v2743_v8 = vsub.f32 %v2677_v53, %v2741_v39  ;;  %v2747_v54 = vsub.f32 %v2681_v13, %v2745_v42  ;;  %v4983_v14 = vsub.f32 %v4943_v32, %v2740_v62 }
0x1ade   :  { %v2749_v47 = vsel %vm5273_vm3, %v2730_v27, %v2743_v8  ;;  %v2751_v38 = vsel %vm5274_vm11, %v2731_v20, %v2747_v54  ;;  %v2798_v5 = vsel %vm5277_vm13, %v4983_v14, 0.0  ;;  %v2746_v8 = vsub.f32 %v2684_v6, %v2744_v48  ;;  %vm5284_vm11 = vmmov %vm5283_vm15 }
0x1adf   :  { %v2799_v25 = vsel %vm5275_vm0, %v2749_v47, 0.0  ;;  %v2756_v3 = vsel %vm5276_vm14, %v2749_v47, 0.0  ;;  %v2800_v49 = vsel %vm206_vm2, %v2798_v5, 0.0  ;;  %v2767_v32 = vsel %vm5279_vm10, %v2751_v38, 0.0  ;;  %vm5285_vm0 = vmmov %vm5284_vm11 }
0x1ae0   :  { %v2803_v1 = vsel %vm208_vm6, %v2799_v25, 0.0  ;;  %v2758_v59 = vsel %vm208_vm6, %v2756_v3, 0.0  ;;  %v2769_v41 = vsel %vm208_vm6, %v2767_v32, 0.0  ;;  %vm5282_vm3 = vcmp.eq.s32.totalorder %v3597_v15, 10 }
0x1ae1   :  { %2804 = vadd.xlane.f32.xlu1 %v2803_v1  ;;  %v2760_v53 = vrot.slane %v2758_v59, 4  ;;  %v2771_v31 = vrot.slane %v2769_v41, 4  ;;  %vm5286_vm14 = vmmov %vm5282_vm3 }
0x1ae3   :  { %v2761_v30 = vadd.f32 %v2760_v53, %v2758_v59  ;;  %v2772_v13 = vadd.f32 %v2771_v31, %v2769_v41 }
0x1ae5   :  { %v2762_v37 = vrot.slane %v2761_v30, 2  ;;  %v2773_v40 = vrot.slane %v2772_v13, 2 }
0x1ae7   :  { %v2763_v55 = vadd.f32 %v2762_v37, %v2761_v30  ;;  %v2774_v2 = vadd.f32 %v2773_v40, %v2772_v13  ;;  %v5031_v40 = vmax.f32 %v5207_v19, 1e-06 }
0x1ae9   :  { %2801 = vadd.xlane.f32.xlu1 %v2800_v49  ;;  %v2764_v12 = vrot.slane %v2763_v55, 1  ;;  %v2775_v0 = vrot.slane %v2774_v2, 1 }
0x1aeb   :  { %v2765_v4 = vadd.f32 %v2764_v12, %v2763_v55  ;;  %v2776_v63 = vadd.f32 %v2775_v0, %v2774_v2 }
0x1aed   :  { %v2777_v50 = vsel %vm5278_vm4, %v2765_v4, 0.0 }
0x1aee   :  { %v2778_v46 = vsel %vm206_vm2, %v2777_v50, 0.0 }
0x1aef   :  { %2779 = vadd.xlane.f32.xlu0 %v2778_v46 }
0x1b54   :  { %v2805_v16 = vpop.xlane.xlu1 %2804 }
0x1b5c   :  { %v2802_v36 = vpop.xlane.xlu1 %2801 }
0x1b62   :  { %v2780_v51 = vpop.xlane.xlu0 %2779 }
0x1b63   :  { %3405 = vrcp.f32 %v2780_v51  ;;  %v2792_v56 = vand.u32 2147483648, %v2780_v51  ;;  %v2790_v23 = vand.u32 2147483647, %v2780_v51  ;;  %vm2786_vm5 = vweird.f32 %v2780_v51 }
0x1b65   :  { %v2793_v57 = vor.u32 1.1754944e-38, %v2792_v56  ;;  %vm2791_vm1 = vcmp.eq.f32.partialorder %v2790_v23, 8.507059e+37 }
0x1b69   :  { %v3406_v22 = vpop.eup %3405 }
0x1b6a   :  { %v2782_v18 = vmul.f32 %v3406_v22, %v2780_v51  ;;  %vm2787_vm8 = vweird.f32 %v3406_v22 }
0x1b6b   :  { %vm2788_vm9 = vmor %vm2786_vm5, %vm2787_vm8 }
0x1b6c   :  { %v2783_v60 = vsub.f32 1.0, %v2782_v18  ;;  %vm5287_vm5 = vmmov %vm5282_vm3 }
0x1b6e   :  { %v2784_v61 = vmul.f32 %v3406_v22, %v2783_v60 }
0x1b70   :  { %v2785_v28 = vadd.f32 %v3406_v22, %v2784_v61 }
0x1b72   :  { %v2789_v34 = vsel %vm2788_vm9, %v3406_v22, %v2785_v28  ;;  %vm5288_vm9 = vcmp.eq.s32.totalorder %v3582_v10, 11 }
0x1b73   :  { %v2794_v29 = vsel %vm2791_vm1, %v2793_v57, %v2789_v34  ;;  %vm5289_vm1 = vmmov %vm5282_vm3 }
0x1b74   :  { %v2796_v21 = vmul.f32 %v2794_v29, %v2765_v4  ;;  %v2797_v27 = vmul.f32 %v2794_v29, %v2776_v63 }
0x1b76   :  { %v2807_v39 = vmul.f32 %v2805_v16, %v2796_v21  ;;  %v2811_v42 = vmul.f32 %v2805_v16, %v2797_v27  ;;  %v2810_v54 = vmul.f32 %v2802_v36, %v2797_v27  ;;  %v2806_v37 = vmul.f32 %v2802_v36, %v2796_v21 }
0x1b78   :  { %v2809_v62 = vsub.f32 %v2749_v47, %v2807_v39  ;;  %v2813_v25 = vsub.f32 %v2751_v38, %v2811_v42  ;;  %v5001_v3 = vsub.f32 %v2746_v8, %v2810_v54  ;;  %v2808_v12 = vsub.f32 %v4983_v14, %v2806_v37 }
0x1b79   :  { %v3016_v37 = vmax.f32 %v5208_v58, 1e-06 }
0x1b7a   :  { %v5005_v17 = vsel %vm5280_vm7, %v2796_v21, %v2809_v62  ;;  %v5009_v20 = vsel %vm5281_vm12, %v2797_v27, %v2813_v25  ;;  %v2864_v4 = vsel %vm5285_vm0, %v2808_v12, 0.0  ;;  %v3013_v25 = vmax.f32 %v5205_v43, 1e-06  ;;  %vm5290_vm7 = vmmov %vm5288_vm9 }
0x1b7b   :  { %v2822_v9 = vsel %vm5282_vm3, %v5005_v17, 0.0  ;;  %v2865_v33 = vsel %vm5283_vm15, %v5005_v17, 0.0  ;;  %v2866_v50 = vsel %vm206_vm2, %v2864_v4, 0.0  ;;  %v2833_v46 = vsel %vm5286_vm14, %v5009_v20, 0.0  ;;  %vm5292_vm15 = vmmov %vm5290_vm7 }
0x1b7c   :  { %v2824_v7 = vsel %vm208_vm6, %v2822_v9, 0.0  ;;  %v2869_v47 = vsel %vm208_vm6, %v2865_v33, 0.0  ;;  %v2835_v32 = vsel %vm208_vm6, %v2833_v46, 0.0  ;;  %vm5291_vm12 = vcmp.eq.s32.totalorder %v3597_v15, 11 }
0x1b7d   :  { %v2826_v38 = vrot.slane %v2824_v7, 4  ;;  %2870 = vadd.xlane.f32.xlu2 %v2869_v47  ;;  %v2837_v41 = vrot.slane %v2835_v32, 4  ;;  %vm3048_vm3 = vcmp.eq.f32.partialorder %v5031_v40, inf  ;;  %vm3024_vm0 = vcmp.eq.f32.partialorder %v3013_v25, inf }
0x1b7e   :  { %vm3026_vm14 = vcmp.eq.f32.partialorder %v3013_v25, 0.0 }
0x1b7f   :  { %v2827_v1 = vadd.f32 %v2826_v38, %v2824_v7  ;;  %v2838_v51 = vadd.f32 %v2837_v41, %v2835_v32 }
0x1b81   :  { %v2828_v59 = vrot.slane %v2827_v1, 2  ;;  %v2839_v13 = vrot.slane %v2838_v51, 2 }
0x1b83   :  { %v2829_v53 = vadd.f32 %v2828_v59, %v2827_v1  ;;  %v2840_v18 = vadd.f32 %v2839_v13, %v2838_v51  ;;  %v3051_v51 = vand.u32 2147483648, %v5031_v40 }
0x1b85   :  { %v2830_v30 = vrot.slane %v2829_v53, 1  ;;  %v2841_v56 = vrot.slane %v2840_v18, 1 }
0x1b87   :  { %v2831_v5 = vadd.f32 %v2830_v30, %v2829_v53  ;;  %v2842_v28 = vadd.f32 %v2841_v56, %v2840_v18 }
0x1b89   :  { %v2843_v55 = vsel %vm5284_vm11, %v2831_v5, 0.0  ;;  %vm3050_vm11 = vcmp.eq.f32.partialorder %v5031_v40, 0.0 }
0x1b8a   :  { %v2844_v49 = vsel %vm206_vm2, %v2843_v55, 0.0 }
0x1b8b   :  { %2845 = vadd.xlane.f32.xlu0 %v2844_v49 }
0x1b93   :  { %2867 = vadd.xlane.f32.xlu0 %v2866_v50 }
0x1bf0   :  { %v2871_v48 = vpop.xlane.xlu2 %2870 }
0x1bfe   :  { %v2846_v31 = vpop.xlane.xlu0 %2845 }
0x1bff   :  { %3407 = vrcp.f32 %v2846_v31  ;;  %v2858_v16 = vand.u32 2147483648, %v2846_v31  ;;  %v2856_v44 = vand.u32 2147483647, %v2846_v31  ;;  %vm2852_vm4 = vweird.f32 %v2846_v31 }
0x1c00   :  { %3409 = vrsqrt.f32 %v5031_v40 }
0x1c01   :  { %v2859_v0 = vor.u32 1.1754944e-38, %v2858_v16  ;;  %vm2857_vm8 = vcmp.eq.f32.partialorder %v2856_v44, 8.507059e+37  ;;  %3411 = vrsqrt.f32 %v3013_v25 }
0x1c02   :  { %3413 = vrsqrt.f32 %v3016_v37 }
0x1c05   :  { %v3408_v14 = vpop.eup %3407 }
0x1c06   :  { %v2848_v22 = vmul.f32 %v3408_v14, %v2846_v31  ;;  %vm2853_vm13 = vweird.f32 %v3408_v14  ;;  %v3410_v61 = vpop.eup %3409  ;;  %v2868_v29 = vpop.xlane.xlu0 %2867 }
0x1c07   :  { %vm2854_vm10 = vmor %vm2852_vm4, %vm2853_vm13  ;;  %v3042_v11 = vmul.f32 %v3410_v61, %v5031_v40  ;;  %v3412_v55 = vpop.eup %3411  ;;  %vm3060_vm13 = vcmp.eq.f32.partialorder %v3016_v37, inf  ;;  %vm3062_vm4 = vcmp.eq.f32.partialorder %v3016_v37, 0.0 }
0x1c08   :  { %v2849_v2 = vsub.f32 1.0, %v2848_v22  ;;  %v3018_v50 = vmul.f32 %v3412_v55, %v3013_v25  ;;  %v3414_v58 = vpop.eup %3413 }
0x1c09   :  { %v3043_v39 = vmul.f32 %v3410_v61, %v3042_v11 }
0x1c0a   :  { %v2850_v60 = vmul.f32 %v3408_v14, %v2849_v2  ;;  %v3019_v13 = vmul.f32 %v3412_v55, %v3018_v50  ;;  %v3054_v2 = vmul.f32 %v3414_v58, %v3016_v37 }
0x1c0b   :  { %v3044_v38 = vmul.f32 0.5, %v3043_v39 }
0x1c0c   :  { %v2851_v23 = vadd.f32 %v3408_v14, %v2850_v60  ;;  %v3020_v18 = vmul.f32 0.5, %v3019_v13  ;;  %v3055_v60 = vmul.f32 %v3414_v58, %v3054_v2  ;;  %v3066_v2 = vld [vmem:[%s5112_s3 + $0x8] sm:$0xff] }
0x1c0d   :  { %v3045_v30 = vsub.f32 1.5, %v3044_v38 }
0x1c0e   :  { %v2855_v19 = vsel %vm2854_vm10, %v3408_v14, %v2851_v23  ;;  %v3021_v16 = vsub.f32 1.5, %v3020_v18  ;;  %v3056_v10 = vmul.f32 0.5, %v3055_v60  ;;  %v3027_v23 = vand.u32 2147483648, %v3013_v25  ;;  %vm5293_vm10 = vmmov %vm5291_vm12 }
0x1c0f   :  { %v2860_v57 = vsel %vm2857_vm8, %v2859_v0, %v2855_v19 }
0x1c10   :  { %v2862_v63 = vmul.f32 %v2860_v57, %v2831_v5  ;;  %v2863_v34 = vmul.f32 %v2860_v57, %v2842_v28  ;;  %v3022_v44 = vmul.f32 %v3412_v55, %v3021_v16 }
0x1c12   :  { %v2872_v21 = vmul.f32 %v2868_v29, %v2862_v63  ;;  %v5035_v27 = vmul.f32 %v2868_v29, %v2863_v34  ;;  %v2877_v36 = vmul.f32 %v2871_v48, %v2863_v34  ;;  %v2873_v6 = vmul.f32 %v2871_v48, %v2862_v63 }
0x1c13   :  { %v3023_v56 = vmul.f32 %v3022_v44, %v3013_v25 }
0x1c14   :  { %v2879_v42 = vsub.f32 %v5009_v20, %v2877_v36  ;;  %v2874_v8 = vsub.f32 %v2808_v12, %v2872_v21  ;;  %v2875_v54 = vsub.f32 %v5005_v17, %v2873_v6  ;;  %v2878_v62 = vsub.f32 %v5001_v3, %v5035_v27 }
0x1c15   :  { %v3046_v12 = vmul.f32 %v3410_v61, %v3045_v30  ;;  %v3057_v61 = vsub.f32 1.5, %v3056_v10  ;;  %v3025_v0 = vsel %vm3024_vm0, %v3013_v25, %v3023_v56  ;;  %v3014_v3 = vmax.f32 %v5206_v52, 1e-06 }
0x1c16   :  { %v5044_v9 = vsel %vm5287_vm5, %v2863_v34, %v2879_v42  ;;  %v2929_v33 = vsel %vm5288_vm9, %v2874_v8, 0.0  ;;  %v2881_v7 = vsel %vm5289_vm1, %v2862_v63, %v2875_v54  ;;  %v3028_v19 = vsel %vm3026_vm14, %v3027_v23, %v3025_v0  ;;  %v3068_v0 = vld [vmem:[%s5112_s3 + $0x18] sm:$0xff] }
0x1c17   :  { %v2931_v20 = vsel %vm206_vm2, %v2929_v33, 0.0  ;;  %v2930_v17 = vsel %vm5290_vm7, %v2881_v7, 0.0  ;;  %v2888_v47 = vsel %vm5291_vm12, %v2881_v7, 0.0  ;;  %v3047_v32 = vmul.f32 %v3046_v12, %v5031_v40 }
0x1c18   :  { %2932 = vadd.xlane.f32.xlu2 %v2931_v20  ;;  %v2934_v43 = vsel %vm208_vm6, %v2930_v17, 0.0  ;;  %v2890_v1 = vsel %vm208_vm6, %v2888_v47, 0.0  ;;  %v3058_v28 = vmul.f32 %v3414_v58, %v3057_v61  ;;  %v2899_v34 = vsel %vm5293_vm10, %v5044_v9, 0.0 }
0x1c19   :  { %2935 = vadd.xlane.f32.xlu0 %v2934_v43  ;;  %v2892_v59 = vrot.slane %v2890_v1, 4  ;;  %v3049_v14 = vsel %vm3048_vm3, %v5031_v40, %v3047_v32  ;;  %v3063_v40 = vand.u32 2147483648, %v3016_v37  ;;  %v2901_v48 = vsel %vm208_vm6, %v2899_v34, 0.0  ;;  %vm5294_vm6 = vmmov %vm5293_vm10 }
0x1c1a   :  { %v3052_v22 = vsel %vm3050_vm11, %v3051_v51, %v3049_v14  ;;  %v3059_v57 = vmul.f32 %v3058_v28, %v3016_v37  ;;  %v2903_v29 = vrot.slane %v2901_v48, 4  ;;  %vm5295_vm7 = vcmask 261120  }
0x1c1b   :  { %v2893_v53 = vadd.f32 %v2892_v59, %v2890_v1  ;;  %vm5296_vm12 = vmmov %vm5295_vm7  ;;  %vm5297_vm3 = vcmask 1043456   ;;  %v3039_v51 = vand.u32 2147483648, %v3014_v3  ;;  %vm3038_vm11 = vcmp.eq.f32.partialorder %v3014_v3, 0.0 }
0x1c1c   :  { %v3061_v11 = vsel %vm3060_vm13, %v3016_v37, %v3059_v57  ;;  %v2904_v21 = vadd.f32 %v2903_v29, %v2901_v48  ;;  %vm5298_vm0 = vcmask 523264  }
0x1c1d   :  { %v2894_v5 = vrot.slane %v2893_v53, 2  ;;  %v3064_v63 = vsel %vm3062_vm4, %v3063_v40, %v3061_v11  ;;  %vm5299_vm14 = vmmov %vm5298_vm0 }
0x1c1e   :  { %v2905_v6 = vrot.slane %v2904_v21, 2  ;;  %vm5301_vm13 = vmmov %vm5298_vm0 }
0x1c1f   :  { %v2895_v49 = vadd.f32 %v2894_v5, %v2893_v53 }
0x1c20   :  { %v2906_v8 = vadd.f32 %v2905_v6, %v2904_v21 }
0x1c21   :  { %v2896_v4 = vrot.slane %v2895_v49, 1 }
0x1c22   :  { %v2907_v20 = vrot.slane %v2906_v8, 1 }
0x1c23   :  { %v2897_v46 = vadd.f32 %v2896_v4, %v2895_v49 }
0x1c24   :  { %v2908_v38 = vadd.f32 %v2907_v20, %v2906_v8 }
0x1c25   :  { %v2909_v41 = vsel %vm5292_vm15, %v2897_v46, 0.0  ;;  %vm3036_vm15 = vcmp.eq.f32.partialorder %v3014_v3, inf }
0x1c26   :  { %v2910_v31 = vsel %vm206_vm2, %v2909_v41, 0.0 }
0x1c27   :  { %2911 = vadd.xlane.f32.xlu1 %v2910_v31 }
0x1c2d   :  { %3081 = vperm.xlu0 %3376, %v3052_v22  }
0x1c40   :  { %3071 = vperm.xlu1 %3377, %v3028_v19  }
0x1c48   :  { %3086 = vperm.xlu1 %3377, %v3064_v63  }
0x1c8b   :  { %v2933_v53 = vpop.xlane.xlu2 %2932 }
0x1c8c   :  { %v2936_v5 = vpop.xlane.xlu0 %2935 }
0x1c9a   :  { %v2912_v36 = vpop.xlane.xlu1 %2911 }
0x1c9b   :  { %3415 = vrcp.f32 %v2912_v36  ;;  %v2924_v25 = vand.u32 2147483648, %v2912_v36  ;;  %v2922_v7 = vand.u32 2147483647, %v2912_v36  ;;  %vm2918_vm5 = vweird.f32 %v2912_v36 }
0x1c9c   :  { %3417 = vrsqrt.f32 %v3014_v3 }
0x1c9d   :  { %v2925_v47 = vor.u32 1.1754944e-38, %v2924_v25  ;;  %vm2923_vm1 = vcmp.eq.f32.partialorder %v2922_v7, 8.507059e+37 }
0x1c9f   :  { %v3082_v10 = vpop.permute.xlu0 %3081 }
0x1ca1   :  { %v3416_v39 = vpop.eup %3415 }
0x1ca2   :  { %v2914_v42 = vmul.f32 %v3416_v39, %v2912_v36  ;;  %vm2919_vm8 = vweird.f32 %v3416_v39 }
0x1ca3   :  { %vm2920_vm9 = vmor %vm2918_vm5, %vm2919_vm8 }
0x1ca4   :  { %v2915_v54 = vsub.f32 1.0, %v2914_v42 }
0x1ca6   :  { %v2916_v33 = vmul.f32 %v3416_v39, %v2915_v54 }
0x1ca8   :  { %v2917_v17 = vadd.f32 %v3416_v39, %v2916_v33 }
0x1caa   :  { %v2921_v43 = vsel %vm2920_vm9, %v3416_v39, %v2917_v17 }
0x1cab   :  { %v2926_v1 = vsel %vm2923_vm1, %v2925_v47, %v2921_v43 }
0x1cac   :  { %v2928_v59 = vmul.f32 %v2926_v1, %v2908_v38 }
0x1cae   :  { %v2937_v30 = vmul.f32 %v2933_v53, %v2928_v59  ;;  %v2938_v55 = vmul.f32 %v2936_v5, %v2928_v59 }
0x1cb0   :  { %v2939_v37 = vsub.f32 %v2878_v62, %v2937_v30  ;;  %v2940_v49 = vsub.f32 %v5044_v9, %v2938_v55  ;;  %v3418_v62 = vpop.eup %3417 }
0x1cb1   :  { %v3030_v15 = vmul.f32 %v3418_v62, %v3014_v3 }
0x1cb2   :  { %3228 = vmatmul.msk.f32.vlgmr.msra.gmra.mxu1 %vm206_vm2, %v2939_v37  ;;  %v2942_v12 = vsel %vm5294_vm6, %v2928_v59, %v2940_v49  ;;  %v3072_v14 = vpop.permute.xlu1 %3071 }
0x1cb3   :  { %v3031_v9 = vmul.f32 %v3418_v62, %v3030_v15 }
0x1cb5   :  { %v3032_v32 = vmul.f32 0.5, %v3031_v9 }
0x1cb7   :  { %v3033_v41 = vsub.f32 1.5, %v3032_v32 }
0x1cb9   :  { %v3034_v31 = vmul.f32 %v3418_v62, %v3033_v41 }
0x1cba   :  { %3229 = vmatmul.msk.f32.gmra.mxu1 %vm206_vm2, %v2942_v12  ;;  %v3087_v28 = vpop.permute.xlu1 %3086 }
0x1cbb   :  { %v3035_v52 = vmul.f32 %v3034_v31, %v3014_v3  ;;  %v3092_v19 = vmul.f32 %v3087_v28, %v3068_v0 }
0x1cbd   :  { %v3037_v13 = vsel %vm3036_vm15, %v3014_v3, %v3035_v52 }
0x1cbe   :  { %v3040_v58 = vsel %vm3038_vm11, %v3039_v51, %v3037_v13 }
0x1cbf   :  { %3076 = vperm.xlu2 %3378, %v3040_v58  }
0x1d19   :  { %v3077_v16 = vpop.permute.xlu2 %3076 }
0x1d1a   :  { %v3090_v60 = vmul.f32 %v3077_v16, %v3066_v2 }
0x1d2f   :  { %v2978_v4 = vpop.f32.mrf.mxu1 }
0x1d30   :  { %3230 = vmatmul.msk.f32.vlgmr.msra.gmra.mxu2 %vm5295_vm7, %v2978_v4 }
0x1d37   :  { %v2981_v50 = vpop.f32.mrf.mxu1 }
0x1d38   :  { %3231 = vmatmul.msk.f32.gmra.mxu2 %vm5296_vm12, %v2981_v50 }
0x1db3   :  { %v3007_v46 = vpop.f32.mrf.mxu2 }
0x1dbb   :  { %v3010_v27 = vpop.f32.mrf.mxu2 }
0x1dbc   :  { %3232 = vmatpush.msk.msra.mxu3 %vm5297_vm3, %v3010_v27 }
0x1dbe   :  { %3124 = vmatpush.msra.mxu3 %v3007_v46 }
0x1dbf   :  { %3233 = vmatmul.msk.f32.vlgmr.msra.gmra.mxu3 %vm206_vm2, %v5197_v24  ;;  %v3065_v24 = vld [vmem:[%s5112_s3] sm:$0xff] }
0x1dc7   :  { %3234 = vmatmul.msk.f32.gmra.mxu3 %vm206_vm2, %v5198_v26  ;;  %v3089_v26 = vmul.f32 %v3072_v14, %v3065_v24 }
0x1dcf   :  { %3235 = vmatmul.msk.f32.gmra.mxu3 %vm206_vm2, %v5199_v45 }
0x1dd7   :  { %3236 = vmatmul.msk.f32.gmra.mxu3 %vm206_vm2, %v5200_v35  ;;  %v3067_v35 = vld [vmem:[%s5112_s3 + $0x10] sm:$0xff]  ;;  %vm5300_vm2 = vmmov %vm5298_vm0 }
0x1dd8   :  { %v3091_v56 = vmul.f32 %v3082_v10, %v3067_v35 }
0x1e42   :  { %v3126_v22 = vpop.f32.mrf.mxu3 }
0x1e43   :  { %v3127_v18 = vadd.f32 %v3126_v22, %v3089_v26 }
0x1e45   :  { %3139 = vst.msk [vmem:[#allocation2] sm:$0xff] %vm5298_vm0, %v3127_v18 }
0x1e4a   :  { %v3129_v45 = vpop.f32.mrf.mxu3 }
0x1e4b   :  { %v3130_v44 = vadd.f32 %v3129_v45, %v3090_v60 }
0x1e4d   :  { %3140 = vst.msk [vmem:[#allocation2 + $0x8] sm:$0xff] %vm5299_vm14, %v3130_v44 }
0x1e52   :  { %v3132_v61 = vpop.f32.mrf.mxu3 }
0x1e53   :  { %v3133_v23 = vadd.f32 %v3132_v61, %v3091_v56 }
0x1e55   :  { %3141 = vst.msk [vmem:[#allocation2 + $0x10] sm:$0xff] %vm5300_vm2, %v3133_v23 }
0x1e5a   :  { %v3135_v57 = vpop.f32.mrf.mxu3 }
0x1e5b   :  { %v3136_v40 = vadd.f32 %v3135_v57, %v3092_v19 }
0x1e5d   :  { %3142 = vst.msk [vmem:[#allocation2 + $0x18] sm:$0xff] %vm5301_vm13, %v3136_v40 }
0x1e5e   :  { %3155 = dma.vmem_to_hbm [thread:$0]  %s3148_s20, 512, %s3150_s23, [#allocation3], %s3521_s24, %s3521_s24, %s3522_s25  }
0x1e5f   :  { %3479 = dma.done.wait [#allocation3], 512  }
0x1e60   :  { %3480 = vsyncadd [#allocation3], 4294966784 }
0x1e61   :  { %3160 = vsyncpa [#allocation3], 1 }

</bundles_post_ra>
